<compile_context>
chip_gen: v7x
topology: tpu7x:2x2x1
jax: 0.10.0
libtpu: 0.0.40
codegen_flags: <defaults>
</compile_context>

<pallas_src>
import functools

import jax
import jax.numpy as jnp
from jax.experimental import pallas as pl
from jax.experimental.pallas import tpu as pltpu

D_MODEL = 768
N_HEADS = 12
HEAD_DIM = D_MODEL // N_HEADS   # 64
D_FF = 128
LN_EPS = 1e-5


# ----------------------------------------------------------------------------
# Pallas kernel: one full TransformerEncoderLayer per (encoder, batch-block)
# ----------------------------------------------------------------------------
def _layernorm_f32(x, w, b):
    mu = jnp.mean(x, axis=-1, keepdims=True)
    xc = x - mu
    var = jnp.mean(xc * xc, axis=-1, keepdims=True)
    inv = jax.lax.rsqrt(var + LN_EPS)
    return xc * inv * w + b


def encoder_layer_kernel(x_ref,
                         wqkv_ref, bqkv_ref, wo_ref, bo_ref,
                         ln1w_ref, ln1b_ref,
                         w1_ref, b1_ref, w2_ref, b2_ref,
                         ln2w_ref, ln2b_ref,
                         out_ref):
    """nn.TransformerEncoderLayer (post-norm, ReLU FFN) on one [b_blk, S, 768] tile.

    Matmul weights are bf16; biases / LN params are f32.  Accumulation and
    LayerNorm math stay f32.  Grid axis 0 selects con/cand encoder weights.
    """
    b_blk, S, D = x_ref.shape
    M = b_blk * S

    x = x_ref[...].astype(jnp.float32).reshape(M, D)        # f32 residual stream
    xb = x.astype(jnp.bfloat16)

    # --- fused QKV projection (batch folded into the matmul M dim) ----------
    qkv = jnp.dot(xb, wqkv_ref[...], preferred_element_type=jnp.float32)
    qkv = qkv + bqkv_ref[...]                                # [M, 3*D] f32

    # --- batched multi-head attention (heads merged into einsum batch dim) --
    scale = jnp.float32(1.0 / (HEAD_DIM ** 0.5))

    def to_heads(t2d):                                       # [M, D] -> [b*H, S, Dh]
        t = t2d.reshape(b_blk, S, N_HEADS, HEAD_DIM)
        t = jnp.transpose(t, (0, 2, 1, 3))                   # minor (lane) dim untouched
        return t.reshape(b_blk * N_HEADS, S, HEAD_DIM)

    q = to_heads(qkv[:, 0 * D:1 * D] * scale).astype(jnp.bfloat16)
    k = to_heads(qkv[:, 1 * D:2 * D]).astype(jnp.bfloat16)
    v = to_heads(qkv[:, 2 * D:3 * D]).astype(jnp.bfloat16)

    s = jnp.einsum('bqd,bkd->bqk', q, k,
                   preferred_element_type=jnp.float32)       # [b*H, S, S] f32
    s = s - jnp.max(s, axis=-1, keepdims=True)
    p = jnp.exp(s)
    p = p / jnp.sum(p, axis=-1, keepdims=True)               # exact softmax
    ctx = jnp.einsum('bqk,bkd->bqd', p.astype(jnp.bfloat16), v,
                     preferred_element_type=jnp.float32)     # [b*H, S, Dh] f32

    ctx = ctx.reshape(b_blk, N_HEADS, S, HEAD_DIM)
    ctx = jnp.transpose(ctx, (0, 2, 1, 3)).reshape(M, D)     # lane-dense [M, 768]

    attn = jnp.dot(ctx.astype(jnp.bfloat16), wo_ref[...],
                   preferred_element_type=jnp.float32) + bo_ref[...]

    # --- add & norm 1 --------------------------------------------------------
    x1 = _layernorm_f32(x + attn, ln1w_ref[...], ln1b_ref[...])

    # --- feed-forward (ReLU) -------------------------------------------------
    h1 = jnp.dot(x1.astype(jnp.bfloat16), w1_ref[...],
                 preferred_element_type=jnp.float32) + b1_ref[...]
    h1 = jnp.maximum(h1, 0.0)
    h2 = jnp.dot(h1.astype(jnp.bfloat16), w2_ref[...],
                 preferred_element_type=jnp.float32) + b2_ref[...]

    # --- add & norm 2 --------------------------------------------------------
    x2 = _layernorm_f32(x1 + h2, ln2w_ref[...], ln2b_ref[...])

    out_ref[...] = x2.reshape(b_blk, S, D).astype(out_ref.dtype)


# ----------------------------------------------------------------------------
# Wrapper: both encoders in one pallas_call, grid = (encoder, batch-block)
# ----------------------------------------------------------------------------
_PACKED_ORDER = ("wqkv", "bqkv", "wo", "bo", "ln1w", "ln1b",
                 "w1", "b1", "w2", "b2", "ln2w", "ln2b")


def _pick_batch_block(B, S, target_rows=512):
    """Batch rows per tile so M = b_blk*S stays ~<= target_rows (VMEM friendly)."""
    bb = max(1, min(B, max(1, target_rows // max(S, 1))))
    while B % bb:
        bb -= 1
    return bb


def run_encoders(x_stacked, stacked_params):
    """x_stacked: [2, B, S, 768] f32 (con input, cand input) -> [2, B, S, 768] bf16."""
    E, B, S, D = x_stacked.shape
    assert E == 2 and D == D_MODEL
    # Keep S a multiple of 8 so [b,S,D] <-> [b*S,D] reshapes are free sublane merges.
    b_blk = _pick_batch_block(B, S)
    nb = B // b_blk
    weights = [stacked_params[name] for name in _PACKED_ORDER]

    x_spec = pl.BlockSpec((None, b_blk, S, D), lambda e, b: (e, b, 0, 0))
    out_spec = pl.BlockSpec((None, b_blk, S, D), lambda e, b: (e, b, 0, 0))
    w_map = lambda e, b: (e, 0, 0)          # weights indexed by encoder only
    w_specs = [pl.BlockSpec((None,) + tuple(w.shape[1:]), w_map) for w in weights]

    return pl.pallas_call(
        encoder_layer_kernel,
        out_shape=jax.ShapeDtypeStruct((E, B, S, D), jnp.bfloat16),
        grid_spec=pltpu.PrefetchScalarGridSpec(
            num_scalar_prefetch=0,
            grid=(E, nb),
            in_specs=[x_spec] + w_specs,
            out_specs=out_spec,
        ),
        compiler_params=pltpu.CompilerParams(
            dimension_semantics=("parallel", "parallel"),
            vmem_limit_bytes=48 * 1024 * 1024,   # headroom on v7x's 64 MiB VMEM
        ),
    )(x_stacked, *weights)


def get_scores(token_emb, ent_emb):
    """scores[b, c] = <mean_s token_emb[b, s], ent_emb[b, c]>.

    TODO(synk): stand-in for external ph.get_scores; tiny O(B*C*768) contraction
    kept in plain JAX (fused by XLA) instead of a dedicated Pallas kernel to
    avoid an extra launch + HBM round trip.
    """
    pooled = jnp.mean(token_emb.astype(jnp.float32), axis=1)           # [B, D]
    return jnp.einsum('bd,bcd->bc', pooled, ent_emb.astype(jnp.float32))


# ----------------------------------------------------------------------------
# Parameter / embedding initialization (deterministic, synthetic)
# ----------------------------------------------------------------------------
def init_encoder_params(key):
    ks = jax.random.split(key, 6)

    def lin(k, fan_in, fan_out):
        lim = 1.0 / (fan_in ** 0.5)
        return jax.random.uniform(k, (fan_in, fan_out), jnp.float32, -lim, lim)

    zeros = lambda n: jnp.zeros((1, n), jnp.float32)
    ones = lambda n: jnp.ones((1, n), jnp.float32)
    return {
        "wq": lin(ks[0], D_MODEL, D_MODEL), "bq": zeros(D_MODEL),
        "wk": lin(ks[1], D_MODEL, D_MODEL), "bk": zeros(D_MODEL),
        "wv": lin(ks[2], D_MODEL, D_MODEL), "bv": zeros(D_MODEL),
        "wo": lin(ks[3], D_MODEL, D_MODEL), "bo": zeros(D_MODEL),
        "ln1w": ones(D_MODEL), "ln1b": zeros(D_MODEL),
        "w1": lin(ks[4], D_MODEL, D_FF), "b1": zeros(D_FF),
        "w2": lin(ks[5], D_FF, D_MODEL), "b2": zeros(D_MODEL),
        "ln2w": ones(D_MODEL), "ln2b": zeros(D_MODEL),
    }


def pack_encoder_params(p):
    """Fuse QKV and cast matmul weights to bf16; biases / LN params stay f32."""
    bf16 = jnp.bfloat16
    return {
        "wqkv": jnp.concatenate([p["wq"], p["wk"], p["wv"]], axis=1).astype(bf16),
        "bqkv": jnp.concatenate([p["bq"], p["bk"], p["bv"]], axis=1),
        "wo": p["wo"].astype(bf16), "bo": p["bo"],
        "ln1w": p["ln1w"], "ln1b": p["ln1b"],
        "w1": p["w1"].astype(bf16), "b1": p["b1"],
        "w2": p["w2"].astype(bf16), "b2": p["b2"],
        "ln2w": p["ln2w"], "ln2b": p["ln2b"],
    }


def stack_encoder_params(con_p, cand_p):
    """Stack con/cand packed params along a leading axis of 2 (grid axis 0)."""
    return {k: jnp.stack([con_p[k], cand_p[k]], axis=0) for k in _PACKED_ORDER}


class CustomModelPallas:
    """Pallas port of CustomModel: con_encoder + cand_encoder + scoring."""

    def __init__(self, key, vocab=100):
        k_con, k_cand, k_tok, k_ent = jax.random.split(key, 4)
        con_p = pack_encoder_params(init_encoder_params(k_con))
        cand_p = pack_encoder_params(init_encoder_params(k_cand))
        self.stacked_params = stack_encoder_params(con_p, cand_p)
        # TODO(synk): stand-in for ph.get_embeddings — deterministic tables.
        self.tok_table = 0.02 * jax.random.normal(k_tok, (vocab, D_MODEL),
                                                  jnp.float32)
        self.ent_table = 0.02 * jax.random.normal(k_ent, (vocab, D_MODEL),
                                                  jnp.float32)

    @functools.partial(jax.jit, static_argnums=0)
    def _forward(self, x_ids):
        token_emb = self.tok_table[x_ids]        # [B, S, 768]
        ent_emb = self.ent_table[x_ids]          # [B, C(=S), 768]
        enc = run_encoders(jnp.stack([token_emb, ent_emb], axis=0),
                           self.stacked_params)  # [2, B, S, 768] bf16
        return get_scores(enc[0], enc[1])        # [B, C] f32

    def __call__(self, x_ids):
        mode = "train"                            # noqa: F841  (mode only affects external get_scores)
        if x_ids.ndim == 1:
            x_ids = x_ids[None, :]
            mode = None                           # noqa: F841
        return self._forward(x_ids)


# ----------------------------------------------------------------------------
if __name__ == "__main__":
    key = jax.random.PRNGKey(0)
    k_data, k_model = jax.random.split(key)

    B, S, VOCAB = 2, 8, 100
    x = jax.random.randint(k_data, (B, S), 0, VOCAB, dtype=jnp.int32)

    model = CustomModelPallas(k_model, vocab=VOCAB)
    scores = model(x)
    jax.block_until_ready(scores)

    assert scores.shape == (B, S) and scores.dtype == jnp.float32
    assert bool(jnp.all(jnp.isfinite(scores)))
    print("KERNEL_OK")
</pallas_src>

<mosaic_0001>
module attributes {stable_mosaic.version = 11 : i64} {
  func.func @encoder_layer_kernel(%arg0: i32, %arg1: i32, %arg2: memref<1x2x8x768xf32, #tpu.memory_space<vmem>>, %arg3: memref<1x768x2304xbf16, #tpu.memory_space<vmem>>, %arg4: memref<1x1x2304xf32, #tpu.memory_space<vmem>>, %arg5: memref<1x768x768xbf16, #tpu.memory_space<vmem>>, %arg6: memref<1x1x768xf32, #tpu.memory_space<vmem>>, %arg7: memref<1x1x768xf32, #tpu.memory_space<vmem>>, %arg8: memref<1x1x768xf32, #tpu.memory_space<vmem>>, %arg9: memref<1x768x128xbf16, #tpu.memory_space<vmem>>, %arg10: memref<1x1x128xf32, #tpu.memory_space<vmem>>, %arg11: memref<1x128x768xbf16, #tpu.memory_space<vmem>>, %arg12: memref<1x1x768xf32, #tpu.memory_space<vmem>>, %arg13: memref<1x1x768xf32, #tpu.memory_space<vmem>>, %arg14: memref<1x1x768xf32, #tpu.memory_space<vmem>>, %arg15: memref<1x2x8x768xbf16, #tpu.memory_space<vmem>>) attributes {dimension_semantics = [#tpu.dimension_semantics<parallel>, #tpu.dimension_semantics<parallel>], iteration_bounds = array<i64: 2, 1>, scalar_prefetch = 0 : i64, scratch_operands = 0 : i64, tpu.core_type = #tpu.core_type<tc>, window_params = [{transform_indices = @transform_0, window_bounds = array<i64: 1, 2, 8, 768>}, {transform_indices = @transform_1, window_bounds = array<i64: 1, 768, 2304>}, {transform_indices = @transform_2, window_bounds = array<i64: 1, 1, 2304>}, {transform_indices = @transform_3, window_bounds = array<i64: 1, 768, 768>}, {transform_indices = @transform_4, window_bounds = array<i64: 1, 1, 768>}, {transform_indices = @transform_5, window_bounds = array<i64: 1, 1, 768>}, {transform_indices = @transform_6, window_bounds = array<i64: 1, 1, 768>}, {transform_indices = @transform_7, window_bounds = array<i64: 1, 768, 128>}, {transform_indices = @transform_8, window_bounds = array<i64: 1, 1, 128>}, {transform_indices = @transform_9, window_bounds = array<i64: 1, 128, 768>}, {transform_indices = @transform_10, window_bounds = array<i64: 1, 1, 768>}, {transform_indices = @transform_11, window_bounds = array<i64: 1, 1, 768>}, {transform_indices = @transform_12, window_bounds = array<i64: 1, 1, 768>}, {transform_indices = @transform_13, window_bounds = array<i64: 1, 2, 8, 768>}]} {
    %c0 = arith.constant 0 : index
    %c0_0 = arith.constant 0 : index
    %c0_1 = arith.constant 0 : index
    %c0_2 = arith.constant 0 : index
    %0 = vector.load %arg2[%c0, %c0_0, %c0_1, %c0_2] : memref<1x2x8x768xf32, #tpu.memory_space<vmem>>, vector<1x2x8x768xf32>
    %1 = vector.shape_cast %0 : vector<1x2x8x768xf32> to vector<2x8x768xf32>
    %2 = vector.shape_cast %1 : vector<2x8x768xf32> to vector<16x768xf32>
    %3 = arith.truncf %2 : vector<16x768xf32> to vector<16x768xbf16>
    %c0_3 = arith.constant 0 : index
    %c0_4 = arith.constant 0 : index
    %c0_5 = arith.constant 0 : index
    %4 = vector.load %arg3[%c0_3, %c0_4, %c0_5] : memref<1x768x2304xbf16, #tpu.memory_space<vmem>>, vector<1x768x2304xbf16>
    %5 = vector.shape_cast %4 : vector<1x768x2304xbf16> to vector<768x2304xbf16>
    %cst = arith.constant dense<0.000000e+00> : vector<16x2304xf32>
    %6 = tpu.matmul %3, %5, %cst {dimension_numbers = #tpu.dot_dimension_numbers<[1], [0], [0], [1], [0, 0, 1, 1], [], []>} : vector<16x768xbf16>, vector<768x2304xbf16>, vector<16x2304xf32> -> vector<16x2304xf32>
    %c0_6 = arith.constant 0 : index
    %c0_7 = arith.constant 0 : index
    %c0_8 = arith.constant 0 : index
    %7 = vector.load %arg4[%c0_6, %c0_7, %c0_8] : memref<1x1x2304xf32, #tpu.memory_space<vmem>>, vector<1x1x2304xf32>
    %8 = vector.shape_cast %7 : vector<1x1x2304xf32> to vector<1x2304xf32>
    %9 = vector.broadcast %8 : vector<1x2304xf32> to vector<16x2304xf32>
    %10 = arith.addf %6, %9 : vector<16x2304xf32>
    %11 = vector.extract_strided_slice %10 {offsets = [0, 0], sizes = [16, 768], strides = [1, 1]} : vector<16x2304xf32> to vector<16x768xf32>
    %cst_9 = arith.constant 1.250000e-01 : f32
    %12 = vector.broadcast %cst_9 : f32 to vector<16x768xf32>
    %13 = arith.mulf %11, %12 : vector<16x768xf32>
    %14 = vector.shape_cast %13 : vector<16x768xf32> to vector<2x8x12x64xf32>
    %15 = tpu.transpose %14, [0, 2, 1, 3] : vector<2x8x12x64xf32> -> vector<2x12x8x64xf32>
    %16 = vector.shape_cast %15 : vector<2x12x8x64xf32> to vector<24x8x64xf32>
    %17 = arith.truncf %16 : vector<24x8x64xf32> to vector<24x8x64xbf16>
    %18 = vector.extract_strided_slice %10 {offsets = [0, 768], sizes = [16, 768], strides = [1, 1]} : vector<16x2304xf32> to vector<16x768xf32>
    %19 = vector.shape_cast %18 : vector<16x768xf32> to vector<2x8x12x64xf32>
    %20 = tpu.transpose %19, [0, 2, 1, 3] : vector<2x8x12x64xf32> -> vector<2x12x8x64xf32>
    %21 = vector.shape_cast %20 : vector<2x12x8x64xf32> to vector<24x8x64xf32>
    %22 = arith.truncf %21 : vector<24x8x64xf32> to vector<24x8x64xbf16>
    %23 = vector.extract_strided_slice %10 {offsets = [0, 1536], sizes = [16, 768], strides = [1, 1]} : vector<16x2304xf32> to vector<16x768xf32>
    %24 = vector.shape_cast %23 : vector<16x768xf32> to vector<2x8x12x64xf32>
    %25 = tpu.transpose %24, [0, 2, 1, 3] : vector<2x8x12x64xf32> -> vector<2x12x8x64xf32>
    %26 = vector.shape_cast %25 : vector<2x12x8x64xf32> to vector<24x8x64xf32>
    %27 = arith.truncf %26 : vector<24x8x64xf32> to vector<24x8x64xbf16>
    "tpu.trace_start"() <{level = 10 : i32, message = "bqd,bkd->bqk"}> : () -> ()
    %cst_10 = arith.constant dense<0.000000e+00> : vector<24x8x8xf32>
    %28 = tpu.matmul %17, %22, %cst_10 {dimension_numbers = #tpu.dot_dimension_numbers<[2], [2], [1], [1], [0, 0, 0, 1, 1, 1], [0], [0]>} : vector<24x8x64xbf16>, vector<24x8x64xbf16>, vector<24x8x8xf32> -> vector<24x8x8xf32>
    "tpu.trace_stop"() : () -> ()
    %cst_11 = arith.constant dense<0xFF800000> : vector<24x8xf32>
    %29 = vector.multi_reduction <maximumf>, %28, %cst_11 [2] : vector<24x8x8xf32> to vector<24x8xf32>
    %30 = vector.shape_cast %29 : vector<24x8xf32> to vector<24x8x1xf32>
    %31 = vector.broadcast %30 : vector<24x8x1xf32> to vector<24x8x8xf32>
    %32 = arith.subf %28, %31 : vector<24x8x8xf32>
    %33 = math.exp %32 : vector<24x8x8xf32>
    %cst_12 = arith.constant dense<0.000000e+00> : vector<24x8xf32>
    %34 = vector.multi_reduction <add>, %33, %cst_12 [2] : vector<24x8x8xf32> to vector<24x8xf32>
    %35 = vector.shape_cast %34 : vector<24x8xf32> to vector<24x8x1xf32>
    %36 = vector.broadcast %35 : vector<24x8x1xf32> to vector<24x8x8xf32>
    %37 = arith.divf %33, %36 : vector<24x8x8xf32>
    %38 = arith.truncf %37 : vector<24x8x8xf32> to vector<24x8x8xbf16>
    "tpu.trace_start"() <{level = 10 : i32, message = "bqk,bkd->bqd"}> : () -> ()
    %cst_13 = arith.constant dense<0.000000e+00> : vector<24x8x64xf32>
    %39 = tpu.matmul %38, %27, %cst_13 {dimension_numbers = #tpu.dot_dimension_numbers<[2], [1], [1], [2], [0, 0, 0, 1, 1, 2], [0], [0]>} : vector<24x8x8xbf16>, vector<24x8x64xbf16>, vector<24x8x64xf32> -> vector<24x8x64xf32>
    "tpu.trace_stop"() : () -> ()
    %40 = vector.shape_cast %39 : vector<24x8x64xf32> to vector<2x12x8x64xf32>
    %41 = tpu.transpose %40, [0, 2, 1, 3] : vector<2x12x8x64xf32> -> vector<2x8x12x64xf32>
    %42 = vector.shape_cast %41 : vector<2x8x12x64xf32> to vector<16x768xf32>
    %43 = arith.truncf %42 : vector<16x768xf32> to vector<16x768xbf16>
    %c0_14 = arith.constant 0 : index
    %c0_15 = arith.constant 0 : index
    %c0_16 = arith.constant 0 : index
    %44 = vector.load %arg5[%c0_14, %c0_15, %c0_16] : memref<1x768x768xbf16, #tpu.memory_space<vmem>>, vector<1x768x768xbf16>
    %45 = vector.shape_cast %44 : vector<1x768x768xbf16> to vector<768x768xbf16>
    %cst_17 = arith.constant dense<0.000000e+00> : vector<16x768xf32>
    %46 = tpu.matmul %43, %45, %cst_17 {dimension_numbers = #tpu.dot_dimension_numbers<[1], [0], [0], [1], [0, 0, 1, 1], [], []>} : vector<16x768xbf16>, vector<768x768xbf16>, vector<16x768xf32> -> vector<16x768xf32>
    %c0_18 = arith.constant 0 : index
    %c0_19 = arith.constant 0 : index
    %c0_20 = arith.constant 0 : index
    %47 = vector.load %arg6[%c0_18, %c0_19, %c0_20] : memref<1x1x768xf32, #tpu.memory_space<vmem>>, vector<1x1x768xf32>
    %48 = vector.shape_cast %47 : vector<1x1x768xf32> to vector<1x768xf32>
    %49 = vector.broadcast %48 : vector<1x768xf32> to vector<16x768xf32>
    %50 = arith.addf %46, %49 : vector<16x768xf32>
    %51 = arith.addf %2, %50 : vector<16x768xf32>
    %c0_21 = arith.constant 0 : index
    %c0_22 = arith.constant 0 : index
    %c0_23 = arith.constant 0 : index
    %52 = vector.load %arg7[%c0_21, %c0_22, %c0_23] : memref<1x1x768xf32, #tpu.memory_space<vmem>>, vector<1x1x768xf32>
    %53 = vector.shape_cast %52 : vector<1x1x768xf32> to vector<1x768xf32>
    %c0_24 = arith.constant 0 : index
    %c0_25 = arith.constant 0 : index
    %c0_26 = arith.constant 0 : index
    %54 = vector.load %arg8[%c0_24, %c0_25, %c0_26] : memref<1x1x768xf32, #tpu.memory_space<vmem>>, vector<1x1x768xf32>
    %55 = vector.shape_cast %54 : vector<1x1x768xf32> to vector<1x768xf32>
    %cst_27 = arith.constant dense<0.000000e+00> : vector<16xf32>
    %56 = vector.multi_reduction <add>, %51, %cst_27 [1] : vector<16x768xf32> to vector<16xf32>
    %57 = vector.shape_cast %56 : vector<16xf32> to vector<16x1xf32>
    %cst_28 = arith.constant 7.680000e+02 : f32
    %58 = vector.broadcast %cst_28 : f32 to vector<16x1xf32>
    %59 = arith.divf %57, %58 : vector<16x1xf32>
    %60 = vector.broadcast %59 : vector<16x1xf32> to vector<16x768xf32>
    %61 = arith.subf %51, %60 : vector<16x768xf32>
    %62 = arith.mulf %61, %61 : vector<16x768xf32>
    %cst_29 = arith.constant dense<0.000000e+00> : vector<16xf32>
    %63 = vector.multi_reduction <add>, %62, %cst_29 [1] : vector<16x768xf32> to vector<16xf32>
    %64 = vector.shape_cast %63 : vector<16xf32> to vector<16x1xf32>
    %cst_30 = arith.constant 7.680000e+02 : f32
    %65 = vector.broadcast %cst_30 : f32 to vector<16x1xf32>
    %66 = arith.divf %64, %65 : vector<16x1xf32>
    %cst_31 = arith.constant 9.99999974E-6 : f32
    %67 = vector.broadcast %cst_31 : f32 to vector<16x1xf32>
    %68 = arith.addf %66, %67 : vector<16x1xf32>
    %69 = math.rsqrt %68 : vector<16x1xf32>
    %70 = vector.broadcast %69 : vector<16x1xf32> to vector<16x768xf32>
    %71 = arith.mulf %61, %70 : vector<16x768xf32>
    %72 = vector.broadcast %53 : vector<1x768xf32> to vector<16x768xf32>
    %73 = arith.mulf %71, %72 : vector<16x768xf32>
    %74 = vector.broadcast %55 : vector<1x768xf32> to vector<16x768xf32>
    %75 = arith.addf %73, %74 : vector<16x768xf32>
    %76 = arith.truncf %75 : vector<16x768xf32> to vector<16x768xbf16>
    %c0_32 = arith.constant 0 : index
    %c0_33 = arith.constant 0 : index
    %c0_34 = arith.constant 0 : index
    %77 = vector.load %arg9[%c0_32, %c0_33, %c0_34] : memref<1x768x128xbf16, #tpu.memory_space<vmem>>, vector<1x768x128xbf16>
    %78 = vector.shape_cast %77 : vector<1x768x128xbf16> to vector<768x128xbf16>
    %cst_35 = arith.constant dense<0.000000e+00> : vector<16x128xf32>
    %79 = tpu.matmul %76, %78, %cst_35 {dimension_numbers = #tpu.dot_dimension_numbers<[1], [0], [0], [1], [0, 0, 1, 1], [], []>} : vector<16x768xbf16>, vector<768x128xbf16>, vector<16x128xf32> -> vector<16x128xf32>
    %c0_36 = arith.constant 0 : index
    %c0_37 = arith.constant 0 : index
    %c0_38 = arith.constant 0 : index
    %80 = vector.load %arg10[%c0_36, %c0_37, %c0_38] : memref<1x1x128xf32, #tpu.memory_space<vmem>>, vector<1x1x128xf32>
    %81 = vector.shape_cast %80 : vector<1x1x128xf32> to vector<1x128xf32>
    %82 = vector.broadcast %81 : vector<1x128xf32> to vector<16x128xf32>
    %83 = arith.addf %79, %82 : vector<16x128xf32>
    %cst_39 = arith.constant 0.000000e+00 : f32
    %84 = vector.broadcast %cst_39 : f32 to vector<16x128xf32>
    %85 = arith.maximumf %83, %84 : vector<16x128xf32>
    %86 = arith.truncf %85 : vector<16x128xf32> to vector<16x128xbf16>
    %c0_40 = arith.constant 0 : index
    %c0_41 = arith.constant 0 : index
    %c0_42 = arith.constant 0 : index
    %87 = vector.load %arg11[%c0_40, %c0_41, %c0_42] : memref<1x128x768xbf16, #tpu.memory_space<vmem>>, vector<1x128x768xbf16>
    %88 = vector.shape_cast %87 : vector<1x128x768xbf16> to vector<128x768xbf16>
    %cst_43 = arith.constant dense<0.000000e+00> : vector<16x768xf32>
    %89 = tpu.matmul %86, %88, %cst_43 {dimension_numbers = #tpu.dot_dimension_numbers<[1], [0], [0], [1], [0, 0, 1, 1], [], []>} : vector<16x128xbf16>, vector<128x768xbf16>, vector<16x768xf32> -> vector<16x768xf32>
    %c0_44 = arith.constant 0 : index
    %c0_45 = arith.constant 0 : index
    %c0_46 = arith.constant 0 : index
    %90 = vector.load %arg12[%c0_44, %c0_45, %c0_46] : memref<1x1x768xf32, #tpu.memory_space<vmem>>, vector<1x1x768xf32>
    %91 = vector.shape_cast %90 : vector<1x1x768xf32> to vector<1x768xf32>
    %92 = vector.broadcast %91 : vector<1x768xf32> to vector<16x768xf32>
    %93 = arith.addf %89, %92 : vector<16x768xf32>
    %94 = arith.addf %75, %93 : vector<16x768xf32>
    %c0_47 = arith.constant 0 : index
    %c0_48 = arith.constant 0 : index
    %c0_49 = arith.constant 0 : index
    %95 = vector.load %arg13[%c0_47, %c0_48, %c0_49] : memref<1x1x768xf32, #tpu.memory_space<vmem>>, vector<1x1x768xf32>
    %96 = vector.shape_cast %95 : vector<1x1x768xf32> to vector<1x768xf32>
    %c0_50 = arith.constant 0 : index
    %c0_51 = arith.constant 0 : index
    %c0_52 = arith.constant 0 : index
    %97 = vector.load %arg14[%c0_50, %c0_51, %c0_52] : memref<1x1x768xf32, #tpu.memory_space<vmem>>, vector<1x1x768xf32>
    %98 = vector.shape_cast %97 : vector<1x1x768xf32> to vector<1x768xf32>
    %cst_53 = arith.constant dense<0.000000e+00> : vector<16xf32>
    %99 = vector.multi_reduction <add>, %94, %cst_53 [1] : vector<16x768xf32> to vector<16xf32>
    %100 = vector.shape_cast %99 : vector<16xf32> to vector<16x1xf32>
    %cst_54 = arith.constant 7.680000e+02 : f32
    %101 = vector.broadcast %cst_54 : f32 to vector<16x1xf32>
    %102 = arith.divf %100, %101 : vector<16x1xf32>
    %103 = vector.broadcast %102 : vector<16x1xf32> to vector<16x768xf32>
    %104 = arith.subf %94, %103 : vector<16x768xf32>
    %105 = arith.mulf %104, %104 : vector<16x768xf32>
    %cst_55 = arith.constant dense<0.000000e+00> : vector<16xf32>
    %106 = vector.multi_reduction <add>, %105, %cst_55 [1] : vector<16x768xf32> to vector<16xf32>
    %107 = vector.shape_cast %106 : vector<16xf32> to vector<16x1xf32>
    %cst_56 = arith.constant 7.680000e+02 : f32
    %108 = vector.broadcast %cst_56 : f32 to vector<16x1xf32>
    %109 = arith.divf %107, %108 : vector<16x1xf32>
    %cst_57 = arith.constant 9.99999974E-6 : f32
    %110 = vector.broadcast %cst_57 : f32 to vector<16x1xf32>
    %111 = arith.addf %109, %110 : vector<16x1xf32>
    %112 = math.rsqrt %111 : vector<16x1xf32>
    %113 = vector.broadcast %112 : vector<16x1xf32> to vector<16x768xf32>
    %114 = arith.mulf %104, %113 : vector<16x768xf32>
    %115 = vector.broadcast %96 : vector<1x768xf32> to vector<16x768xf32>
    %116 = arith.mulf %114, %115 : vector<16x768xf32>
    %117 = vector.broadcast %98 : vector<1x768xf32> to vector<16x768xf32>
    %118 = arith.addf %116, %117 : vector<16x768xf32>
    %119 = vector.shape_cast %118 : vector<16x768xf32> to vector<2x8x768xf32>
    %120 = arith.truncf %119 : vector<2x8x768xf32> to vector<2x8x768xbf16>
    %c0_58 = arith.constant 0 : index
    %c0_59 = arith.constant 0 : index
    %c0_60 = arith.constant 0 : index
    %c0_61 = arith.constant 0 : index
    %121 = vector.load %arg15[%c0_58, %c0_59, %c0_60, %c0_61] : memref<1x2x8x768xbf16, #tpu.memory_space<vmem>>, vector<1x2x8x768xbf16>
    %122 = vector.shape_cast %121 : vector<1x2x8x768xbf16> to vector<2x8x768xbf16>
    %123 = vector.shape_cast %120 : vector<2x8x768xbf16> to vector<1x2x8x768xbf16>
    tpu.vector_store %arg15[%c0_58, %c0_59, %c0_60, %c0_61], %123 {strides = array<i32>} : memref<1x2x8x768xbf16, #tpu.memory_space<vmem>>, vector<1x2x8x768xbf16>,
    return
  }
  func.func @transform_0(%arg0: i32, %arg1: i32) -> (i32, i32, i32, i32) {
    %c0_i32 = arith.constant 0 : i32
    %c0_i32_0 = arith.constant 0 : i32
    %c0_i32_1 = arith.constant 0 : i32
    return %arg0, %arg1, %c0_i32, %c0_i32_0 : i32, i32, i32, i32
  }
  func.func @transform_1(%arg0: i32, %arg1: i32) -> (i32, i32, i32) {
    %c0_i32 = arith.constant 0 : i32
    %c0_i32_0 = arith.constant 0 : i32
    %c0_i32_1 = arith.constant 0 : i32
    return %arg0, %c0_i32, %c0_i32_0 : i32, i32, i32
  }
  func.func @transform_2(%arg0: i32, %arg1: i32) -> (i32, i32, i32) {
    %c0_i32 = arith.constant 0 : i32
    %c0_i32_0 = arith.constant 0 : i32
    %c0_i32_1 = arith.constant 0 : i32
    return %arg0, %c0_i32, %c0_i32_0 : i32, i32, i32
  }
  func.func @transform_3(%arg0: i32, %arg1: i32) -> (i32, i32, i32) {
    %c0_i32 = arith.constant 0 : i32
    %c0_i32_0 = arith.constant 0 : i32
    %c0_i32_1 = arith.constant 0 : i32
    return %arg0, %c0_i32, %c0_i32_0 : i32, i32, i32
  }
  func.func @transform_4(%arg0: i32, %arg1: i32) -> (i32, i32, i32) {
    %c0_i32 = arith.constant 0 : i32
    %c0_i32_0 = arith.constant 0 : i32
    %c0_i32_1 = arith.constant 0 : i32
    return %arg0, %c0_i32, %c0_i32_0 : i32, i32, i32
  }
  func.func @transform_5(%arg0: i32, %arg1: i32) -> (i32, i32, i32) {
    %c0_i32 = arith.constant 0 : i32
    %c0_i32_0 = arith.constant 0 : i32
    %c0_i32_1 = arith.constant 0 : i32
    return %arg0, %c0_i32, %c0_i32_0 : i32, i32, i32
  }
  func.func @transform_6(%arg0: i32, %arg1: i32) -> (i32, i32, i32) {
    %c0_i32 = arith.constant 0 : i32
    %c0_i32_0 = arith.constant 0 : i32
    %c0_i32_1 = arith.constant 0 : i32
    return %arg0, %c0_i32, %c0_i32_0 : i32, i32, i32
  }
  func.func @transform_7(%arg0: i32, %arg1: i32) -> (i32, i32, i32) {
    %c0_i32 = arith.constant 0 : i32
    %c0_i32_0 = arith.constant 0 : i32
    %c0_i32_1 = arith.constant 0 : i32
    return %arg0, %c0_i32, %c0_i32_0 : i32, i32, i32
  }
  func.func @transform_8(%arg0: i32, %arg1: i32) -> (i32, i32, i32) {
    %c0_i32 = arith.constant 0 : i32
    %c0_i32_0 = arith.constant 0 : i32
    %c0_i32_1 = arith.constant 0 : i32
    return %arg0, %c0_i32, %c0_i32_0 : i32, i32, i32
  }
  func.func @transform_9(%arg0: i32, %arg1: i32) -> (i32, i32, i32) {
    %c0_i32 = arith.constant 0 : i32
    %c0_i32_0 = arith.constant 0 : i32
    %c0_i32_1 = arith.constant 0 : i32
    return %arg0, %c0_i32, %c0_i32_0 : i32, i32, i32
  }
  func.func @transform_10(%arg0: i32, %arg1: i32) -> (i32, i32, i32) {
    %c0_i32 = arith.constant 0 : i32
    %c0_i32_0 = arith.constant 0 : i32
    %c0_i32_1 = arith.constant 0 : i32
    return %arg0, %c0_i32, %c0_i32_0 : i32, i32, i32
  }
  func.func @transform_11(%arg0: i32, %arg1: i32) -> (i32, i32, i32) {
    %c0_i32 = arith.constant 0 : i32
    %c0_i32_0 = arith.constant 0 : i32
    %c0_i32_1 = arith.constant 0 : i32
    return %arg0, %c0_i32, %c0_i32_0 : i32, i32, i32
  }
  func.func @transform_12(%arg0: i32, %arg1: i32) -> (i32, i32, i32) {
    %c0_i32 = arith.constant 0 : i32
    %c0_i32_0 = arith.constant 0 : i32
    %c0_i32_1 = arith.constant 0 : i32
    return %arg0, %c0_i32, %c0_i32_0 : i32, i32, i32
  }
  func.func @transform_13(%arg0: i32, %arg1: i32) -> (i32, i32, i32, i32) {
    %c0_i32 = arith.constant 0 : i32
    %c0_i32_0 = arith.constant 0 : i32
    %c0_i32_1 = arith.constant 0 : i32
    return %arg0, %arg1, %c0_i32, %c0_i32_0 : i32, i32, i32, i32
  }
}

</mosaic_0001>

<bundles_post_ra>
// kernel: _forward.1
= control target key start
LH: loop header
LB: loop body
LE: loop exit
PB: predicated region body
PF: predicated region fallthrough
CT: control target
= control target key end

     0   :  { %s21098_s25 = smov 0   ;;  %s21100_s26 = smov 0   ;;  %s24558_s0 = inlined_call_operand.vmem [shape: f32[2,2,8,768], index: 0, kind: input, shape index: {}]   ;;  %s24559_s1 = inlined_call_operand.vmem [shape: bf16[2,768,2304], index: 1, kind: input, shape index: {}]   ;;  %s24560_s2 = inlined_call_operand.vmem [shape: f32[2,1,2304], index: 2, kind: input, shape index: {}]   ;;  %s24561_s3 = inlined_call_operand.vmem [shape: bf16[2,768,768], index: 3, kind: input, shape index: {}]   ;;  %s24562_s4 = inlined_call_operand.vmem [shape: f32[2,1,768], index: 4, kind: input, shape index: {}, may-alias: {4,6,10,12}]   ;;  %s24563_s5 = inlined_call_operand.vmem [shape: f32[2,1,768], index: 5, kind: input, shape index: {}, may-alias: {5,11}]   ;;  %s24564_s6 = inlined_call_operand.vmem [shape: f32[2,1,768], index: 6, kind: input, shape index: {}, may-alias: {4,6,10,12}]   ;;  %s24565_s7 = inlined_call_operand.vmem [shape: bf16[2,768,128], index: 7, kind: input, shape index: {}]   ;;  %s24566_s8 = inlined_call_operand.vmem [shape: f32[2,1,128], index: 8, kind: input, shape index: {}]   ;;  %s24567_s9 = inlined_call_operand.vmem [shape: bf16[2,128,768], index: 9, kind: input, shape index: {}]   ;;  %s24568_s10 = inlined_call_operand.vmem [shape: f32[2,1,768], index: 10, kind: input, shape index: {}, may-alias: {4,6,10,12}]   ;;  %s24569_s11 = inlined_call_operand.vmem [shape: f32[2,1,768], index: 11, kind: input, shape index: {}, may-alias: {5,11}]   ;;  %s24570_s12 = inlined_call_operand.vmem [shape: f32[2,1,768], index: 12, kind: input, shape index: {}, may-alias: {4,6,10,12}]   ;;  %s24571_s13 = inlined_call_operand.vmem [shape: bf16[2,2,8,768], index: 13, kind: output, shape index: {}]  }
   0x1   :  { %s21102_s27 = smov 0  }
   0x2 LB: > { %s35_s28 = sadd.s32 1, %s21016_s26  ;;  %p16974_p0 = scmp.ge.s32.totalorder %s21020_s27, 1  ;;  %s21020_s27 = sphi %s21102_s27, %s23_s27   ;;  %s21016_s26 = sphi %s21100_s26, %s24591_s26   ;;  %s21012_s25 = sphi %s21098_s25, %s24590_s25  }
   0x3   : > { %p37_p1 = scmp.ge.s32.totalorder %s35_s28, 2  ;;  %p520_p2 = scmp.lt.s32.totalorder %s21020_s27, 3 }
   0x5   : > { %s24593_s28 = smov (%p37_p1, %s35_s28), 0  ;;  %p521_p3 = pnand %p16974_p0, %p520_p2 }
   0x7   : > { %524 = sbr.rel (%p521_p3) target bundleno = 3850 (0xf0a), region = 72 }
   0xe   : > { %p626_p4 = scmp.lt.s32.totalorder %s21012_s25, 1  ;;  %s21022_s24 = smov 64   ;;  %vm21026_vm0 = vmmov 0   ;;  %vm9834_vm1 = vcmask 523264   ;;  %vm10939_vm2 = vcmask 64512   ;;  %vm11231_vm3 = vcmask 1043456  }
  0x10   : > { %s24595_s25 = smov (!%p626_p4, %s21012_s25), 1 }
  0x11   : > { %s18967_s29 = smul.u32 6912, %s24595_s25 }
  0x12   : > { %s18966_s16 = smul.u32 96, %s24595_s25 }
  0x13   : > { %s21122_s15 = scalar_lea.vmem %s24559_s1, %s18967_s29  ;;  %s18968_s20 = smul.u32 18, %s24595_s25 }
  0x14   : > { %v19033_v0 = vld [vmem:[%s21122_s15 + $0x4] ss:$72 sps:$4 sm:$0xff]   ;;  %v19037_v2 = vld [vmem:[%s21122_s15] ss:$72 sps:$4 sm:$0xff]   ;;  %v19039_v4 = vld [vmem:[%s21122_s15 + $0x94] ss:$72 sps:$4 sm:$0xff]   ;;  %s21172_s19 = scalar_lea.vmem %s24558_s0, %s18966_s16 }
  0x15   : > { %v19035_v1 = vld [vmem:[%s21122_s15 + $0xc] ss:$72 sps:$4 sm:$0xff]   ;;  %5997 = vmatprep.subr.bf16.mxu0 %v19033_v0  ;;  %v19038_v3 = vld [vmem:[%s21122_s15 + $0x8] ss:$72 sps:$4 sm:$0xff]   ;;  %v19041_v5 = vld [vmem:[%s21122_s15 + $0x9c] ss:$72 sps:$4 sm:$0xff]   ;;  %s21584_s23 = scalar_lea.vmem %s24560_s2, %s18968_s20 }
  0x16   : > { %6126 = vmatprep.subr.bf16.mxu1 %v19035_v1  ;;  %5998 = vmatpush1.bf16.msra.mxu0 %v19037_v2  ;;  %v19043_v6 = vld [vmem:[%s21122_s15 + $0x90] ss:$72 sps:$4 sm:$0xff]   ;;  %v19045_v8 = vld [vmem:[%s21122_s15 + $0x124] ss:$72 sps:$4 sm:$0xff]   ;;  %v19049_v10 = vld [vmem:[%s21122_s15 + $0x120] ss:$72 sps:$4 sm:$0xff]  }
  0x17   : > { %6127 = vmatpush1.bf16.msra.mxu1 %v19038_v3  ;;  %5999 = vmatprep.subr.bf16.mxu0 %v19039_v4  ;;  %v19044_v7 = vld [vmem:[%s21122_s15 + $0x98] ss:$72 sps:$4 sm:$0xff]   ;;  %v19047_v9 = vld [vmem:[%s21122_s15 + $0x12c] ss:$72 sps:$4 sm:$0xff]   ;;  %v19050_v11 = vld [vmem:[%s21122_s15 + $0x128] ss:$72 sps:$4 sm:$0xff]  }
  0x18   : > { %6128 = vmatprep.subr.bf16.mxu1 %v19041_v5  ;;  %v19051_v12 = vld [vmem:[%s21122_s15 + $0x1b4] ss:$72 sps:$4 sm:$0xff]   ;;  %v19055_v14 = vld [vmem:[%s21122_s15 + $0x1b0] ss:$72 sps:$4 sm:$0xff]   ;;  %v19057_v16 = vld [vmem:[%s21122_s15 + $0x244] ss:$72 sps:$4 sm:$0xff]  }
  0x19   : > { %v19053_v13 = vld [vmem:[%s21122_s15 + $0x1bc] ss:$72 sps:$4 sm:$0xff]   ;;  %v19056_v15 = vld [vmem:[%s21122_s15 + $0x1b8] ss:$72 sps:$4 sm:$0xff]   ;;  %v19059_v17 = vld [vmem:[%s21122_s15 + $0x24c] ss:$72 sps:$4 sm:$0xff]  }
  0x1a   : > { %6000 = vmatpush1.bf16.msra.mxu0 %v19043_v6  ;;  %v19061_v18 = vld [vmem:[%s21122_s15 + $0x240] ss:$72 sps:$4 sm:$0xff]   ;;  %v19063_v20 = vld [vmem:[%s21122_s15 + $0x2d4] ss:$72 sps:$4 sm:$0xff]   ;;  %v19067_v22 = vld [vmem:[%s21122_s15 + $0x2d0] ss:$72 sps:$4 sm:$0xff]  }
  0x1b   : > { %6129 = vmatpush1.bf16.msra.mxu1 %v19044_v7  ;;  %6001 = vmatprep.subr.bf16.mxu0 %v19045_v8  ;;  %v19062_v19 = vld [vmem:[%s21122_s15 + $0x248] ss:$72 sps:$4 sm:$0xff]   ;;  %v19065_v21 = vld [vmem:[%s21122_s15 + $0x2dc] ss:$72 sps:$4 sm:$0xff]   ;;  %v19068_v23 = vld [vmem:[%s21122_s15 + $0x2d8] ss:$72 sps:$4 sm:$0xff]  }
  0x1c   : > { %6130 = vmatprep.subr.bf16.mxu1 %v19047_v9  ;;  %v19069_v24 = vld [vmem:[%s21122_s15 + $0x364] ss:$72 sps:$4 sm:$0xff]   ;;  %v19073_v26 = vld [vmem:[%s21122_s15 + $0x360] ss:$72 sps:$4 sm:$0xff]   ;;  %v19075_v28 = vld [vmem:[%s21122_s15 + $0x3f4] ss:$72 sps:$4 sm:$0xff]  }
  0x1d   : > { %v19071_v25 = vld [vmem:[%s21122_s15 + $0x36c] ss:$72 sps:$4 sm:$0xff]   ;;  %v19074_v27 = vld [vmem:[%s21122_s15 + $0x368] ss:$72 sps:$4 sm:$0xff]   ;;  %v19077_v29 = vld [vmem:[%s21122_s15 + $0x3fc] ss:$72 sps:$4 sm:$0xff]  }
  0x1e   : > { %6002 = vmatpush1.bf16.msra.mxu0 %v19049_v10  ;;  %v19079_v30 = vld [vmem:[%s21122_s15 + $0x3f0] ss:$72 sps:$4 sm:$0xff]   ;;  %v19081_v32 = vld [vmem:[%s21122_s15 + $0x484] ss:$72 sps:$4 sm:$0xff]   ;;  %v19085_v34 = vld [vmem:[%s21122_s15 + $0x480] ss:$72 sps:$4 sm:$0xff]  }
  0x1f   : > { %6131 = vmatpush1.bf16.msra.mxu1 %v19050_v11  ;;  %6003 = vmatprep.subr.bf16.mxu0 %v19051_v12  ;;  %v19080_v31 = vld [vmem:[%s21122_s15 + $0x3f8] ss:$72 sps:$4 sm:$0xff]   ;;  %v19083_v33 = vld [vmem:[%s21122_s15 + $0x48c] ss:$72 sps:$4 sm:$0xff]   ;;  %v19086_v35 = vld [vmem:[%s21122_s15 + $0x488] ss:$72 sps:$4 sm:$0xff]  }
  0x20   : > { %6132 = vmatprep.subr.bf16.mxu1 %v19053_v13  ;;  %v19087_v36 = vld [vmem:[%s21122_s15 + $0x514] ss:$72 sps:$4 sm:$0xff]   ;;  %v19091_v38 = vld [vmem:[%s21122_s15 + $0x510] ss:$72 sps:$4 sm:$0xff]   ;;  %v19093_v40 = vld [vmem:[%s21122_s15 + $0x5a4] ss:$72 sps:$4 sm:$0xff]  }
  0x21   : > { %v19089_v37 = vld [vmem:[%s21122_s15 + $0x51c] ss:$72 sps:$4 sm:$0xff]   ;;  %v19092_v39 = vld [vmem:[%s21122_s15 + $0x518] ss:$72 sps:$4 sm:$0xff]   ;;  %v19095_v41 = vld [vmem:[%s21122_s15 + $0x5ac] ss:$72 sps:$4 sm:$0xff]  }
  0x22   : > { %6004 = vmatpush1.bf16.msra.mxu0 %v19055_v14  ;;  %v19097_v42 = vld [vmem:[%s21122_s15 + $0x5a0] ss:$72 sps:$4 sm:$0xff]   ;;  %v19099_v44 = vld [vmem:[%s21122_s15 + $0x634] ss:$72 sps:$4 sm:$0xff]   ;;  %v19103_v48 = vld [vmem:[%s21122_s15 + $0x630] ss:$72 sps:$4 sm:$0xff]  }
  0x23   : > { %6133 = vmatpush1.bf16.msra.mxu1 %v19056_v15  ;;  %6005 = vmatprep.subr.bf16.mxu0 %v19057_v16  ;;  %v19098_v43 = vld [vmem:[%s21122_s15 + $0x5a8] ss:$72 sps:$4 sm:$0xff]   ;;  %v19101_v45 = vld [vmem:[%s21122_s15 + $0x63c] ss:$72 sps:$4 sm:$0xff]   ;;  %v19104_v49 = vld [vmem:[%s21122_s15 + $0x638] ss:$72 sps:$4 sm:$0xff]  }
  0x24   : > { %6134 = vmatprep.subr.bf16.mxu1 %v19059_v17  ;;  %v700_v46 = vld [vmem:[%s21172_s19 + $0x8] sm:$0xff]  ;;  %v706_v47 = vld [vmem:[%s21172_s19 + $0x38] sm:$0xff]  ;;  %v699_v4 = vld [vmem:[%s21172_s19] sm:$0xff]  ;;  %s18969_s29 = smul.u32 2304, %s24595_s25 }
  0x25   : > { %v21180_v50 = vpack.c.bf16 %v706_v47, %v700_v46  ;;  %v19105_v51 = vld [vmem:[%s21122_s15 + $0x6c4] ss:$72 sps:$4 sm:$0xff]   ;;  %v19109_v53 = vld [vmem:[%s21122_s15 + $0x6c0] ss:$72 sps:$4 sm:$0xff]   ;;  %v19111_v55 = vld [vmem:[%s21122_s15 + $0x754] ss:$72 sps:$4 sm:$0xff]  }
  0x26   : > { %6006 = vmatpush1.bf16.msra.mxu0 %v19061_v18  ;;  %v19107_v52 = vld [vmem:[%s21122_s15 + $0x6cc] ss:$72 sps:$4 sm:$0xff]   ;;  %v19110_v54 = vld [vmem:[%s21122_s15 + $0x6c8] ss:$72 sps:$4 sm:$0xff]   ;;  %v19113_v56 = vld [vmem:[%s21122_s15 + $0x75c] ss:$72 sps:$4 sm:$0xff]  }
  0x27   : > { %6135 = vmatpush1.bf16.msra.mxu1 %v19062_v19  ;;  %6007 = vmatprep.subr.bf16.mxu0 %v19063_v20  ;;  %v19115_v57 = vld [vmem:[%s21122_s15 + $0x750] ss:$72 sps:$4 sm:$0xff]   ;;  %v19117_v59 = vld [vmem:[%s21122_s15 + $0x7e4] ss:$72 sps:$4 sm:$0xff]   ;;  %v19121_v61 = vld [vmem:[%s21122_s15 + $0x7e0] ss:$72 sps:$4 sm:$0xff]  }
  0x28   : > { %6136 = vmatprep.subr.bf16.mxu1 %v19065_v21  ;;  %6029 = vmatprep.mubr.bf16.mxu0 %v21180_v50  ;;  %v19116_v58 = vld [vmem:[%s21122_s15 + $0x758] ss:$72 sps:$4 sm:$0xff]   ;;  %v19119_v60 = vld [vmem:[%s21122_s15 + $0x7ec] ss:$72 sps:$4 sm:$0xff]   ;;  %v19122_v62 = vld [vmem:[%s21122_s15 + $0x7e8] ss:$72 sps:$4 sm:$0xff]  }
  0x29   : > { %6158 = vmatprep.mubr.bf16.mxu1 %v21180_v50  ;;  %v19123_v63 = vld [vmem:[%s21122_s15 + $0x874] ss:$72 sps:$4 sm:$0xff]   ;;  %v19127_v1 = vld [vmem:[%s21122_s15 + $0x870] ss:$72 sps:$4 sm:$0xff]   ;;  %v19131_v3 = vld [vmem:[%s21122_s15 + $0x904] ss:$72 sps:$4 sm:$0xff]  }
  0x2a   : > { %6008 = vmatpush1.bf16.msra.mxu0 %v19067_v22  ;;  %v19125_v0 = vld [vmem:[%s21122_s15 + $0x87c] ss:$72 sps:$4 sm:$0xff]   ;;  %v19128_v2 = vld [vmem:[%s21122_s15 + $0x878] ss:$72 sps:$4 sm:$0xff]   ;;  %v705_v5 = vld [vmem:[%s21172_s19 + $0x30] sm:$0xff]  ;;  %s24186_s16 = smul.u32 6, %s24595_s25 }
  0x2b   : > { %6137 = vmatpush1.bf16.msra.mxu1 %v19068_v23  ;;  %6009 = vmatprep.subr.bf16.mxu0 %v19069_v24  ;;  %v19134_v6 = vld [vmem:[%s21122_s15 + $0x90c] ss:$72 sps:$4 sm:$0xff]   ;;  %v19129_v7 = vld [vmem:[%s21122_s15 + $0x900] ss:$72 sps:$4 sm:$0xff]   ;;  %v21206_v9 = vpack.c.bf16 %v705_v5, %v699_v4  ;;  %v19140_v11 = vld [vmem:[%s21122_s15 + $0x99c] ss:$72 sps:$4 sm:$0xff]  }
  0x2c   : > { %6138 = vmatprep.subr.bf16.mxu1 %v19071_v25  ;;  %v19132_v8 = vld [vmem:[%s21122_s15 + $0x908] ss:$72 sps:$4 sm:$0xff]   ;;  %v19137_v10 = vld [vmem:[%s21122_s15 + $0x994] ss:$72 sps:$4 sm:$0xff]   ;;  %v19138_v13 = vld [vmem:[%s21122_s15 + $0x998] ss:$72 sps:$4 sm:$0xff]   ;;  %s653_s20 = scalar_lea.vmem %s24562_s4, %s24186_s16  ;;  %s657_s30 = scalar_lea.vmem %s24563_s5, %s24186_s16 }
  0x2d   : > { %v19135_v12 = vld [vmem:[%s21122_s15 + $0x990] ss:$72 sps:$4 sm:$0xff]   ;;  %v19143_v14 = vld [vmem:[%s21122_s15 + $0xa24] ss:$72 sps:$4 sm:$0xff]   ;;  %v19141_v16 = vld [vmem:[%s21122_s15 + $0xa20] ss:$72 sps:$4 sm:$0xff]   ;;  %s661_s17 = scalar_lea.vmem %s24564_s6, %s24186_s16 }
  0x2e   : > { %6010 = vmatpush1.bf16.msra.mxu0 %v19073_v26  ;;  %v19146_v15 = vld [vmem:[%s21122_s15 + $0xa2c] ss:$72 sps:$4 sm:$0xff]   ;;  %v19144_v17 = vld [vmem:[%s21122_s15 + $0xa28] ss:$72 sps:$4 sm:$0xff]   ;;  %v19152_v19 = vld [vmem:[%s21122_s15 + $0xabc] ss:$72 sps:$4 sm:$0xff]  }
  0x2f   : > { %6139 = vmatpush1.bf16.msra.mxu1 %v19074_v27  ;;  %6011 = vmatprep.subr.bf16.mxu0 %v19075_v28  ;;  %v19149_v18 = vld [vmem:[%s21122_s15 + $0xab4] ss:$72 sps:$4 sm:$0xff]   ;;  %v19147_v20 = vld [vmem:[%s21122_s15 + $0xab0] ss:$72 sps:$4 sm:$0xff]   ;;  %v19155_v22 = vld [vmem:[%s21122_s15 + $0xb44] ss:$72 sps:$4 sm:$0xff]  }
  0x30   : > { %6140 = vmatprep.subr.bf16.mxu1 %v19077_v29  ;;  %v19150_v21 = vld [vmem:[%s21122_s15 + $0xab8] ss:$72 sps:$4 sm:$0xff]   ;;  %v19158_v23 = vld [vmem:[%s21122_s15 + $0xb4c] ss:$72 sps:$4 sm:$0xff]   ;;  %v19156_v25 = vld [vmem:[%s21122_s15 + $0xb48] ss:$72 sps:$4 sm:$0xff]  }
  0x31   : > { %v19153_v24 = vld [vmem:[%s21122_s15 + $0xb40] ss:$72 sps:$4 sm:$0xff]   ;;  %v19161_v26 = vld [vmem:[%s21122_s15 + $0xbd4] ss:$72 sps:$4 sm:$0xff]   ;;  %v19159_v28 = vld [vmem:[%s21122_s15 + $0xbd0] ss:$72 sps:$4 sm:$0xff]  }
  0x32   : > { %6012 = vmatpush1.bf16.msra.mxu0 %v19079_v30  ;;  %v19164_v27 = vld [vmem:[%s21122_s15 + $0xbdc] ss:$72 sps:$4 sm:$0xff]   ;;  %v19162_v29 = vld [vmem:[%s21122_s15 + $0xbd8] ss:$72 sps:$4 sm:$0xff]   ;;  %v19216_v5 = vld [vmem:[%s21122_s15 + $0x10e8] ss:$72 sps:$4 sm:$0xff]  }
  0x33   : > { %6141 = vmatpush1.bf16.msra.mxu1 %v19080_v31  ;;  %6013 = vmatprep.subr.bf16.mxu0 %v19081_v32  ;;  %v19167_v30 = vld [vmem:[%s21122_s15 + $0xc64] ss:$72 sps:$4 sm:$0xff]   ;;  %v702_v32 = vld [vmem:[%s21172_s19 + $0x18] sm:$0xff]  ;;  %v19213_v4 = vld [vmem:[%s21122_s15 + $0x10e0] ss:$72 sps:$4 sm:$0xff]   ;;  %s18971_s21 = smul.u32 384, %s24595_s25 }
  0x34   : > { %6142 = vmatprep.subr.bf16.mxu1 %v19083_v33  ;;  %v19170_v31 = vld [vmem:[%s21122_s15 + $0xc6c] ss:$72 sps:$4 sm:$0xff]   ;;  %v19188_v46 = vld [vmem:[%s21122_s15 + $0xe1c] ss:$72 sps:$4 sm:$0xff]   ;;  %v19183_v47 = vld [vmem:[%s21122_s15 + $0xe10] ss:$72 sps:$4 sm:$0xff]  }
  0x35   : > { %v708_v33 = vld [vmem:[%s21172_s19 + $0x48] sm:$0xff]  ;;  %s24411_s22 = scalar_lea.vmem %s24567_s9, %s18971_s21 }
  0x36   : > { %6014 = vmatpush1.bf16.msra.mxu0 %v19085_v34  ;;  %v19165_v34 = vld [vmem:[%s21122_s15 + $0xc60] ss:$72 sps:$4 sm:$0xff]  }
  0x37   : > { %6143 = vmatpush1.bf16.msra.mxu1 %v19086_v35  ;;  %6015 = vmatprep.subr.bf16.mxu0 %v19087_v36  ;;  %v19168_v35 = vld [vmem:[%s21122_s15 + $0xc68] ss:$72 sps:$4 sm:$0xff]   ;;  %v21236_v36 = vpack.c.bf16 %v708_v33, %v702_v32  ;;  %v19246_v32 = vld [vmem:[%s21122_s15 + $0x13b8] ss:$72 sps:$4 sm:$0xff]   ;;  %v19251_v33 = vld [vmem:[%s21122_s15 + $0x1444] ss:$72 sps:$4 sm:$0xff]  }
  0x38   : > { %6144 = vmatprep.subr.bf16.mxu1 %v19089_v37  ;;  %v19173_v37 = vld [vmem:[%s21122_s15 + $0xcf4] ss:$72 sps:$4 sm:$0xff]  }
  0x3a   : > { %6016 = vmatpush1.bf16.msra.mxu0 %v19091_v38  ;;  %v19176_v38 = vld [vmem:[%s21122_s15 + $0xcfc] ss:$72 sps:$4 sm:$0xff]  }
  0x3b   : > { %6145 = vmatpush1.bf16.msra.mxu1 %v19092_v39  ;;  %6017 = vmatprep.subr.bf16.mxu0 %v19093_v40  ;;  %v19171_v39 = vld [vmem:[%s21122_s15 + $0xcf0] ss:$72 sps:$4 sm:$0xff]  }
  0x3c   : > { %6146 = vmatprep.subr.bf16.mxu1 %v19095_v41  ;;  %v19174_v40 = vld [vmem:[%s21122_s15 + $0xcf8] ss:$72 sps:$4 sm:$0xff]   ;;  %v19179_v41 = vld [vmem:[%s21122_s15 + $0xd84] ss:$72 sps:$4 sm:$0xff]  }
  0x3e   : > { %6018 = vmatpush1.bf16.msra.mxu0 %v19097_v42  ;;  %v19182_v42 = vld [vmem:[%s21122_s15 + $0xd8c] ss:$72 sps:$4 sm:$0xff]  }
  0x3f   : > { %6147 = vmatpush1.bf16.msra.mxu1 %v19098_v43  ;;  %6019 = vmatprep.subr.bf16.mxu0 %v19099_v44  ;;  %v19177_v43 = vld [vmem:[%s21122_s15 + $0xd80] ss:$72 sps:$4 sm:$0xff]  }
  0x40   : > { %6148 = vmatprep.subr.bf16.mxu1 %v19101_v45  ;;  %v19180_v44 = vld [vmem:[%s21122_s15 + $0xd88] ss:$72 sps:$4 sm:$0xff]   ;;  %v19185_v45 = vld [vmem:[%s21122_s15 + $0xe14] ss:$72 sps:$4 sm:$0xff]  }
  0x42   : > { %6020 = vmatpush1.bf16.msra.mxu0 %v19103_v48  ;;  %v19186_v48 = vld [vmem:[%s21122_s15 + $0xe18] ss:$72 sps:$4 sm:$0xff]  }
  0x43   : > { %6149 = vmatpush1.bf16.msra.mxu1 %v19104_v49  ;;  %6021 = vmatprep.subr.bf16.mxu0 %v19105_v51  ;;  %v19191_v49 = vld [vmem:[%s21122_s15 + $0xea4] ss:$72 sps:$4 sm:$0xff]  }
  0x44   : > { %6150 = vmatprep.subr.bf16.mxu1 %v19107_v52  ;;  %v19194_v51 = vld [vmem:[%s21122_s15 + $0xeac] ss:$72 sps:$4 sm:$0xff]   ;;  %v19189_v52 = vld [vmem:[%s21122_s15 + $0xea0] ss:$72 sps:$4 sm:$0xff]  }
  0x46   : > { %6022 = vmatpush1.bf16.msra.mxu0 %v19109_v53  ;;  %v19192_v53 = vld [vmem:[%s21122_s15 + $0xea8] ss:$72 sps:$4 sm:$0xff]  }
  0x47   : > { %6151 = vmatpush1.bf16.msra.mxu1 %v19110_v54  ;;  %6023 = vmatprep.subr.bf16.mxu0 %v19111_v55  ;;  %v19197_v54 = vld [vmem:[%s21122_s15 + $0xf34] ss:$72 sps:$4 sm:$0xff]  }
  0x48   : > { %6152 = vmatprep.subr.bf16.mxu1 %v19113_v56  ;;  %v19200_v55 = vld [vmem:[%s21122_s15 + $0xf3c] ss:$72 sps:$4 sm:$0xff]   ;;  %v19195_v56 = vld [vmem:[%s21122_s15 + $0xf30] ss:$72 sps:$4 sm:$0xff]  }
  0x4a   : > { %6024 = vmatpush1.bf16.msra.mxu0 %v19115_v57  ;;  %v19198_v57 = vld [vmem:[%s21122_s15 + $0xf38] ss:$72 sps:$4 sm:$0xff]  }
  0x4b   : > { %6153 = vmatpush1.bf16.msra.mxu1 %v19116_v58  ;;  %6025 = vmatprep.subr.bf16.mxu0 %v19117_v59  ;;  %v19203_v58 = vld [vmem:[%s21122_s15 + $0xfc4] ss:$72 sps:$4 sm:$0xff]  }
  0x4c   : > { %6154 = vmatprep.subr.bf16.mxu1 %v19119_v60  ;;  %v19206_v59 = vld [vmem:[%s21122_s15 + $0xfcc] ss:$72 sps:$4 sm:$0xff]   ;;  %v19201_v60 = vld [vmem:[%s21122_s15 + $0xfc0] ss:$72 sps:$4 sm:$0xff]  }
  0x4e   : > { %6026 = vmatpush1.bf16.msra.mxu0 %v19121_v61  ;;  %v19204_v61 = vld [vmem:[%s21122_s15 + $0xfc8] ss:$72 sps:$4 sm:$0xff]  }
  0x4f   : > { %6155 = vmatpush1.bf16.msra.mxu1 %v19122_v62  ;;  %6027 = vmatprep.subr.bf16.mxu0 %v19123_v63  ;;  %v19209_v62 = vld [vmem:[%s21122_s15 + $0x1054] ss:$72 sps:$4 sm:$0xff]  }
  0x50   : > { %6156 = vmatprep.subr.bf16.mxu1 %v19125_v0  ;;  %v19212_v63 = vld [vmem:[%s21122_s15 + $0x105c] ss:$72 sps:$4 sm:$0xff]   ;;  %v19207_v0 = vld [vmem:[%s21122_s15 + $0x1050] ss:$72 sps:$4 sm:$0xff]  }
  0x52   : > { %6028 = vmatpush1.bf16.msra.mxu0 %v19127_v1  ;;  %v19210_v1 = vld [vmem:[%s21122_s15 + $0x1058] ss:$72 sps:$4 sm:$0xff]  }
  0x53   : > { %6157 = vmatpush1.bf16.msra.mxu1 %v19128_v2  ;;  %6040 = vmatprep.subr.bf16.mxu0 %v19131_v3  ;;  %v19215_v2 = vld [vmem:[%s21122_s15 + $0x10e4] ss:$72 sps:$4 sm:$0xff]  }
  0x54   : > { %6169 = vmatprep.subr.bf16.mxu1 %v19134_v6  ;;  %v19218_v3 = vld [vmem:[%s21122_s15 + $0x10ec] ss:$72 sps:$4 sm:$0xff]  }
  0x55   : > { %6030 = vmatmul.mubr.bf16.vlgmr.msra.gmra.mrb[0].mxu0 %v21206_v9  ;;  %v19221_v6 = vld [vmem:[%s21122_s15 + $0x1174] ss:$72 sps:$4 sm:$0xff]  }
  0x56   : > { %6159 = vmatmul.mubr.bf16.vlgmr.msra.gmra.mrb[0].mxu1 %v21206_v9  ;;  %6041 = vmatpush1.bf16.msra.mxu0 %v19129_v7  ;;  %v19224_v7 = vld [vmem:[%s21122_s15 + $0x117c] ss:$72 sps:$4 sm:$0xff]  }
  0x57   : > { %6170 = vmatpush1.bf16.msra.mxu1 %v19132_v8  ;;  %6042 = vmatprep.subr.bf16.mxu0 %v19137_v10  ;;  %v19219_v8 = vld [vmem:[%s21122_s15 + $0x1170] ss:$72 sps:$4 sm:$0xff]  }
  0x58   : > { %6171 = vmatprep.subr.bf16.mxu1 %v19140_v11  ;;  %6072 = vmatprep.mubr.bf16.mxu0 %v21236_v36  ;;  %v19222_v10 = vld [vmem:[%s21122_s15 + $0x1178] ss:$72 sps:$4 sm:$0xff]   ;;  %v19227_v11 = vld [vmem:[%s21122_s15 + $0x1204] ss:$72 sps:$4 sm:$0xff]  }
  0x59   : > { %6201 = vmatprep.mubr.bf16.mxu1 %v21236_v36 }
  0x5a   : > { %6043 = vmatpush1.bf16.msra.mxu0 %v19135_v12  ;;  %v701_v12 = vld [vmem:[%s21172_s19 + $0x10] sm:$0xff] }
  0x5b   : > { %6172 = vmatpush1.bf16.msra.mxu1 %v19138_v13  ;;  %6044 = vmatprep.subr.bf16.mxu0 %v19143_v14  ;;  %v707_v13 = vld [vmem:[%s21172_s19 + $0x40] sm:$0xff]  ;;  %v19230_v14 = vld [vmem:[%s21122_s15 + $0x120c] ss:$72 sps:$4 sm:$0xff]  }
  0x5c   : > { %6173 = vmatprep.subr.bf16.mxu1 %v19146_v15  ;;  %v19225_v15 = vld [vmem:[%s21122_s15 + $0x1200] ss:$72 sps:$4 sm:$0xff]  }
  0x5e   : > { %6045 = vmatpush1.bf16.msra.mxu0 %v19141_v16  ;;  %v19228_v16 = vld [vmem:[%s21122_s15 + $0x1208] ss:$72 sps:$4 sm:$0xff]  }
  0x5f   : > { %6174 = vmatpush1.bf16.msra.mxu1 %v19144_v17  ;;  %6046 = vmatprep.subr.bf16.mxu0 %v19149_v18  ;;  %v21282_v17 = vpack.c.bf16 %v707_v13, %v701_v12  ;;  %v19233_v18 = vld [vmem:[%s21122_s15 + $0x1294] ss:$72 sps:$4 sm:$0xff]   ;;  %v19311_v12 = vld [vmem:[%s21122_s15 + $0x19e4] ss:$72 sps:$4 sm:$0xff]  }
  0x60   : > { %6175 = vmatprep.subr.bf16.mxu1 %v19152_v19  ;;  %v19236_v19 = vld [vmem:[%s21122_s15 + $0x129c] ss:$72 sps:$4 sm:$0xff]   ;;  %v19314_v13 = vld [vmem:[%s21122_s15 + $0x19ec] ss:$72 sps:$4 sm:$0xff]  }
  0x62   : > { %6047 = vmatpush1.bf16.msra.mxu0 %v19147_v20  ;;  %v704_v20 = vld [vmem:[%s21172_s19 + $0x28] sm:$0xff] }
  0x63   : > { %6176 = vmatpush1.bf16.msra.mxu1 %v19150_v21  ;;  %6048 = vmatprep.subr.bf16.mxu0 %v19155_v22  ;;  %v19231_v21 = vld [vmem:[%s21122_s15 + $0x1290] ss:$72 sps:$4 sm:$0xff]  }
  0x64   : > { %6177 = vmatprep.subr.bf16.mxu1 %v19158_v23  ;;  %v19234_v22 = vld [vmem:[%s21122_s15 + $0x1298] ss:$72 sps:$4 sm:$0xff]  }
  0x65   : > { %v710_v23 = vld [vmem:[%s21172_s19 + $0x58] sm:$0xff] }
  0x66   : > { %6049 = vmatpush1.bf16.msra.mxu0 %v19153_v24  ;;  %v19239_v24 = vld [vmem:[%s21122_s15 + $0x1324] ss:$72 sps:$4 sm:$0xff]  }
  0x67   : > { %6178 = vmatpush1.bf16.msra.mxu1 %v19156_v25  ;;  %6050 = vmatprep.subr.bf16.mxu0 %v19161_v26  ;;  %v21293_v25 = vpack.c.bf16 %v710_v23, %v704_v20  ;;  %v19242_v26 = vld [vmem:[%s21122_s15 + $0x132c] ss:$72 sps:$4 sm:$0xff]   ;;  %v19318_v20 = vld [vmem:[%s21122_s15 + $0x1a78] ss:$72 sps:$4 sm:$0xff]  }
  0x68   : > { %6179 = vmatprep.subr.bf16.mxu1 %v19164_v27  ;;  %v19237_v27 = vld [vmem:[%s21122_s15 + $0x1320] ss:$72 sps:$4 sm:$0xff]   ;;  %v19323_v23 = vld [vmem:[%s21122_s15 + $0x14] ss:$72 sps:$4 sm:$0xff]  }
  0x6a   : > { %6051 = vmatpush1.bf16.msra.mxu0 %v19159_v28  ;;  %v19240_v28 = vld [vmem:[%s21122_s15 + $0x1328] ss:$72 sps:$4 sm:$0xff]  }
  0x6b   : > { %6180 = vmatpush1.bf16.msra.mxu1 %v19162_v29  ;;  %6052 = vmatprep.subr.bf16.mxu0 %v19167_v30  ;;  %v19245_v29 = vld [vmem:[%s21122_s15 + $0x13b4] ss:$72 sps:$4 sm:$0xff]  }
  0x6c   : > { %6181 = vmatprep.subr.bf16.mxu1 %v19170_v31  ;;  %v19248_v30 = vld [vmem:[%s21122_s15 + $0x13bc] ss:$72 sps:$4 sm:$0xff]   ;;  %v19243_v31 = vld [vmem:[%s21122_s15 + $0x13b0] ss:$72 sps:$4 sm:$0xff]  }
  0x6e   : > { %6053 = vmatpush1.bf16.msra.mxu0 %v19165_v34  ;;  %v19254_v34 = vld [vmem:[%s21122_s15 + $0x144c] ss:$72 sps:$4 sm:$0xff]  }
  0x6f   : > { %6182 = vmatpush1.bf16.msra.mxu1 %v19168_v35  ;;  %6054 = vmatprep.subr.bf16.mxu0 %v19173_v37  ;;  %v19249_v35 = vld [vmem:[%s21122_s15 + $0x1440] ss:$72 sps:$4 sm:$0xff]  }
  0x70   : > { %6183 = vmatprep.subr.bf16.mxu1 %v19176_v38  ;;  %v19252_v37 = vld [vmem:[%s21122_s15 + $0x1448] ss:$72 sps:$4 sm:$0xff]   ;;  %v19257_v38 = vld [vmem:[%s21122_s15 + $0x14d4] ss:$72 sps:$4 sm:$0xff]  }
  0x72   : > { %6055 = vmatpush1.bf16.msra.mxu0 %v19171_v39  ;;  %v19260_v39 = vld [vmem:[%s21122_s15 + $0x14dc] ss:$72 sps:$4 sm:$0xff]  }
  0x73   : > { %6184 = vmatpush1.bf16.msra.mxu1 %v19174_v40  ;;  %6056 = vmatprep.subr.bf16.mxu0 %v19179_v41  ;;  %v19255_v40 = vld [vmem:[%s21122_s15 + $0x14d0] ss:$72 sps:$4 sm:$0xff]  }
  0x74   : > { %6185 = vmatprep.subr.bf16.mxu1 %v19182_v42  ;;  %v19258_v41 = vld [vmem:[%s21122_s15 + $0x14d8] ss:$72 sps:$4 sm:$0xff]   ;;  %v19263_v42 = vld [vmem:[%s21122_s15 + $0x1564] ss:$72 sps:$4 sm:$0xff]  }
  0x76   : > { %6057 = vmatpush1.bf16.msra.mxu0 %v19177_v43  ;;  %v19266_v43 = vld [vmem:[%s21122_s15 + $0x156c] ss:$72 sps:$4 sm:$0xff]  }
  0x77   : > { %6186 = vmatpush1.bf16.msra.mxu1 %v19180_v44  ;;  %6058 = vmatprep.subr.bf16.mxu0 %v19185_v45  ;;  %v19261_v44 = vld [vmem:[%s21122_s15 + $0x1560] ss:$72 sps:$4 sm:$0xff]  }
  0x78   : > { %6187 = vmatprep.subr.bf16.mxu1 %v19188_v46  ;;  %v19264_v45 = vld [vmem:[%s21122_s15 + $0x1568] ss:$72 sps:$4 sm:$0xff]   ;;  %v19269_v46 = vld [vmem:[%s21122_s15 + $0x15f4] ss:$72 sps:$4 sm:$0xff]  }
  0x7a   : > { %6059 = vmatpush1.bf16.msra.mxu0 %v19183_v47  ;;  %v19272_v47 = vld [vmem:[%s21122_s15 + $0x15fc] ss:$72 sps:$4 sm:$0xff]  }
  0x7b   : > { %6188 = vmatpush1.bf16.msra.mxu1 %v19186_v48  ;;  %6060 = vmatprep.subr.bf16.mxu0 %v19191_v49  ;;  %v19267_v48 = vld [vmem:[%s21122_s15 + $0x15f0] ss:$72 sps:$4 sm:$0xff]  }
  0x7c   : > { %6189 = vmatprep.subr.bf16.mxu1 %v19194_v51  ;;  %v19270_v49 = vld [vmem:[%s21122_s15 + $0x15f8] ss:$72 sps:$4 sm:$0xff]   ;;  %v19275_v51 = vld [vmem:[%s21122_s15 + $0x1684] ss:$72 sps:$4 sm:$0xff]  }
  0x7e   : > { %6061 = vmatpush1.bf16.msra.mxu0 %v19189_v52  ;;  %v19278_v52 = vld [vmem:[%s21122_s15 + $0x168c] ss:$72 sps:$4 sm:$0xff]  }
  0x7f   : > { %6190 = vmatpush1.bf16.msra.mxu1 %v19192_v53  ;;  %6062 = vmatprep.subr.bf16.mxu0 %v19197_v54  ;;  %v19273_v53 = vld [vmem:[%s21122_s15 + $0x1680] ss:$72 sps:$4 sm:$0xff]  }
  0x80   : > { %6191 = vmatprep.subr.bf16.mxu1 %v19200_v55  ;;  %v19276_v54 = vld [vmem:[%s21122_s15 + $0x1688] ss:$72 sps:$4 sm:$0xff]   ;;  %v19281_v55 = vld [vmem:[%s21122_s15 + $0x1714] ss:$72 sps:$4 sm:$0xff]  }
  0x82   : > { %6063 = vmatpush1.bf16.msra.mxu0 %v19195_v56  ;;  %v19284_v56 = vld [vmem:[%s21122_s15 + $0x171c] ss:$72 sps:$4 sm:$0xff]  }
  0x83   : > { %6192 = vmatpush1.bf16.msra.mxu1 %v19198_v57  ;;  %6064 = vmatprep.subr.bf16.mxu0 %v19203_v58  ;;  %v19279_v57 = vld [vmem:[%s21122_s15 + $0x1710] ss:$72 sps:$4 sm:$0xff]  }
  0x84   : > { %6193 = vmatprep.subr.bf16.mxu1 %v19206_v59  ;;  %v19282_v58 = vld [vmem:[%s21122_s15 + $0x1718] ss:$72 sps:$4 sm:$0xff]   ;;  %v19287_v59 = vld [vmem:[%s21122_s15 + $0x17a4] ss:$72 sps:$4 sm:$0xff]  }
  0x86   : > { %6065 = vmatpush1.bf16.msra.mxu0 %v19201_v60  ;;  %v19290_v60 = vld [vmem:[%s21122_s15 + $0x17ac] ss:$72 sps:$4 sm:$0xff]  }
  0x87   : > { %6194 = vmatpush1.bf16.msra.mxu1 %v19204_v61  ;;  %6066 = vmatprep.subr.bf16.mxu0 %v19209_v62  ;;  %v19285_v61 = vld [vmem:[%s21122_s15 + $0x17a0] ss:$72 sps:$4 sm:$0xff]  }
  0x88   : > { %6195 = vmatprep.subr.bf16.mxu1 %v19212_v63  ;;  %v19288_v62 = vld [vmem:[%s21122_s15 + $0x17a8] ss:$72 sps:$4 sm:$0xff]   ;;  %v19293_v63 = vld [vmem:[%s21122_s15 + $0x1834] ss:$72 sps:$4 sm:$0xff]  }
  0x8a   : > { %6067 = vmatpush1.bf16.msra.mxu0 %v19207_v0  ;;  %v19296_v0 = vld [vmem:[%s21122_s15 + $0x183c] ss:$72 sps:$4 sm:$0xff]  }
  0x8b   : > { %6196 = vmatpush1.bf16.msra.mxu1 %v19210_v1  ;;  %6068 = vmatprep.subr.bf16.mxu0 %v19215_v2  ;;  %v19291_v1 = vld [vmem:[%s21122_s15 + $0x1830] ss:$72 sps:$4 sm:$0xff]  }
  0x8c   : > { %6197 = vmatprep.subr.bf16.mxu1 %v19218_v3  ;;  %v19294_v2 = vld [vmem:[%s21122_s15 + $0x1838] ss:$72 sps:$4 sm:$0xff]   ;;  %v19299_v3 = vld [vmem:[%s21122_s15 + $0x18c4] ss:$72 sps:$4 sm:$0xff]  }
  0x8e   : > { %6069 = vmatpush1.bf16.msra.mxu0 %v19213_v4  ;;  %v19302_v4 = vld [vmem:[%s21122_s15 + $0x18cc] ss:$72 sps:$4 sm:$0xff]  }
  0x8f   : > { %6198 = vmatpush1.bf16.msra.mxu1 %v19216_v5  ;;  %6070 = vmatprep.subr.bf16.mxu0 %v19221_v6  ;;  %v19297_v5 = vld [vmem:[%s21122_s15 + $0x18c0] ss:$72 sps:$4 sm:$0xff]  }
  0x90   : > { %6199 = vmatprep.subr.bf16.mxu1 %v19224_v7  ;;  %v19300_v6 = vld [vmem:[%s21122_s15 + $0x18c8] ss:$72 sps:$4 sm:$0xff]   ;;  %v19305_v7 = vld [vmem:[%s21122_s15 + $0x1954] ss:$72 sps:$4 sm:$0xff]  }
  0x92   : > { %6071 = vmatpush1.bf16.msra.mxu0 %v19219_v8  ;;  %v19308_v8 = vld [vmem:[%s21122_s15 + $0x195c] ss:$72 sps:$4 sm:$0xff]  }
  0x93   : > { %6200 = vmatpush1.bf16.msra.mxu1 %v19222_v10  ;;  %6083 = vmatprep.subr.bf16.mxu0 %v19227_v11  ;;  %v19303_v10 = vld [vmem:[%s21122_s15 + $0x1950] ss:$72 sps:$4 sm:$0xff]  }
  0x94   : > { %6212 = vmatprep.subr.bf16.mxu1 %v19230_v14  ;;  %v19306_v11 = vld [vmem:[%s21122_s15 + $0x1958] ss:$72 sps:$4 sm:$0xff]  }
  0x95   : > { %6073 = vmatmul.mubr.bf16.vlgmr.msra.gmra.mrb[0].mxu0 %v21282_v17  ;;  %v19309_v14 = vld [vmem:[%s21122_s15 + $0x19e0] ss:$72 sps:$4 sm:$0xff]  }
  0x96   : > { %6202 = vmatmul.mubr.bf16.vlgmr.msra.gmra.mrb[0].mxu1 %v21282_v17  ;;  %6084 = vmatpush1.bf16.msra.mxu0 %v19225_v15  ;;  %v19312_v15 = vld [vmem:[%s21122_s15 + $0x19e8] ss:$72 sps:$4 sm:$0xff]  }
  0x97   : > { %6213 = vmatpush1.bf16.msra.mxu1 %v19228_v16  ;;  %6085 = vmatprep.subr.bf16.mxu0 %v19233_v18  ;;  %v19317_v16 = vld [vmem:[%s21122_s15 + $0x1a74] ss:$72 sps:$4 sm:$0xff]  }
  0x98   : > { %6214 = vmatprep.subr.bf16.mxu1 %v19236_v19  ;;  %6115 = vmatprep.mubr.bf16.mxu0 %v21293_v25  ;;  %v19320_v18 = vld [vmem:[%s21122_s15 + $0x1a7c] ss:$72 sps:$4 sm:$0xff]   ;;  %v19315_v19 = vld [vmem:[%s21122_s15 + $0x1a70] ss:$72 sps:$4 sm:$0xff]  }
  0x99   : > { %6244 = vmatprep.mubr.bf16.mxu1 %v21293_v25 }
  0x9a   : > { %6086 = vmatpush1.bf16.msra.mxu0 %v19231_v21  ;;  %v703_v21 = vld [vmem:[%s21172_s19 + $0x20] sm:$0xff] }
  0x9b   : > { %6215 = vmatpush1.bf16.msra.mxu1 %v19234_v22  ;;  %6087 = vmatprep.subr.bf16.mxu0 %v19239_v24  ;;  %v709_v22 = vld [vmem:[%s21172_s19 + $0x50] sm:$0xff]  ;;  %v19326_v24 = vld [vmem:[%s21122_s15 + $0x1c] ss:$72 sps:$4 sm:$0xff]  }
  0x9c   : > { %6216 = vmatprep.subr.bf16.mxu1 %v19242_v26  ;;  %v21356_v26 = vpack.c.bf16 %v709_v22, %v703_v21  ;;  %v19407_v21 = vld [vmem:[%s21122_s15 + $0x7f4] ss:$72 sps:$4 sm:$0xff]  }
  0x9d   : > { %v19410_v22 = vld [vmem:[%s21122_s15 + $0x7fc] ss:$72 sps:$4 sm:$0xff]  }
  0x9e   : > { %6088 = vmatpush1.bf16.msra.mxu0 %v19237_v27  ;;  %v19321_v27 = vld [vmem:[%s21122_s15 + $0x10] ss:$72 sps:$4 sm:$0xff]  }
  0x9f   : > { %6217 = vmatpush1.bf16.msra.mxu1 %v19240_v28  ;;  %6089 = vmatprep.subr.bf16.mxu0 %v19245_v29  ;;  %v19324_v28 = vld [vmem:[%s21122_s15 + $0x18] ss:$72 sps:$4 sm:$0xff]   ;;  %v19329_v29 = vld [vmem:[%s21122_s15 + $0xa4] ss:$72 sps:$4 sm:$0xff]  }
  0xa0   : > { %6218 = vmatprep.subr.bf16.mxu1 %v19248_v30  ;;  %v19332_v30 = vld [vmem:[%s21122_s15 + $0xac] ss:$72 sps:$4 sm:$0xff]  }
  0xa2   : > { %6090 = vmatpush1.bf16.msra.mxu0 %v19243_v31  ;;  %v19327_v31 = vld [vmem:[%s21122_s15 + $0xa0] ss:$72 sps:$4 sm:$0xff]  }
  0xa3   : > { %6219 = vmatpush1.bf16.msra.mxu1 %v19246_v32  ;;  %6091 = vmatprep.subr.bf16.mxu0 %v19251_v33  ;;  %v19330_v32 = vld [vmem:[%s21122_s15 + $0xa8] ss:$72 sps:$4 sm:$0xff]   ;;  %v19335_v33 = vld [vmem:[%s21122_s15 + $0x134] ss:$72 sps:$4 sm:$0xff]  }
  0xa4   : > { %6220 = vmatprep.subr.bf16.mxu1 %v19254_v34  ;;  %v19338_v34 = vld [vmem:[%s21122_s15 + $0x13c] ss:$72 sps:$4 sm:$0xff]  }
  0xa6   : > { %6092 = vmatpush1.bf16.msra.mxu0 %v19249_v35  ;;  %v19333_v35 = vld [vmem:[%s21122_s15 + $0x130] ss:$72 sps:$4 sm:$0xff]  }
  0xa7   : > { %6221 = vmatpush1.bf16.msra.mxu1 %v19252_v37  ;;  %6093 = vmatprep.subr.bf16.mxu0 %v19257_v38  ;;  %v19336_v37 = vld [vmem:[%s21122_s15 + $0x138] ss:$72 sps:$4 sm:$0xff]   ;;  %v19341_v38 = vld [vmem:[%s21122_s15 + $0x1c4] ss:$72 sps:$4 sm:$0xff]  }
  0xa8   : > { %6222 = vmatprep.subr.bf16.mxu1 %v19260_v39  ;;  %v19344_v39 = vld [vmem:[%s21122_s15 + $0x1cc] ss:$72 sps:$4 sm:$0xff]  }
  0xaa   : > { %6094 = vmatpush1.bf16.msra.mxu0 %v19255_v40  ;;  %v19339_v40 = vld [vmem:[%s21122_s15 + $0x1c0] ss:$72 sps:$4 sm:$0xff]  }
  0xab   : > { %6223 = vmatpush1.bf16.msra.mxu1 %v19258_v41  ;;  %6095 = vmatprep.subr.bf16.mxu0 %v19263_v42  ;;  %v19342_v41 = vld [vmem:[%s21122_s15 + $0x1c8] ss:$72 sps:$4 sm:$0xff]   ;;  %v19347_v42 = vld [vmem:[%s21122_s15 + $0x254] ss:$72 sps:$4 sm:$0xff]  }
  0xac   : > { %6224 = vmatprep.subr.bf16.mxu1 %v19266_v43  ;;  %v19350_v43 = vld [vmem:[%s21122_s15 + $0x25c] ss:$72 sps:$4 sm:$0xff]  }
  0xae   : > { %6096 = vmatpush1.bf16.msra.mxu0 %v19261_v44  ;;  %v19345_v44 = vld [vmem:[%s21122_s15 + $0x250] ss:$72 sps:$4 sm:$0xff]  }
  0xaf   : > { %6225 = vmatpush1.bf16.msra.mxu1 %v19264_v45  ;;  %6097 = vmatprep.subr.bf16.mxu0 %v19269_v46  ;;  %v19348_v45 = vld [vmem:[%s21122_s15 + $0x258] ss:$72 sps:$4 sm:$0xff]   ;;  %v19353_v46 = vld [vmem:[%s21122_s15 + $0x2e4] ss:$72 sps:$4 sm:$0xff]  }
  0xb0   : > { %6226 = vmatprep.subr.bf16.mxu1 %v19272_v47  ;;  %v19356_v47 = vld [vmem:[%s21122_s15 + $0x2ec] ss:$72 sps:$4 sm:$0xff]  }
  0xb2   : > { %6098 = vmatpush1.bf16.msra.mxu0 %v19267_v48  ;;  %v19351_v48 = vld [vmem:[%s21122_s15 + $0x2e0] ss:$72 sps:$4 sm:$0xff]  }
  0xb3   : > { %6227 = vmatpush1.bf16.msra.mxu1 %v19270_v49  ;;  %6099 = vmatprep.subr.bf16.mxu0 %v19275_v51  ;;  %v19354_v49 = vld [vmem:[%s21122_s15 + $0x2e8] ss:$72 sps:$4 sm:$0xff]   ;;  %v19359_v51 = vld [vmem:[%s21122_s15 + $0x374] ss:$72 sps:$4 sm:$0xff]  }
  0xb4   : > { %6228 = vmatprep.subr.bf16.mxu1 %v19278_v52  ;;  %v19362_v52 = vld [vmem:[%s21122_s15 + $0x37c] ss:$72 sps:$4 sm:$0xff]  }
  0xb6   : > { %6100 = vmatpush1.bf16.msra.mxu0 %v19273_v53  ;;  %v19357_v53 = vld [vmem:[%s21122_s15 + $0x370] ss:$72 sps:$4 sm:$0xff]  }
  0xb7   : > { %6229 = vmatpush1.bf16.msra.mxu1 %v19276_v54  ;;  %6101 = vmatprep.subr.bf16.mxu0 %v19281_v55  ;;  %v19360_v54 = vld [vmem:[%s21122_s15 + $0x378] ss:$72 sps:$4 sm:$0xff]   ;;  %v19365_v55 = vld [vmem:[%s21122_s15 + $0x404] ss:$72 sps:$4 sm:$0xff]  }
  0xb8   : > { %6230 = vmatprep.subr.bf16.mxu1 %v19284_v56  ;;  %v19368_v56 = vld [vmem:[%s21122_s15 + $0x40c] ss:$72 sps:$4 sm:$0xff]  }
  0xba   : > { %6102 = vmatpush1.bf16.msra.mxu0 %v19279_v57  ;;  %v19363_v57 = vld [vmem:[%s21122_s15 + $0x400] ss:$72 sps:$4 sm:$0xff]  }
  0xbb   : > { %6231 = vmatpush1.bf16.msra.mxu1 %v19282_v58  ;;  %6103 = vmatprep.subr.bf16.mxu0 %v19287_v59  ;;  %v19366_v58 = vld [vmem:[%s21122_s15 + $0x408] ss:$72 sps:$4 sm:$0xff]   ;;  %v19371_v59 = vld [vmem:[%s21122_s15 + $0x494] ss:$72 sps:$4 sm:$0xff]  }
  0xbc   : > { %6232 = vmatprep.subr.bf16.mxu1 %v19290_v60  ;;  %v19374_v60 = vld [vmem:[%s21122_s15 + $0x49c] ss:$72 sps:$4 sm:$0xff]  }
  0xbe   : > { %6104 = vmatpush1.bf16.msra.mxu0 %v19285_v61  ;;  %v19369_v61 = vld [vmem:[%s21122_s15 + $0x490] ss:$72 sps:$4 sm:$0xff]  }
  0xbf   : > { %6233 = vmatpush1.bf16.msra.mxu1 %v19288_v62  ;;  %6105 = vmatprep.subr.bf16.mxu0 %v19293_v63  ;;  %v19372_v62 = vld [vmem:[%s21122_s15 + $0x498] ss:$72 sps:$4 sm:$0xff]   ;;  %v19377_v63 = vld [vmem:[%s21122_s15 + $0x524] ss:$72 sps:$4 sm:$0xff]  }
  0xc0   : > { %6234 = vmatprep.subr.bf16.mxu1 %v19296_v0  ;;  %v19380_v0 = vld [vmem:[%s21122_s15 + $0x52c] ss:$72 sps:$4 sm:$0xff]  }
  0xc2   : > { %6106 = vmatpush1.bf16.msra.mxu0 %v19291_v1  ;;  %v19375_v1 = vld [vmem:[%s21122_s15 + $0x520] ss:$72 sps:$4 sm:$0xff]  }
  0xc3   : > { %6235 = vmatpush1.bf16.msra.mxu1 %v19294_v2  ;;  %6107 = vmatprep.subr.bf16.mxu0 %v19299_v3  ;;  %v19378_v2 = vld [vmem:[%s21122_s15 + $0x528] ss:$72 sps:$4 sm:$0xff]   ;;  %v19383_v3 = vld [vmem:[%s21122_s15 + $0x5b4] ss:$72 sps:$4 sm:$0xff]  }
  0xc4   : > { %6236 = vmatprep.subr.bf16.mxu1 %v19302_v4  ;;  %v19386_v4 = vld [vmem:[%s21122_s15 + $0x5bc] ss:$72 sps:$4 sm:$0xff]  }
  0xc6   : > { %6108 = vmatpush1.bf16.msra.mxu0 %v19297_v5  ;;  %v19381_v5 = vld [vmem:[%s21122_s15 + $0x5b0] ss:$72 sps:$4 sm:$0xff]  }
  0xc7   : > { %6237 = vmatpush1.bf16.msra.mxu1 %v19300_v6  ;;  %6109 = vmatprep.subr.bf16.mxu0 %v19305_v7  ;;  %v19384_v6 = vld [vmem:[%s21122_s15 + $0x5b8] ss:$72 sps:$4 sm:$0xff]   ;;  %v19389_v7 = vld [vmem:[%s21122_s15 + $0x644] ss:$72 sps:$4 sm:$0xff]  }
  0xc8   : > { %6238 = vmatprep.subr.bf16.mxu1 %v19308_v8  ;;  %v19392_v8 = vld [vmem:[%s21122_s15 + $0x64c] ss:$72 sps:$4 sm:$0xff]  }
  0xca   : > { %6110 = vmatpush1.bf16.msra.mxu0 %v19303_v10  ;;  %v19387_v10 = vld [vmem:[%s21122_s15 + $0x640] ss:$72 sps:$4 sm:$0xff]  }
  0xcb   : > { %6239 = vmatpush1.bf16.msra.mxu1 %v19306_v11  ;;  %6111 = vmatprep.subr.bf16.mxu0 %v19311_v12  ;;  %v19390_v11 = vld [vmem:[%s21122_s15 + $0x648] ss:$72 sps:$4 sm:$0xff]   ;;  %v19395_v12 = vld [vmem:[%s21122_s15 + $0x6d4] ss:$72 sps:$4 sm:$0xff]  }
  0xcc   : > { %6240 = vmatprep.subr.bf16.mxu1 %v19314_v13  ;;  %v19398_v13 = vld [vmem:[%s21122_s15 + $0x6dc] ss:$72 sps:$4 sm:$0xff]  }
  0xce   : > { %6112 = vmatpush1.bf16.msra.mxu0 %v19309_v14  ;;  %v19393_v14 = vld [vmem:[%s21122_s15 + $0x6d0] ss:$72 sps:$4 sm:$0xff]  }
  0xcf   : > { %6241 = vmatpush1.bf16.msra.mxu1 %v19312_v15  ;;  %6113 = vmatprep.subr.bf16.mxu0 %v19317_v16  ;;  %v19396_v15 = vld [vmem:[%s21122_s15 + $0x6d8] ss:$72 sps:$4 sm:$0xff]   ;;  %v19401_v16 = vld [vmem:[%s21122_s15 + $0x764] ss:$72 sps:$4 sm:$0xff]  }
  0xd0   : > { %6242 = vmatprep.subr.bf16.mxu1 %v19320_v18  ;;  %v19404_v18 = vld [vmem:[%s21122_s15 + $0x76c] ss:$72 sps:$4 sm:$0xff]  }
  0xd2   : > { %6114 = vmatpush1.bf16.msra.mxu0 %v19315_v19  ;;  %v19399_v19 = vld [vmem:[%s21122_s15 + $0x760] ss:$72 sps:$4 sm:$0xff]  }
  0xd3   : > { %6243 = vmatpush1.bf16.msra.mxu1 %v19318_v20  ;;  %6255 = vmatprep.subr.bf16.mxu0 %v19323_v23  ;;  %v19402_v20 = vld [vmem:[%s21122_s15 + $0x768] ss:$72 sps:$4 sm:$0xff]  }
  0xd4   : > { %6384 = vmatprep.subr.bf16.mxu1 %v19326_v24  ;;  %v19405_v23 = vld [vmem:[%s21122_s15 + $0x7f0] ss:$72 sps:$4 sm:$0xff]  }
  0xd5   : > { %6116 = vmatmul.mubr.bf16.vlgmr.msra.gmra.mrb[0].mxu0 %v21356_v26  ;;  %v19408_v24 = vld [vmem:[%s21122_s15 + $0x7f8] ss:$72 sps:$4 sm:$0xff]  }
  0xd6   : > { %6245 = vmatmul.mubr.bf16.vlgmr.msra.gmra.mrb[0].mxu1 %v21356_v26  ;;  %6256 = vmatpush1.bf16.msra.mxu0 %v19321_v27  ;;  %v19413_v27 = vld [vmem:[%s21122_s15 + $0x884] ss:$72 sps:$4 sm:$0xff]  }
  0xd7   : > { %6385 = vmatpush1.bf16.msra.mxu1 %v19324_v28  ;;  %6257 = vmatprep.subr.bf16.mxu0 %v19329_v29  ;;  %v19416_v28 = vld [vmem:[%s21122_s15 + $0x88c] ss:$72 sps:$4 sm:$0xff]   ;;  %v19411_v29 = vld [vmem:[%s21122_s15 + $0x880] ss:$72 sps:$4 sm:$0xff]  }
  0xd8   : > { %6386 = vmatprep.subr.bf16.mxu1 %v19332_v30  ;;  %6287 = vmatprep.mubr.bf16.mxu0 %v21180_v50  ;;  %v19414_v30 = vld [vmem:[%s21122_s15 + $0x888] ss:$72 sps:$4 sm:$0xff]  }
  0xd9   : > { %6416 = vmatprep.mubr.bf16.mxu1 %v21180_v50 }
  0xda   : > { %6258 = vmatpush1.bf16.msra.mxu0 %v19327_v31  ;;  %v19419_v31 = vld [vmem:[%s21122_s15 + $0x914] ss:$72 sps:$4 sm:$0xff]  }
  0xdb   : > { %6387 = vmatpush1.bf16.msra.mxu1 %v19330_v32  ;;  %6259 = vmatprep.subr.bf16.mxu0 %v19335_v33  ;;  %v19422_v32 = vld [vmem:[%s21122_s15 + $0x91c] ss:$72 sps:$4 sm:$0xff]   ;;  %v19417_v33 = vld [vmem:[%s21122_s15 + $0x910] ss:$72 sps:$4 sm:$0xff]  }
  0xdc   : > { %6388 = vmatprep.subr.bf16.mxu1 %v19338_v34  ;;  %v19420_v34 = vld [vmem:[%s21122_s15 + $0x918] ss:$72 sps:$4 sm:$0xff]  }
  0xde   : > { %6260 = vmatpush1.bf16.msra.mxu0 %v19333_v35  ;;  %v19425_v35 = vld [vmem:[%s21122_s15 + $0x9a4] ss:$72 sps:$4 sm:$0xff]  }
  0xdf   : > { %6389 = vmatpush1.bf16.msra.mxu1 %v19336_v37  ;;  %6261 = vmatprep.subr.bf16.mxu0 %v19341_v38  ;;  %v19428_v37 = vld [vmem:[%s21122_s15 + $0x9ac] ss:$72 sps:$4 sm:$0xff]   ;;  %v19423_v38 = vld [vmem:[%s21122_s15 + $0x9a0] ss:$72 sps:$4 sm:$0xff]  }
  0xe0   : > { %6390 = vmatprep.subr.bf16.mxu1 %v19344_v39  ;;  %v19426_v39 = vld [vmem:[%s21122_s15 + $0x9a8] ss:$72 sps:$4 sm:$0xff]  }
  0xe2   : > { %6262 = vmatpush1.bf16.msra.mxu0 %v19339_v40  ;;  %v19431_v40 = vld [vmem:[%s21122_s15 + $0xa34] ss:$72 sps:$4 sm:$0xff]  }
  0xe3   : > { %6391 = vmatpush1.bf16.msra.mxu1 %v19342_v41  ;;  %6263 = vmatprep.subr.bf16.mxu0 %v19347_v42  ;;  %v19434_v41 = vld [vmem:[%s21122_s15 + $0xa3c] ss:$72 sps:$4 sm:$0xff]   ;;  %v19429_v42 = vld [vmem:[%s21122_s15 + $0xa30] ss:$72 sps:$4 sm:$0xff]  }
  0xe4   : > { %6392 = vmatprep.subr.bf16.mxu1 %v19350_v43  ;;  %v19432_v43 = vld [vmem:[%s21122_s15 + $0xa38] ss:$72 sps:$4 sm:$0xff]  }
  0xe6   : > { %6264 = vmatpush1.bf16.msra.mxu0 %v19345_v44  ;;  %v19437_v44 = vld [vmem:[%s21122_s15 + $0xac4] ss:$72 sps:$4 sm:$0xff]  }
  0xe7   : > { %6393 = vmatpush1.bf16.msra.mxu1 %v19348_v45  ;;  %6265 = vmatprep.subr.bf16.mxu0 %v19353_v46  ;;  %v19440_v45 = vld [vmem:[%s21122_s15 + $0xacc] ss:$72 sps:$4 sm:$0xff]   ;;  %v19435_v46 = vld [vmem:[%s21122_s15 + $0xac0] ss:$72 sps:$4 sm:$0xff]  }
  0xe8   : > { %6394 = vmatprep.subr.bf16.mxu1 %v19356_v47  ;;  %v19438_v47 = vld [vmem:[%s21122_s15 + $0xac8] ss:$72 sps:$4 sm:$0xff]  }
  0xea   : > { %6266 = vmatpush1.bf16.msra.mxu0 %v19351_v48  ;;  %v19443_v48 = vld [vmem:[%s21122_s15 + $0xb54] ss:$72 sps:$4 sm:$0xff]  }
  0xeb   : > { %6395 = vmatpush1.bf16.msra.mxu1 %v19354_v49  ;;  %6267 = vmatprep.subr.bf16.mxu0 %v19359_v51  ;;  %v19446_v49 = vld [vmem:[%s21122_s15 + $0xb5c] ss:$72 sps:$4 sm:$0xff]   ;;  %v19441_v51 = vld [vmem:[%s21122_s15 + $0xb50] ss:$72 sps:$4 sm:$0xff]  }
  0xec   : > { %6396 = vmatprep.subr.bf16.mxu1 %v19362_v52  ;;  %v19444_v52 = vld [vmem:[%s21122_s15 + $0xb58] ss:$72 sps:$4 sm:$0xff]  }
  0xee   : > { %6268 = vmatpush1.bf16.msra.mxu0 %v19357_v53  ;;  %v19449_v53 = vld [vmem:[%s21122_s15 + $0xbe4] ss:$72 sps:$4 sm:$0xff]  }
  0xef   : > { %6397 = vmatpush1.bf16.msra.mxu1 %v19360_v54  ;;  %6269 = vmatprep.subr.bf16.mxu0 %v19365_v55  ;;  %v19452_v54 = vld [vmem:[%s21122_s15 + $0xbec] ss:$72 sps:$4 sm:$0xff]   ;;  %v19447_v55 = vld [vmem:[%s21122_s15 + $0xbe0] ss:$72 sps:$4 sm:$0xff]  }
  0xf0   : > { %6398 = vmatprep.subr.bf16.mxu1 %v19368_v56  ;;  %v19450_v56 = vld [vmem:[%s21122_s15 + $0xbe8] ss:$72 sps:$4 sm:$0xff]  }
  0xf2   : > { %6270 = vmatpush1.bf16.msra.mxu0 %v19363_v57  ;;  %v19455_v57 = vld [vmem:[%s21122_s15 + $0xc74] ss:$72 sps:$4 sm:$0xff]  }
  0xf3   : > { %6399 = vmatpush1.bf16.msra.mxu1 %v19366_v58  ;;  %6271 = vmatprep.subr.bf16.mxu0 %v19371_v59  ;;  %v19458_v58 = vld [vmem:[%s21122_s15 + $0xc7c] ss:$72 sps:$4 sm:$0xff]   ;;  %v19453_v59 = vld [vmem:[%s21122_s15 + $0xc70] ss:$72 sps:$4 sm:$0xff]  }
  0xf4   : > { %6400 = vmatprep.subr.bf16.mxu1 %v19374_v60  ;;  %v19456_v60 = vld [vmem:[%s21122_s15 + $0xc78] ss:$72 sps:$4 sm:$0xff]  }
  0xf6   : > { %6272 = vmatpush1.bf16.msra.mxu0 %v19369_v61  ;;  %v19461_v61 = vld [vmem:[%s21122_s15 + $0xd04] ss:$72 sps:$4 sm:$0xff]  }
  0xf7   : > { %6401 = vmatpush1.bf16.msra.mxu1 %v19372_v62  ;;  %6273 = vmatprep.subr.bf16.mxu0 %v19377_v63  ;;  %v19464_v62 = vld [vmem:[%s21122_s15 + $0xd0c] ss:$72 sps:$4 sm:$0xff]   ;;  %v19459_v63 = vld [vmem:[%s21122_s15 + $0xd00] ss:$72 sps:$4 sm:$0xff]  }
  0xf8   : > { %6402 = vmatprep.subr.bf16.mxu1 %v19380_v0  ;;  %v19462_v0 = vld [vmem:[%s21122_s15 + $0xd08] ss:$72 sps:$4 sm:$0xff]  }
  0xfa   : > { %6274 = vmatpush1.bf16.msra.mxu0 %v19375_v1  ;;  %v19467_v1 = vld [vmem:[%s21122_s15 + $0xd94] ss:$72 sps:$4 sm:$0xff]  }
  0xfb   : > { %6403 = vmatpush1.bf16.msra.mxu1 %v19378_v2  ;;  %6275 = vmatprep.subr.bf16.mxu0 %v19383_v3  ;;  %v19470_v2 = vld [vmem:[%s21122_s15 + $0xd9c] ss:$72 sps:$4 sm:$0xff]   ;;  %v19465_v3 = vld [vmem:[%s21122_s15 + $0xd90] ss:$72 sps:$4 sm:$0xff]  }
  0xfc   : > { %6404 = vmatprep.subr.bf16.mxu1 %v19386_v4  ;;  %v19468_v4 = vld [vmem:[%s21122_s15 + $0xd98] ss:$72 sps:$4 sm:$0xff]  }
  0xfe   : > { %6276 = vmatpush1.bf16.msra.mxu0 %v19381_v5  ;;  %v19473_v5 = vld [vmem:[%s21122_s15 + $0xe24] ss:$72 sps:$4 sm:$0xff]  }
  0xff   : > { %6405 = vmatpush1.bf16.msra.mxu1 %v19384_v6  ;;  %6277 = vmatprep.subr.bf16.mxu0 %v19389_v7  ;;  %v19476_v6 = vld [vmem:[%s21122_s15 + $0xe2c] ss:$72 sps:$4 sm:$0xff]   ;;  %v19471_v7 = vld [vmem:[%s21122_s15 + $0xe20] ss:$72 sps:$4 sm:$0xff]  }
 0x100   : > { %6406 = vmatprep.subr.bf16.mxu1 %v19392_v8  ;;  %v19474_v8 = vld [vmem:[%s21122_s15 + $0xe28] ss:$72 sps:$4 sm:$0xff]  }
 0x102   : > { %6278 = vmatpush1.bf16.msra.mxu0 %v19387_v10  ;;  %v19479_v10 = vld [vmem:[%s21122_s15 + $0xeb4] ss:$72 sps:$4 sm:$0xff]  }
 0x103   : > { %6407 = vmatpush1.bf16.msra.mxu1 %v19390_v11  ;;  %6279 = vmatprep.subr.bf16.mxu0 %v19395_v12  ;;  %v19482_v11 = vld [vmem:[%s21122_s15 + $0xebc] ss:$72 sps:$4 sm:$0xff]   ;;  %v19477_v12 = vld [vmem:[%s21122_s15 + $0xeb0] ss:$72 sps:$4 sm:$0xff]  }
 0x104   : > { %6408 = vmatprep.subr.bf16.mxu1 %v19398_v13  ;;  %v19480_v13 = vld [vmem:[%s21122_s15 + $0xeb8] ss:$72 sps:$4 sm:$0xff]  }
 0x106   : > { %6280 = vmatpush1.bf16.msra.mxu0 %v19393_v14  ;;  %v19485_v14 = vld [vmem:[%s21122_s15 + $0xf44] ss:$72 sps:$4 sm:$0xff]  }
 0x107   : > { %6409 = vmatpush1.bf16.msra.mxu1 %v19396_v15  ;;  %6281 = vmatprep.subr.bf16.mxu0 %v19401_v16  ;;  %v19488_v15 = vld [vmem:[%s21122_s15 + $0xf4c] ss:$72 sps:$4 sm:$0xff]   ;;  %v19483_v16 = vld [vmem:[%s21122_s15 + $0xf40] ss:$72 sps:$4 sm:$0xff]  }
 0x108   : > { %6410 = vmatprep.subr.bf16.mxu1 %v19404_v18  ;;  %v19486_v18 = vld [vmem:[%s21122_s15 + $0xf48] ss:$72 sps:$4 sm:$0xff]  }
 0x10a   : > { %6282 = vmatpush1.bf16.msra.mxu0 %v19399_v19  ;;  %v19491_v19 = vld [vmem:[%s21122_s15 + $0xfd4] ss:$72 sps:$4 sm:$0xff]  }
 0x10b   : > { %6411 = vmatpush1.bf16.msra.mxu1 %v19402_v20  ;;  %6283 = vmatprep.subr.bf16.mxu0 %v19407_v21  ;;  %v19494_v20 = vld [vmem:[%s21122_s15 + $0xfdc] ss:$72 sps:$4 sm:$0xff]   ;;  %v19489_v21 = vld [vmem:[%s21122_s15 + $0xfd0] ss:$72 sps:$4 sm:$0xff]  }
 0x10c   : > { %6412 = vmatprep.subr.bf16.mxu1 %v19410_v22  ;;  %v19492_v22 = vld [vmem:[%s21122_s15 + $0xfd8] ss:$72 sps:$4 sm:$0xff]  }
 0x10e   : > { %6284 = vmatpush1.bf16.msra.mxu0 %v19405_v23  ;;  %v19497_v23 = vld [vmem:[%s21122_s15 + $0x1064] ss:$72 sps:$4 sm:$0xff]  }
 0x10f   : > { %6413 = vmatpush1.bf16.msra.mxu1 %v19408_v24  ;;  %6285 = vmatprep.subr.bf16.mxu0 %v19413_v27  ;;  %v19500_v24 = vld [vmem:[%s21122_s15 + $0x106c] ss:$72 sps:$4 sm:$0xff]   ;;  %v19495_v27 = vld [vmem:[%s21122_s15 + $0x1060] ss:$72 sps:$4 sm:$0xff]  }
 0x110   : > { %6414 = vmatprep.subr.bf16.mxu1 %v19416_v28  ;;  %v19498_v28 = vld [vmem:[%s21122_s15 + $0x1068] ss:$72 sps:$4 sm:$0xff]  }
 0x112   : > { %6286 = vmatpush1.bf16.msra.mxu0 %v19411_v29  ;;  %v19503_v29 = vld [vmem:[%s21122_s15 + $0x10f4] ss:$72 sps:$4 sm:$0xff]  }
 0x113   : > { %6415 = vmatpush1.bf16.msra.mxu1 %v19414_v30  ;;  %6298 = vmatprep.subr.bf16.mxu0 %v19419_v31  ;;  %v19506_v30 = vld [vmem:[%s21122_s15 + $0x10fc] ss:$72 sps:$4 sm:$0xff]   ;;  %v19501_v31 = vld [vmem:[%s21122_s15 + $0x10f0] ss:$72 sps:$4 sm:$0xff]  }
 0x114   : > { %6427 = vmatprep.subr.bf16.mxu1 %v19422_v32  ;;  %v19504_v32 = vld [vmem:[%s21122_s15 + $0x10f8] ss:$72 sps:$4 sm:$0xff]  }
 0x115   : > { %6288 = vmatmul.mubr.bf16.vlgmr.msra.gmra.mrb[4].mxu0 %v21206_v9 }
 0x116   : > { %6417 = vmatmul.mubr.bf16.vlgmr.msra.gmra.mrb[4].mxu1 %v21206_v9  ;;  %6299 = vmatpush1.bf16.msra.mxu0 %v19417_v33  ;;  %v19509_v33 = vld [vmem:[%s21122_s15 + $0x1184] ss:$72 sps:$4 sm:$0xff]  }
 0x117   : > { %6428 = vmatpush1.bf16.msra.mxu1 %v19420_v34  ;;  %6300 = vmatprep.subr.bf16.mxu0 %v19425_v35  ;;  %v19512_v34 = vld [vmem:[%s21122_s15 + $0x118c] ss:$72 sps:$4 sm:$0xff]   ;;  %v19507_v35 = vld [vmem:[%s21122_s15 + $0x1180] ss:$72 sps:$4 sm:$0xff]  }
 0x118   : > { %6429 = vmatprep.subr.bf16.mxu1 %v19428_v37  ;;  %6330 = vmatprep.mubr.bf16.mxu0 %v21236_v36  ;;  %v19510_v37 = vld [vmem:[%s21122_s15 + $0x1188] ss:$72 sps:$4 sm:$0xff]  }
 0x119   : > { %6459 = vmatprep.mubr.bf16.mxu1 %v21236_v36 }
 0x11a   : > { %6301 = vmatpush1.bf16.msra.mxu0 %v19423_v38  ;;  %v19515_v38 = vld [vmem:[%s21122_s15 + $0x1214] ss:$72 sps:$4 sm:$0xff]  }
 0x11b   : > { %6430 = vmatpush1.bf16.msra.mxu1 %v19426_v39  ;;  %6302 = vmatprep.subr.bf16.mxu0 %v19431_v40  ;;  %v19518_v39 = vld [vmem:[%s21122_s15 + $0x121c] ss:$72 sps:$4 sm:$0xff]   ;;  %v19513_v40 = vld [vmem:[%s21122_s15 + $0x1210] ss:$72 sps:$4 sm:$0xff]  }
 0x11c   : > { %6431 = vmatprep.subr.bf16.mxu1 %v19434_v41  ;;  %v19516_v41 = vld [vmem:[%s21122_s15 + $0x1218] ss:$72 sps:$4 sm:$0xff]  }
 0x11e   : > { %6303 = vmatpush1.bf16.msra.mxu0 %v19429_v42  ;;  %v19521_v42 = vld [vmem:[%s21122_s15 + $0x12a4] ss:$72 sps:$4 sm:$0xff]  }
 0x11f   : > { %6432 = vmatpush1.bf16.msra.mxu1 %v19432_v43  ;;  %6304 = vmatprep.subr.bf16.mxu0 %v19437_v44  ;;  %v19524_v43 = vld [vmem:[%s21122_s15 + $0x12ac] ss:$72 sps:$4 sm:$0xff]   ;;  %v19519_v44 = vld [vmem:[%s21122_s15 + $0x12a0] ss:$72 sps:$4 sm:$0xff]  }
 0x120   : > { %6433 = vmatprep.subr.bf16.mxu1 %v19440_v45  ;;  %v19522_v45 = vld [vmem:[%s21122_s15 + $0x12a8] ss:$72 sps:$4 sm:$0xff]  }
 0x122   : > { %6305 = vmatpush1.bf16.msra.mxu0 %v19435_v46  ;;  %v19527_v46 = vld [vmem:[%s21122_s15 + $0x1334] ss:$72 sps:$4 sm:$0xff]  }
 0x123   : > { %6434 = vmatpush1.bf16.msra.mxu1 %v19438_v47  ;;  %6306 = vmatprep.subr.bf16.mxu0 %v19443_v48  ;;  %v19530_v47 = vld [vmem:[%s21122_s15 + $0x133c] ss:$72 sps:$4 sm:$0xff]   ;;  %v19525_v48 = vld [vmem:[%s21122_s15 + $0x1330] ss:$72 sps:$4 sm:$0xff]  }
 0x124   : > { %6435 = vmatprep.subr.bf16.mxu1 %v19446_v49  ;;  %v19528_v49 = vld [vmem:[%s21122_s15 + $0x1338] ss:$72 sps:$4 sm:$0xff]  }
 0x126   : > { %6307 = vmatpush1.bf16.msra.mxu0 %v19441_v51  ;;  %v19533_v51 = vld [vmem:[%s21122_s15 + $0x13c4] ss:$72 sps:$4 sm:$0xff]  }
 0x127   : > { %6436 = vmatpush1.bf16.msra.mxu1 %v19444_v52  ;;  %6308 = vmatprep.subr.bf16.mxu0 %v19449_v53  ;;  %v19536_v52 = vld [vmem:[%s21122_s15 + $0x13cc] ss:$72 sps:$4 sm:$0xff]   ;;  %v19531_v53 = vld [vmem:[%s21122_s15 + $0x13c0] ss:$72 sps:$4 sm:$0xff]  }
 0x128   : > { %6437 = vmatprep.subr.bf16.mxu1 %v19452_v54  ;;  %v19534_v54 = vld [vmem:[%s21122_s15 + $0x13c8] ss:$72 sps:$4 sm:$0xff]  }
 0x12a   : > { %6309 = vmatpush1.bf16.msra.mxu0 %v19447_v55  ;;  %v19539_v55 = vld [vmem:[%s21122_s15 + $0x1454] ss:$72 sps:$4 sm:$0xff]  }
 0x12b   : > { %6438 = vmatpush1.bf16.msra.mxu1 %v19450_v56  ;;  %6310 = vmatprep.subr.bf16.mxu0 %v19455_v57  ;;  %v19542_v56 = vld [vmem:[%s21122_s15 + $0x145c] ss:$72 sps:$4 sm:$0xff]   ;;  %v19537_v57 = vld [vmem:[%s21122_s15 + $0x1450] ss:$72 sps:$4 sm:$0xff]  }
 0x12c   : > { %6439 = vmatprep.subr.bf16.mxu1 %v19458_v58  ;;  %v19540_v58 = vld [vmem:[%s21122_s15 + $0x1458] ss:$72 sps:$4 sm:$0xff]  }
 0x12e   : > { %6311 = vmatpush1.bf16.msra.mxu0 %v19453_v59  ;;  %v19545_v59 = vld [vmem:[%s21122_s15 + $0x14e4] ss:$72 sps:$4 sm:$0xff]  }
 0x12f   : > { %6440 = vmatpush1.bf16.msra.mxu1 %v19456_v60  ;;  %6312 = vmatprep.subr.bf16.mxu0 %v19461_v61  ;;  %v19548_v60 = vld [vmem:[%s21122_s15 + $0x14ec] ss:$72 sps:$4 sm:$0xff]   ;;  %v19543_v61 = vld [vmem:[%s21122_s15 + $0x14e0] ss:$72 sps:$4 sm:$0xff]  }
 0x130   : > { %6441 = vmatprep.subr.bf16.mxu1 %v19464_v62  ;;  %v19546_v62 = vld [vmem:[%s21122_s15 + $0x14e8] ss:$72 sps:$4 sm:$0xff]  }
 0x132   : > { %6313 = vmatpush1.bf16.msra.mxu0 %v19459_v63  ;;  %v19551_v63 = vld [vmem:[%s21122_s15 + $0x1574] ss:$72 sps:$4 sm:$0xff]  }
 0x133   : > { %6442 = vmatpush1.bf16.msra.mxu1 %v19462_v0  ;;  %6314 = vmatprep.subr.bf16.mxu0 %v19467_v1  ;;  %v19554_v0 = vld [vmem:[%s21122_s15 + $0x157c] ss:$72 sps:$4 sm:$0xff]   ;;  %v19549_v1 = vld [vmem:[%s21122_s15 + $0x1570] ss:$72 sps:$4 sm:$0xff]  }
 0x134   : > { %6443 = vmatprep.subr.bf16.mxu1 %v19470_v2  ;;  %v19552_v2 = vld [vmem:[%s21122_s15 + $0x1578] ss:$72 sps:$4 sm:$0xff]  }
 0x136   : > { %6315 = vmatpush1.bf16.msra.mxu0 %v19465_v3  ;;  %v19557_v3 = vld [vmem:[%s21122_s15 + $0x1604] ss:$72 sps:$4 sm:$0xff]  }
 0x137   : > { %6444 = vmatpush1.bf16.msra.mxu1 %v19468_v4  ;;  %6316 = vmatprep.subr.bf16.mxu0 %v19473_v5  ;;  %v19560_v4 = vld [vmem:[%s21122_s15 + $0x160c] ss:$72 sps:$4 sm:$0xff]   ;;  %v19555_v5 = vld [vmem:[%s21122_s15 + $0x1600] ss:$72 sps:$4 sm:$0xff]  }
 0x138   : > { %6445 = vmatprep.subr.bf16.mxu1 %v19476_v6  ;;  %v19558_v6 = vld [vmem:[%s21122_s15 + $0x1608] ss:$72 sps:$4 sm:$0xff]  }
 0x13a   : > { %6317 = vmatpush1.bf16.msra.mxu0 %v19471_v7  ;;  %v19563_v7 = vld [vmem:[%s21122_s15 + $0x1694] ss:$72 sps:$4 sm:$0xff]  }
 0x13b   : > { %6446 = vmatpush1.bf16.msra.mxu1 %v19474_v8  ;;  %6318 = vmatprep.subr.bf16.mxu0 %v19479_v10  ;;  %v19566_v8 = vld [vmem:[%s21122_s15 + $0x169c] ss:$72 sps:$4 sm:$0xff]   ;;  %v19561_v10 = vld [vmem:[%s21122_s15 + $0x1690] ss:$72 sps:$4 sm:$0xff]  }
 0x13c   : > { %6447 = vmatprep.subr.bf16.mxu1 %v19482_v11  ;;  %v19564_v11 = vld [vmem:[%s21122_s15 + $0x1698] ss:$72 sps:$4 sm:$0xff]  }
 0x13e   : > { %6319 = vmatpush1.bf16.msra.mxu0 %v19477_v12  ;;  %v19569_v12 = vld [vmem:[%s21122_s15 + $0x1724] ss:$72 sps:$4 sm:$0xff]  }
 0x13f   : > { %6448 = vmatpush1.bf16.msra.mxu1 %v19480_v13  ;;  %6320 = vmatprep.subr.bf16.mxu0 %v19485_v14  ;;  %v19572_v13 = vld [vmem:[%s21122_s15 + $0x172c] ss:$72 sps:$4 sm:$0xff]   ;;  %v19567_v14 = vld [vmem:[%s21122_s15 + $0x1720] ss:$72 sps:$4 sm:$0xff]  }
 0x140   : > { %6449 = vmatprep.subr.bf16.mxu1 %v19488_v15  ;;  %v19570_v15 = vld [vmem:[%s21122_s15 + $0x1728] ss:$72 sps:$4 sm:$0xff]  }
 0x142   : > { %6321 = vmatpush1.bf16.msra.mxu0 %v19483_v16  ;;  %v19575_v16 = vld [vmem:[%s21122_s15 + $0x17b4] ss:$72 sps:$4 sm:$0xff]  }
 0x143   : > { %6450 = vmatpush1.bf16.msra.mxu1 %v19486_v18  ;;  %6322 = vmatprep.subr.bf16.mxu0 %v19491_v19  ;;  %v19578_v18 = vld [vmem:[%s21122_s15 + $0x17bc] ss:$72 sps:$4 sm:$0xff]   ;;  %v19573_v19 = vld [vmem:[%s21122_s15 + $0x17b0] ss:$72 sps:$4 sm:$0xff]  }
 0x144   : > { %6451 = vmatprep.subr.bf16.mxu1 %v19494_v20  ;;  %v19576_v20 = vld [vmem:[%s21122_s15 + $0x17b8] ss:$72 sps:$4 sm:$0xff]  }
 0x146   : > { %6323 = vmatpush1.bf16.msra.mxu0 %v19489_v21  ;;  %v19581_v21 = vld [vmem:[%s21122_s15 + $0x1844] ss:$72 sps:$4 sm:$0xff]  }
 0x147   : > { %6452 = vmatpush1.bf16.msra.mxu1 %v19492_v22  ;;  %6324 = vmatprep.subr.bf16.mxu0 %v19497_v23  ;;  %v19584_v22 = vld [vmem:[%s21122_s15 + $0x184c] ss:$72 sps:$4 sm:$0xff]   ;;  %v19579_v23 = vld [vmem:[%s21122_s15 + $0x1840] ss:$72 sps:$4 sm:$0xff]  }
 0x148   : > { %6453 = vmatprep.subr.bf16.mxu1 %v19500_v24  ;;  %v19582_v24 = vld [vmem:[%s21122_s15 + $0x1848] ss:$72 sps:$4 sm:$0xff]  }
 0x14a   : > { %6325 = vmatpush1.bf16.msra.mxu0 %v19495_v27  ;;  %v19587_v27 = vld [vmem:[%s21122_s15 + $0x18d4] ss:$72 sps:$4 sm:$0xff]  }
 0x14b   : > { %6454 = vmatpush1.bf16.msra.mxu1 %v19498_v28  ;;  %6326 = vmatprep.subr.bf16.mxu0 %v19503_v29  ;;  %v19590_v28 = vld [vmem:[%s21122_s15 + $0x18dc] ss:$72 sps:$4 sm:$0xff]   ;;  %v19585_v29 = vld [vmem:[%s21122_s15 + $0x18d0] ss:$72 sps:$4 sm:$0xff]  }
 0x14c   : > { %6455 = vmatprep.subr.bf16.mxu1 %v19506_v30  ;;  %v19588_v30 = vld [vmem:[%s21122_s15 + $0x18d8] ss:$72 sps:$4 sm:$0xff]  }
 0x14e   : > { %6327 = vmatpush1.bf16.msra.mxu0 %v19501_v31  ;;  %v19593_v31 = vld [vmem:[%s21122_s15 + $0x1964] ss:$72 sps:$4 sm:$0xff]  }
 0x14f   : > { %6456 = vmatpush1.bf16.msra.mxu1 %v19504_v32  ;;  %6328 = vmatprep.subr.bf16.mxu0 %v19509_v33  ;;  %v19596_v32 = vld [vmem:[%s21122_s15 + $0x196c] ss:$72 sps:$4 sm:$0xff]   ;;  %v19591_v33 = vld [vmem:[%s21122_s15 + $0x1960] ss:$72 sps:$4 sm:$0xff]  }
 0x150   : > { %6457 = vmatprep.subr.bf16.mxu1 %v19512_v34  ;;  %v19594_v34 = vld [vmem:[%s21122_s15 + $0x1968] ss:$72 sps:$4 sm:$0xff]  }
 0x152   : > { %6329 = vmatpush1.bf16.msra.mxu0 %v19507_v35  ;;  %v19599_v35 = vld [vmem:[%s21122_s15 + $0x19f4] ss:$72 sps:$4 sm:$0xff]  }
 0x153   : > { %6458 = vmatpush1.bf16.msra.mxu1 %v19510_v37  ;;  %6341 = vmatprep.subr.bf16.mxu0 %v19515_v38  ;;  %v19602_v37 = vld [vmem:[%s21122_s15 + $0x19fc] ss:$72 sps:$4 sm:$0xff]   ;;  %v19597_v38 = vld [vmem:[%s21122_s15 + $0x19f0] ss:$72 sps:$4 sm:$0xff]  }
 0x154   : > { %6470 = vmatprep.subr.bf16.mxu1 %v19518_v39  ;;  %v19600_v39 = vld [vmem:[%s21122_s15 + $0x19f8] ss:$72 sps:$4 sm:$0xff]  }
 0x155   : > { %6331 = vmatmul.mubr.bf16.vlgmr.msra.gmra.mrb[4].mxu0 %v21282_v17 }
 0x156   : > { %6460 = vmatmul.mubr.bf16.vlgmr.msra.gmra.mrb[4].mxu1 %v21282_v17  ;;  %6342 = vmatpush1.bf16.msra.mxu0 %v19513_v40  ;;  %v19605_v40 = vld [vmem:[%s21122_s15 + $0x1a84] ss:$72 sps:$4 sm:$0xff]  }
 0x157   : > { %6471 = vmatpush1.bf16.msra.mxu1 %v19516_v41  ;;  %6343 = vmatprep.subr.bf16.mxu0 %v19521_v42  ;;  %v19608_v41 = vld [vmem:[%s21122_s15 + $0x1a8c] ss:$72 sps:$4 sm:$0xff]   ;;  %v19603_v42 = vld [vmem:[%s21122_s15 + $0x1a80] ss:$72 sps:$4 sm:$0xff]  }
 0x158   : > { %6472 = vmatprep.subr.bf16.mxu1 %v19524_v43  ;;  %6373 = vmatprep.mubr.bf16.mxu0 %v21293_v25  ;;  %v19606_v43 = vld [vmem:[%s21122_s15 + $0x1a88] ss:$72 sps:$4 sm:$0xff]  }
 0x159   : > { %6502 = vmatprep.mubr.bf16.mxu1 %v21293_v25 }
 0x15a   : > { %6344 = vmatpush1.bf16.msra.mxu0 %v19519_v44  ;;  %v19611_v44 = vld [vmem:[%s21122_s15 + $0x24] ss:$72 sps:$4 sm:$0xff]  }
 0x15b   : > { %6473 = vmatpush1.bf16.msra.mxu1 %v19522_v45  ;;  %6345 = vmatprep.subr.bf16.mxu0 %v19527_v46  ;;  %v19614_v45 = vld [vmem:[%s21122_s15 + $0x2c] ss:$72 sps:$4 sm:$0xff]   ;;  %v19609_v46 = vld [vmem:[%s21122_s15 + $0x20] ss:$72 sps:$4 sm:$0xff]  }
 0x15c   : > { %6474 = vmatprep.subr.bf16.mxu1 %v19530_v47  ;;  %v19612_v47 = vld [vmem:[%s21122_s15 + $0x28] ss:$72 sps:$4 sm:$0xff]  }
 0x15e   : > { %6346 = vmatpush1.bf16.msra.mxu0 %v19525_v48  ;;  %v19617_v48 = vld [vmem:[%s21122_s15 + $0xb4] ss:$72 sps:$4 sm:$0xff]  }
 0x15f   : > { %6475 = vmatpush1.bf16.msra.mxu1 %v19528_v49  ;;  %6347 = vmatprep.subr.bf16.mxu0 %v19533_v51  ;;  %v19620_v49 = vld [vmem:[%s21122_s15 + $0xbc] ss:$72 sps:$4 sm:$0xff]   ;;  %v19615_v51 = vld [vmem:[%s21122_s15 + $0xb0] ss:$72 sps:$4 sm:$0xff]  }
 0x160   : > { %6476 = vmatprep.subr.bf16.mxu1 %v19536_v52  ;;  %v19618_v52 = vld [vmem:[%s21122_s15 + $0xb8] ss:$72 sps:$4 sm:$0xff]  }
 0x162   : > { %6348 = vmatpush1.bf16.msra.mxu0 %v19531_v53  ;;  %v19623_v53 = vld [vmem:[%s21122_s15 + $0x144] ss:$72 sps:$4 sm:$0xff]  }
 0x163   : > { %6477 = vmatpush1.bf16.msra.mxu1 %v19534_v54  ;;  %6349 = vmatprep.subr.bf16.mxu0 %v19539_v55  ;;  %v19626_v54 = vld [vmem:[%s21122_s15 + $0x14c] ss:$72 sps:$4 sm:$0xff]   ;;  %v19621_v55 = vld [vmem:[%s21122_s15 + $0x140] ss:$72 sps:$4 sm:$0xff]  }
 0x164   : > { %6478 = vmatprep.subr.bf16.mxu1 %v19542_v56  ;;  %v19624_v56 = vld [vmem:[%s21122_s15 + $0x148] ss:$72 sps:$4 sm:$0xff]  }
 0x166   : > { %6350 = vmatpush1.bf16.msra.mxu0 %v19537_v57  ;;  %v1587_v57 = vlaneseq }
 0x167   : > { %6479 = vmatpush1.bf16.msra.mxu1 %v19540_v58  ;;  %6351 = vmatprep.subr.bf16.mxu0 %v19545_v59  ;;  %v19629_v58 = vld [vmem:[%s21122_s15 + $0x1d4] ss:$72 sps:$4 sm:$0xff]  }
 0x168   : > { %6480 = vmatprep.subr.bf16.mxu1 %v19548_v60  ;;  %v19632_v59 = vld [vmem:[%s21122_s15 + $0x1dc] ss:$72 sps:$4 sm:$0xff]   ;;  %v19627_v60 = vld [vmem:[%s21122_s15 + $0x1d0] ss:$72 sps:$4 sm:$0xff]  }
 0x16a   : > { %6352 = vmatpush1.bf16.msra.mxu0 %v19543_v61  ;;  %v19630_v61 = vld [vmem:[%s21122_s15 + $0x1d8] ss:$72 sps:$4 sm:$0xff]  }
 0x16b   : > { %6481 = vmatpush1.bf16.msra.mxu1 %v19546_v62  ;;  %6353 = vmatprep.subr.bf16.mxu0 %v19551_v63  ;;  %v21586_v62 = vshrl.u32 %v1587_v57, 7  ;;  %v19635_v63 = vld [vmem:[%s21122_s15 + $0x264] ss:$72 sps:$4 sm:$0xff]   ;;  %v19678_v57 = vld [vmem:[%s21122_s15 + $0x658] ss:$72 sps:$4 sm:$0xff]  }
 0x16c   : > { %6482 = vmatprep.subr.bf16.mxu1 %v19554_v0  ;;  %v19638_v0 = vld [vmem:[%s21122_s15 + $0x26c] ss:$72 sps:$4 sm:$0xff]  }
 0x16e   : > { %6354 = vmatpush1.bf16.msra.mxu0 %v19549_v1  ;;  %v19633_v1 = vld [vmem:[%s21122_s15 + $0x260] ss:$72 sps:$4 sm:$0xff]  }
 0x16f   : > { %6483 = vmatpush1.bf16.msra.mxu1 %v19552_v2  ;;  %6355 = vmatprep.subr.bf16.mxu0 %v19557_v3  ;;  %v19636_v2 = vld [vmem:[%s21122_s15 + $0x268] ss:$72 sps:$4 sm:$0xff]   ;;  %v1581_v3 = vld [vmem:[%s21584_s23] sm:$0xff] }
 0x170   : > { %6484 = vmatprep.subr.bf16.mxu1 %v19560_v4  ;;  %v21594_v4 = vsub.s32 0, %v21586_v62 }
 0x172   : > { %6356 = vmatpush1.bf16.msra.mxu0 %v19555_v5  ;;  %v19641_v5 = vld [vmem:[%s21122_s15 + $0x2f4] ss:$72 sps:$4 sm:$0xff]  }
 0x173   : > { %6485 = vmatpush1.bf16.msra.mxu1 %v19558_v6  ;;  %6357 = vmatprep.subr.bf16.mxu0 %v19563_v7  ;;  %v19644_v6 = vld [vmem:[%s21122_s15 + $0x2fc] ss:$72 sps:$4 sm:$0xff]   ;;  %v21599_v7 = vsub.s32 1, %v21586_v62 }
 0x174   : > { %6486 = vmatprep.subr.bf16.mxu1 %v19566_v8  ;;  %v19639_v8 = vld [vmem:[%s21122_s15 + $0x2f0] ss:$72 sps:$4 sm:$0xff]  }
 0x176   : > { %6358 = vmatpush1.bf16.msra.mxu0 %v19561_v10  ;;  %v19642_v10 = vld [vmem:[%s21122_s15 + $0x2f8] ss:$72 sps:$4 sm:$0xff]  }
 0x177   : > { %6487 = vmatpush1.bf16.msra.mxu1 %v19564_v11  ;;  %6359 = vmatprep.subr.bf16.mxu0 %v19569_v12  ;;  %v1590_v11 = vrot.slane %v1581_v3, %v21594_v4  ;;  %v19647_v12 = vld [vmem:[%s21122_s15 + $0x384] ss:$72 sps:$4 sm:$0xff]  }
 0x178   : > { %6488 = vmatprep.subr.bf16.mxu1 %v19572_v13  ;;  %v19650_v13 = vld [vmem:[%s21122_s15 + $0x38c] ss:$72 sps:$4 sm:$0xff]  }
 0x17a   : > { %6360 = vmatpush1.bf16.msra.mxu0 %v19567_v14  ;;  %v1594_v14 = vrot.slane %v1581_v3, %v21599_v7  ;;  %v19695_v3 = vld [vmem:[%s21122_s15 + $0x804] ss:$72 sps:$4 sm:$0xff]  }
 0x17b   : > { %6489 = vmatpush1.bf16.msra.mxu1 %v19570_v15  ;;  %6361 = vmatprep.subr.bf16.mxu0 %v19575_v16 }
 0x17c   : > { %6490 = vmatprep.subr.bf16.mxu1 %v19578_v18  ;;  %v19645_v18 = vld [vmem:[%s21122_s15 + $0x380] ss:$72 sps:$4 sm:$0xff]  }
 0x17e   : > { %6362 = vmatpush1.bf16.msra.mxu0 %v19573_v19 }
 0x17f   : > { %6491 = vmatpush1.bf16.msra.mxu1 %v19576_v20  ;;  %6363 = vmatprep.subr.bf16.mxu0 %v19581_v21 }
 0x180   : > { %6492 = vmatprep.subr.bf16.mxu1 %v19584_v22  ;;  %v19648_v22 = vld [vmem:[%s21122_s15 + $0x388] ss:$72 sps:$4 sm:$0xff]  }
 0x182   : > { %6364 = vmatpush1.bf16.msra.mxu0 %v19579_v23  ;;  %v19653_v23 = vld [vmem:[%s21122_s15 + $0x414] ss:$72 sps:$4 sm:$0xff]  }
 0x183   : > { %6493 = vmatpush1.bf16.msra.mxu1 %v19582_v24  ;;  %6365 = vmatprep.subr.bf16.mxu0 %v19587_v27 }
 0x184   : > { %6494 = vmatprep.subr.bf16.mxu1 %v19590_v28 }
 0x186   : > { %6366 = vmatpush1.bf16.msra.mxu0 %v19585_v29 }
 0x187   : > { %6495 = vmatpush1.bf16.msra.mxu1 %v19588_v30  ;;  %6367 = vmatprep.subr.bf16.mxu0 %v19593_v31 }
 0x188   : > { %6496 = vmatprep.subr.bf16.mxu1 %v19596_v32 }
 0x18a   : > { %6368 = vmatpush1.bf16.msra.mxu0 %v19591_v33 }
 0x18b   : > { %6497 = vmatpush1.bf16.msra.mxu1 %v19594_v34  ;;  %6369 = vmatprep.subr.bf16.mxu0 %v19599_v35  ;;  %v19656_v35 = vld [vmem:[%s21122_s15 + $0x41c] ss:$72 sps:$4 sm:$0xff]  }
 0x18c   : > { %6498 = vmatprep.subr.bf16.mxu1 %v19602_v37  ;;  %v19651_v37 = vld [vmem:[%s21122_s15 + $0x410] ss:$72 sps:$4 sm:$0xff]  }
 0x18e   : > { %6370 = vmatpush1.bf16.msra.mxu0 %v19597_v38  ;;  %v19654_v38 = vld [vmem:[%s21122_s15 + $0x418] ss:$72 sps:$4 sm:$0xff]  }
 0x18f   : > { %6499 = vmatpush1.bf16.msra.mxu1 %v19600_v39  ;;  %6371 = vmatprep.subr.bf16.mxu0 %v19605_v40 }
 0x190   : > { %6500 = vmatprep.subr.bf16.mxu1 %v19608_v41  ;;  %v19659_v41 = vld [vmem:[%s21122_s15 + $0x4a4] ss:$72 sps:$4 sm:$0xff]  }
 0x192   : > { %6372 = vmatpush1.bf16.msra.mxu0 %v19603_v42  ;;  %v19662_v42 = vld [vmem:[%s21122_s15 + $0x4ac] ss:$72 sps:$4 sm:$0xff]  }
 0x193   : > { %6501 = vmatpush1.bf16.msra.mxu1 %v19606_v43  ;;  %6513 = vmatprep.subr.bf16.mxu0 %v19611_v44  ;;  %v19657_v43 = vld [vmem:[%s21122_s15 + $0x4a0] ss:$72 sps:$4 sm:$0xff]  }
 0x194   : > { %6642 = vmatprep.subr.bf16.mxu1 %v19614_v45  ;;  %v19660_v44 = vld [vmem:[%s21122_s15 + $0x4a8] ss:$72 sps:$4 sm:$0xff]   ;;  %v19665_v45 = vld [vmem:[%s21122_s15 + $0x534] ss:$72 sps:$4 sm:$0xff]  }
 0x195   : > { %6374 = vmatmul.mubr.bf16.vlgmr.msra.gmra.mrb[4].mxu0 %v21356_v26 }
 0x196   : > { %6503 = vmatmul.mubr.bf16.vlgmr.msra.gmra.mrb[4].mxu1 %v21356_v26  ;;  %6514 = vmatpush1.bf16.msra.mxu0 %v19609_v46  ;;  %v19663_v46 = vld [vmem:[%s21122_s15 + $0x530] ss:$72 sps:$4 sm:$0xff]  }
 0x197   : > { %6643 = vmatpush1.bf16.msra.mxu1 %v19612_v47  ;;  %6515 = vmatprep.subr.bf16.mxu0 %v19617_v48  ;;  %v19668_v47 = vld [vmem:[%s21122_s15 + $0x53c] ss:$72 sps:$4 sm:$0xff]   ;;  %v19666_v48 = vld [vmem:[%s21122_s15 + $0x538] ss:$72 sps:$4 sm:$0xff]  }
 0x198   : > { %6644 = vmatprep.subr.bf16.mxu1 %v19620_v49  ;;  %6545 = vmatprep.mubr.bf16.mxu0 %v21180_v50  ;;  %v19671_v49 = vld [vmem:[%s21122_s15 + $0x5c4] ss:$72 sps:$4 sm:$0xff]  }
 0x199   : > { %6674 = vmatprep.mubr.bf16.mxu1 %v21180_v50 }
 0x19a   : > { %6516 = vmatpush1.bf16.msra.mxu0 %v19615_v51  ;;  %v19669_v51 = vld [vmem:[%s21122_s15 + $0x5c0] ss:$72 sps:$4 sm:$0xff]  }
 0x19b   : > { %6645 = vmatpush1.bf16.msra.mxu1 %v19618_v52  ;;  %6517 = vmatprep.subr.bf16.mxu0 %v19623_v53  ;;  %v19674_v52 = vld [vmem:[%s21122_s15 + $0x5cc] ss:$72 sps:$4 sm:$0xff]   ;;  %v19672_v53 = vld [vmem:[%s21122_s15 + $0x5c8] ss:$72 sps:$4 sm:$0xff]  }
 0x19c   : > { %6646 = vmatprep.subr.bf16.mxu1 %v19626_v54  ;;  %v19677_v54 = vld [vmem:[%s21122_s15 + $0x654] ss:$72 sps:$4 sm:$0xff]  }
 0x19e   : > { %6518 = vmatpush1.bf16.msra.mxu0 %v19621_v55  ;;  %v19675_v55 = vld [vmem:[%s21122_s15 + $0x650] ss:$72 sps:$4 sm:$0xff]  }
 0x19f   : > { %6647 = vmatpush1.bf16.msra.mxu1 %v19624_v56  ;;  %6519 = vmatprep.subr.bf16.mxu0 %v19629_v58  ;;  %v19680_v56 = vld [vmem:[%s21122_s15 + $0x65c] ss:$72 sps:$4 sm:$0xff]  }
 0x1a0   : > { %6648 = vmatprep.subr.bf16.mxu1 %v19632_v59  ;;  %v19683_v58 = vld [vmem:[%s21122_s15 + $0x6e4] ss:$72 sps:$4 sm:$0xff]   ;;  %v19681_v59 = vld [vmem:[%s21122_s15 + $0x6e0] ss:$72 sps:$4 sm:$0xff]  }
 0x1a2   : > { %6520 = vmatpush1.bf16.msra.mxu0 %v19627_v60  ;;  %v19686_v60 = vld [vmem:[%s21122_s15 + $0x6ec] ss:$72 sps:$4 sm:$0xff]  }
 0x1a3   : > { %6649 = vmatpush1.bf16.msra.mxu1 %v19630_v61  ;;  %6521 = vmatprep.subr.bf16.mxu0 %v19635_v63  ;;  %v19684_v61 = vld [vmem:[%s21122_s15 + $0x6e8] ss:$72 sps:$4 sm:$0xff]   ;;  %v19689_v63 = vld [vmem:[%s21122_s15 + $0x774] ss:$72 sps:$4 sm:$0xff]  }
 0x1a4   : > { %6650 = vmatprep.subr.bf16.mxu1 %v19638_v0  ;;  %v19687_v0 = vld [vmem:[%s21122_s15 + $0x770] ss:$72 sps:$4 sm:$0xff]  }
 0x1a6   : > { %6522 = vmatpush1.bf16.msra.mxu0 %v19633_v1  ;;  %v19692_v1 = vld [vmem:[%s21122_s15 + $0x77c] ss:$72 sps:$4 sm:$0xff]  }
 0x1a7   : > { %6651 = vmatpush1.bf16.msra.mxu1 %v19636_v2  ;;  %6523 = vmatprep.subr.bf16.mxu0 %v19641_v5  ;;  %v19690_v2 = vld [vmem:[%s21122_s15 + $0x778] ss:$72 sps:$4 sm:$0xff]  }
 0x1a8   : > { %6652 = vmatprep.subr.bf16.mxu1 %v19644_v6  ;;  %v6117_v15 = vpop.f32.mrb[0].mxu0  ;;  %v19693_v5 = vld [vmem:[%s21122_s15 + $0x800] ss:$72 sps:$4 sm:$0xff]   ;;  %v19698_v6 = vld [vmem:[%s21122_s15 + $0x80c] ss:$72 sps:$4 sm:$0xff]  }
 0x1a9   : > { %v21607_v16 = vpop.f32.mrb[0].mxu1  ;;  %v18822_v19 = vadd.f32 %v6117_v15, %v1590_v11  ;;  %v6119_v20 = vpop.f32.mrb[1].mxu0  ;;  %v19705_v15 = vld [vmem:[%s21122_s15 + $0x920] ss:$72 sps:$4 sm:$0xff]  }
 0x1aa   : > { %v21610_v21 = vpop.f32.mrb[1].mxu1  ;;  %v18823_v24 = vadd.f32 %v6119_v20, %v1594_v14  ;;  %v6121_v27 = vpop.f32.mrb[2].mxu0  ;;  %6524 = vmatpush1.bf16.msra.mxu0 %v19639_v8  ;;  %v19696_v8 = vld [vmem:[%s21122_s15 + $0x808] ss:$72 sps:$4 sm:$0xff]   ;;  %v19713_v20 = vld [vmem:[%s21122_s15 + $0x9b4] ss:$72 sps:$4 sm:$0xff]  }
 0x1ab   : > { %v21614_v28 = vpop.f32.mrb[2].mxu1  ;;  %6653 = vmatpush1.bf16.msra.mxu1 %v19642_v10  ;;  %v21616_v29 = vmul.f32 0.125, %v18822_v19  ;;  %v21618_v30 = vadd.f32 %v6121_v27, %v1590_v11  ;;  %v6123_v31 = vpop.f32.mrb[3].mxu0  ;;  %6525 = vmatprep.subr.bf16.mxu0 %v19647_v12  ;;  %v19701_v10 = vld [vmem:[%s21122_s15 + $0x894] ss:$72 sps:$4 sm:$0xff]  }
 0x1ac   : > { %v21620_v32 = vpop.f32.mrb[3].mxu1  ;;  %6654 = vmatprep.subr.bf16.mxu1 %v19650_v13  ;;  %v21622_v33 = vmul.f32 0.125, %v18823_v24  ;;  %v21624_v34 = vadd.f32 %v6123_v31, %v1594_v14  ;;  %v19699_v11 = vld [vmem:[%s21122_s15 + $0x890] ss:$72 sps:$4 sm:$0xff]   ;;  %v19704_v12 = vld [vmem:[%s21122_s15 + $0x89c] ss:$72 sps:$4 sm:$0xff]  }
 0x1ad   : > { %7172 = vrot.lane.b32.xlu1 %v21616_v29, %s21022_s24  ;;  %v19702_v13 = vld [vmem:[%s21122_s15 + $0x898] ss:$72 sps:$4 sm:$0xff]   ;;  %v19707_v14 = vld [vmem:[%s21122_s15 + $0x924] ss:$72 sps:$4 sm:$0xff]   ;;  %v19708_v19 = vld [vmem:[%s21122_s15 + $0x928] ss:$72 sps:$4 sm:$0xff]  }
 0x1ae   : > { %v7218_v39 = vcombine.low %v21616_v29, %v21622_v33  ;;  %v7219_v40 = vcombine.high %v21616_v29, %v21622_v33  ;;  %6526 = vmatpush1.bf16.msra.mxu0 %v19645_v18  ;;  %v19710_v18 = vld [vmem:[%s21122_s15 + $0x92c] ss:$72 sps:$4 sm:$0xff]   ;;  %v19714_v24 = vld [vmem:[%s21122_s15 + $0x9b8] ss:$72 sps:$4 sm:$0xff]  }
 0x1af   : > { %6655 = vmatpush1.bf16.msra.mxu1 %v19648_v22  ;;  %6527 = vmatprep.subr.bf16.mxu0 %v19653_v23  ;;  %v19716_v22 = vld [vmem:[%s21122_s15 + $0x9bc] ss:$72 sps:$4 sm:$0xff]   ;;  %v19711_v23 = vld [vmem:[%s21122_s15 + $0x9b0] ss:$72 sps:$4 sm:$0xff]   ;;  %v19717_v31 = vld [vmem:[%s21122_s15 + $0xa40] ss:$72 sps:$4 sm:$0xff]  }
 0x1b0   : > { %6656 = vmatprep.subr.bf16.mxu1 %v19656_v35  ;;  %v19719_v27 = vld [vmem:[%s21122_s15 + $0xa44] ss:$72 sps:$4 sm:$0xff]  }
 0x1b1   : > { %7180 = vrot.lane.b32.xlu1 %v21622_v33, %s21022_s24  ;;  %v19722_v35 = vld [vmem:[%s21122_s15 + $0xa4c] ss:$72 sps:$4 sm:$0xff]  }
 0x1b2   : > { %6528 = vmatpush1.bf16.msra.mxu0 %v19651_v37  ;;  %v19720_v37 = vld [vmem:[%s21122_s15 + $0xa48] ss:$72 sps:$4 sm:$0xff]   ;;  %v19842_v29 = vld [vmem:[%s21122_s15 + $0x158c] ss:$72 sps:$4 sm:$0xff]  }
 0x1b3   : > { %6657 = vmatpush1.bf16.msra.mxu1 %v19654_v38  ;;  %6529 = vmatprep.subr.bf16.mxu0 %v19659_v41  ;;  %v19725_v38 = vld [vmem:[%s21122_s15 + $0xad4] ss:$72 sps:$4 sm:$0xff]   ;;  %v19723_v41 = vld [vmem:[%s21122_s15 + $0xad0] ss:$72 sps:$4 sm:$0xff]  }
 0x1b4   : > { %6658 = vmatprep.subr.bf16.mxu1 %v19662_v42  ;;  %v19728_v42 = vld [vmem:[%s21122_s15 + $0xadc] ss:$72 sps:$4 sm:$0xff]  }
 0x1b6   : > { %6530 = vmatpush1.bf16.msra.mxu0 %v19657_v43  ;;  %v19726_v43 = vld [vmem:[%s21122_s15 + $0xad8] ss:$72 sps:$4 sm:$0xff]  }
 0x1b7   : > { %6659 = vmatpush1.bf16.msra.mxu1 %v19660_v44  ;;  %6531 = vmatprep.subr.bf16.mxu0 %v19665_v45  ;;  %v19731_v44 = vld [vmem:[%s21122_s15 + $0xb64] ss:$72 sps:$4 sm:$0xff]   ;;  %v19729_v45 = vld [vmem:[%s21122_s15 + $0xb60] ss:$72 sps:$4 sm:$0xff]  }
 0x1b8   : > { %6660 = vmatprep.subr.bf16.mxu1 %v19668_v47  ;;  %v19732_v47 = vld [vmem:[%s21122_s15 + $0xb68] ss:$72 sps:$4 sm:$0xff]  }
 0x1ba   : > { %6532 = vmatpush1.bf16.msra.mxu0 %v19663_v46  ;;  %v19734_v46 = vld [vmem:[%s21122_s15 + $0xb6c] ss:$72 sps:$4 sm:$0xff]  }
 0x1bb   : > { %6661 = vmatpush1.bf16.msra.mxu1 %v19666_v48  ;;  %6533 = vmatprep.subr.bf16.mxu0 %v19671_v49  ;;  %v19737_v48 = vld [vmem:[%s21122_s15 + $0xbf4] ss:$72 sps:$4 sm:$0xff]   ;;  %v19735_v49 = vld [vmem:[%s21122_s15 + $0xbf0] ss:$72 sps:$4 sm:$0xff]  }
 0x1bc   : > { %6662 = vmatprep.subr.bf16.mxu1 %v19674_v52  ;;  %v19738_v52 = vld [vmem:[%s21122_s15 + $0xbf8] ss:$72 sps:$4 sm:$0xff]  }
 0x1be   : > { %6534 = vmatpush1.bf16.msra.mxu0 %v19669_v51  ;;  %v19740_v51 = vld [vmem:[%s21122_s15 + $0xbfc] ss:$72 sps:$4 sm:$0xff]  }
 0x1bf   : > { %6663 = vmatpush1.bf16.msra.mxu1 %v19672_v53  ;;  %6535 = vmatprep.subr.bf16.mxu0 %v19677_v54  ;;  %v19743_v53 = vld [vmem:[%s21122_s15 + $0xc84] ss:$72 sps:$4 sm:$0xff]   ;;  %v19741_v54 = vld [vmem:[%s21122_s15 + $0xc80] ss:$72 sps:$4 sm:$0xff]  }
 0x1c0   : > { %6664 = vmatprep.subr.bf16.mxu1 %v19680_v56  ;;  %v19744_v56 = vld [vmem:[%s21122_s15 + $0xc88] ss:$72 sps:$4 sm:$0xff]  }
 0x1c2   : > { %6536 = vmatpush1.bf16.msra.mxu0 %v19675_v55  ;;  %v19746_v55 = vld [vmem:[%s21122_s15 + $0xc8c] ss:$72 sps:$4 sm:$0xff]  }
 0x1c3   : > { %6665 = vmatpush1.bf16.msra.mxu1 %v19678_v57  ;;  %6537 = vmatprep.subr.bf16.mxu0 %v19683_v58  ;;  %v19749_v57 = vld [vmem:[%s21122_s15 + $0xd14] ss:$72 sps:$4 sm:$0xff]   ;;  %v19747_v58 = vld [vmem:[%s21122_s15 + $0xd10] ss:$72 sps:$4 sm:$0xff]  }
 0x1c4   : > { %6666 = vmatprep.subr.bf16.mxu1 %v19686_v60  ;;  %v19750_v60 = vld [vmem:[%s21122_s15 + $0xd18] ss:$72 sps:$4 sm:$0xff]  }
 0x1c6   : > { %6538 = vmatpush1.bf16.msra.mxu0 %v19681_v59  ;;  %v19752_v59 = vld [vmem:[%s21122_s15 + $0xd1c] ss:$72 sps:$4 sm:$0xff]  }
 0x1c7   : > { %6667 = vmatpush1.bf16.msra.mxu1 %v19684_v61  ;;  %6539 = vmatprep.subr.bf16.mxu0 %v19689_v63  ;;  %v19755_v61 = vld [vmem:[%s21122_s15 + $0xda4] ss:$72 sps:$4 sm:$0xff]  }
 0x1c8   : > { %6668 = vmatprep.subr.bf16.mxu1 %v19692_v1  ;;  %v19758_v63 = vld [vmem:[%s21122_s15 + $0xdac] ss:$72 sps:$4 sm:$0xff]   ;;  %v19756_v1 = vld [vmem:[%s21122_s15 + $0xda8] ss:$72 sps:$4 sm:$0xff]  }
 0x1ca   : > { %6540 = vmatpush1.bf16.msra.mxu0 %v19687_v0  ;;  %v19753_v0 = vld [vmem:[%s21122_s15 + $0xda0] ss:$72 sps:$4 sm:$0xff]  }
 0x1cb   : > { %6669 = vmatpush1.bf16.msra.mxu1 %v19690_v2  ;;  %6541 = vmatprep.subr.bf16.mxu0 %v19695_v3  ;;  %v19761_v2 = vld [vmem:[%s21122_s15 + $0xe34] ss:$72 sps:$4 sm:$0xff]   ;;  %v19759_v3 = vld [vmem:[%s21122_s15 + $0xe30] ss:$72 sps:$4 sm:$0xff]  }
 0x1cc   : > { %6670 = vmatprep.subr.bf16.mxu1 %v19698_v6  ;;  %v19762_v6 = vld [vmem:[%s21122_s15 + $0xe38] ss:$72 sps:$4 sm:$0xff]  }
 0x1ce   : > { %6542 = vmatpush1.bf16.msra.mxu0 %v19693_v5  ;;  %v19764_v5 = vld [vmem:[%s21122_s15 + $0xe3c] ss:$72 sps:$4 sm:$0xff]  }
 0x1cf   : > { %6671 = vmatpush1.bf16.msra.mxu1 %v19696_v8  ;;  %6543 = vmatprep.subr.bf16.mxu0 %v19701_v10  ;;  %v19767_v8 = vld [vmem:[%s21122_s15 + $0xec4] ss:$72 sps:$4 sm:$0xff]   ;;  %v19765_v10 = vld [vmem:[%s21122_s15 + $0xec0] ss:$72 sps:$4 sm:$0xff]  }
 0x1d0   : > { %6672 = vmatprep.subr.bf16.mxu1 %v19704_v12  ;;  %v19768_v12 = vld [vmem:[%s21122_s15 + $0xec8] ss:$72 sps:$4 sm:$0xff]  }
 0x1d2   : > { %6544 = vmatpush1.bf16.msra.mxu0 %v19699_v11  ;;  %v19770_v11 = vld [vmem:[%s21122_s15 + $0xecc] ss:$72 sps:$4 sm:$0xff]  }
 0x1d3   : > { %6673 = vmatpush1.bf16.msra.mxu1 %v19702_v13  ;;  %6556 = vmatprep.subr.bf16.mxu0 %v19707_v14  ;;  %v19773_v13 = vld [vmem:[%s21122_s15 + $0xf54] ss:$72 sps:$4 sm:$0xff]   ;;  %v19771_v14 = vld [vmem:[%s21122_s15 + $0xf50] ss:$72 sps:$4 sm:$0xff]  }
 0x1d4   : > { %6685 = vmatprep.subr.bf16.mxu1 %v19710_v18  ;;  %v19774_v18 = vld [vmem:[%s21122_s15 + $0xf58] ss:$72 sps:$4 sm:$0xff]  }
 0x1d5   : > { %6546 = vmatmul.mubr.bf16.vlgmr.msra.gmra.mrb[8].mxu0 %v21206_v9 }
 0x1d6   : > { %6557 = vmatpush1.bf16.msra.mxu0 %v19705_v15  ;;  %6675 = vmatmul.mubr.bf16.vlgmr.msra.gmra.mrb[8].mxu1 %v21206_v9  ;;  %v19776_v15 = vld [vmem:[%s21122_s15 + $0xf5c] ss:$72 sps:$4 sm:$0xff]  }
 0x1d7   : > { %6686 = vmatpush1.bf16.msra.mxu1 %v19708_v19  ;;  %6558 = vmatprep.subr.bf16.mxu0 %v19713_v20  ;;  %v19779_v19 = vld [vmem:[%s21122_s15 + $0xfe4] ss:$72 sps:$4 sm:$0xff]   ;;  %v19777_v20 = vld [vmem:[%s21122_s15 + $0xfe0] ss:$72 sps:$4 sm:$0xff]  }
 0x1d8   : > { %6687 = vmatprep.subr.bf16.mxu1 %v19716_v22  ;;  %6588 = vmatprep.mubr.bf16.mxu0 %v21236_v36  ;;  %v19782_v22 = vld [vmem:[%s21122_s15 + $0xfec] ss:$72 sps:$4 sm:$0xff]  }
 0x1d9   : > { %6717 = vmatprep.mubr.bf16.mxu1 %v21236_v36 }
 0x1da   : > { %6559 = vmatpush1.bf16.msra.mxu0 %v19711_v23  ;;  %v19780_v23 = vld [vmem:[%s21122_s15 + $0xfe8] ss:$72 sps:$4 sm:$0xff]  }
 0x1db   : > { %6688 = vmatpush1.bf16.msra.mxu1 %v19714_v24  ;;  %6560 = vmatprep.subr.bf16.mxu0 %v19719_v27  ;;  %v19785_v24 = vld [vmem:[%s21122_s15 + $0x1074] ss:$72 sps:$4 sm:$0xff]   ;;  %v19783_v27 = vld [vmem:[%s21122_s15 + $0x1070] ss:$72 sps:$4 sm:$0xff]  }
 0x1dc   : > { %6689 = vmatprep.subr.bf16.mxu1 %v19722_v35  ;;  %v19786_v35 = vld [vmem:[%s21122_s15 + $0x1078] ss:$72 sps:$4 sm:$0xff]  }
 0x1de   : > { %6561 = vmatpush1.bf16.msra.mxu0 %v19717_v31  ;;  %v19788_v31 = vld [vmem:[%s21122_s15 + $0x107c] ss:$72 sps:$4 sm:$0xff]  }
 0x1df   : > { %6690 = vmatpush1.bf16.msra.mxu1 %v19720_v37  ;;  %6562 = vmatprep.subr.bf16.mxu0 %v19725_v38  ;;  %v19791_v37 = vld [vmem:[%s21122_s15 + $0x1104] ss:$72 sps:$4 sm:$0xff]   ;;  %v19789_v38 = vld [vmem:[%s21122_s15 + $0x1100] ss:$72 sps:$4 sm:$0xff]  }
 0x1e0   : > { %6691 = vmatprep.subr.bf16.mxu1 %v19728_v42  ;;  %v19792_v42 = vld [vmem:[%s21122_s15 + $0x1108] ss:$72 sps:$4 sm:$0xff]  }
 0x1e2   : > { %6563 = vmatpush1.bf16.msra.mxu0 %v19723_v41  ;;  %v19794_v41 = vld [vmem:[%s21122_s15 + $0x110c] ss:$72 sps:$4 sm:$0xff]  }
 0x1e3   : > { %6692 = vmatpush1.bf16.msra.mxu1 %v19726_v43  ;;  %6564 = vmatprep.subr.bf16.mxu0 %v19731_v44  ;;  %v19797_v43 = vld [vmem:[%s21122_s15 + $0x1194] ss:$72 sps:$4 sm:$0xff]  }
 0x1e4   : > { %6693 = vmatprep.subr.bf16.mxu1 %v19734_v46  ;;  %v19800_v44 = vld [vmem:[%s21122_s15 + $0x119c] ss:$72 sps:$4 sm:$0xff]   ;;  %v19798_v46 = vld [vmem:[%s21122_s15 + $0x1198] ss:$72 sps:$4 sm:$0xff]  }
 0x1e6   : > { %6565 = vmatpush1.bf16.msra.mxu0 %v19729_v45  ;;  %v19795_v45 = vld [vmem:[%s21122_s15 + $0x1190] ss:$72 sps:$4 sm:$0xff]  }
 0x1e7   : > { %6694 = vmatpush1.bf16.msra.mxu1 %v19732_v47  ;;  %6566 = vmatprep.subr.bf16.mxu0 %v19737_v48  ;;  %v19803_v47 = vld [vmem:[%s21122_s15 + $0x1224] ss:$72 sps:$4 sm:$0xff]  }
 0x1e8   : > { %6695 = vmatprep.subr.bf16.mxu1 %v19740_v51  ;;  %v19806_v48 = vld [vmem:[%s21122_s15 + $0x122c] ss:$72 sps:$4 sm:$0xff]   ;;  %v19804_v51 = vld [vmem:[%s21122_s15 + $0x1228] ss:$72 sps:$4 sm:$0xff]  }
 0x1ea   : > { %6567 = vmatpush1.bf16.msra.mxu0 %v19735_v49  ;;  %v19801_v49 = vld [vmem:[%s21122_s15 + $0x1220] ss:$72 sps:$4 sm:$0xff]  }
 0x1eb   : > { %6696 = vmatpush1.bf16.msra.mxu1 %v19738_v52  ;;  %6568 = vmatprep.subr.bf16.mxu0 %v19743_v53  ;;  %v19809_v52 = vld [vmem:[%s21122_s15 + $0x12b4] ss:$72 sps:$4 sm:$0xff]  }
 0x1ec   : > { %6697 = vmatprep.subr.bf16.mxu1 %v19746_v55  ;;  %v19812_v53 = vld [vmem:[%s21122_s15 + $0x12bc] ss:$72 sps:$4 sm:$0xff]   ;;  %v19810_v55 = vld [vmem:[%s21122_s15 + $0x12b8] ss:$72 sps:$4 sm:$0xff]  }
 0x1ee   : > { %6569 = vmatpush1.bf16.msra.mxu0 %v19741_v54  ;;  %v19807_v54 = vld [vmem:[%s21122_s15 + $0x12b0] ss:$72 sps:$4 sm:$0xff]  }
 0x1ef   : > { %6698 = vmatpush1.bf16.msra.mxu1 %v19744_v56  ;;  %6570 = vmatprep.subr.bf16.mxu0 %v19749_v57  ;;  %v19815_v56 = vld [vmem:[%s21122_s15 + $0x1344] ss:$72 sps:$4 sm:$0xff]  }
 0x1f0   : > { %6699 = vmatprep.subr.bf16.mxu1 %v19752_v59  ;;  %v19818_v57 = vld [vmem:[%s21122_s15 + $0x134c] ss:$72 sps:$4 sm:$0xff]  }
 0x1f2   : > { %6571 = vmatpush1.bf16.msra.mxu0 %v19747_v58  ;;  %v21023_v58 = vmov 1983009808  }
 0x1f3   : > { %6700 = vmatpush1.bf16.msra.mxu1 %v19750_v60  ;;  %6572 = vmatprep.subr.bf16.mxu0 %v19755_v61  ;;  %v7221_v59 = vunpack.c.l.s4 %v21023_v58  ;;  %v19813_v60 = vld [vmem:[%s21122_s15 + $0x1340] ss:$72 sps:$4 sm:$0xff]  }
 0x1f4   : > { %6701 = vmatprep.subr.bf16.mxu1 %v19758_v63  ;;  %v19816_v61 = vld [vmem:[%s21122_s15 + $0x1348] ss:$72 sps:$4 sm:$0xff]   ;;  %v19821_v63 = vld [vmem:[%s21122_s15 + $0x13d4] ss:$72 sps:$4 sm:$0xff]  }
 0x1f6   : > { %6573 = vmatpush1.bf16.msra.mxu0 %v19753_v0  ;;  %v19824_v0 = vld [vmem:[%s21122_s15 + $0x13dc] ss:$72 sps:$4 sm:$0xff]  }
 0x1f7   : > { %6702 = vmatpush1.bf16.msra.mxu1 %v19756_v1  ;;  %6574 = vmatprep.subr.bf16.mxu0 %v19761_v2  ;;  %v21024_v1 = vmov 1934713408  }
 0x1f8   : > { %6703 = vmatprep.subr.bf16.mxu1 %v19764_v5  ;;  %v7285_v2 = vunpack.c.l.s4 %v21024_v1  ;;  %v19819_v5 = vld [vmem:[%s21122_s15 + $0x13d0] ss:$72 sps:$4 sm:$0xff]  }
 0x1fa   : > { %6575 = vmatpush1.bf16.msra.mxu0 %v19759_v3  ;;  %v7222_v3 = vunpack.c.0.s8 %v7221_v59 }
 0x1fb   : > { %6704 = vmatpush1.bf16.msra.mxu1 %v19762_v6  ;;  %6576 = vmatprep.subr.bf16.mxu0 %v19767_v8  ;;  %v19822_v8 = vld [vmem:[%s21122_s15 + $0x13d8] ss:$72 sps:$4 sm:$0xff]  }
 0x1fc   : > { %6705 = vmatprep.subr.bf16.mxu1 %v19770_v11  ;;  %v19830_v11 = vld [vmem:[%s21122_s15 + $0x146c] ss:$72 sps:$4 sm:$0xff]  }
 0x1fe   : > { %6577 = vmatpush1.bf16.msra.mxu0 %v19765_v10  ;;  %v19827_v10 = vld [vmem:[%s21122_s15 + $0x1464] ss:$72 sps:$4 sm:$0xff]  }
 0x1ff   : > { %6706 = vmatpush1.bf16.msra.mxu1 %v19768_v12  ;;  %6578 = vmatprep.subr.bf16.mxu0 %v19773_v13  ;;  %v7286_v12 = vunpack.c.0.s8 %v7285_v2  ;;  %v21760_v13 = vsub.s32 %v7222_v3, %v21586_v62 }
 0x200   : > { %6707 = vmatprep.subr.bf16.mxu1 %v19776_v15 }
 0x202   : > { %6579 = vmatpush1.bf16.msra.mxu0 %v19771_v14  ;;  %v19825_v14 = vld [vmem:[%s21122_s15 + $0x1460] ss:$72 sps:$4 sm:$0xff]  }
 0x203   : > { %6708 = vmatpush1.bf16.msra.mxu1 %v19774_v18  ;;  %6580 = vmatprep.subr.bf16.mxu0 %v19779_v19  ;;  %v19828_v18 = vld [vmem:[%s21122_s15 + $0x1468] ss:$72 sps:$4 sm:$0xff]   ;;  %v19833_v19 = vld [vmem:[%s21122_s15 + $0x14f4] ss:$72 sps:$4 sm:$0xff]  }
 0x204   : > { %6709 = vmatprep.subr.bf16.mxu1 %v19782_v22 }
 0x206   : > { %6581 = vmatpush1.bf16.msra.mxu0 %v19777_v20 }
 0x207   : > { %6710 = vmatpush1.bf16.msra.mxu1 %v19780_v23  ;;  %6582 = vmatprep.subr.bf16.mxu0 %v19785_v24  ;;  %v19836_v23 = vld [vmem:[%s21122_s15 + $0x14fc] ss:$72 sps:$4 sm:$0xff]   ;;  %v21767_v24 = vsub.s32 %v7286_v12, %v21586_v62 }
 0x208   : > { %6711 = vmatprep.subr.bf16.mxu1 %v19788_v31  ;;  %v7233_v31 = vrot.slane %v7219_v40, %v21760_v13 }
 0x20a   : > { %6583 = vmatpush1.bf16.msra.mxu0 %v19783_v27  ;;  %v7226_v27 = vrot.slane %v7218_v39, %v21760_v13 }
 0x20b   : > { %6712 = vmatpush1.bf16.msra.mxu1 %v19786_v35  ;;  %6584 = vmatprep.subr.bf16.mxu0 %v19791_v37 }
 0x20c   : > { %6713 = vmatprep.subr.bf16.mxu1 %v19794_v41  ;;  %v19834_v41 = vld [vmem:[%s21122_s15 + $0x14f8] ss:$72 sps:$4 sm:$0xff]  }
 0x20e   : > { %6585 = vmatpush1.bf16.msra.mxu0 %v19789_v38  ;;  %v19831_v38 = vld [vmem:[%s21122_s15 + $0x14f0] ss:$72 sps:$4 sm:$0xff]  }
 0x20f   : > { %6714 = vmatpush1.bf16.msra.mxu1 %v19792_v42  ;;  %6586 = vmatprep.subr.bf16.mxu0 %v19797_v43  ;;  %v19839_v42 = vld [vmem:[%s21122_s15 + $0x1584] ss:$72 sps:$4 sm:$0xff]  }
 0x210   : > { %6715 = vmatprep.subr.bf16.mxu1 %v19800_v44 }
 0x212   : > { %6587 = vmatpush1.bf16.msra.mxu0 %v19795_v45 }
 0x213   : > { %6716 = vmatpush1.bf16.msra.mxu1 %v19798_v46  ;;  %6599 = vmatprep.subr.bf16.mxu0 %v19803_v47 }
 0x214   : > { %6728 = vmatprep.subr.bf16.mxu1 %v19806_v48  ;;  %v19837_v48 = vld [vmem:[%s21122_s15 + $0x1580] ss:$72 sps:$4 sm:$0xff]  }
 0x215   : > { %6589 = vmatmul.mubr.bf16.vlgmr.msra.gmra.mrb[8].mxu0 %v21282_v17 }
 0x216   : > { %6600 = vmatpush1.bf16.msra.mxu0 %v19801_v49  ;;  %6718 = vmatmul.mubr.bf16.vlgmr.msra.gmra.mrb[8].mxu1 %v21282_v17  ;;  %v19840_v49 = vld [vmem:[%s21122_s15 + $0x1588] ss:$72 sps:$4 sm:$0xff]  }
 0x217   : > { %6729 = vmatpush1.bf16.msra.mxu1 %v19804_v51  ;;  %6601 = vmatprep.subr.bf16.mxu0 %v19809_v52  ;;  %v19845_v51 = vld [vmem:[%s21122_s15 + $0x1614] ss:$72 sps:$4 sm:$0xff]  }
 0x218   : > { %6730 = vmatprep.subr.bf16.mxu1 %v19812_v53  ;;  %6631 = vmatprep.mubr.bf16.mxu0 %v21293_v25 }
 0x219   : > { %6760 = vmatprep.mubr.bf16.mxu1 %v21293_v25 }
 0x21a   : > { %6602 = vmatpush1.bf16.msra.mxu0 %v19807_v54 }
 0x21b   : > { %6731 = vmatpush1.bf16.msra.mxu1 %v19810_v55  ;;  %6603 = vmatprep.subr.bf16.mxu0 %v19815_v56  ;;  %v19848_v56 = vld [vmem:[%s21122_s15 + $0x161c] ss:$72 sps:$4 sm:$0xff]  }
 0x21c   : > { %6732 = vmatprep.subr.bf16.mxu1 %v19818_v57 }
 0x21e   : > { %6604 = vmatpush1.bf16.msra.mxu0 %v19813_v60 }
 0x21f   : > { %6733 = vmatpush1.bf16.msra.mxu1 %v19816_v61  ;;  %v7173_v6 = vpop.permute.xlu1 %7172  ;;  %6605 = vmatprep.subr.bf16.mxu0 %v19821_v63  ;;  %v19843_v61 = vld [vmem:[%s21122_s15 + $0x1610] ss:$72 sps:$4 sm:$0xff]  }
 0x220   : > { %6734 = vmatprep.subr.bf16.mxu1 %v19824_v0  ;;  %v19846_v63 = vld [vmem:[%s21122_s15 + $0x1618] ss:$72 sps:$4 sm:$0xff]   ;;  %v19851_v0 = vld [vmem:[%s21122_s15 + $0x16a4] ss:$72 sps:$4 sm:$0xff]  }
 0x222   : > { %6606 = vmatpush1.bf16.msra.mxu0 %v19819_v5 }
 0x223   : > { %6735 = vmatpush1.bf16.msra.mxu1 %v19822_v8  ;;  %v7181_v15 = vpop.permute.xlu1 %7180  ;;  %6607 = vmatprep.subr.bf16.mxu0 %v19827_v10  ;;  %v19849_v8 = vld [vmem:[%s21122_s15 + $0x16a0] ss:$72 sps:$4 sm:$0xff]  }
 0x224   : > { %v7234_v20 = vcombine.low %v7173_v6, %v7181_v15  ;;  %v7235_v22 = vcombine.high %v7173_v6, %v7181_v15  ;;  %6736 = vmatprep.subr.bf16.mxu1 %v19830_v11  ;;  %v19854_v6 = vld [vmem:[%s21122_s15 + $0x16ac] ss:$72 sps:$4 sm:$0xff]   ;;  %v19852_v15 = vld [vmem:[%s21122_s15 + $0x16a8] ss:$72 sps:$4 sm:$0xff]  }
 0x226   : > { %v7242_v35 = vrot.slane %v7234_v20, %v21760_v13  ;;  %v7249_v37 = vrot.slane %v7235_v22, %v21760_v13  ;;  %6608 = vmatpush1.bf16.msra.mxu0 %v19825_v14 }
 0x227   : > { %6737 = vmatpush1.bf16.msra.mxu1 %v19828_v18  ;;  %6609 = vmatprep.subr.bf16.mxu0 %v19833_v19  ;;  %v19857_v18 = vld [vmem:[%s21122_s15 + $0x1734] ss:$72 sps:$4 sm:$0xff]  }
 0x228   : > { %v7282_v43 = vcombine.low %v7226_v27, %v7242_v35  ;;  %v7283_v39 = vcombine.high %v7226_v27, %v7242_v35  ;;  %v7298_v44 = vcombine.low %v7233_v31, %v7249_v37  ;;  %v7299_v45 = vcombine.high %v7233_v31, %v7249_v37  ;;  %6738 = vmatprep.subr.bf16.mxu1 %v19836_v23  ;;  %v19860_v19 = vld [vmem:[%s21122_s15 + $0x173c] ss:$72 sps:$4 sm:$0xff]   ;;  %v19855_v31 = vld [vmem:[%s21122_s15 + $0x1730] ss:$72 sps:$4 sm:$0xff]  }
 0x229   : > { %v19858_v35 = vld [vmem:[%s21122_s15 + $0x1738] ss:$72 sps:$4 sm:$0xff]   ;;  %v19863_v37 = vld [vmem:[%s21122_s15 + $0x17c4] ss:$72 sps:$4 sm:$0xff]  }
 0x22a   : > { %v7290_v33 = vrot.slane %v7282_v43, %v21767_v24  ;;  %v7297_v40 = vrot.slane %v7283_v39, %v21767_v24  ;;  %v7306_v46 = vrot.slane %v7298_v44, %v21767_v24  ;;  %v7313_v47 = vrot.slane %v7299_v45, %v21767_v24  ;;  %6610 = vmatpush1.bf16.msra.mxu0 %v19831_v38  ;;  %v19866_v38 = vld [vmem:[%s21122_s15 + $0x17cc] ss:$72 sps:$4 sm:$0xff]   ;;  %v19872_v39 = vld [vmem:[%s21122_s15 + $0x185c] ss:$72 sps:$4 sm:$0xff]   ;;  %v19867_v44 = vld [vmem:[%s21122_s15 + $0x1850] ss:$72 sps:$4 sm:$0xff]  }
 0x22b   : > { %6739 = vmatpush1.bf16.msra.mxu1 %v19834_v41  ;;  %6611 = vmatprep.subr.bf16.mxu0 %v19839_v42  ;;  %v19861_v41 = vld [vmem:[%s21122_s15 + $0x17c0] ss:$72 sps:$4 sm:$0xff]   ;;  %v19869_v43 = vld [vmem:[%s21122_s15 + $0x1854] ss:$72 sps:$4 sm:$0xff]  }
 0x22c   : > { %v17845_v52 = vcombine.low %v7290_v33, %v7297_v40  ;;  %v17847_v53 = vcombine.high %v7290_v33, %v7297_v40  ;;  %v17849_v54 = vcombine.low %v7306_v46, %v7313_v47  ;;  %v17851_v55 = vcombine.high %v7306_v46, %v7313_v47  ;;  %6740 = vmatprep.subr.bf16.mxu1 %v19842_v29  ;;  %v19864_v42 = vld [vmem:[%s21122_s15 + $0x17c8] ss:$72 sps:$4 sm:$0xff]   ;;  %v19870_v45 = vld [vmem:[%s21122_s15 + $0x1858] ss:$72 sps:$4 sm:$0xff]   ;;  %v19875_v29 = vld [vmem:[%s21122_s15 + $0x18e4] ss:$72 sps:$4 sm:$0xff]  }
 0x22d   : > { %v19878_v33 = vld [vmem:[%s21122_s15 + $0x18ec] ss:$72 sps:$4 sm:$0xff]   ;;  %v19873_v40 = vld [vmem:[%s21122_s15 + $0x18e0] ss:$72 sps:$4 sm:$0xff]  }
 0x22e   : > { %v7634_v57 = vrot.slane %v17845_v52, %v21760_v13  ;;  %v7650_v58 = vrot.slane %v17847_v53, %v21760_v13  ;;  %v7666_v59 = vrot.slane %v17849_v54, %v21760_v13  ;;  %v7682_v60 = vrot.slane %v17851_v55, %v21760_v13  ;;  %6612 = vmatpush1.bf16.msra.mxu0 %v19837_v48  ;;  %v19876_v46 = vld [vmem:[%s21122_s15 + $0x18e8] ss:$72 sps:$4 sm:$0xff]   ;;  %v19881_v47 = vld [vmem:[%s21122_s15 + $0x1974] ss:$72 sps:$4 sm:$0xff]   ;;  %v19887_v52 = vld [vmem:[%s21122_s15 + $0x1a04] ss:$72 sps:$4 sm:$0xff]  }
 0x22f   : > { %6741 = vmatpush1.bf16.msra.mxu1 %v19840_v49  ;;  %6613 = vmatprep.subr.bf16.mxu0 %v19845_v51  ;;  %v19884_v48 = vld [vmem:[%s21122_s15 + $0x197c] ss:$72 sps:$4 sm:$0xff]   ;;  %v19879_v49 = vld [vmem:[%s21122_s15 + $0x1970] ss:$72 sps:$4 sm:$0xff]   ;;  %v19890_v53 = vld [vmem:[%s21122_s15 + $0x1a0c] ss:$72 sps:$4 sm:$0xff]  }
 0x230   : > { %v7690_v1 = vcombine.low %v7634_v57, %v7650_v58  ;;  %v7691_v2 = vcombine.high %v7634_v57, %v7650_v58  ;;  %v7722_v3 = vcombine.low %v7666_v59, %v7682_v60  ;;  %v7723_v5 = vcombine.high %v7666_v59, %v7682_v60  ;;  %6742 = vmatprep.subr.bf16.mxu1 %v19848_v56  ;;  %v19882_v51 = vld [vmem:[%s21122_s15 + $0x1978] ss:$72 sps:$4 sm:$0xff]   ;;  %v19888_v55 = vld [vmem:[%s21122_s15 + $0x1a08] ss:$72 sps:$4 sm:$0xff]   ;;  %v19893_v56 = vld [vmem:[%s21122_s15 + $0x1a94] ss:$72 sps:$4 sm:$0xff]  }
 0x231   : > { %v19885_v54 = vld [vmem:[%s21122_s15 + $0x1a00] ss:$72 sps:$4 sm:$0xff]   ;;  %v19896_v57 = vld [vmem:[%s21122_s15 + $0x1a9c] ss:$72 sps:$4 sm:$0xff]   ;;  %v19891_v58 = vld [vmem:[%s21122_s15 + $0x1a90] ss:$72 sps:$4 sm:$0xff]  }
 0x232   : > { %6614 = vmatpush1.bf16.msra.mxu0 %v19843_v61  ;;  %v7698_v10 = vrot.slane %v7690_v1, %v21767_v24  ;;  %v7730_v11 = vrot.slane %v7722_v3, %v21767_v24  ;;  %v7705_v12 = vrot.slane %v7691_v2, %v21767_v24  ;;  %v7737_v14 = vrot.slane %v7723_v5, %v21767_v24  ;;  %v19894_v59 = vld [vmem:[%s21122_s15 + $0x1a98] ss:$72 sps:$4 sm:$0xff]   ;;  %v19899_v60 = vld [vmem:[%s21122_s15 + $0x34] ss:$72 sps:$4 sm:$0xff]   ;;  %v19905_v1 = vld [vmem:[%s21122_s15 + $0xc4] ss:$72 sps:$4 sm:$0xff]  }
 0x233   : > { %6743 = vmatpush1.bf16.msra.mxu1 %v19846_v63  ;;  %6615 = vmatprep.subr.bf16.mxu0 %v19851_v0  ;;  %v19902_v61 = vld [vmem:[%s21122_s15 + $0x3c] ss:$72 sps:$4 sm:$0xff]   ;;  %v19897_v63 = vld [vmem:[%s21122_s15 + $0x30] ss:$72 sps:$4 sm:$0xff]   ;;  %v19908_v2 = vld [vmem:[%s21122_s15 + $0xcc] ss:$72 sps:$4 sm:$0xff]  }
 0x234   : > { %6744 = vmatprep.subr.bf16.mxu1 %v19854_v6  ;;  %v21807_v20 = vcombine.low %v7698_v10, %v7730_v11  ;;  %v21809_v22 = vcombine.high %v7698_v10, %v7730_v11  ;;  %v21811_v23 = vcombine.low %v7705_v12, %v7737_v14  ;;  %v21813_v27 = vcombine.high %v7705_v12, %v7737_v14  ;;  %v19900_v0 = vld [vmem:[%s21122_s15 + $0x38] ss:$72 sps:$4 sm:$0xff]   ;;  %v19906_v5 = vld [vmem:[%s21122_s15 + $0xc8] ss:$72 sps:$4 sm:$0xff]   ;;  %v19911_v6 = vld [vmem:[%s21122_s15 + $0x154] ss:$72 sps:$4 sm:$0xff]  }
 0x235   : > { %v19903_v3 = vld [vmem:[%s21122_s15 + $0xc0] ss:$72 sps:$4 sm:$0xff]   ;;  %v19909_v10 = vld [vmem:[%s21122_s15 + $0x150] ss:$72 sps:$4 sm:$0xff]   ;;  %v19917_v12 = vld [vmem:[%s21122_s15 + $0x1e4] ss:$72 sps:$4 sm:$0xff]  }
 0x236   : > { %6616 = vmatpush1.bf16.msra.mxu0 %v19849_v8  ;;  %v19914_v8 = vld [vmem:[%s21122_s15 + $0x15c] ss:$72 sps:$4 sm:$0xff]   ;;  %v19912_v11 = vld [vmem:[%s21122_s15 + $0x158] ss:$72 sps:$4 sm:$0xff]   ;;  %v19920_v14 = vld [vmem:[%s21122_s15 + $0x1ec] ss:$72 sps:$4 sm:$0xff]  }
 0x237   : > { %6745 = vmatpush1.bf16.msra.mxu1 %v19852_v15  ;;  %6617 = vmatprep.subr.bf16.mxu0 %v19857_v18  ;;  %v19915_v15 = vld [vmem:[%s21122_s15 + $0x1e0] ss:$72 sps:$4 sm:$0xff]  }
 0x238   : > { %6746 = vmatprep.subr.bf16.mxu1 %v19860_v19  ;;  %v19918_v18 = vld [vmem:[%s21122_s15 + $0x1e8] ss:$72 sps:$4 sm:$0xff]   ;;  %v19923_v19 = vld [vmem:[%s21122_s15 + $0x274] ss:$72 sps:$4 sm:$0xff]  }
 0x23a   : > { %6618 = vmatpush1.bf16.msra.mxu0 %v19855_v31  ;;  %v19926_v31 = vld [vmem:[%s21122_s15 + $0x27c] ss:$72 sps:$4 sm:$0xff]  }
 0x23b   : > { %6747 = vmatpush1.bf16.msra.mxu1 %v19858_v35  ;;  %6619 = vmatprep.subr.bf16.mxu0 %v19863_v37  ;;  %v24573_v35 = vsub.s32 6, %v21586_v62  ;;  %v19921_v37 = vld [vmem:[%s21122_s15 + $0x270] ss:$72 sps:$4 sm:$0xff]  }
 0x23c   : > { %6748 = vmatprep.subr.bf16.mxu1 %v19866_v38  ;;  %v24572_v38 = vsub.s32 7, %v21586_v62 }
 0x23e   : > { %6620 = vmatpush1.bf16.msra.mxu0 %v19861_v41  ;;  %v19924_v41 = vld [vmem:[%s21122_s15 + $0x278] ss:$72 sps:$4 sm:$0xff]  }
 0x23f   : > { %6749 = vmatpush1.bf16.msra.mxu1 %v19864_v42  ;;  %6621 = vmatprep.subr.bf16.mxu0 %v19869_v43  ;;  %v19929_v42 = vld [vmem:[%s21122_s15 + $0x304] ss:$72 sps:$4 sm:$0xff]  }
 0x240   : > { %6750 = vmatprep.subr.bf16.mxu1 %v19872_v39  ;;  %v19932_v43 = vld [vmem:[%s21122_s15 + $0x30c] ss:$72 sps:$4 sm:$0xff]   ;;  %v21870_v39 = vld [vmem:[%s21584_s23] sm:$0xff] }
 0x242   : > { %6622 = vmatpush1.bf16.msra.mxu0 %v19867_v44  ;;  %v1614_v44 = vrot.slane %v21870_v39, %v24573_v35 }
 0x243   : > { %6751 = vmatpush1.bf16.msra.mxu1 %v19870_v45  ;;  %6623 = vmatprep.subr.bf16.mxu0 %v19875_v29  ;;  %v1618_v45 = vrot.slane %v21870_v39, %v24572_v38  ;;  %v19927_v29 = vld [vmem:[%s21122_s15 + $0x300] ss:$72 sps:$4 sm:$0xff]  }
 0x244   : > { %6752 = vmatprep.subr.bf16.mxu1 %v19878_v33  ;;  %v19930_v33 = vld [vmem:[%s21122_s15 + $0x308] ss:$72 sps:$4 sm:$0xff]  }
 0x246   : > { %6624 = vmatpush1.bf16.msra.mxu0 %v19873_v40 }
 0x247   : > { %6753 = vmatpush1.bf16.msra.mxu1 %v19876_v46  ;;  %6625 = vmatprep.subr.bf16.mxu0 %v19881_v47  ;;  %v19935_v47 = vld [vmem:[%s21122_s15 + $0x394] ss:$72 sps:$4 sm:$0xff]  }
 0x248   : > { %6754 = vmatprep.subr.bf16.mxu1 %v19884_v48  ;;  %v19938_v48 = vld [vmem:[%s21122_s15 + $0x39c] ss:$72 sps:$4 sm:$0xff]  }
 0x24a   : > { %6626 = vmatpush1.bf16.msra.mxu0 %v19879_v49 }
 0x24b   : > { %6755 = vmatpush1.bf16.msra.mxu1 %v19882_v51  ;;  %6627 = vmatprep.subr.bf16.mxu0 %v19887_v52 }
 0x24c   : > { %6756 = vmatprep.subr.bf16.mxu1 %v19890_v53 }
 0x24e   : > { %6628 = vmatpush1.bf16.msra.mxu0 %v19885_v54 }
 0x24f   : > { %6757 = vmatpush1.bf16.msra.mxu1 %v19888_v55  ;;  %6629 = vmatprep.subr.bf16.mxu0 %v19893_v56  ;;  %v19933_v56 = vld [vmem:[%s21122_s15 + $0x390] ss:$72 sps:$4 sm:$0xff]  }
 0x250   : > { %6758 = vmatprep.subr.bf16.mxu1 %v19896_v57 }
 0x252   : > { %6630 = vmatpush1.bf16.msra.mxu0 %v19891_v58 }
 0x253   : > { %6759 = vmatpush1.bf16.msra.mxu1 %v19894_v59  ;;  %6771 = vmatprep.subr.bf16.mxu0 %v19899_v60  ;;  %v19936_v60 = vld [vmem:[%s21122_s15 + $0x398] ss:$72 sps:$4 sm:$0xff]  }
 0x254   : > { %6900 = vmatprep.subr.bf16.mxu1 %v19902_v61 }
 0x255   : > { %6632 = vmatmul.mubr.bf16.vlgmr.msra.gmra.mrb[8].mxu0 %v21356_v26 }
 0x256   : > { %6761 = vmatmul.mubr.bf16.vlgmr.msra.gmra.mrb[8].mxu1 %v21356_v26  ;;  %6772 = vmatpush1.bf16.msra.mxu0 %v19897_v63 }
 0x257   : > { %6901 = vmatpush1.bf16.msra.mxu1 %v19900_v0  ;;  %6773 = vmatprep.subr.bf16.mxu0 %v19905_v1  ;;  %v19941_v1 = vld [vmem:[%s21122_s15 + $0x424] ss:$72 sps:$4 sm:$0xff]  }
 0x258   : > { %6902 = vmatprep.subr.bf16.mxu1 %v19908_v2  ;;  %6803 = vmatprep.mubr.bf16.mxu0 %v21180_v50  ;;  %v19944_v2 = vld [vmem:[%s21122_s15 + $0x42c] ss:$72 sps:$4 sm:$0xff]  }
 0x259   : > { %6932 = vmatprep.mubr.bf16.mxu1 %v21180_v50 }
 0x25a   : > { %6774 = vmatpush1.bf16.msra.mxu0 %v19903_v3  ;;  %v19939_v3 = vld [vmem:[%s21122_s15 + $0x420] ss:$72 sps:$4 sm:$0xff]  }
 0x25b   : > { %6903 = vmatpush1.bf16.msra.mxu1 %v19906_v5  ;;  %6775 = vmatprep.subr.bf16.mxu0 %v19911_v6  ;;  %v19942_v5 = vld [vmem:[%s21122_s15 + $0x428] ss:$72 sps:$4 sm:$0xff]   ;;  %v19947_v6 = vld [vmem:[%s21122_s15 + $0x4b4] ss:$72 sps:$4 sm:$0xff]  }
 0x25c   : > { %6904 = vmatprep.subr.bf16.mxu1 %v19914_v8  ;;  %v19950_v8 = vld [vmem:[%s21122_s15 + $0x4bc] ss:$72 sps:$4 sm:$0xff]  }
 0x25e   : > { %6776 = vmatpush1.bf16.msra.mxu0 %v19909_v10  ;;  %v19945_v10 = vld [vmem:[%s21122_s15 + $0x4b0] ss:$72 sps:$4 sm:$0xff]  }
 0x25f   : > { %6905 = vmatpush1.bf16.msra.mxu1 %v19912_v11  ;;  %6777 = vmatprep.subr.bf16.mxu0 %v19917_v12  ;;  %v19948_v11 = vld [vmem:[%s21122_s15 + $0x4b8] ss:$72 sps:$4 sm:$0xff]   ;;  %v19953_v12 = vld [vmem:[%s21122_s15 + $0x544] ss:$72 sps:$4 sm:$0xff]  }
 0x260   : > { %6906 = vmatprep.subr.bf16.mxu1 %v19920_v14  ;;  %v19956_v14 = vld [vmem:[%s21122_s15 + $0x54c] ss:$72 sps:$4 sm:$0xff]  }
 0x262   : > { %6778 = vmatpush1.bf16.msra.mxu0 %v19915_v15  ;;  %v19951_v15 = vld [vmem:[%s21122_s15 + $0x540] ss:$72 sps:$4 sm:$0xff]  }
 0x263   : > { %6907 = vmatpush1.bf16.msra.mxu1 %v19918_v18  ;;  %6779 = vmatprep.subr.bf16.mxu0 %v19923_v19  ;;  %v19954_v18 = vld [vmem:[%s21122_s15 + $0x548] ss:$72 sps:$4 sm:$0xff]   ;;  %v19959_v19 = vld [vmem:[%s21122_s15 + $0x5d4] ss:$72 sps:$4 sm:$0xff]  }
 0x264   : > { %6908 = vmatprep.subr.bf16.mxu1 %v19926_v31  ;;  %v19962_v31 = vld [vmem:[%s21122_s15 + $0x5dc] ss:$72 sps:$4 sm:$0xff]  }
 0x266   : > { %6780 = vmatpush1.bf16.msra.mxu0 %v19921_v37  ;;  %v19957_v37 = vld [vmem:[%s21122_s15 + $0x5d0] ss:$72 sps:$4 sm:$0xff]  }
 0x267   : > { %6909 = vmatpush1.bf16.msra.mxu1 %v19924_v41  ;;  %6781 = vmatprep.subr.bf16.mxu0 %v19929_v42  ;;  %v19960_v41 = vld [vmem:[%s21122_s15 + $0x5d8] ss:$72 sps:$4 sm:$0xff]   ;;  %v19965_v42 = vld [vmem:[%s21122_s15 + $0x664] ss:$72 sps:$4 sm:$0xff]  }
 0x268   : > { %v21880_v40 = vpop.f32.mrb[4].mxu0  ;;  %6910 = vmatprep.subr.bf16.mxu1 %v19932_v43  ;;  %v19968_v43 = vld [vmem:[%s21122_s15 + $0x66c] ss:$72 sps:$4 sm:$0xff]  }
 0x269   : > { %v6504_v46 = vpop.f32.mrb[4].mxu1  ;;  %v21886_v51 = vpop.f32.mrb[5].mxu0 }
 0x26a   : > { %v21884_v49 = vadd.f32 %v6504_v46, %v1614_v44  ;;  %v6506_v52 = vpop.f32.mrb[5].mxu1  ;;  %v21890_v54 = vpop.f32.mrb[6].mxu0  ;;  %6782 = vmatpush1.bf16.msra.mxu0 %v19927_v29  ;;  %v19971_v29 = vld [vmem:[%s21122_s15 + $0x6f4] ss:$72 sps:$4 sm:$0xff]   ;;  %v19969_v46 = vld [vmem:[%s21122_s15 + $0x6f0] ss:$72 sps:$4 sm:$0xff]  }
 0x26b   : > { %v21888_v53 = vadd.f32 %v6506_v52, %v1618_v45  ;;  %v6508_v55 = vpop.f32.mrb[6].mxu1  ;;  %6911 = vmatpush1.bf16.msra.mxu1 %v19930_v33  ;;  %v21897_v59 = vpop.f32.mrb[7].mxu0  ;;  %6783 = vmatprep.subr.bf16.mxu0 %v19935_v47  ;;  %v19974_v33 = vld [vmem:[%s21122_s15 + $0x6fc] ss:$72 sps:$4 sm:$0xff]   ;;  %v19972_v47 = vld [vmem:[%s21122_s15 + $0x6f8] ss:$72 sps:$4 sm:$0xff]  }
 0x26c   : > { %v21893_v57 = vadd.f32 %v6508_v55, %v1614_v44  ;;  %v6510_v58 = vpop.f32.mrb[7].mxu1  ;;  %8060 = vrot.lane.b32.xlu0 %v21884_v49, %s21022_s24  ;;  %6912 = vmatprep.subr.bf16.mxu1 %v19938_v48  ;;  %v19963_v44 = vld [vmem:[%s21122_s15 + $0x660] ss:$72 sps:$4 sm:$0xff]   ;;  %v19977_v48 = vld [vmem:[%s21122_s15 + $0x784] ss:$72 sps:$4 sm:$0xff]  }
 0x26d   : > { %v8106_v61 = vcombine.low %v21884_v49, %v21888_v53  ;;  %v8107_v63 = vcombine.high %v21884_v49, %v21888_v53  ;;  %v21904_v0 = vadd.f32 %v6510_v58, %v1618_v45  ;;  %v19966_v45 = vld [vmem:[%s21122_s15 + $0x668] ss:$72 sps:$4 sm:$0xff]   ;;  %v19980_v52 = vld [vmem:[%s21122_s15 + $0x78c] ss:$72 sps:$4 sm:$0xff]  }
 0x26e   : > { %6784 = vmatpush1.bf16.msra.mxu0 %v19933_v56  ;;  %v19975_v55 = vld [vmem:[%s21122_s15 + $0x780] ss:$72 sps:$4 sm:$0xff]   ;;  %v19983_v58 = vld [vmem:[%s21122_s15 + $0x814] ss:$72 sps:$4 sm:$0xff]  }
 0x26f   : > { %6913 = vmatpush1.bf16.msra.mxu1 %v19936_v60  ;;  %6785 = vmatprep.subr.bf16.mxu0 %v19941_v1  ;;  %v19978_v56 = vld [vmem:[%s21122_s15 + $0x788] ss:$72 sps:$4 sm:$0xff]   ;;  %v19986_v60 = vld [vmem:[%s21122_s15 + $0x81c] ss:$72 sps:$4 sm:$0xff]  }
 0x270   : > { %8068 = vrot.lane.b32.xlu0 %v21888_v53, %s21022_s24  ;;  %6914 = vmatprep.subr.bf16.mxu1 %v19944_v2  ;;  %v19981_v1 = vld [vmem:[%s21122_s15 + $0x810] ss:$72 sps:$4 sm:$0xff]   ;;  %v20127_v49 = vld [vmem:[%s21122_s15 + $0x1594] ss:$72 sps:$4 sm:$0xff]  }
 0x271   : > { %v19984_v2 = vld [vmem:[%s21122_s15 + $0x818] ss:$72 sps:$4 sm:$0xff]  }
 0x272   : > { %6786 = vmatpush1.bf16.msra.mxu0 %v19939_v3  ;;  %v19989_v3 = vld [vmem:[%s21122_s15 + $0x8a4] ss:$72 sps:$4 sm:$0xff]  }
 0x273   : > { %6915 = vmatpush1.bf16.msra.mxu1 %v19942_v5  ;;  %6787 = vmatprep.subr.bf16.mxu0 %v19947_v6  ;;  %v19992_v5 = vld [vmem:[%s21122_s15 + $0x8ac] ss:$72 sps:$4 sm:$0xff]   ;;  %v19987_v6 = vld [vmem:[%s21122_s15 + $0x8a0] ss:$72 sps:$4 sm:$0xff]  }
 0x274   : > { %6916 = vmatprep.subr.bf16.mxu1 %v19950_v8  ;;  %v19990_v8 = vld [vmem:[%s21122_s15 + $0x8a8] ss:$72 sps:$4 sm:$0xff]  }
 0x276   : > { %6788 = vmatpush1.bf16.msra.mxu0 %v19945_v10  ;;  %v19995_v10 = vld [vmem:[%s21122_s15 + $0x934] ss:$72 sps:$4 sm:$0xff]  }
 0x277   : > { %6917 = vmatpush1.bf16.msra.mxu1 %v19948_v11  ;;  %6789 = vmatprep.subr.bf16.mxu0 %v19953_v12  ;;  %v19998_v11 = vld [vmem:[%s21122_s15 + $0x93c] ss:$72 sps:$4 sm:$0xff]   ;;  %v19993_v12 = vld [vmem:[%s21122_s15 + $0x930] ss:$72 sps:$4 sm:$0xff]  }
 0x278   : > { %6918 = vmatprep.subr.bf16.mxu1 %v19956_v14  ;;  %v19996_v14 = vld [vmem:[%s21122_s15 + $0x938] ss:$72 sps:$4 sm:$0xff]  }
 0x27a   : > { %6790 = vmatpush1.bf16.msra.mxu0 %v19951_v15  ;;  %v20001_v15 = vld [vmem:[%s21122_s15 + $0x9c4] ss:$72 sps:$4 sm:$0xff]  }
 0x27b   : > { %6919 = vmatpush1.bf16.msra.mxu1 %v19954_v18  ;;  %6791 = vmatprep.subr.bf16.mxu0 %v19959_v19  ;;  %v20004_v18 = vld [vmem:[%s21122_s15 + $0x9cc] ss:$72 sps:$4 sm:$0xff]   ;;  %v19999_v19 = vld [vmem:[%s21122_s15 + $0x9c0] ss:$72 sps:$4 sm:$0xff]  }
 0x27c   : > { %6920 = vmatprep.subr.bf16.mxu1 %v19962_v31  ;;  %v20002_v31 = vld [vmem:[%s21122_s15 + $0x9c8] ss:$72 sps:$4 sm:$0xff]  }
 0x27e   : > { %6792 = vmatpush1.bf16.msra.mxu0 %v19957_v37  ;;  %v20007_v37 = vld [vmem:[%s21122_s15 + $0xa54] ss:$72 sps:$4 sm:$0xff]  }
 0x27f   : > { %6921 = vmatpush1.bf16.msra.mxu1 %v19960_v41  ;;  %6793 = vmatprep.subr.bf16.mxu0 %v19965_v42  ;;  %v20010_v41 = vld [vmem:[%s21122_s15 + $0xa5c] ss:$72 sps:$4 sm:$0xff]   ;;  %v20005_v42 = vld [vmem:[%s21122_s15 + $0xa50] ss:$72 sps:$4 sm:$0xff]  }
 0x280   : > { %6922 = vmatprep.subr.bf16.mxu1 %v19968_v43  ;;  %v20008_v43 = vld [vmem:[%s21122_s15 + $0xa58] ss:$72 sps:$4 sm:$0xff]  }
 0x282   : > { %6794 = vmatpush1.bf16.msra.mxu0 %v19963_v44  ;;  %v20013_v44 = vld [vmem:[%s21122_s15 + $0xae4] ss:$72 sps:$4 sm:$0xff]  }
 0x283   : > { %6923 = vmatpush1.bf16.msra.mxu1 %v19966_v45  ;;  %6795 = vmatprep.subr.bf16.mxu0 %v19971_v29  ;;  %v20016_v45 = vld [vmem:[%s21122_s15 + $0xaec] ss:$72 sps:$4 sm:$0xff]   ;;  %v20011_v29 = vld [vmem:[%s21122_s15 + $0xae0] ss:$72 sps:$4 sm:$0xff]  }
 0x284   : > { %6924 = vmatprep.subr.bf16.mxu1 %v19974_v33  ;;  %v20014_v33 = vld [vmem:[%s21122_s15 + $0xae8] ss:$72 sps:$4 sm:$0xff]  }
 0x286   : > { %6796 = vmatpush1.bf16.msra.mxu0 %v19969_v46  ;;  %v20019_v46 = vld [vmem:[%s21122_s15 + $0xb74] ss:$72 sps:$4 sm:$0xff]  }
 0x287   : > { %6925 = vmatpush1.bf16.msra.mxu1 %v19972_v47  ;;  %6797 = vmatprep.subr.bf16.mxu0 %v19977_v48  ;;  %v20022_v47 = vld [vmem:[%s21122_s15 + $0xb7c] ss:$72 sps:$4 sm:$0xff]   ;;  %v20017_v48 = vld [vmem:[%s21122_s15 + $0xb70] ss:$72 sps:$4 sm:$0xff]  }
 0x288   : > { %6926 = vmatprep.subr.bf16.mxu1 %v19980_v52  ;;  %v20020_v52 = vld [vmem:[%s21122_s15 + $0xb78] ss:$72 sps:$4 sm:$0xff]  }
 0x28a   : > { %6798 = vmatpush1.bf16.msra.mxu0 %v19975_v55  ;;  %v20025_v55 = vld [vmem:[%s21122_s15 + $0xc04] ss:$72 sps:$4 sm:$0xff]  }
 0x28b   : > { %6927 = vmatpush1.bf16.msra.mxu1 %v19978_v56  ;;  %6799 = vmatprep.subr.bf16.mxu0 %v19983_v58  ;;  %v20028_v56 = vld [vmem:[%s21122_s15 + $0xc0c] ss:$72 sps:$4 sm:$0xff]   ;;  %v20023_v58 = vld [vmem:[%s21122_s15 + $0xc00] ss:$72 sps:$4 sm:$0xff]  }
 0x28c   : > { %6928 = vmatprep.subr.bf16.mxu1 %v19986_v60  ;;  %v20026_v60 = vld [vmem:[%s21122_s15 + $0xc08] ss:$72 sps:$4 sm:$0xff]  }
 0x28e   : > { %6800 = vmatpush1.bf16.msra.mxu0 %v19981_v1  ;;  %v20031_v1 = vld [vmem:[%s21122_s15 + $0xc94] ss:$72 sps:$4 sm:$0xff]  }
 0x28f   : > { %6929 = vmatpush1.bf16.msra.mxu1 %v19984_v2  ;;  %6801 = vmatprep.subr.bf16.mxu0 %v19989_v3  ;;  %v20034_v2 = vld [vmem:[%s21122_s15 + $0xc9c] ss:$72 sps:$4 sm:$0xff]   ;;  %v20029_v3 = vld [vmem:[%s21122_s15 + $0xc90] ss:$72 sps:$4 sm:$0xff]  }
 0x290   : > { %6930 = vmatprep.subr.bf16.mxu1 %v19992_v5  ;;  %v20032_v5 = vld [vmem:[%s21122_s15 + $0xc98] ss:$72 sps:$4 sm:$0xff]  }
 0x292   : > { %6802 = vmatpush1.bf16.msra.mxu0 %v19987_v6  ;;  %v20037_v6 = vld [vmem:[%s21122_s15 + $0xd24] ss:$72 sps:$4 sm:$0xff]  }
 0x293   : > { %6931 = vmatpush1.bf16.msra.mxu1 %v19990_v8  ;;  %6814 = vmatprep.subr.bf16.mxu0 %v19995_v10  ;;  %v20040_v8 = vld [vmem:[%s21122_s15 + $0xd2c] ss:$72 sps:$4 sm:$0xff]   ;;  %v20035_v10 = vld [vmem:[%s21122_s15 + $0xd20] ss:$72 sps:$4 sm:$0xff]  }
 0x294   : > { %6943 = vmatprep.subr.bf16.mxu1 %v19998_v11  ;;  %v20038_v11 = vld [vmem:[%s21122_s15 + $0xd28] ss:$72 sps:$4 sm:$0xff]  }
 0x295   : > { %6804 = vmatmul.mubr.bf16.vlgmr.msra.gmra.mrb[12].mxu0 %v21206_v9 }
 0x296   : > { %6815 = vmatpush1.bf16.msra.mxu0 %v19993_v12  ;;  %6933 = vmatmul.mubr.bf16.vlgmr.msra.gmra.mrb[12].mxu1 %v21206_v9  ;;  %v20043_v12 = vld [vmem:[%s21122_s15 + $0xdb4] ss:$72 sps:$4 sm:$0xff]  }
 0x297   : > { %6944 = vmatpush1.bf16.msra.mxu1 %v19996_v14  ;;  %6816 = vmatprep.subr.bf16.mxu0 %v20001_v15  ;;  %v20046_v14 = vld [vmem:[%s21122_s15 + $0xdbc] ss:$72 sps:$4 sm:$0xff]   ;;  %v20041_v15 = vld [vmem:[%s21122_s15 + $0xdb0] ss:$72 sps:$4 sm:$0xff]  }
 0x298   : > { %6945 = vmatprep.subr.bf16.mxu1 %v20004_v18  ;;  %6846 = vmatprep.mubr.bf16.mxu0 %v21236_v36  ;;  %v20044_v18 = vld [vmem:[%s21122_s15 + $0xdb8] ss:$72 sps:$4 sm:$0xff]  }
 0x299   : > { %6975 = vmatprep.mubr.bf16.mxu1 %v21236_v36 }
 0x29a   : > { %6817 = vmatpush1.bf16.msra.mxu0 %v19999_v19  ;;  %v20049_v19 = vld [vmem:[%s21122_s15 + $0xe44] ss:$72 sps:$4 sm:$0xff]  }
 0x29b   : > { %6946 = vmatpush1.bf16.msra.mxu1 %v20002_v31  ;;  %6818 = vmatprep.subr.bf16.mxu0 %v20007_v37  ;;  %v20052_v31 = vld [vmem:[%s21122_s15 + $0xe4c] ss:$72 sps:$4 sm:$0xff]   ;;  %v20047_v37 = vld [vmem:[%s21122_s15 + $0xe40] ss:$72 sps:$4 sm:$0xff]  }
 0x29c   : > { %6947 = vmatprep.subr.bf16.mxu1 %v20010_v41  ;;  %v20050_v41 = vld [vmem:[%s21122_s15 + $0xe48] ss:$72 sps:$4 sm:$0xff]  }
 0x29e   : > { %6819 = vmatpush1.bf16.msra.mxu0 %v20005_v42  ;;  %v20055_v42 = vld [vmem:[%s21122_s15 + $0xed4] ss:$72 sps:$4 sm:$0xff]  }
 0x29f   : > { %6948 = vmatpush1.bf16.msra.mxu1 %v20008_v43  ;;  %6820 = vmatprep.subr.bf16.mxu0 %v20013_v44  ;;  %v20058_v43 = vld [vmem:[%s21122_s15 + $0xedc] ss:$72 sps:$4 sm:$0xff]   ;;  %v20053_v44 = vld [vmem:[%s21122_s15 + $0xed0] ss:$72 sps:$4 sm:$0xff]  }
 0x2a0   : > { %6949 = vmatprep.subr.bf16.mxu1 %v20016_v45  ;;  %v20056_v45 = vld [vmem:[%s21122_s15 + $0xed8] ss:$72 sps:$4 sm:$0xff]  }
 0x2a2   : > { %6821 = vmatpush1.bf16.msra.mxu0 %v20011_v29  ;;  %v20061_v29 = vld [vmem:[%s21122_s15 + $0xf64] ss:$72 sps:$4 sm:$0xff]  }
 0x2a3   : > { %6950 = vmatpush1.bf16.msra.mxu1 %v20014_v33  ;;  %6822 = vmatprep.subr.bf16.mxu0 %v20019_v46  ;;  %v20064_v33 = vld [vmem:[%s21122_s15 + $0xf6c] ss:$72 sps:$4 sm:$0xff]   ;;  %v20059_v46 = vld [vmem:[%s21122_s15 + $0xf60] ss:$72 sps:$4 sm:$0xff]  }
 0x2a4   : > { %6951 = vmatprep.subr.bf16.mxu1 %v20022_v47  ;;  %v20062_v47 = vld [vmem:[%s21122_s15 + $0xf68] ss:$72 sps:$4 sm:$0xff]  }
 0x2a6   : > { %6823 = vmatpush1.bf16.msra.mxu0 %v20017_v48  ;;  %v20067_v48 = vld [vmem:[%s21122_s15 + $0xff4] ss:$72 sps:$4 sm:$0xff]  }
 0x2a7   : > { %6952 = vmatpush1.bf16.msra.mxu1 %v20020_v52  ;;  %6824 = vmatprep.subr.bf16.mxu0 %v20025_v55  ;;  %v20070_v52 = vld [vmem:[%s21122_s15 + $0xffc] ss:$72 sps:$4 sm:$0xff]   ;;  %v20065_v55 = vld [vmem:[%s21122_s15 + $0xff0] ss:$72 sps:$4 sm:$0xff]  }
 0x2a8   : > { %6953 = vmatprep.subr.bf16.mxu1 %v20028_v56  ;;  %v20068_v56 = vld [vmem:[%s21122_s15 + $0xff8] ss:$72 sps:$4 sm:$0xff]  }
 0x2aa   : > { %6825 = vmatpush1.bf16.msra.mxu0 %v20023_v58  ;;  %v20073_v58 = vld [vmem:[%s21122_s15 + $0x1084] ss:$72 sps:$4 sm:$0xff]  }
 0x2ab   : > { %6954 = vmatpush1.bf16.msra.mxu1 %v20026_v60  ;;  %6826 = vmatprep.subr.bf16.mxu0 %v20031_v1  ;;  %v20076_v60 = vld [vmem:[%s21122_s15 + $0x108c] ss:$72 sps:$4 sm:$0xff]   ;;  %v20071_v1 = vld [vmem:[%s21122_s15 + $0x1080] ss:$72 sps:$4 sm:$0xff]  }
 0x2ac   : > { %6955 = vmatprep.subr.bf16.mxu1 %v20034_v2  ;;  %v20074_v2 = vld [vmem:[%s21122_s15 + $0x1088] ss:$72 sps:$4 sm:$0xff]  }
 0x2ae   : > { %6827 = vmatpush1.bf16.msra.mxu0 %v20029_v3  ;;  %v20079_v3 = vld [vmem:[%s21122_s15 + $0x1114] ss:$72 sps:$4 sm:$0xff]  }
 0x2af   : > { %6956 = vmatpush1.bf16.msra.mxu1 %v20032_v5  ;;  %6828 = vmatprep.subr.bf16.mxu0 %v20037_v6  ;;  %v20082_v5 = vld [vmem:[%s21122_s15 + $0x111c] ss:$72 sps:$4 sm:$0xff]   ;;  %v20077_v6 = vld [vmem:[%s21122_s15 + $0x1110] ss:$72 sps:$4 sm:$0xff]  }
 0x2b0   : > { %6957 = vmatprep.subr.bf16.mxu1 %v20040_v8  ;;  %v20080_v8 = vld [vmem:[%s21122_s15 + $0x1118] ss:$72 sps:$4 sm:$0xff]  }
 0x2b2   : > { %6829 = vmatpush1.bf16.msra.mxu0 %v20035_v10  ;;  %v20085_v10 = vld [vmem:[%s21122_s15 + $0x11a4] ss:$72 sps:$4 sm:$0xff]  }
 0x2b3   : > { %6958 = vmatpush1.bf16.msra.mxu1 %v20038_v11  ;;  %6830 = vmatprep.subr.bf16.mxu0 %v20043_v12  ;;  %v20088_v11 = vld [vmem:[%s21122_s15 + $0x11ac] ss:$72 sps:$4 sm:$0xff]   ;;  %v20083_v12 = vld [vmem:[%s21122_s15 + $0x11a0] ss:$72 sps:$4 sm:$0xff]  }
 0x2b4   : > { %6959 = vmatprep.subr.bf16.mxu1 %v20046_v14  ;;  %v20086_v14 = vld [vmem:[%s21122_s15 + $0x11a8] ss:$72 sps:$4 sm:$0xff]  }
 0x2b6   : > { %6831 = vmatpush1.bf16.msra.mxu0 %v20041_v15  ;;  %v20091_v15 = vld [vmem:[%s21122_s15 + $0x1234] ss:$72 sps:$4 sm:$0xff]  }
 0x2b7   : > { %6960 = vmatpush1.bf16.msra.mxu1 %v20044_v18  ;;  %6832 = vmatprep.subr.bf16.mxu0 %v20049_v19  ;;  %v20094_v18 = vld [vmem:[%s21122_s15 + $0x123c] ss:$72 sps:$4 sm:$0xff]   ;;  %v20089_v19 = vld [vmem:[%s21122_s15 + $0x1230] ss:$72 sps:$4 sm:$0xff]  }
 0x2b8   : > { %6961 = vmatprep.subr.bf16.mxu1 %v20052_v31  ;;  %v20092_v31 = vld [vmem:[%s21122_s15 + $0x1238] ss:$72 sps:$4 sm:$0xff]  }
 0x2ba   : > { %6833 = vmatpush1.bf16.msra.mxu0 %v20047_v37  ;;  %v20097_v37 = vld [vmem:[%s21122_s15 + $0x12c4] ss:$72 sps:$4 sm:$0xff]  }
 0x2bb   : > { %6962 = vmatpush1.bf16.msra.mxu1 %v20050_v41  ;;  %6834 = vmatprep.subr.bf16.mxu0 %v20055_v42  ;;  %v20100_v41 = vld [vmem:[%s21122_s15 + $0x12cc] ss:$72 sps:$4 sm:$0xff]   ;;  %v20095_v42 = vld [vmem:[%s21122_s15 + $0x12c0] ss:$72 sps:$4 sm:$0xff]  }
 0x2bc   : > { %6963 = vmatprep.subr.bf16.mxu1 %v20058_v43  ;;  %v20098_v43 = vld [vmem:[%s21122_s15 + $0x12c8] ss:$72 sps:$4 sm:$0xff]  }
 0x2be   : > { %6835 = vmatpush1.bf16.msra.mxu0 %v20053_v44  ;;  %v20106_v44 = vld [vmem:[%s21122_s15 + $0x1354] ss:$72 sps:$4 sm:$0xff]  }
 0x2bf   : > { %6964 = vmatpush1.bf16.msra.mxu1 %v20056_v45  ;;  %6836 = vmatprep.subr.bf16.mxu0 %v20061_v29  ;;  %v20103_v45 = vld [vmem:[%s21122_s15 + $0x135c] ss:$72 sps:$4 sm:$0xff]   ;;  %v20104_v29 = vld [vmem:[%s21122_s15 + $0x1350] ss:$72 sps:$4 sm:$0xff]  }
 0x2c0   : > { %6965 = vmatprep.subr.bf16.mxu1 %v20064_v33  ;;  %v20101_v33 = vld [vmem:[%s21122_s15 + $0x1358] ss:$72 sps:$4 sm:$0xff]  }
 0x2c2   : > { %6837 = vmatpush1.bf16.msra.mxu0 %v20059_v46  ;;  %v20112_v46 = vld [vmem:[%s21122_s15 + $0x13e4] ss:$72 sps:$4 sm:$0xff]  }
 0x2c3   : > { %6966 = vmatpush1.bf16.msra.mxu1 %v20062_v47  ;;  %6838 = vmatprep.subr.bf16.mxu0 %v20067_v48  ;;  %v20109_v47 = vld [vmem:[%s21122_s15 + $0x13ec] ss:$72 sps:$4 sm:$0xff]  }
 0x2c4   : > { %6967 = vmatprep.subr.bf16.mxu1 %v20070_v52  ;;  %v20110_v52 = vld [vmem:[%s21122_s15 + $0x13e0] ss:$72 sps:$4 sm:$0xff]  }
 0x2c6   : > { %6839 = vmatpush1.bf16.msra.mxu0 %v20065_v55  ;;  %v20107_v55 = vld [vmem:[%s21122_s15 + $0x13e8] ss:$72 sps:$4 sm:$0xff]  }
 0x2c7   : > { %6968 = vmatpush1.bf16.msra.mxu1 %v20068_v56  ;;  %6840 = vmatprep.subr.bf16.mxu0 %v20073_v58  ;;  %v20115_v56 = vld [vmem:[%s21122_s15 + $0x1474] ss:$72 sps:$4 sm:$0xff]  }
 0x2c8   : > { %6969 = vmatprep.subr.bf16.mxu1 %v20076_v60  ;;  %v20118_v58 = vld [vmem:[%s21122_s15 + $0x147c] ss:$72 sps:$4 sm:$0xff]  }
 0x2ca   : > { %6841 = vmatpush1.bf16.msra.mxu0 %v20071_v1 }
 0x2cb   : > { %6970 = vmatpush1.bf16.msra.mxu1 %v20074_v2  ;;  %6842 = vmatprep.subr.bf16.mxu0 %v20079_v3  ;;  %v20113_v3 = vld [vmem:[%s21122_s15 + $0x1470] ss:$72 sps:$4 sm:$0xff]  }
 0x2cc   : > { %6971 = vmatprep.subr.bf16.mxu1 %v20082_v5  ;;  %v20116_v5 = vld [vmem:[%s21122_s15 + $0x1478] ss:$72 sps:$4 sm:$0xff]  }
 0x2ce   : > { %6843 = vmatpush1.bf16.msra.mxu0 %v20077_v6  ;;  %v20121_v6 = vld [vmem:[%s21122_s15 + $0x1504] ss:$72 sps:$4 sm:$0xff]  }
 0x2cf   : > { %6972 = vmatpush1.bf16.msra.mxu1 %v20080_v8  ;;  %6844 = vmatprep.subr.bf16.mxu0 %v20085_v10  ;;  %v8114_v8 = vrot.slane %v8106_v61, %v21760_v13  ;;  %v8121_v10 = vrot.slane %v8107_v63, %v21760_v13  ;;  %v20122_v61 = vld [vmem:[%s21122_s15 + $0x1508] ss:$72 sps:$4 sm:$0xff]  }
 0x2d0   : > { %6973 = vmatprep.subr.bf16.mxu1 %v20088_v11 }
 0x2d2   : > { %6845 = vmatpush1.bf16.msra.mxu0 %v20083_v12 }
 0x2d3   : > { %6974 = vmatpush1.bf16.msra.mxu1 %v20086_v14  ;;  %6857 = vmatprep.subr.bf16.mxu0 %v20091_v15  ;;  %v20124_v14 = vld [vmem:[%s21122_s15 + $0x150c] ss:$72 sps:$4 sm:$0xff]  }
 0x2d4   : > { %6986 = vmatprep.subr.bf16.mxu1 %v20094_v18 }
 0x2d5   : > { %6847 = vmatmul.mubr.bf16.vlgmr.msra.gmra.mrb[12].mxu0 %v21282_v17 }
 0x2d6   : > { %6858 = vmatpush1.bf16.msra.mxu0 %v20089_v19  ;;  %6976 = vmatmul.mubr.bf16.vlgmr.msra.gmra.mrb[12].mxu1 %v21282_v17 }
 0x2d7   : > { %6987 = vmatpush1.bf16.msra.mxu1 %v20092_v31  ;;  %6859 = vmatprep.subr.bf16.mxu0 %v20097_v37  ;;  %v20119_v37 = vld [vmem:[%s21122_s15 + $0x1500] ss:$72 sps:$4 sm:$0xff]  }
 0x2d8   : > { %6988 = vmatprep.subr.bf16.mxu1 %v20100_v41  ;;  %6889 = vmatprep.mubr.bf16.mxu0 %v21293_v25 }
 0x2d9   : > { %7018 = vmatprep.mubr.bf16.mxu1 %v21293_v25 }
 0x2da   : > { %6860 = vmatpush1.bf16.msra.mxu0 %v20095_v42 }
 0x2db   : > { %6989 = vmatpush1.bf16.msra.mxu1 %v20098_v43  ;;  %6861 = vmatprep.subr.bf16.mxu0 %v20106_v44  ;;  %v20130_v43 = vld [vmem:[%s21122_s15 + $0x159c] ss:$72 sps:$4 sm:$0xff]  }
 0x2dc   : > { %6990 = vmatprep.subr.bf16.mxu1 %v20103_v45 }
 0x2de   : > { %v8061_v48 = vpop.permute.xlu0 %8060  ;;  %6862 = vmatpush1.bf16.msra.mxu0 %v20104_v29 }
 0x2df   : > { %6991 = vmatpush1.bf16.msra.mxu1 %v20101_v33  ;;  %6863 = vmatprep.subr.bf16.mxu0 %v20112_v46  ;;  %v20125_v46 = vld [vmem:[%s21122_s15 + $0x1590] ss:$72 sps:$4 sm:$0xff]  }
 0x2e0   : > { %6992 = vmatprep.subr.bf16.mxu1 %v20109_v47  ;;  %v20128_v47 = vld [vmem:[%s21122_s15 + $0x1598] ss:$72 sps:$4 sm:$0xff]  }
 0x2e2   : > { %v8069_v60 = vpop.permute.xlu0 %8068  ;;  %6864 = vmatpush1.bf16.msra.mxu0 %v20110_v52 }
 0x2e3   : > { %v8122_v1 = vcombine.low %v8061_v48, %v8069_v60  ;;  %v8123_v2 = vcombine.high %v8061_v48, %v8069_v60  ;;  %6993 = vmatpush1.bf16.msra.mxu1 %v20107_v55  ;;  %6865 = vmatprep.subr.bf16.mxu0 %v20115_v56  ;;  %v20133_v48 = vld [vmem:[%s21122_s15 + $0x1624] ss:$72 sps:$4 sm:$0xff]  }
 0x2e4   : > { %6994 = vmatprep.subr.bf16.mxu1 %v20118_v58  ;;  %v20136_v60 = vld [vmem:[%s21122_s15 + $0x162c] ss:$72 sps:$4 sm:$0xff]  }
 0x2e5   : > { %v8130_v11 = vrot.slane %v8122_v1, %v21760_v13  ;;  %v8137_v12 = vrot.slane %v8123_v2, %v21760_v13  ;;  %v20131_v1 = vld [vmem:[%s21122_s15 + $0x1620] ss:$72 sps:$4 sm:$0xff]  }
 0x2e6   : > { %6866 = vmatpush1.bf16.msra.mxu0 %v20113_v3 }
 0x2e7   : > { %v8170_v15 = vcombine.low %v8114_v8, %v8130_v11  ;;  %v8171_v18 = vcombine.high %v8114_v8, %v8130_v11  ;;  %v8186_v19 = vcombine.low %v8121_v10, %v8137_v12  ;;  %v8187_v31 = vcombine.high %v8121_v10, %v8137_v12  ;;  %6995 = vmatpush1.bf16.msra.mxu1 %v20116_v5  ;;  %v20134_v8 = vld [vmem:[%s21122_s15 + $0x1628] ss:$72 sps:$4 sm:$0xff]   ;;  %v20139_v10 = vld [vmem:[%s21122_s15 + $0x16b4] ss:$72 sps:$4 sm:$0xff]  }
 0x2e8   : > { %6867 = vmatprep.subr.bf16.mxu0 %v20121_v6  ;;  %6996 = vmatprep.subr.bf16.mxu1 %v20124_v14  ;;  %v20142_v11 = vld [vmem:[%s21122_s15 + $0x16bc] ss:$72 sps:$4 sm:$0xff]  }
 0x2e9   : > { %v8178_v53 = vrot.slane %v8170_v15, %v21767_v24  ;;  %v8185_v63 = vrot.slane %v8171_v18, %v21767_v24  ;;  %v8194_v41 = vrot.slane %v8186_v19, %v21767_v24  ;;  %v8201_v42 = vrot.slane %v8187_v31, %v21767_v24  ;;  %v20137_v19 = vld [vmem:[%s21122_s15 + $0x16b0] ss:$72 sps:$4 sm:$0xff]  }
 0x2ea   : > { %6868 = vmatpush1.bf16.msra.mxu0 %v20119_v37 }
 0x2eb   : > { %v17865_v44 = vcombine.low %v8178_v53, %v8185_v63  ;;  %v17867_v45 = vcombine.high %v8178_v53, %v8185_v63  ;;  %v17869_v29 = vcombine.low %v8194_v41, %v8201_v42  ;;  %v17871_v33 = vcombine.high %v8194_v41, %v8201_v42  ;;  %6997 = vmatpush1.bf16.msra.mxu1 %v20122_v61  ;;  %v20140_v53 = vld [vmem:[%s21122_s15 + $0x16b8] ss:$72 sps:$4 sm:$0xff]   ;;  %v20145_v63 = vld [vmem:[%s21122_s15 + $0x1744] ss:$72 sps:$4 sm:$0xff]  }
 0x2ec   : > { %6869 = vmatprep.subr.bf16.mxu0 %v20127_v49  ;;  %6998 = vmatprep.subr.bf16.mxu1 %v20130_v43  ;;  %v20148_v41 = vld [vmem:[%s21122_s15 + $0x174c] ss:$72 sps:$4 sm:$0xff]   ;;  %v20143_v42 = vld [vmem:[%s21122_s15 + $0x1740] ss:$72 sps:$4 sm:$0xff]  }
 0x2ed   : > { %v8522_v52 = vrot.slane %v17865_v44, %v21760_v13  ;;  %v8538_v55 = vrot.slane %v17867_v45, %v21760_v13  ;;  %v8554_v56 = vrot.slane %v17869_v29, %v21760_v13  ;;  %v8570_v58 = vrot.slane %v17871_v33, %v21760_v13  ;;  %v20146_v43 = vld [vmem:[%s21122_s15 + $0x1748] ss:$72 sps:$4 sm:$0xff]   ;;  %v20151_v44 = vld [vmem:[%s21122_s15 + $0x17d4] ss:$72 sps:$4 sm:$0xff]   ;;  %v20152_v33 = vld [vmem:[%s21122_s15 + $0x17d8] ss:$72 sps:$4 sm:$0xff]  }
 0x2ee   : > { %6870 = vmatpush1.bf16.msra.mxu0 %v20125_v46  ;;  %v20154_v45 = vld [vmem:[%s21122_s15 + $0x17dc] ss:$72 sps:$4 sm:$0xff]   ;;  %v20149_v29 = vld [vmem:[%s21122_s15 + $0x17d0] ss:$72 sps:$4 sm:$0xff]  }
 0x2ef   : > { %v8578_v2 = vcombine.low %v8522_v52, %v8538_v55  ;;  %v8610_v3 = vcombine.low %v8554_v56, %v8570_v58  ;;  %v8579_v5 = vcombine.high %v8522_v52, %v8538_v55  ;;  %v8611_v6 = vcombine.high %v8554_v56, %v8570_v58  ;;  %6999 = vmatpush1.bf16.msra.mxu1 %v20128_v47  ;;  %v20157_v46 = vld [vmem:[%s21122_s15 + $0x1864] ss:$72 sps:$4 sm:$0xff]   ;;  %v20158_v52 = vld [vmem:[%s21122_s15 + $0x1868] ss:$72 sps:$4 sm:$0xff]   ;;  %v20163_v55 = vld [vmem:[%s21122_s15 + $0x18f4] ss:$72 sps:$4 sm:$0xff]  }
 0x2f0   : > { %6871 = vmatprep.subr.bf16.mxu0 %v20133_v48  ;;  %7000 = vmatprep.subr.bf16.mxu1 %v20136_v60  ;;  %v20160_v47 = vld [vmem:[%s21122_s15 + $0x186c] ss:$72 sps:$4 sm:$0xff]   ;;  %v20155_v48 = vld [vmem:[%s21122_s15 + $0x1860] ss:$72 sps:$4 sm:$0xff]   ;;  %v20166_v56 = vld [vmem:[%s21122_s15 + $0x18fc] ss:$72 sps:$4 sm:$0xff]  }
 0x2f1   : > { %v8586_v12 = vrot.slane %v8578_v2, %v21767_v24  ;;  %v8618_v14 = vrot.slane %v8610_v3, %v21767_v24  ;;  %v8593_v15 = vrot.slane %v8579_v5, %v21767_v24  ;;  %v8625_v18 = vrot.slane %v8611_v6, %v21767_v24  ;;  %v20161_v58 = vld [vmem:[%s21122_s15 + $0x18f0] ss:$72 sps:$4 sm:$0xff]   ;;  %v20172_v2 = vld [vmem:[%s21122_s15 + $0x198c] ss:$72 sps:$4 sm:$0xff]   ;;  %v20167_v3 = vld [vmem:[%s21122_s15 + $0x1980] ss:$72 sps:$4 sm:$0xff]  }
 0x2f2   : > { %6872 = vmatpush1.bf16.msra.mxu0 %v20131_v1  ;;  %v20164_v60 = vld [vmem:[%s21122_s15 + $0x18f8] ss:$72 sps:$4 sm:$0xff]   ;;  %v20169_v1 = vld [vmem:[%s21122_s15 + $0x1984] ss:$72 sps:$4 sm:$0xff]   ;;  %v20170_v5 = vld [vmem:[%s21122_s15 + $0x1988] ss:$72 sps:$4 sm:$0xff]  }
 0x2f3   : > { %v22073_v31 = vcombine.low %v8586_v12, %v8618_v14  ;;  %v22075_v37 = vcombine.high %v8586_v12, %v8618_v14  ;;  %v22077_v61 = vcombine.low %v8593_v15, %v8625_v18  ;;  %v22079_v49 = vcombine.high %v8593_v15, %v8625_v18  ;;  %7001 = vmatpush1.bf16.msra.mxu1 %v20134_v8  ;;  %v20175_v6 = vld [vmem:[%s21122_s15 + $0x1a14] ss:$72 sps:$4 sm:$0xff]   ;;  %v20181_v12 = vld [vmem:[%s21122_s15 + $0x1aa4] ss:$72 sps:$4 sm:$0xff]   ;;  %v20179_v15 = vld [vmem:[%s21122_s15 + $0x1aa0] ss:$72 sps:$4 sm:$0xff]  }
 0x2f4   : > { %6873 = vmatprep.subr.bf16.mxu0 %v20139_v10  ;;  %7002 = vmatprep.subr.bf16.mxu1 %v20142_v11  ;;  %v20178_v8 = vld [vmem:[%s21122_s15 + $0x1a1c] ss:$72 sps:$4 sm:$0xff]   ;;  %v20173_v10 = vld [vmem:[%s21122_s15 + $0x1a10] ss:$72 sps:$4 sm:$0xff]   ;;  %v20184_v14 = vld [vmem:[%s21122_s15 + $0x1aac] ss:$72 sps:$4 sm:$0xff]  }
 0x2f5   : > { %v20176_v11 = vld [vmem:[%s21122_s15 + $0x1a18] ss:$72 sps:$4 sm:$0xff]   ;;  %v20182_v18 = vld [vmem:[%s21122_s15 + $0x1aa8] ss:$72 sps:$4 sm:$0xff]  }
 0x2f6   : > { %6874 = vmatpush1.bf16.msra.mxu0 %v20137_v19  ;;  %v20187_v19 = vld [vmem:[%s21122_s15 + $0x44] ss:$72 sps:$4 sm:$0xff]  }
 0x2f7   : > { %7003 = vmatpush1.bf16.msra.mxu1 %v20140_v53  ;;  %6875 = vmatprep.subr.bf16.mxu0 %v20145_v63  ;;  %v20185_v53 = vld [vmem:[%s21122_s15 + $0x40] ss:$72 sps:$4 sm:$0xff]   ;;  %v20190_v63 = vld [vmem:[%s21122_s15 + $0xd4] ss:$72 sps:$4 sm:$0xff]  }
 0x2f8   : > { %7004 = vmatprep.subr.bf16.mxu1 %v20148_v41  ;;  %v24574_v41 = vmov 0.0  }
 0x2fa   : > { %6876 = vmatpush1.bf16.msra.mxu0 %v20143_v42  ;;  %v20188_v42 = vld [vmem:[%s21122_s15 + $0xd0] ss:$72 sps:$4 sm:$0xff]  }
 0x2fb   : > { %7005 = vmatpush1.bf16.msra.mxu1 %v20146_v43  ;;  %6877 = vmatprep.subr.bf16.mxu0 %v20151_v44  ;;  %v8922_v43 = vpack.c.bf16 %v22073_v31, %v22073_v31  ;;  %v20193_v44 = vld [vmem:[%s21122_s15 + $0x164] ss:$72 sps:$4 sm:$0xff]   ;;  %v20194_v31 = vld [vmem:[%s21122_s15 + $0x1f0] ss:$72 sps:$4 sm:$0xff]  }
 0x2fc   : > { %7006 = vmatprep.subr.bf16.mxu1 %v20154_v45  ;;  %v20191_v45 = vld [vmem:[%s21122_s15 + $0x160] ss:$72 sps:$4 sm:$0xff]  }
 0x2fe   : > { %6878 = vmatpush1.bf16.msra.mxu0 %v20149_v29  ;;  %v9839_v29 = vsel %vm9834_vm1, %v8922_v43, 0 }
 0x2ff   : > { %7007 = vmatpush1.bf16.msra.mxu1 %v20152_v33  ;;  %6879 = vmatprep.subr.bf16.mxu0 %v20157_v46  ;;  %v20196_v33 = vld [vmem:[%s21122_s15 + $0x1f4] ss:$72 sps:$4 sm:$0xff]   ;;  %v8923_v46 = vpack.c.bf16 %v22075_v37, %v22075_v37 }
 0x300   : > { %7008 = vmatprep.subr.bf16.mxu1 %v20160_v47  ;;  %v20199_v47 = vld [vmem:[%s21122_s15 + $0x284] ss:$72 sps:$4 sm:$0xff]  }
 0x301   : > { %v9885_v37 = vsel %vm9834_vm1, %v8923_v46, 0 }
 0x302   : > { %6880 = vmatpush1.bf16.msra.mxu0 %v20155_v48  ;;  %v8034_v48 = vpack.c.bf16 %v21807_v20, %v21807_v20 }
 0x303   : > { %7009 = vmatpush1.bf16.msra.mxu1 %v20158_v52  ;;  %6881 = vmatprep.subr.bf16.mxu0 %v20163_v55  ;;  %v22137_v52 = vsub.s32 3, %v21586_v62  ;;  %v22140_v55 = vld [vmem:[%s21584_s23 + $0x8] sm:$0xff] }
 0x304   : > { %7010 = vmatprep.subr.bf16.mxu1 %v20166_v56  ;;  %v20197_v56 = vld [vmem:[%s21122_s15 + $0x280] ss:$72 sps:$4 sm:$0xff]  }
 0x306   : > { %6882 = vmatpush1.bf16.msra.mxu0 %v20161_v58  ;;  %v20202_v58 = vld [vmem:[%s21122_s15 + $0x314] ss:$72 sps:$4 sm:$0xff]  }
 0x307   : > { %7011 = vmatpush1.bf16.msra.mxu1 %v20164_v60  ;;  %6883 = vmatprep.subr.bf16.mxu0 %v20169_v1  ;;  %v1622_v60 = vrot.slane %v22140_v55, %v21594_v4  ;;  %v22157_v1 = vrot.slane %v21870_v39, %v22137_v52 }
 0x308   : > { %7012 = vmatprep.subr.bf16.mxu1 %v20172_v2 }
 0x30a   : > { %6884 = vmatpush1.bf16.msra.mxu0 %v20167_v3  ;;  %v1626_v3 = vrot.slane %v22140_v55, %v21599_v7 }
 0x30b   : > { %7013 = vmatpush1.bf16.msra.mxu1 %v20170_v5  ;;  %6885 = vmatprep.subr.bf16.mxu0 %v20175_v6  ;;  %v20200_v5 = vld [vmem:[%s21122_s15 + $0x310] ss:$72 sps:$4 sm:$0xff]   ;;  %v22165_v6 = vsub.s32 4, %v21586_v62 }
 0x30c   : > { %7014 = vmatprep.subr.bf16.mxu1 %v20178_v8  ;;  %v1634_v8 = vrot.slane %v22140_v55, %v22137_v52 }
 0x30e   : > { %6886 = vmatpush1.bf16.msra.mxu0 %v20173_v10  ;;  %v8924_v10 = vpack.c.bf16 %v22077_v61, %v22077_v61 }
 0x30f   : > { %7015 = vmatpush1.bf16.msra.mxu1 %v20176_v11  ;;  %6887 = vmatprep.subr.bf16.mxu0 %v20181_v12 }
 0x310   : > { %7016 = vmatprep.subr.bf16.mxu1 %v20184_v14 }
 0x312   : > { %6888 = vmatpush1.bf16.msra.mxu0 %v20179_v15 }
 0x313   : > { %7017 = vmatpush1.bf16.msra.mxu1 %v20182_v18  ;;  %7029 = vmatprep.subr.bf16.mxu0 %v20187_v19  ;;  %v8035_v19 = vpack.c.bf16 %v21809_v22, %v21809_v22 }
 0x314   : > { %18534 = vmatprep.subr.bf16.mxu1 %v24574_v41 }
 0x315   : > { %6890 = vmatmul.mubr.bf16.vlgmr.msra.gmra.mrb[12].mxu0 %v21356_v26 }
 0x316   : > { %7019 = vmatmul.mubr.bf16.vlgmr.msra.gmra.mrb[12].mxu1 %v21356_v26  ;;  %7030 = vmatpush1.bf16.msra.mxu0 %v20185_v53  ;;  %v18827_v53 = vadd.f32 %v21610_v21, %v22157_v1 }
 0x317   : > { %18536 = vmatprep.mubr.msk.bf16.mxu1 %vm21026_vm0, %v24574_v41  ;;  %7031 = vmatprep.subr.bf16.mxu0 %v20190_v63  ;;  %v22180_v63 = vsub.s32 5, %v21586_v62 }
 0x318   : > { %7061 = vmatprep.mubr.bf16.mxu0 %v21180_v50  ;;  %v22132_v50 = vsub.s32 2, %v21586_v62 }
 0x319   : > { %24578 = vst [vmem:[#allocation2_spill] sm:$0xff] %v22180_v63 }
 0x31a   : > { %7032 = vmatpush1.bf16.msra.mxu0 %v20188_v42  ;;  %v22150_v20 = vrot.slane %v21870_v39, %v22132_v50  ;;  %v1630_v2 = vrot.slane %v22140_v55, %v22132_v50 }
 0x31b   : > { %7033 = vmatprep.subr.bf16.mxu0 %v20193_v44 }
 0x31c   : > { %18535 = vmatpush3.bf16.xpose.msra.mxu1 %v9839_v29  ;;  %v18826_v12 = vadd.f32 %v21607_v16, %v22150_v20  ;;  %v22188_v16 = vrot.slane %v21870_v39, %v22165_v6 }
 0x31d   : > { %18540 = vmatprep.subr.bf16.mxu1 %v24574_v41 }
 0x31e   : > { %7034 = vmatpush1.bf16.msra.mxu0 %v20191_v45 }
 0x31f   : > { %7035 = vmatprep.subr.bf16.mxu0 %v20196_v33  ;;  %v9931_v33 = vsel %vm9834_vm1, %v8924_v10, 0 }
 0x322   : > { %7036 = vmatpush1.bf16.msra.mxu0 %v20194_v31 }
 0x323   : > { %18537 = vmatmul.mubr.msk.bf16.vlgmr.msra.gmra.mrb[16].mxu1 %vm9834_vm1, %v8034_v48  ;;  %7037 = vmatprep.subr.bf16.mxu0 %v20199_v47 }
 0x324   : > { %18541 = vmatpush3.bf16.xpose.msra.mxu1 %v9885_v37  ;;  %18542 = vmatprep.mubr.msk.bf16.mxu1 %vm21026_vm0, %v24574_v41  ;;  %v20205_v37 = vld [vmem:[%s21122_s15 + $0x3a4] ss:$72 sps:$4 sm:$0xff]  }
 0x325   : > { %18546 = vmatprep.subr.bf16.mxu1 %v24574_v41 }
 0x326   : > { %7038 = vmatpush1.bf16.msra.mxu0 %v20197_v56 }
 0x327   : > { %7039 = vmatprep.subr.bf16.mxu0 %v20202_v58  ;;  %v22207_v58 = vmul.f32 0.125, %v18826_v12 }
 0x328   : > { %v6633_v11 = vpop.f32.mrb[8].mxu0 }
 0x329   : > { %v22173_v14 = vadd.f32 %v6633_v11, %v1622_v60  ;;  %v6762_v15 = vpop.f32.mrb[8].mxu1  ;;  %v6635_v18 = vpop.f32.mrb[9].mxu0 }
 0x32a   : > { %v22182_v42 = vadd.f32 %v6762_v15, %v1630_v2  ;;  %v22184_v61 = vadd.f32 %v6635_v18, %v1626_v3  ;;  %v6764_v43 = vpop.f32.mrb[9].mxu1  ;;  %v6637_v44 = vpop.f32.mrb[10].mxu0  ;;  %7040 = vmatpush1.bf16.msra.mxu0 %v20200_v5  ;;  %v22230_v15 = vrot.slane %v21870_v39, %v22180_v63  ;;  %v8036_v39 = vpack.c.bf16 %v21811_v23, %v21811_v23 }
 0x32b   : > { %v22190_v45 = vadd.f32 %v6764_v43, %v1634_v8  ;;  %v22192_v22 = vadd.f32 %v6637_v44, %v1622_v60  ;;  %v6766_v21 = vpop.f32.mrb[10].mxu1  ;;  %18543 = vmatmul.mubr.msk.bf16.vlgmr.msra.gmra.mrb[20].mxu1 %vm9834_vm1, %v8035_v19  ;;  %v6639_v29 = vpop.f32.mrb[11].mxu0  ;;  %8076 = vrot.lane.b32.xlu0 %v22173_v14, %s21022_s24  ;;  %v18830_v43 = vadd.f32 %v21880_v40, %v22188_v16  ;;  %v20206_v44 = vld [vmem:[%s21122_s15 + $0x430] ss:$72 sps:$4 sm:$0xff]  }
 0x32c   : > { %v8138_v31 = vcombine.low %v22173_v14, %v22184_v61  ;;  %v8139_v46 = vcombine.high %v22173_v14, %v22184_v61  ;;  %v22202_v47 = vadd.f32 %v6766_v21, %v1630_v2  ;;  %v22204_v48 = vadd.f32 %v6639_v29, %v1626_v3  ;;  %v6768_v56 = vpop.f32.mrb[11].mxu1  ;;  %18547 = vmatpush3.bf16.xpose.msra.mxu1 %v9931_v33  ;;  %v20203_v2 = vld [vmem:[%s21122_s15 + $0x3a0] ss:$72 sps:$4 sm:$0xff]   ;;  %v20211_v21 = vld [vmem:[%s21122_s15 + $0x4c4] ss:$72 sps:$4 sm:$0xff]  }
 0x32d   : > { %v8242_v60 = vcombine.low %v22182_v42, %v22190_v45  ;;  %v8243_v5 = vcombine.high %v22182_v42, %v22190_v45  ;;  %v22213_v10 = vadd.f32 %v6768_v56, %v1634_v8  ;;  %8084 = vrot.lane.b32.xlu1 %v22184_v61, %s21022_s24  ;;  %18548 = vmatprep.mubr.msk.bf16.mxu1 %vm21026_vm0, %v24574_v41  ;;  %v22220_v3 = vmul.f32 0.125, %v18827_v53  ;;  %v20208_v8 = vld [vmem:[%s21122_s15 + $0x434] ss:$72 sps:$4 sm:$0xff]  }
 0x32e   : > { %v8342_v11 = vcombine.low %v22192_v22, %v22204_v48  ;;  %v8343_v12 = vcombine.high %v22192_v22, %v22204_v48  ;;  %18552 = vmatprep.subr.bf16.mxu1 %v24574_v41  ;;  %v8925_v53 = vpack.c.bf16 %v22079_v49, %v22079_v49  ;;  %7041 = vmatprep.subr.bf16.mxu0 %v20205_v37  ;;  %v22256_v23 = vmul.f32 0.125, %v18830_v43  ;;  %v20214_v49 = vld [vmem:[%s21122_s15 + $0x554] ss:$72 sps:$4 sm:$0xff]   ;;  %v20212_v37 = vld [vmem:[%s21122_s15 + $0x550] ss:$72 sps:$4 sm:$0xff]  }
 0x32f   : > { %7188 = vrot.lane.b32.xlu0 %v22207_v58, %s21022_s24  ;;  %7042 = vmatpush1.bf16.msra.mxu0 %v20203_v2  ;;  %v18831_v29 = vadd.f32 %v21886_v51, %v22230_v15  ;;  %v20209_v51 = vld [vmem:[%s21122_s15 + $0x4c0] ss:$72 sps:$4 sm:$0xff]   ;;  %v8037_v56 = vpack.c.bf16 %v21813_v27, %v21813_v27  ;;  %v20217_v2 = vld [vmem:[%s21122_s15 + $0x5e4] ss:$72 sps:$4 sm:$0xff]   ;;  %v22286_v43 = vmul.f32 0.125, %v21624_v34 }
 0x330   : > { %7043 = vmatprep.subr.bf16.mxu0 %v20208_v8  ;;  %v9977_v40 = vsel %vm9834_vm1, %v8925_v53, 0  ;;  %v22279_v8 = vmul.f32 0.125, %v21618_v30  ;;  %v20215_v27 = vld [vmem:[%s21122_s15 + $0x5e0] ss:$72 sps:$4 sm:$0xff]   ;;  %v20220_v53 = vld [vmem:[%s21122_s15 + $0x674] ss:$72 sps:$4 sm:$0xff]  }
 0x331   : > { %7196 = vrot.lane.b32.xlu1 %v22220_v3, %s21022_s24  ;;  %v22263_v33 = vmul.f32 0.125, %v18831_v29  ;;  %v20218_v30 = vld [vmem:[%s21122_s15 + $0x670] ss:$72 sps:$4 sm:$0xff]  }
 0x333   : > { %18549 = vmatmul.mubr.msk.bf16.vlgmr.msra.gmra.mrb[24].mxu1 %vm9834_vm1, %v8036_v39  ;;  %8092 = vrot.lane.b32.xlu0 %v22182_v42, %s21022_s24  ;;  %v18828_v39 = vadd.f32 %v21614_v28, %v22150_v20  ;;  %v20221_v28 = vld [vmem:[%s21122_s15 + $0x700] ss:$72 sps:$4 sm:$0xff]   ;;  %v20226_v20 = vld [vmem:[%s21122_s15 + $0x794] ss:$72 sps:$4 sm:$0xff]  }
 0x334   : > { %18553 = vmatpush3.bf16.xpose.msra.mxu1 %v9977_v40  ;;  %18554 = vmatprep.mubr.msk.bf16.mxu1 %vm21026_vm0, %v24574_v41  ;;  %v20229_v40 = vld [vmem:[%s21122_s15 + $0x824] ss:$72 sps:$4 sm:$0xff]  }
 0x335   : > { %8100 = vrot.lane.b32.xlu1 %v22190_v45, %s21022_s24  ;;  %7044 = vmatpush1.bf16.msra.mxu0 %v20206_v44  ;;  %v20223_v44 = vld [vmem:[%s21122_s15 + $0x704] ss:$72 sps:$4 sm:$0xff]   ;;  %v22300_v34 = vmul.f32 0.125, %v18828_v39  ;;  %v20239_v39 = vld [vmem:[%s21122_s15 + $0xa60] ss:$72 sps:$4 sm:$0xff]  }
 0x336   : > { %7045 = vmatprep.subr.bf16.mxu0 %v20211_v21  ;;  %18558 = vmatprep.subr.bf16.mxu1 %v24574_v41  ;;  %v18829_v21 = vadd.f32 %v21620_v32, %v22157_v1  ;;  %v18832_v32 = vadd.f32 %v21890_v54, %v22188_v16  ;;  %v20224_v1 = vld [vmem:[%s21122_s15 + $0x790] ss:$72 sps:$4 sm:$0xff]   ;;  %v20227_v54 = vld [vmem:[%s21122_s15 + $0x820] ss:$72 sps:$4 sm:$0xff]   ;;  %v20232_v16 = vld [vmem:[%s21122_s15 + $0x8b4] ss:$72 sps:$4 sm:$0xff]  }
 0x337   : > { %7204 = vrot.lane.b32.xlu0 %v22256_v23, %s21022_s24  ;;  %v20323_v45 = vld [vmem:[%s21122_s15 + $0x1a20] ss:$72 sps:$4 sm:$0xff]  }
 0x338   : > { %v22306_v29 = vmul.f32 0.125, %v18829_v21  ;;  %v20245_v21 = vld [vmem:[%s21122_s15 + $0xb80] ss:$72 sps:$4 sm:$0xff]  }
 0x339   : > { %7212 = vrot.lane.b32.xlu1 %v22263_v33, %s21022_s24  ;;  %7046 = vmatpush1.bf16.msra.mxu0 %v20209_v51  ;;  %v18833_v51 = vadd.f32 %v21897_v59, %v22230_v15  ;;  %v20230_v59 = vld [vmem:[%s21122_s15 + $0x8b0] ss:$72 sps:$4 sm:$0xff]   ;;  %v20235_v15 = vld [vmem:[%s21122_s15 + $0x944] ss:$72 sps:$4 sm:$0xff]  }
 0x33a   : > { %7047 = vmatprep.subr.bf16.mxu0 %v20214_v49  ;;  %v22320_v49 = vmul.f32 0.125, %v18832_v32  ;;  %v20251_v32 = vld [vmem:[%s21122_s15 + $0xca0] ss:$72 sps:$4 sm:$0xff]  }
 0x33b   : > { %18555 = vmatmul.mubr.msk.bf16.vlgmr.msra.gmra.mrb[28].mxu1 %vm9834_vm1, %v8037_v56  ;;  %8062 = vrot.lane.b32.xlu0 %v21893_v57, %s21022_s24  ;;  %v22326_v56 = vmul.f32 0.125, %v18833_v51  ;;  %v20259_v51 = vld [vmem:[%s21122_s15 + $0xdc4] ss:$72 sps:$4 sm:$0xff]  }
 0x33c   : > { %18560 = vmatprep.mubr.msk.bf16.mxu1 %vm21026_vm0, %v24574_v41 }
 0x33d   : > { %8070 = vrot.lane.b32.xlu1 %v21904_v0, %s21022_s24  ;;  %7048 = vmatpush1.bf16.msra.mxu0 %v20212_v37  ;;  %v20233_v37 = vld [vmem:[%s21122_s15 + $0x940] ss:$72 sps:$4 sm:$0xff]  }
 0x33e   : > { %7049 = vmatprep.subr.bf16.mxu0 %v20217_v2  ;;  %v20238_v2 = vld [vmem:[%s21122_s15 + $0x9d4] ss:$72 sps:$4 sm:$0xff]  }
 0x33f   : > { %7174 = vrot.lane.b32.xlu0 %v22279_v8, %s21022_s24 }
 0x341   : > { %7182 = vrot.lane.b32.xlu1 %v22286_v43, %s21022_s24  ;;  %7050 = vmatpush1.bf16.msra.mxu0 %v20215_v27  ;;  %v20236_v27 = vld [vmem:[%s21122_s15 + $0x9d0] ss:$72 sps:$4 sm:$0xff]  }
 0x342   : > { %7051 = vmatprep.subr.bf16.mxu0 %v20220_v53  ;;  %v20241_v53 = vld [vmem:[%s21122_s15 + $0xa64] ss:$72 sps:$4 sm:$0xff]  }
 0x343   : > { %8078 = vrot.lane.b32.xlu0 %v22192_v22, %s21022_s24 }
 0x345   : > { %8086 = vrot.lane.b32.xlu1 %v22204_v48, %s21022_s24  ;;  %7052 = vmatpush1.bf16.msra.mxu0 %v20218_v30  ;;  %v20244_v30 = vld [vmem:[%s21122_s15 + $0xaf4] ss:$72 sps:$4 sm:$0xff]  }
 0x346   : > { %7053 = vmatprep.subr.bf16.mxu0 %v20223_v44  ;;  %v20242_v44 = vld [vmem:[%s21122_s15 + $0xaf0] ss:$72 sps:$4 sm:$0xff]  }
 0x347   : > { %7190 = vrot.lane.b32.xlu0 %v22300_v34, %s21022_s24 }
 0x349   : > { %7198 = vrot.lane.b32.xlu1 %v22306_v29, %s21022_s24  ;;  %7054 = vmatpush1.bf16.msra.mxu0 %v20221_v28  ;;  %v20248_v28 = vld [vmem:[%s21122_s15 + $0xc10] ss:$72 sps:$4 sm:$0xff]  }
 0x34a   : > { %7055 = vmatprep.subr.bf16.mxu0 %v20226_v20  ;;  %v20253_v20 = vld [vmem:[%s21122_s15 + $0xca4] ss:$72 sps:$4 sm:$0xff]  }
 0x34b   : > { %8094 = vrot.lane.b32.xlu0 %v22202_v47, %s21022_s24 }
 0x34d   : > { %8102 = vrot.lane.b32.xlu1 %v22213_v10, %s21022_s24  ;;  %7056 = vmatpush1.bf16.msra.mxu0 %v20224_v1  ;;  %v20256_v1 = vld [vmem:[%s21122_s15 + $0xd34] ss:$72 sps:$4 sm:$0xff]  }
 0x34e   : > { %7057 = vmatprep.subr.bf16.mxu0 %v20229_v40  ;;  %v20254_v40 = vld [vmem:[%s21122_s15 + $0xd30] ss:$72 sps:$4 sm:$0xff]  }
 0x34f   : > { %7206 = vrot.lane.b32.xlu0 %v22320_v49, %s21022_s24 }
 0x351   : > { %7214 = vrot.lane.b32.xlu1 %v22326_v56, %s21022_s24  ;;  %7058 = vmatpush1.bf16.msra.mxu0 %v20227_v54  ;;  %v20257_v54 = vld [vmem:[%s21122_s15 + $0xdc0] ss:$72 sps:$4 sm:$0xff]  }
 0x352   : > { %7059 = vmatprep.subr.bf16.mxu0 %v20232_v16  ;;  %v20262_v16 = vld [vmem:[%s21122_s15 + $0xe54] ss:$72 sps:$4 sm:$0xff]  }
 0x355   : > { %7060 = vmatpush1.bf16.msra.mxu0 %v20230_v59  ;;  %v20260_v59 = vld [vmem:[%s21122_s15 + $0xe50] ss:$72 sps:$4 sm:$0xff]  }
 0x356   : > { %7072 = vmatprep.subr.bf16.mxu0 %v20235_v15  ;;  %v20265_v15 = vld [vmem:[%s21122_s15 + $0xee4] ss:$72 sps:$4 sm:$0xff]  }
 0x358   : > { %7062 = vmatmul.mubr.bf16.vlgmr.msra.gmra.mrb[16].mxu0 %v21206_v9  ;;  %v20247_v9 = vld [vmem:[%s21122_s15 + $0xb84] ss:$72 sps:$4 sm:$0xff]  }
 0x359   : > { %7073 = vmatpush1.bf16.msra.mxu0 %v20233_v37  ;;  %7104 = vmatprep.mubr.bf16.mxu0 %v21236_v36  ;;  %v20250_v36 = vld [vmem:[%s21122_s15 + $0xc14] ss:$72 sps:$4 sm:$0xff]   ;;  %v20263_v37 = vld [vmem:[%s21122_s15 + $0xee0] ss:$72 sps:$4 sm:$0xff]  }
 0x35a   : > { %7074 = vmatprep.subr.bf16.mxu0 %v20238_v2  ;;  %v20268_v2 = vld [vmem:[%s21122_s15 + $0xf74] ss:$72 sps:$4 sm:$0xff]  }
 0x35d   : > { %7075 = vmatpush1.bf16.msra.mxu0 %v20236_v27  ;;  %v20266_v27 = vld [vmem:[%s21122_s15 + $0xf70] ss:$72 sps:$4 sm:$0xff]  }
 0x35e   : > { %7076 = vmatprep.subr.bf16.mxu0 %v20241_v53  ;;  %v20271_v53 = vld [vmem:[%s21122_s15 + $0x1004] ss:$72 sps:$4 sm:$0xff]  }
 0x361   : > { %7077 = vmatpush1.bf16.msra.mxu0 %v20239_v39  ;;  %v20269_v39 = vld [vmem:[%s21122_s15 + $0x1000] ss:$72 sps:$4 sm:$0xff]  }
 0x362   : > { %7078 = vmatprep.subr.bf16.mxu0 %v20244_v30  ;;  %v20274_v30 = vld [vmem:[%s21122_s15 + $0x1094] ss:$72 sps:$4 sm:$0xff]  }
 0x365   : > { %7079 = vmatpush1.bf16.msra.mxu0 %v20242_v44  ;;  %v20272_v44 = vld [vmem:[%s21122_s15 + $0x1090] ss:$72 sps:$4 sm:$0xff]  }
 0x366   : > { %7080 = vmatprep.subr.bf16.mxu0 %v20247_v9  ;;  %v20277_v9 = vld [vmem:[%s21122_s15 + $0x1124] ss:$72 sps:$4 sm:$0xff]  }
 0x369   : > { %7081 = vmatpush1.bf16.msra.mxu0 %v20245_v21  ;;  %v20275_v21 = vld [vmem:[%s21122_s15 + $0x1120] ss:$72 sps:$4 sm:$0xff]  }
 0x36a   : > { %7082 = vmatprep.subr.bf16.mxu0 %v20250_v36  ;;  %v20280_v36 = vld [vmem:[%s21122_s15 + $0x11b4] ss:$72 sps:$4 sm:$0xff]  }
 0x36d   : > { %7083 = vmatpush1.bf16.msra.mxu0 %v20248_v28  ;;  %v20278_v28 = vld [vmem:[%s21122_s15 + $0x11b0] ss:$72 sps:$4 sm:$0xff]  }
 0x36e   : > { %7084 = vmatprep.subr.bf16.mxu0 %v20253_v20  ;;  %v20283_v20 = vld [vmem:[%s21122_s15 + $0x1244] ss:$72 sps:$4 sm:$0xff]  }
 0x371   : > { %7085 = vmatpush1.bf16.msra.mxu0 %v20251_v32  ;;  %v20281_v32 = vld [vmem:[%s21122_s15 + $0x1240] ss:$72 sps:$4 sm:$0xff]  }
 0x372   : > { %7086 = vmatprep.subr.bf16.mxu0 %v20256_v1  ;;  %v20286_v1 = vld [vmem:[%s21122_s15 + $0x12d4] ss:$72 sps:$4 sm:$0xff]  }
 0x375   : > { %7087 = vmatpush1.bf16.msra.mxu0 %v20254_v40  ;;  %v20284_v40 = vld [vmem:[%s21122_s15 + $0x12d0] ss:$72 sps:$4 sm:$0xff]  }
 0x376   : > { %7088 = vmatprep.subr.bf16.mxu0 %v20259_v51  ;;  %v20289_v51 = vld [vmem:[%s21122_s15 + $0x1364] ss:$72 sps:$4 sm:$0xff]  }
 0x379   : > { %7089 = vmatpush1.bf16.msra.mxu0 %v20257_v54  ;;  %v20287_v54 = vld [vmem:[%s21122_s15 + $0x1360] ss:$72 sps:$4 sm:$0xff]  }
 0x37a   : > { %7090 = vmatprep.subr.bf16.mxu0 %v20262_v16  ;;  %v20292_v16 = vld [vmem:[%s21122_s15 + $0x13f4] ss:$72 sps:$4 sm:$0xff]  }
 0x37d   : > { %7091 = vmatpush1.bf16.msra.mxu0 %v20260_v59  ;;  %v20290_v59 = vld [vmem:[%s21122_s15 + $0x13f0] ss:$72 sps:$4 sm:$0xff]  }
 0x37e   : > { %7092 = vmatprep.subr.bf16.mxu0 %v20265_v15  ;;  %v20295_v15 = vld [vmem:[%s21122_s15 + $0x1484] ss:$72 sps:$4 sm:$0xff]  }
 0x381   : > { %7093 = vmatpush1.bf16.msra.mxu0 %v20263_v37 }
 0x382   : > { %7094 = vmatprep.subr.bf16.mxu0 %v20268_v2  ;;  %v20293_v2 = vld [vmem:[%s21122_s15 + $0x1480] ss:$72 sps:$4 sm:$0xff]  }
 0x385   : > { %7095 = vmatpush1.bf16.msra.mxu0 %v20266_v27  ;;  %v20296_v27 = vld [vmem:[%s21122_s15 + $0x1510] ss:$72 sps:$4 sm:$0xff]  }
 0x386   : > { %7096 = vmatprep.subr.bf16.mxu0 %v20271_v53  ;;  %v20301_v53 = vld [vmem:[%s21122_s15 + $0x15a4] ss:$72 sps:$4 sm:$0xff]  }
 0x389   : > { %7097 = vmatpush1.bf16.msra.mxu0 %v20269_v39 }
 0x38a   : > { %7098 = vmatprep.subr.bf16.mxu0 %v20274_v30 }
 0x38d   : > { %7099 = vmatpush1.bf16.msra.mxu0 %v20272_v44 }
 0x38e   : > { %7100 = vmatprep.subr.bf16.mxu0 %v20277_v9 }
 0x391   : > { %7101 = vmatpush1.bf16.msra.mxu0 %v20275_v21  ;;  %v20299_v21 = vld [vmem:[%s21122_s15 + $0x15a0] ss:$72 sps:$4 sm:$0xff]  }
 0x392   : > { %7102 = vmatprep.subr.bf16.mxu0 %v20280_v36 }
 0x395   : > { %7103 = vmatpush1.bf16.msra.mxu0 %v20278_v28 }
 0x396   : > { %7115 = vmatprep.subr.bf16.mxu0 %v20283_v20  ;;  %v20304_v20 = vld [vmem:[%s21122_s15 + $0x1634] ss:$72 sps:$4 sm:$0xff]  }
 0x398   : > { %7105 = vmatmul.mubr.bf16.vlgmr.msra.gmra.mrb[16].mxu0 %v21282_v17 }
 0x399   : > { %7116 = vmatpush1.bf16.msra.mxu0 %v20281_v32  ;;  %7147 = vmatprep.mubr.bf16.mxu0 %v21293_v25  ;;  %v20298_v25 = vld [vmem:[%s21122_s15 + $0x1514] ss:$72 sps:$4 sm:$0xff]   ;;  %v7250_v32 = vcombine.low %v22207_v58, %v22220_v3 }
 0x39a   : > { %7117 = vmatprep.subr.bf16.mxu0 %v20286_v1  ;;  %v7251_v1 = vcombine.high %v22207_v58, %v22220_v3  ;;  %v20307_v3 = vld [vmem:[%s21122_s15 + $0x16c4] ss:$72 sps:$4 sm:$0xff]  }
 0x39d   : > { %7118 = vmatpush1.bf16.msra.mxu0 %v20284_v40  ;;  %v8077_v17 = vpop.permute.xlu0 %8076 }
 0x39e   : > { %7119 = vmatprep.subr.bf16.mxu0 %v20289_v51 }
 0x39f   : > { %v8085_v37 = vpop.permute.xlu1 %8084 }
 0x3a0   : > { %v8154_v44 = vcombine.low %v8077_v17, %v8085_v37  ;;  %v8155_v9 = vcombine.high %v8077_v17, %v8085_v37  ;;  %v7258_v17 = vrot.slane %v7250_v32, %v21760_v13  ;;  %v7265_v37 = vrot.slane %v7251_v1, %v21760_v13 }
 0x3a1   : > { %7120 = vmatpush1.bf16.msra.mxu0 %v20287_v54  ;;  %v7189_v39 = vpop.permute.xlu0 %7188  ;;  %v20302_v54 = vld [vmem:[%s21122_s15 + $0x1630] ss:$72 sps:$4 sm:$0xff]  }
 0x3a2   : > { %7121 = vmatprep.subr.bf16.mxu0 %v20292_v16  ;;  %v8162_v40 = vrot.slane %v8154_v44, %v21760_v13  ;;  %v8169_v51 = vrot.slane %v8155_v9, %v21760_v13  ;;  %v8146_v16 = vrot.slane %v8138_v31, %v21760_v13 }
 0x3a3   : > { %v7197_v30 = vpop.permute.xlu1 %7196 }
 0x3a4   : > { %v7266_v36 = vcombine.low %v7189_v39, %v7197_v30  ;;  %v7267_v28 = vcombine.high %v7189_v39, %v7197_v30  ;;  %v20310_v30 = vld [vmem:[%s21122_s15 + $0x1754] ss:$72 sps:$4 sm:$0xff]  }
 0x3a5   : > { %7122 = vmatpush1.bf16.msra.mxu0 %v20290_v59  ;;  %v8153_v59 = vrot.slane %v8139_v46, %v21760_v13 }
 0x3a6   : > { %7123 = vmatprep.subr.bf16.mxu0 %v20295_v15  ;;  %v7274_v15 = vrot.slane %v7266_v36, %v21760_v13  ;;  %v7281_v58 = vrot.slane %v7267_v28, %v21760_v13  ;;  %v20308_v28 = vld [vmem:[%s21122_s15 + $0x1750] ss:$72 sps:$4 sm:$0xff]  }
 0x3a7   : > { %v8218_v31 = vcombine.low %v8153_v59, %v8169_v51 }
 0x3a8   : > { %v7314_v14 = vcombine.low %v7258_v17, %v7274_v15  ;;  %v7315_v61 = vcombine.high %v7258_v17, %v7274_v15  ;;  %v7330_v46 = vcombine.low %v7265_v37, %v7281_v58  ;;  %v7331_v39 = vcombine.high %v7265_v37, %v7281_v58  ;;  %v20311_v17 = vld [vmem:[%s21122_s15 + $0x17e0] ss:$72 sps:$4 sm:$0xff]  }
 0x3a9   : > { %7124 = vmatpush1.bf16.msra.mxu0 %v20293_v2  ;;  %v8202_v2 = vcombine.low %v8146_v16, %v8162_v40 }
 0x3aa   : > { %7125 = vmatprep.subr.bf16.mxu0 %v20298_v25  ;;  %v8203_v25 = vcombine.high %v8146_v16, %v8162_v40  ;;  %v7329_v32 = vrot.slane %v7315_v61, %v21767_v24  ;;  %v7338_v1 = vrot.slane %v7330_v46, %v21767_v24  ;;  %v7345_v40 = vrot.slane %v7331_v39, %v21767_v24  ;;  %v8101_v16 = vpop.permute.xlu1 %8100 }
 0x3ab   : > { %v8210_v44 = vrot.slane %v8202_v2, %v21767_v24 }
 0x3ac   : > { %v8217_v9 = vrot.slane %v8203_v25, %v21767_v24  ;;  %v17850_v25 = vcombine.low %v7338_v1, %v7345_v40 }
 0x3ad   : > { %7126 = vmatpush1.bf16.msra.mxu0 %v20296_v27  ;;  %v8219_v27 = vcombine.high %v8153_v59, %v8169_v51  ;;  %v20313_v51 = vld [vmem:[%s21122_s15 + $0x17e4] ss:$72 sps:$4 sm:$0xff]  }
 0x3ae   : > { %7127 = vmatprep.subr.bf16.mxu0 %v20301_v53  ;;  %v20305_v53 = vld [vmem:[%s21122_s15 + $0x16c0] ss:$72 sps:$4 sm:$0xff]   ;;  %v17866_v59 = vcombine.low %v8210_v44, %v8217_v9  ;;  %v17868_v15 = vcombine.high %v8210_v44, %v8217_v9  ;;  %v20314_v44 = vld [vmem:[%s21122_s15 + $0x1870] ss:$72 sps:$4 sm:$0xff]  }
 0x3af   : > { %v8233_v36 = vrot.slane %v8219_v27, %v21767_v24  ;;  %v20316_v27 = vld [vmem:[%s21122_s15 + $0x1874] ss:$72 sps:$4 sm:$0xff]  }
 0x3b1   : > { %7128 = vmatpush1.bf16.msra.mxu0 %v20299_v21  ;;  %v8226_v21 = vrot.slane %v8218_v31, %v21767_v24  ;;  %v17852_v31 = vcombine.high %v7338_v1, %v7345_v40 }
 0x3b2   : > { %7129 = vmatprep.subr.bf16.mxu0 %v20304_v20  ;;  %v7322_v20 = vrot.slane %v7314_v14, %v21767_v24  ;;  %v22422_v14 = vrot.slane %v17868_v15, %v21760_v13 }
 0x3b3   : > { %v17870_v58 = vcombine.low %v8226_v21, %v8233_v36 }
 0x3b4   : > { %v17846_v37 = vcombine.low %v7322_v20, %v7329_v32  ;;  %v17848_v2 = vcombine.high %v7322_v20, %v7329_v32  ;;  %v20319_v20 = vld [vmem:[%s21122_s15 + $0x1904] ss:$72 sps:$4 sm:$0xff]  }
 0x3b5   : > { %7130 = vmatpush1.bf16.msra.mxu0 %v20302_v54  ;;  %v8093_v54 = vpop.permute.xlu0 %8092  ;;  %v22425_v61 = vrot.slane %v17870_v58, %v21760_v13 }
 0x3b6   : > { %7131 = vmatprep.subr.bf16.mxu0 %v20307_v3  ;;  %v17872_v3 = vcombine.high %v8226_v21, %v8233_v36  ;;  %v22432_v9 = vrot.slane %v17846_v37, %v21760_v13  ;;  %v22435_v21 = vrot.slane %v17848_v2, %v21760_v13  ;;  %v22438_v36 = vrot.slane %v17850_v25, %v21760_v13 }
 0x3b7   : > { %v8258_v40 = vcombine.low %v8093_v54, %v8101_v16  ;;  %v8259_v37 = vcombine.high %v8093_v54, %v8101_v16  ;;  %v20320_v16 = vld [vmem:[%s21122_s15 + $0x1990] ss:$72 sps:$4 sm:$0xff]  }
 0x3b8   : > { %v22428_v46 = vrot.slane %v17872_v3, %v21760_v13 }
 0x3b9   : > { %7132 = vmatpush1.bf16.msra.mxu0 %v20305_v53  ;;  %v22419_v53 = vrot.slane %v17866_v59, %v21760_v13  ;;  %v7205_v39 = vpop.permute.xlu0 %7204  ;;  %v7706_v59 = vcombine.low %v22432_v9, %v22435_v21 }
 0x3ba   : > { %7133 = vmatprep.subr.bf16.mxu0 %v20310_v30  ;;  %v7213_v30 = vpop.permute.xlu1 %7212  ;;  %v8626_v1 = vcombine.low %v22425_v61, %v22428_v46 }
 0x3bb   : > { %v8594_v32 = vcombine.low %v22419_v53, %v22422_v14  ;;  %v22462_v38 = vrot.slane %v7706_v59, %v21767_v24  ;;  %v7370_v54 = vcombine.low %v7205_v39, %v7213_v30  ;;  %v7354_v59 = vcombine.low %v22256_v23, %v22263_v33 }
 0x3bc   : > { %v8634_v3 = vrot.slane %v8626_v1, %v21767_v24  ;;  %v8250_v1 = vrot.slane %v8242_v60, %v21760_v13  ;;  %v7355_v60 = vcombine.high %v22256_v23, %v22263_v33  ;;  %v20328_v23 = vld [vmem:[%s21122_s15 + $0x1ab4] ss:$72 sps:$4 sm:$0xff]   ;;  %v7423_v33 = vcombine.high %v22279_v8, %v22286_v43 }
 0x3bd   : > { %7134 = vmatpush1.bf16.msra.mxu0 %v20308_v28  ;;  %v22441_v28 = vrot.slane %v17852_v31, %v21760_v13  ;;  %v8602_v58 = vrot.slane %v8594_v32, %v21767_v24  ;;  %v22456_v2 = vpop.permute.xlu0 %8062  ;;  %v7378_v42 = vrot.slane %v7370_v54, %v21760_v13  ;;  %v8311_v54 = vcombine.high %v21893_v57, %v21904_v0 }
 0x3be   : > { %7135 = vmatprep.subr.bf16.mxu0 %v20313_v51  ;;  %v20317_v51 = vld [vmem:[%s21122_s15 + $0x1900] ss:$72 sps:$4 sm:$0xff]   ;;  %v22458_v25 = vpop.permute.xlu1 %8070 }
 0x3bf   : > { %v7738_v15 = vcombine.low %v22438_v36, %v22441_v28  ;;  %v8646_v31 = vcombine.low %v8602_v58, %v8634_v3  ;;  %v8647_v18 = vcombine.high %v8602_v58, %v8634_v3 }
 0x3c1   : > { %7136 = vmatpush1.bf16.msra.mxu0 %v20311_v17  ;;  %v20322_v17 = vld [vmem:[%s21122_s15 + $0x1994] ss:$72 sps:$4 sm:$0xff]   ;;  %v22465_v32 = vrot.slane %v7738_v15, %v21767_v24  ;;  %v8257_v15 = vrot.slane %v8243_v5, %v21760_v13  ;;  %v7422_v5 = vcombine.low %v22279_v8, %v22286_v43  ;;  %v8927_v58 = vpack.c.bf16 %v8647_v18, %v8647_v18 }
 0x3c2   : > { %7137 = vmatprep.subr.bf16.mxu0 %v20316_v27  ;;  %v8266_v27 = vrot.slane %v8258_v40, %v21760_v13 }
 0x3c3   : > { %v10069_v18 = vsel %vm9834_vm1, %v8927_v58, 0  ;;  %v22576_v58 = vrot.slane %v22140_v55, %v22180_v63 }
 0x3c5   : > { %7138 = vmatpush1.bf16.msra.mxu0 %v20314_v44  ;;  %v8926_v44 = vpack.c.bf16 %v8646_v31, %v8646_v31  ;;  %v20325_v31 = vld [vmem:[%s21122_s15 + $0x1a24] ss:$72 sps:$4 sm:$0xff]  }
 0x3c6   : > { %7139 = vmatprep.subr.bf16.mxu0 %v20319_v20  ;;  %v8273_v20 = vrot.slane %v8259_v37, %v21760_v13  ;;  %v22483_v37 = vpop.permute.xlu1 %7182 }
 0x3c7   : > { %v10023_v40 = vsel %vm9834_vm1, %v8926_v44, 0  ;;  %v8275_v44 = vcombine.high %v8250_v1, %v8266_v27 }
 0x3c8   : > { %18559 = vmatpush3.bf16.xpose.msra.mxu1 %v10023_v40  ;;  %v8290_v35 = vcombine.low %v8257_v15, %v8273_v20  ;;  %v8291_v19 = vcombine.high %v8257_v15, %v8273_v20  ;;  %v8310_v20 = vcombine.low %v21893_v57, %v21904_v0 }
 0x3c9   : > { %7140 = vmatpush1.bf16.msra.mxu0 %v20317_v51  ;;  %v7371_v51 = vcombine.high %v7205_v39, %v7213_v30  ;;  %v8274_v39 = vcombine.low %v8250_v1, %v8266_v27  ;;  %v7758_v30 = vcombine.low %v22462_v38, %v22465_v32  ;;  %18564 = vmatprep.subr.bf16.mxu1 %v24574_v41  ;;  %v20326_v41 = vld [vmem:[%s21122_s15 + $0x1ab0] ss:$72 sps:$4 sm:$0xff]   ;;  %s23651_s15 = scalar_lea.vmem %s24561_s3, %s18969_s29 }
 0x3ca   : > { %7141 = vmatprep.subr.bf16.mxu0 %v20322_v17  ;;  %v22481_v17 = vpop.permute.xlu0 %7174  ;;  %v7362_v27 = vrot.slane %v7354_v59, %v21760_v13  ;;  %v8289_v3 = vrot.slane %v8275_v44, %v21767_v24  ;;  %v8305_v8 = vrot.slane %v8291_v19, %v21767_v24  ;;  %v22510_v15 = vpop.permute.xlu1 %8086  ;;  %v22522_v19 = vrot.slane %v8310_v20, %v21760_v13 }
 0x3cb   : > { %v7385_v40 = vrot.slane %v7371_v51, %v21760_v13  ;;  %v8282_v1 = vrot.slane %v8274_v39, %v21767_v24  ;;  %v8038_v51 = vpack.c.bf16 %v7758_v30, %v7758_v30  ;;  %v22516_v39 = vrot.slane %v7422_v5, %v21760_v13 }
 0x3cc   : > { %v7386_v43 = vcombine.low %v7362_v27, %v7378_v42  ;;  %v7387_v57 = vcombine.high %v7362_v27, %v7378_v42  ;;  %v22525_v30 = vrot.slane %v8311_v54, %v21760_v13  ;;  %v22531_v44 = vrot.slane %v8342_v11, %v21760_v13 }
 0x3cd   : > { %7142 = vmatpush1.bf16.msra.mxu0 %v20320_v16  ;;  %v7369_v16 = vrot.slane %v7355_v60, %v21760_v13  ;;  %v22537_v42 = vrot.slane %v8343_v12, %v21760_v13  ;;  %v24581_v11 = vcombine.high %v22202_v47, %v22213_v10  ;;  %v8650_v22 = vcombine.low %v8282_v1, %v8289_v3 }
 0x3ce   : > { %7143 = vmatprep.subr.bf16.mxu0 %v20325_v31  ;;  %v8298_v31 = vrot.slane %v8290_v35, %v21767_v24  ;;  %v22508_v59 = vpop.permute.xlu0 %8078  ;;  %v22519_v35 = vrot.slane %v7423_v33, %v21760_v13  ;;  %v17873_v48 = vcombine.high %v8282_v1, %v8289_v3  ;;  %v7394_v33 = vrot.slane %v7386_v43, %v21767_v24 }
 0x3cf   : > { %v7402_v0 = vcombine.low %v7369_v16, %v7385_v40  ;;  %v7403_v60 = vcombine.high %v7369_v16, %v7385_v40  ;;  %18561 = vmatmul.mubr.msk.bf16.vlgmr.msra.gmra.mrb[32].mxu1 %vm9834_vm1, %v8038_v51  ;;  %v24580_v40 = vmov 0.0   ;;  %v7401_v27 = vrot.slane %v7387_v57, %v21767_v24  ;;  %v22561_v51 = vpop.permute.xlu1 %7198 }
 0x3d0   : > { %18565 = vmatpush3.bf16.xpose.msra.mxu1 %v10069_v18  ;;  %18566 = vmatprep.mubr.msk.bf16.mxu1 %vm21026_vm0, %v24580_v40  ;;  %v8666_v12 = vcombine.low %v8298_v31, %v8305_v8  ;;  %v7707_v3 = vcombine.high %v22432_v9, %v22435_v21  ;;  %v7739_v43 = vcombine.high %v22438_v36, %v22441_v28 }
 0x3d1   : > { %7144 = vmatpush1.bf16.msra.mxu0 %v20323_v45  ;;  %v24579_v45 = vcombine.low %v22202_v47, %v22213_v10  ;;  %18570 = vmatprep.subr.bf16.mxu1 %v24580_v40  ;;  %v7410_v20 = vrot.slane %v7402_v0, %v21767_v24  ;;  %v7417_v54 = vrot.slane %v7403_v60, %v21767_v24  ;;  %v24582_v10 = vsub.s32 6, %v21586_v62 }
 0x3d2   : > { %7145 = vmatprep.subr.bf16.mxu0 %v20328_v23  ;;  %v22552_v23 = vrot.slane %v24581_v11, %v21760_v13  ;;  %v22559_v16 = vpop.permute.xlu0 %7190  ;;  %v7759_v47 = vcombine.high %v22462_v38, %v22465_v32  ;;  %v17874_v38 = vcombine.high %v8298_v31, %v8305_v8  ;;  %v24583_v32 = vsub.s32 7, %v21586_v62 }
 0x3d3   : > { %v22543_v5 = vrot.slane %v24579_v45, %v21760_v13  ;;  %v22572_v1 = vrot.slane %v22140_v55, %v24582_v10  ;;  %v8657_v0 = vrot.slane %v8650_v22, %v21760_v13  ;;  %v8665_v60 = vrot.slane %v17873_v48, %v21760_v13 }
 0x3d4   : > { %v22586_v57 = vrot.slane %v22140_v55, %v24583_v32  ;;  %v8673_v18 = vrot.slane %v8666_v12, %v21760_v13  ;;  %v8358_v9 = vcombine.low %v22508_v59, %v22510_v15  ;;  %v7762_v21 = vcombine.low %v7394_v33, %v7401_v27  ;;  %v8103_v12 = vpop.permute.xlu1 %8102 }
 0x3d5   : > { %7146 = vmatpush1.bf16.msra.mxu0 %v20326_v41  ;;  %v22567_v41 = vrot.slane %v22140_v55, %v22165_v6  ;;  %v17853_v36 = vcombine.high %v7394_v33, %v7401_v27  ;;  %v8359_v62 = vcombine.high %v22508_v59, %v22510_v15  ;;  %v17854_v55 = vcombine.high %v7410_v20, %v7417_v54 }
 0x3d6   : > { %18678 = vmatprep.subr.bf16.mxu0 %v24580_v40  ;;  %v8039_v28 = vpack.c.bf16 %v7759_v47, %v7759_v47  ;;  %v8595_v31 = vcombine.high %v22419_v53, %v22422_v14  ;;  %v8627_v8 = vcombine.high %v22425_v61, %v22428_v46  ;;  %v8681_v45 = vrot.slane %v17874_v38, %v21760_v13  ;;  %v8095_v15 = vpop.permute.xlu0 %8094 }
 0x3d7   : > { %v8326_v11 = vcombine.low %v22456_v2, %v22458_v25  ;;  %v8327_v22 = vcombine.high %v22456_v2, %v22458_v25  ;;  %v7438_v48 = vcombine.low %v22481_v17, %v22483_v37  ;;  %v8366_v59 = vrot.slane %v8358_v9, %v21760_v13 }
 0x3d8   : > { %7148 = vmatmul.mubr.bf16.vlgmr.msra.gmra.mrb[16].mxu0 %v21356_v26  ;;  %v7778_v26 = vcombine.low %v7410_v20, %v7417_v54  ;;  %18567 = vmatmul.mubr.msk.bf16.vlgmr.msra.gmra.mrb[36].mxu1 %vm9834_vm1, %v8039_v28  ;;  %v8609_v53 = vrot.slane %v8595_v31, %v21767_v24  ;;  %v8641_v14 = vrot.slane %v8627_v8, %v21767_v24 }
 0x3d9   : > { %18680 = vmatprep.mubr.msk.bf16.mxu0 %vm21026_vm0, %v24580_v40  ;;  %v8682_v61 = vcombine.low %v8657_v0, %v8665_v60  ;;  %v22613_v46 = vrot.slane %v7762_v21, %v21760_v13  ;;  %v22616_v33 = vrot.slane %v17853_v36, %v21760_v13  ;;  %v7439_v2 = vcombine.high %v22481_v17, %v22483_v37 }
 0x3da   : > { %v22621_v25 = vrot.slane %v8359_v62, %v21760_v13  ;;  %18572 = vmatprep.mubr.msk.bf16.mxu1 %vm21026_vm0, %v24580_v40  ;;  %v22626_v27 = vrot.slane %v7778_v26, %v21760_v13  ;;  %v22629_v20 = vrot.slane %v17854_v55, %v21760_v13  ;;  %v8648_v54 = vcombine.low %v8609_v53, %v8641_v14 }
 0x3db   : > { %v8649_v47 = vcombine.high %v8609_v53, %v8641_v14  ;;  %v22632_v10 = vrot.slane %v8326_v11, %v21760_v13  ;;  %v8462_v38 = vcombine.low %v8095_v15, %v8103_v12  ;;  %v8690_v17 = vrot.slane %v8682_v61, %v21767_v24 }
 0x3dc   : > { %v8698_v37 = vcombine.low %v8673_v18, %v8681_v45  ;;  %v8406_v32 = vcombine.low %v22531_v44, %v8366_v59  ;;  %v8928_v9 = vpack.c.bf16 %v8648_v54, %v8648_v54  ;;  %v22637_v21 = vrot.slane %v7707_v3, %v21767_v24 }
 0x3dd   : > { %v7753_v36 = vrot.slane %v7739_v43, %v21767_v24  ;;  %v8407_v26 = vcombine.high %v22531_v44, %v8366_v59  ;;  %v8422_v62 = vcombine.low %v22537_v42, %v22621_v25  ;;  %v8683_v28 = vcombine.high %v8657_v0, %v8665_v60 }
 0x3de   : > { %v8706_v55 = vrot.slane %v8698_v37, %v21767_v24  ;;  %v22645_v31 = vrot.slane %v8327_v22, %v21760_v13  ;;  %v22648_v8 = vrot.slane %v7438_v48, %v21760_v13  ;;  %v10115_v11 = vsel %vm9834_vm1, %v8928_v9, 0 }
 0x3df   : > { %v8699_v3 = vcombine.high %v8673_v18, %v8681_v45  ;;  %v8463_v53 = vcombine.high %v8095_v15, %v8103_v12  ;;  %v8470_v43 = vrot.slane %v8462_v38, %v21760_v13  ;;  %18571 = vmatpush3.bf16.xpose.msra.mxu1 %v10115_v11  ;;  %v22657_v14 = vrot.slane %v7439_v2, %v21760_v13 }
 0x3e0   : > { %v22652_v44 = vcombine.low %v8690_v17, %v8706_v55  ;;  %v22654_v59 = vcombine.high %v8690_v17, %v8706_v55  ;;  %v7760_v0 = vcombine.low %v22637_v21, %v7753_v36  ;;  %18576 = vmatprep.subr.bf16.mxu1 %v24580_v40  ;;  %v8697_v60 = vrot.slane %v8683_v28, %v21767_v24 }
 0x3e1   : > { %v8713_v22 = vrot.slane %v8699_v3, %v21767_v24  ;;  %v8414_v18 = vrot.slane %v8406_v32, %v21767_v24  ;;  %v8421_v45 = vrot.slane %v8407_v26, %v21767_v24  ;;  %v8423_v48 = vcombine.high %v22537_v42, %v22621_v25 }
 0x3e2   : > { %v22668_v15 = vrot.slane %v8422_v62, %v21767_v24  ;;  %v8929_v61 = vpack.c.bf16 %v8649_v47, %v8649_v47  ;;  %v8477_v32 = vrot.slane %v8463_v53, %v21760_v13  ;;  %v8478_v9 = vcombine.low %v22543_v5, %v8470_v43 }
 0x3e3   : > { %v22670_v2 = vcombine.low %v8697_v60, %v8713_v22  ;;  %v22675_v37 = vcombine.high %v8697_v60, %v8713_v22  ;;  %v8479_v62 = vcombine.high %v22543_v5, %v8470_v43  ;;  %v8040_v55 = vpack.c.bf16 %v7760_v0, %v7760_v0 }
 0x3e6   : > { %18573 = vmatmul.mubr.msk.bf16.vlgmr.msra.gmra.mrb[40].mxu1 %vm9834_vm1, %v8040_v55  ;;  %v8374_v55 = vcombine.low %v22522_v19, %v22632_v10 }
 0x3e7   : > { %18578 = vmatprep.mubr.msk.bf16.mxu1 %vm21026_vm0, %v24580_v40 }
 0x3e8   : > { %v6891_v12 = vpop.f32.mrb[12].mxu0 }
 0x3e9   : > { %v22673_v54 = vadd.f32 %v6891_v12, %v22567_v41  ;;  %v7020_v38 = vpop.f32.mrb[12].mxu1  ;;  %v6893_v17 = vpop.f32.mrb[13].mxu0 }
 0x3ea   : > { %v22680_v42 = vadd.f32 %v7020_v38, %v22572_v1  ;;  %v22683_v25 = vadd.f32 %v6893_v17, %v22576_v58  ;;  %v7022_v47 = vpop.f32.mrb[13].mxu1  ;;  %v6895_v26 = vpop.f32.mrb[14].mxu0  ;;  %v17876_v17 = vcombine.low %v8414_v18, %v8421_v45 }
 0x3eb   : > { %v22687_v28 = vadd.f32 %v7022_v47, %v22586_v57  ;;  %v22690_v11 = vadd.f32 %v6895_v26, %v22567_v41  ;;  %v7024_v3 = vpop.f32.mrb[14].mxu1  ;;  %v6897_v53 = vpop.f32.mrb[15].mxu0  ;;  %8948 = vrot.lane.b32.xlu1 %v22673_v54, %s21022_s24  ;;  %v10161_v41 = vsel %vm9834_vm1, %v8929_v61, 0  ;;  %v17878_v47 = vcombine.high %v8414_v18, %v8421_v45 }
 0x3ec   : > { %v22699_v5 = vadd.f32 %v7024_v3, %v22572_v1  ;;  %v22702_v43 = vadd.f32 %v6897_v53, %v22576_v58  ;;  %v7026_v0 = vpop.f32.mrb[15].mxu1  ;;  %8956 = vrot.lane.b32.xlu0 %v22683_v25, %s21022_s24  ;;  %v8437_v58 = vrot.slane %v8423_v48, %v21767_v24  ;;  %18577 = vmatpush3.bf16.xpose.msra.mxu1 %v10161_v41 }
 0x3ed   : > { %v22713_v1 = vadd.f32 %v7026_v0, %v22586_v57  ;;  %v7794_v61 = vcombine.low %v22613_v46, %v22616_v33  ;;  %v7810_v26 = vcombine.low %v22626_v27, %v22629_v20  ;;  %v7761_v57 = vcombine.high %v22637_v21, %v7753_v36  ;;  %18582 = vmatprep.subr.bf16.mxu1 %v24580_v40 }
 0x3ee   : > { %v8375_v18 = vcombine.high %v22522_v19, %v22632_v10  ;;  %v8494_v45 = vcombine.low %v22552_v23, %v8477_v32  ;;  %v8495_v48 = vcombine.high %v22552_v23, %v8477_v32  ;;  %v8390_v3 = vcombine.low %v22525_v30, %v22645_v31 }
 0x3ef   : > { %8964 = vrot.lane.b32.xlu1 %v22680_v42, %s21022_s24  ;;  %v8486_v21 = vrot.slane %v8478_v9, %v21767_v24  ;;  %v8493_v36 = vrot.slane %v8479_v62, %v21767_v24  ;;  %v8930_v19 = vpack.c.bf16 %v22652_v44, %v22652_v44  ;;  %v8733_v10 = vrot.slane %v17876_v17, %v21760_v13 }
 0x3f0   : > { %8972 = vrot.lane.b32.xlu0 %v22687_v28, %s21022_s24  ;;  %v8749_v23 = vrot.slane %v17878_v47, %v21760_v13  ;;  %v17880_v32 = vcombine.low %v22668_v15, %v8437_v58  ;;  %v17882_v53 = vcombine.high %v22668_v15, %v8437_v58  ;;  %v8391_v0 = vcombine.high %v22525_v30, %v22645_v31 }
 0x3f1   : > { %v8041_v41 = vpack.c.bf16 %v7761_v57, %v7761_v57  ;;  %v7802_v38 = vrot.slane %v7794_v61, %v21767_v24  ;;  %v7818_v9 = vrot.slane %v7810_v26, %v21767_v24  ;;  %v8382_v44 = vrot.slane %v8374_v55, %v21767_v24 }
 0x3f2   : > { %v8502_v17 = vrot.slane %v8494_v45, %v21767_v24  ;;  %v8509_v47 = vrot.slane %v8495_v48, %v21767_v24  ;;  %v8389_v12 = vrot.slane %v8375_v18, %v21767_v24  ;;  %v8854_v15 = vcombine.low %v8486_v21, %v8493_v36 }
 0x3f3   : > { %v17883_v58 = vcombine.high %v8486_v21, %v8493_v36  ;;  %18579 = vmatmul.mubr.msk.bf16.vlgmr.msra.gmra.mrb[44].mxu1 %vm9834_vm1, %v8041_v41  ;;  %v10207_v30 = vsel %vm9834_vm1, %v8930_v19, 0  ;;  %v8765_v31 = vrot.slane %v17880_v32, %v21760_v13  ;;  %v8781_v61 = vrot.slane %v17882_v53, %v21760_v13 }
 0x3f4   : > { %18583 = vmatpush3.bf16.xpose.msra.mxu1 %v10207_v30  ;;  %18584 = vmatprep.mubr.msk.bf16.mxu1 %vm21026_vm0, %v24580_v40  ;;  %v8798_v55 = vcombine.low %v8733_v10, %v8749_v23  ;;  %v7811_v57 = vcombine.high %v22626_v27, %v22629_v20  ;;  %v8398_v18 = vrot.slane %v8390_v3, %v21767_v24 }
 0x3f5   : > { %v8405_v45 = vrot.slane %v8391_v0, %v21767_v24  ;;  %v7826_v48 = vcombine.low %v7802_v38, %v7818_v9  ;;  %18588 = vmatprep.subr.bf16.mxu1 %v24580_v40  ;;  %v7486_v36 = vcombine.low %v22516_v39, %v22648_v8  ;;  %v7487_v19 = vcombine.high %v22516_v39, %v22648_v8 }
 0x3f6   : > { %v22760_v26 = vpop.f32.mrb[16].mxu1  ;;  %v8870_v32 = vcombine.low %v8502_v17, %v8509_v47  ;;  %v17884_v53 = vcombine.high %v8502_v17, %v8509_v47  ;;  %v7502_v27 = vcombine.low %v22519_v35, %v22657_v14  ;;  %v22774_v20 = vrot.slane %v8854_v15, %v21760_v13 }
 0x3f7   : > { %v18538_v21 = vpop.f32.mrb[17].mxu1  ;;  %v8869_v3 = vrot.slane %v17883_v58, %v21760_v13  ;;  %v8931_v0 = vpack.c.bf16 %v22654_v59, %v22654_v59  ;;  %v17877_v22 = vcombine.high %v8382_v44, %v8389_v12  ;;  %v8806_v60 = vrot.slane %v8798_v55, %v21767_v24 }
 0x3f8   : > { %v9878_v41 = vpop.f32.mrb[18].mxu1  ;;  %v17875_v21 = vcombine.low %v8382_v44, %v8389_v12  ;;  %v8830_v39 = vcombine.low %v8765_v31, %v8781_v61  ;;  %v17879_v8 = vcombine.low %v8398_v18, %v8405_v45  ;;  %v8042_v17 = vpack.c.bf16 %v7826_v48, %v7826_v48 }
 0x3f9   : > { %v18539_v30 = vpop.f32.mrb[19].mxu1  ;;  %v8799_v47 = vcombine.high %v8733_v10, %v8749_v23  ;;  %v8831_v41 = vcombine.high %v8765_v31, %v8781_v61  ;;  %v17881_v62 = vcombine.high %v8398_v18, %v8405_v45  ;;  %v8877_v63 = vrot.slane %v8870_v32, %v21760_v13 }
 0x3fa   : > { %v8885_v15 = vrot.slane %v17884_v53, %v21760_v13  ;;  %v8838_v58 = vrot.slane %v8830_v39, %v21767_v24  ;;  %v10253_v59 = vsel %vm9834_vm1, %v8931_v0, 0  ;;  %v8886_v55 = vcombine.low %v22774_v20, %v8869_v3 }
 0x3fb   : > { %18585 = vmatmul.mubr.msk.bf16.vlgmr.msra.gmra.mrb[48].mxu1 %vm9834_vm1, %v8042_v17  ;;  %v8813_v12 = vrot.slane %v8799_v47, %v21767_v24  ;;  %v8845_v44 = vrot.slane %v8831_v41, %v21767_v24  ;;  %v7503_v10 = vcombine.high %v22519_v35, %v22657_v14  ;;  %v7494_v18 = vrot.slane %v7486_v36, %v21767_v24 }
 0x3fc   : > { %18589 = vmatpush3.bf16.xpose.msra.mxu1 %v10253_v59  ;;  %18590 = vmatprep.mubr.msk.bf16.mxu1 %vm21026_vm0, %v24580_v40  ;;  %v22794_v31 = vcombine.low %v8806_v60, %v8838_v58  ;;  %v22796_v61 = vcombine.high %v8806_v60, %v8838_v58  ;;  %v7501_v45 = vrot.slane %v7487_v19, %v21767_v24 }
 0x3fd   : > { %v7827_v48 = vcombine.high %v7802_v38, %v7818_v9  ;;  %18594 = vmatprep.subr.bf16.mxu1 %v24580_v40  ;;  %v22801_v53 = vcombine.low %v8813_v12, %v8845_v44  ;;  %v22804_v35 = vrot.slane %v17875_v21, %v21760_v13  ;;  %v22807_v14 = vrot.slane %v17877_v22, %v21760_v13 }
 0x3fe   : > { %v22792_v23 = vpop.f32.mrb[20].mxu1  ;;  %v22810_v0 = vrot.slane %v17879_v8, %v21760_v13  ;;  %v22812_v30 = vcombine.high %v8813_v12, %v8845_v44  ;;  %v22815_v36 = vrot.slane %v17881_v62, %v21760_v13  ;;  %v8932_v38 = vpack.c.bf16 %v22670_v2, %v22670_v2 }
 0x3ff   : > { %v18544_v32 = vpop.f32.mrb[21].mxu1  ;;  %v8894_v19 = vrot.slane %v8886_v55, %v21767_v24  ;;  %v8902_v21 = vcombine.low %v8877_v63, %v8885_v15  ;;  %v7510_v39 = vrot.slane %v7502_v27, %v21767_v24  ;;  %v7517_v22 = vrot.slane %v7503_v10, %v21767_v24 }
 0x400   : > { %v9924_v60 = vpop.f32.mrb[22].mxu1  ;;  %v8043_v17 = vpack.c.bf16 %v7827_v48, %v7827_v48  ;;  %v24584_v8 = vcombine.high %v22613_v46, %v22616_v33  ;;  %v7825_v62 = vrot.slane %v7811_v57, %v21767_v24  ;;  %v17855_v58 = vcombine.low %v7494_v18, %v7501_v45 }
 0x401   : > { %v18545_v9 = vpop.f32.mrb[23].mxu1  ;;  %v8910_v41 = vrot.slane %v8902_v21, %v21767_v24  ;;  %v8782_v2 = vcombine.low %v22804_v35, %v22807_v14  ;;  %v8887_v59 = vcombine.high %v22774_v20, %v8869_v3  ;;  %v8903_v12 = vcombine.high %v8877_v63, %v8885_v15 }
 0x402   : > { %v7809_v47 = vrot.slane %v24584_v8, %v21767_v24  ;;  %v10299_v27 = vsel %vm9834_vm1, %v8932_v38, 0  ;;  %v8814_v44 = vcombine.low %v22810_v0, %v22815_v36  ;;  %v17857_v57 = vcombine.high %v7494_v18, %v7501_v45 }
 0x403   : > { %18591 = vmatmul.mubr.msk.bf16.vlgmr.msra.gmra.mrb[52].mxu1 %vm9834_vm1, %v8043_v17  ;;  %v22835_v46 = vcombine.low %v8894_v19, %v8910_v41  ;;  %v22837_v33 = vcombine.high %v8894_v19, %v8910_v41  ;;  %v8901_v63 = vrot.slane %v8887_v59, %v21767_v24  ;;  %v8917_v20 = vrot.slane %v8903_v12, %v21767_v24 }
 0x404   : > { %18595 = vmatpush3.bf16.xpose.msra.mxu1 %v10299_v27  ;;  %18596 = vmatprep.mubr.msk.bf16.mxu1 %vm21026_vm0, %v24580_v40  ;;  %v17859_v3 = vcombine.low %v7510_v39, %v7517_v22  ;;  %v17861_v15 = vcombine.high %v7510_v39, %v7517_v22  ;;  %v7828_v10 = vcombine.low %v7809_v47, %v7825_v62 }
 0x405   : > { %18600 = vmatprep.subr.bf16.mxu1 %v24580_v40  ;;  %v22846_v60 = vcombine.low %v8901_v63, %v8917_v20  ;;  %v22848_v18 = vcombine.high %v8901_v63, %v8917_v20  ;;  %v8933_v45 = vpack.c.bf16 %v22675_v37, %v22675_v37  ;;  %v8790_v38 = vrot.slane %v8782_v2, %v21767_v24 }
 0x406   : > { %v22841_v55 = vpop.f32.mrb[24].mxu1  ;;  %v8822_v9 = vrot.slane %v8814_v44, %v21767_v24  ;;  %v22855_v21 = vrot.slane %v17855_v58, %v21760_v13  ;;  %v22858_v39 = vrot.slane %v17857_v57, %v21760_v13  ;;  %v22861_v22 = vrot.slane %v17859_v3, %v21760_v13 }
 0x407   : > { %v18550_v48 = vpop.f32.mrb[25].mxu1  ;;  %v22864_v17 = vrot.slane %v17861_v15, %v21760_v13  ;;  %v8044_v8 = vpack.c.bf16 %v7828_v10, %v7828_v10  ;;  %v10345_v37 = vsel %vm9834_vm1, %v8933_v45, 0  ;;  %v10940_v2 = vsel %vm10939_vm2, %v22760_v26, -inf }
 0x408   : > { %v9970_v32 = vpop.f32.mrb[26].mxu1  ;;  %v8846_v41 = vcombine.low %v8790_v38, %v8822_v9  ;;  %v7894_v59 = vcombine.low %v22855_v21, %v22858_v39  ;;  %v7829_v27 = vcombine.high %v7809_v47, %v7825_v62  ;;  %v10946_v3 = vsel %vm10939_vm2, %v22841_v55, -inf }
 0x409   : > { %v18551_v19 = vpop.f32.mrb[27].mxu1  ;;  %v7926_v12 = vcombine.low %v22861_v22, %v22864_v17  ;;  %v10943_v32 = vsel %vm10939_vm2, %v22792_v23, -inf  ;;  %v8847_v62 = vcombine.high %v8790_v38, %v8822_v9  ;;  %v8783_v45 = vcombine.high %v22804_v35, %v22807_v14 }
 0x40a   : > { %v8934_v63 = vpack.c.bf16 %v8846_v41, %v8846_v41  ;;  %v8045_v15 = vpack.c.bf16 %v7829_v27, %v7829_v27  ;;  %v7902_v10 = vrot.slane %v7894_v59, %v21767_v24  ;;  %v8815_v19 = vcombine.high %v22810_v0, %v22815_v36 }
 0x40b   : > { %18597 = vmatmul.mubr.msk.bf16.vlgmr.msra.gmra.mrb[56].mxu1 %vm9834_vm1, %v8044_v8  ;;  %v7934_v48 = vrot.slane %v7926_v12, %v21767_v24  ;;  %v7470_v8 = vcombine.low %v22559_v16, %v22561_v51  ;;  %v7454_v35 = vcombine.low %v22300_v34, %v22306_v29  ;;  %v7455_v14 = vcombine.high %v22300_v34, %v22306_v29 }
 0x40c   : > { %18601 = vmatpush3.bf16.xpose.msra.mxu1 %v10345_v37  ;;  %18602 = vmatprep.mubr.msk.bf16.mxu1 %vm21026_vm0, %v24580_v40  ;;  %v10391_v47 = vsel %vm9834_vm1, %v8934_v63, 0  ;;  %v7471_v37 = vcombine.high %v22559_v16, %v22561_v51  ;;  %v8935_v0 = vpack.c.bf16 %v8847_v62, %v8847_v62  ;;  %v8797_v16 = vrot.slane %v8783_v45, %v21767_v24 }
 0x40d   : > { %18606 = vmatprep.subr.bf16.mxu1 %v24580_v40  ;;  %v7958_v38 = vcombine.low %v7902_v10, %v7934_v48  ;;  %v8829_v51 = vrot.slane %v8815_v19, %v21767_v24  ;;  %v7478_v36 = vrot.slane %v7470_v8, %v21760_v13  ;;  %v7462_v59 = vrot.slane %v7454_v35, %v21760_v13 }
 0x40e   : > { %v22870_v58 = vpop.f32.mrb[28].mxu1  ;;  %v7485_v9 = vrot.slane %v7471_v37, %v21760_v13  ;;  %v7469_v12 = vrot.slane %v7455_v14, %v21760_v13  ;;  %v10437_v27 = vsel %vm9834_vm1, %v8935_v0, 0  ;;  %v7895_v63 = vcombine.high %v22855_v21, %v22858_v39 }
 0x40f   : > { %v18556_v44 = vpop.f32.mrb[29].mxu1  ;;  %10941 = vmax.xlane.f32.xlu0 %v10940_v2  ;;  %v10949_v41 = vsel %vm10939_vm2, %v22870_v58, -inf  ;;  %v8046_v2 = vpack.c.bf16 %v7958_v38, %v7958_v38  ;;  %v7518_v34 = vcombine.low %v7462_v59, %v7478_v36  ;;  %v7519_v29 = vcombine.high %v7462_v59, %v7478_v36 }
 0x410   : > { %v10016_v57 = vpop.f32.mrb[30].mxu1  ;;  %v8848_v44 = vcombine.low %v8797_v16, %v8829_v51  ;;  %v7909_v37 = vrot.slane %v7895_v63, %v21767_v24 }
 0x411   : > { %v18557_v20 = vpop.f32.mrb[31].mxu1  ;;  %v7534_v57 = vcombine.low %v7469_v12, %v7485_v9  ;;  %v7533_v62 = vrot.slane %v7519_v29, %v21767_v24 }
 0x412   : > { %v7927_v20 = vcombine.high %v22861_v22, %v22864_v17  ;;  %v8849_v22 = vcombine.high %v8797_v16, %v8829_v51 }
 0x413   : > { %10947 = vmax.xlane.f32.xlu0 %v10946_v3  ;;  %10944 = vmax.xlane.f32.xlu1 %v10943_v32  ;;  %v7535_v3 = vcombine.high %v7469_v12, %v7485_v9  ;;  %v8936_v32 = vpack.c.bf16 %v8848_v44, %v8848_v44  ;;  %v7542_v45 = vrot.slane %v7534_v57, %v21767_v24  ;;  %v7207_v44 = vpop.permute.xlu0 %7206 }
 0x414   : > { %18603 = vmatmul.mubr.msk.bf16.vlgmr.msra.gmra.mrb[60].mxu1 %vm9834_vm1, %v8045_v15  ;;  %v7959_v15 = vcombine.high %v7902_v10, %v7934_v48  ;;  %v7941_v21 = vrot.slane %v7927_v20, %v21767_v24  ;;  %v8937_v35 = vpack.c.bf16 %v8849_v22, %v8849_v22 }
 0x415   : > { %18607 = vmatpush3.bf16.xpose.msra.mxu1 %v10391_v47  ;;  %18608 = vmatprep.mubr.msk.bf16.mxu1 %vm21026_vm0, %v24580_v40  ;;  %v7526_v47 = vrot.slane %v7518_v34, %v21767_v24  ;;  %v7549_v19 = vrot.slane %v7535_v3, %v21767_v24  ;;  %v10483_v39 = vsel %vm9834_vm1, %v8936_v32, 0  ;;  %v7215_v34 = vpop.permute.xlu1 %7214 }
 0x416   : > { %18612 = vmatprep.subr.bf16.mxu1 %v24580_v40  ;;  %v8047_v8 = vpack.c.bf16 %v7959_v15, %v7959_v15  ;;  %v7960_v38 = vcombine.low %v7909_v37, %v7941_v21  ;;  %v10529_v9 = vsel %vm9834_vm1, %v8937_v35, 0  ;;  %v7961_v12 = vcombine.high %v7909_v37, %v7941_v21 }
 0x417   : > { %10950 = vmax.xlane.f32.xlu0 %v10949_v41  ;;  %v17856_v17 = vcombine.low %v7526_v47, %v7533_v62  ;;  %v17858_v10 = vcombine.high %v7526_v47, %v7533_v62  ;;  %v17860_v48 = vcombine.low %v7542_v45, %v7549_v19  ;;  %v17862_v41 = vcombine.high %v7542_v45, %v7549_v19 }
 0x418   : > { %v8048_v51 = vpack.c.bf16 %v7960_v38, %v7960_v38  ;;  %v8049_v29 = vpack.c.bf16 %v7961_v12, %v7961_v12  ;;  %v7574_v3 = vcombine.low %v7207_v44, %v7215_v34  ;;  %v7575_v15 = vcombine.high %v7207_v44, %v7215_v34 }
 0x419   : > { %v7845_v14 = vrot.slane %v17856_v17, %v21760_v13  ;;  %v7861_v0 = vrot.slane %v17858_v10, %v21760_v13  ;;  %v7877_v36 = vrot.slane %v17860_v48, %v21760_v13  ;;  %v7893_v16 = vrot.slane %v17862_v41, %v21760_v13 }
 0x41a   : > { %v7559_v47 = vcombine.high %v22320_v49, %v22326_v56  ;;  %v8939_v62 = vpack.c.bf16 %v22796_v61, %v22796_v61  ;;  %v7582_v45 = vrot.slane %v7574_v3, %v21760_v13  ;;  %v7589_v19 = vrot.slane %v7575_v15, %v21760_v13 }
 0x41b   : > { %v7942_v59 = vcombine.low %v7877_v36, %v7893_v16  ;;  %v8940_v41 = vpack.c.bf16 %v22801_v53, %v22801_v53  ;;  %v8941_v44 = vpack.c.bf16 %v22812_v30, %v22812_v30 }
 0x41c   : > { %18609 = vmatmul.mubr.msk.bf16.vlgmr.msra.gmra.mrb[64].mxu1 %vm9834_vm1, %v8046_v2  ;;  %v7910_v2 = vcombine.low %v7845_v14, %v7861_v0  ;;  %v7573_v21 = vrot.slane %v7559_v47, %v21760_v13 }
 0x41d   : > { %18613 = vmatpush3.bf16.xpose.msra.mxu1 %v10437_v27  ;;  %18614 = vmatprep.mubr.msk.bf16.mxu1 %vm21026_vm0, %v24580_v40  ;;  %v8938_v27 = vpack.c.bf16 %v22794_v31, %v22794_v31  ;;  %v7950_v63 = vrot.slane %v7942_v59, %v21767_v24  ;;  %v7558_v31 = vcombine.low %v22320_v49, %v22326_v56  ;;  %v10713_v3 = vsel %vm9834_vm1, %v8941_v44, 0 }
 0x41e   : > { %18618 = vmatprep.subr.bf16.mxu1 %v24580_v40  ;;  %v7918_v57 = vrot.slane %v7910_v2, %v21767_v24  ;;  %v7606_v10 = vcombine.low %v7573_v21, %v7589_v19  ;;  %v7911_v49 = vcombine.high %v7845_v14, %v7861_v0  ;;  %v7943_v56 = vcombine.high %v7877_v36, %v7893_v16 }
 0x41f   : > { %v10575_v20 = vsel %vm9834_vm1, %v8938_v27, 0  ;;  %v7566_v37 = vrot.slane %v7558_v31, %v21760_v13  ;;  %v7607_v61 = vcombine.high %v7573_v21, %v7589_v19  ;;  %v10667_v0 = vsel %vm9834_vm1, %v8940_v41, 0 }
 0x420   : > { %v7962_v32 = vcombine.low %v7918_v57, %v7950_v63  ;;  %v7963_v48 = vcombine.high %v7918_v57, %v7950_v63  ;;  %v7925_v59 = vrot.slane %v7911_v49, %v21767_v24  ;;  %v7957_v14 = vrot.slane %v7943_v56, %v21767_v24 }
 0x421   : > { %v7590_v22 = vcombine.low %v7566_v37, %v7582_v45  ;;  %v7591_v17 = vcombine.high %v7566_v37, %v7582_v45  ;;  %v8942_v31 = vpack.c.bf16 %v22835_v46, %v22835_v46  ;;  %v8943_v37 = vpack.c.bf16 %v22837_v33, %v22837_v33 }
 0x422   : > { %v8051_v2 = vpack.c.bf16 %v7963_v48, %v7963_v48  ;;  %v7964_v27 = vcombine.low %v7925_v59, %v7957_v14  ;;  %v7965_v30 = vcombine.high %v7925_v59, %v7957_v14  ;;  %v24585_v41 = vcombine.low %v22673_v54, %v22683_v25 }
 0x423   : > { %v7598_v38 = vrot.slane %v7590_v22, %v21767_v24  ;;  %v7605_v35 = vrot.slane %v7591_v17, %v21767_v24  ;;  %v10759_v19 = vsel %vm9834_vm1, %v8942_v31, 0  ;;  %v10805_v22 = vsel %vm9834_vm1, %v8943_v37, 0 }
 0x424   : > { %18615 = vmatmul.mubr.msk.bf16.vlgmr.msra.gmra.mrb[68].mxu1 %vm9834_vm1, %v8047_v8  ;;  %v8050_v8 = vpack.c.bf16 %v7962_v32, %v7962_v32  ;;  %v8053_v47 = vpack.c.bf16 %v7965_v30, %v7965_v30 }
 0x425   : > { %18619 = vmatpush3.bf16.xpose.msra.mxu1 %v10483_v39  ;;  %18620 = vmatprep.mubr.msk.bf16.mxu1 %vm21026_vm0, %v24580_v40  ;;  %v10621_v39 = vsel %vm9834_vm1, %v8939_v62, 0  ;;  %v7966_v36 = vcombine.low %v7598_v38, %v7605_v35  ;;  %v17863_v53 = vcombine.high %v7598_v38, %v7605_v35  ;;  %v9002_v38 = vrot.slane %v24585_v41, %v21760_v13 }
 0x426   : > { %18624 = vmatprep.subr.bf16.mxu1 %v24580_v40  ;;  %v8944_v35 = vpack.c.bf16 %v22846_v60, %v22846_v60 }
 0x427   : > { %v7973_v34 = vrot.slane %v7966_v36, %v21760_v13  ;;  %v24588_v36 = vcombine.high %v22680_v42, %v22687_v28 }
 0x42c   : > { %18621 = vmatmul.mubr.msk.bf16.vlgmr.msra.gmra.mrb[72].mxu1 %vm9834_vm1, %v8048_v51  ;;  %v7614_v51 = vrot.slane %v7606_v10, %v21767_v24 }
 0x42d   : > { %18625 = vmatpush3.bf16.xpose.msra.mxu1 %v10529_v9  ;;  %18626 = vmatprep.mubr.msk.bf16.mxu1 %vm21026_vm0, %v24580_v40  ;;  %v7621_v9 = vrot.slane %v7607_v61, %v21767_v24 }
 0x42e   : > { %18630 = vmatprep.subr.bf16.mxu1 %v24580_v40 }
 0x42f   : > { %v7982_v16 = vcombine.low %v7614_v51, %v7621_v9  ;;  %v17864_v12 = vcombine.high %v7614_v51, %v7621_v9  ;;  %v24586_v51 = vcombine.high %v22673_v54, %v22683_v25  ;;  %v8945_v54 = vpack.c.bf16 %v22848_v18, %v22848_v18 }
 0x431   : > { %v7989_v57 = vrot.slane %v7982_v16, %v21760_v13  ;;  %v7997_v63 = vrot.slane %v17864_v12, %v21760_v13  ;;  %v9009_v9 = vrot.slane %v24586_v51, %v21760_v13  ;;  %v10897_v30 = vsel %vm9834_vm1, %v8945_v54, 0 }
 0x433   : > { %v8014_v32 = vcombine.low %v7989_v57, %v7997_v63  ;;  %v8015_v21 = vcombine.high %v7989_v57, %v7997_v63  ;;  %v10851_v57 = vsel %vm9834_vm1, %v8944_v35, 0 }
 0x434   : > { %18627 = vmatmul.mubr.msk.bf16.vlgmr.msra.gmra.mrb[76].mxu1 %vm9834_vm1, %v8049_v29  ;;  %v7981_v29 = vrot.slane %v17863_v53, %v21760_v13  ;;  %v9041_v53 = vrot.slane %v24588_v36, %v21760_v13 }
 0x435   : > { %18631 = vmatpush3.bf16.xpose.msra.mxu1 %v10575_v20  ;;  %18632 = vmatprep.mubr.msk.bf16.mxu1 %vm21026_vm0, %v24580_v40  ;;  %v8052_v20 = vpack.c.bf16 %v7964_v27, %v7964_v27  ;;  %v8022_v45 = vrot.slane %v8014_v32, %v21767_v24  ;;  %v8029_v56 = vrot.slane %v8015_v21, %v21767_v24 }
 0x436   : > { %18636 = vmatprep.subr.bf16.mxu1 %v24580_v40  ;;  %v7998_v15 = vcombine.low %v7973_v34, %v7981_v29  ;;  %v7999_v46 = vcombine.high %v7973_v34, %v7981_v29 }
 0x438   : > { %v8006_v62 = vrot.slane %v7998_v15, %v21767_v24  ;;  %v8013_v49 = vrot.slane %v7999_v46, %v21767_v24 }
 0x43a   : > { %v8031_v10 = vcombine.high %v8006_v62, %v8022_v45  ;;  %v8032_v16 = vcombine.low %v8013_v49, %v8029_v56  ;;  %v23028_v63 = vcombine.high %v8013_v49, %v8029_v56 }
 0x43c   : > { %18633 = vmatmul.mubr.msk.bf16.vlgmr.msra.gmra.mrb[80].mxu1 %vm9834_vm1, %v8050_v8  ;;  %v8030_v8 = vcombine.low %v8006_v62, %v8022_v45  ;;  %v8055_v60 = vpack.c.bf16 %v8031_v10, %v8031_v10  ;;  %v8056_v32 = vpack.c.bf16 %v8032_v16, %v8032_v16 }
 0x43d   : > { %18637 = vmatpush3.bf16.xpose.msra.mxu1 %v10621_v39  ;;  %18638 = vmatprep.mubr.msk.bf16.mxu1 %vm21026_vm0, %v24580_v40 }
 0x43e   : > { %18642 = vmatprep.subr.bf16.mxu1 %v24580_v40  ;;  %v8054_v39 = vpack.c.bf16 %v8030_v8, %v8030_v8 }
 0x444   : > { %18639 = vmatmul.mubr.msk.bf16.vlgmr.msra.gmra.mrb[84].mxu1 %vm9834_vm1, %v8051_v2  ;;  %v24587_v2 = vcombine.low %v22680_v42, %v22687_v28 }
 0x445   : > { %18643 = vmatpush3.bf16.xpose.msra.mxu1 %v10667_v0  ;;  %18644 = vmatprep.mubr.msk.bf16.mxu1 %vm21026_vm0, %v24580_v40 }
 0x446   : > { %18648 = vmatprep.subr.bf16.mxu1 %v24580_v40  ;;  %v9034_v59 = vrot.slane %v24587_v2, %v21760_v13 }
 0x44c   : > { %18645 = vmatmul.mubr.msk.bf16.vlgmr.msra.gmra.mrb[88].mxu1 %vm9834_vm1, %v8052_v20 }
 0x44d   : > { %18649 = vmatpush3.bf16.xpose.msra.mxu1 %v10713_v3  ;;  %18650 = vmatprep.mubr.msk.bf16.mxu1 %vm21026_vm0, %v24580_v40 }
 0x44e   : > { %18654 = vmatprep.subr.bf16.mxu1 %v24580_v40 }
 0x454   : > { %18651 = vmatmul.mubr.msk.bf16.vlgmr.msra.gmra.mrb[92].mxu1 %vm9834_vm1, %v8053_v47 }
 0x455   : > { %18655 = vmatpush3.bf16.xpose.msra.mxu1 %v10759_v19  ;;  %18656 = vmatprep.mubr.msk.bf16.mxu1 %vm21026_vm0, %v24580_v40 }
 0x456   : > { %18660 = vmatprep.subr.bf16.mxu1 %v24580_v40 }
 0x45c   : > { %18657 = vmatmul.mubr.msk.bf16.vlgmr.msra.gmra.mrb[96].mxu1 %vm9834_vm1, %v8054_v39 }
 0x45d   : > { %v8949_v17 = vpop.permute.xlu1 %8948  ;;  %18661 = vmatpush3.bf16.xpose.msra.mxu1 %v10805_v22  ;;  %18662 = vmatprep.mubr.msk.bf16.mxu1 %vm21026_vm0, %v24580_v40 }
 0x45e   : > { %v8957_v61 = vpop.permute.xlu0 %8956  ;;  %18666 = vmatprep.subr.bf16.mxu1 %v24580_v40 }
 0x45f   : > { %v9010_v33 = vcombine.low %v8949_v17, %v8957_v61  ;;  %v9011_v48 = vcombine.high %v8949_v17, %v8957_v61 }
 0x461   : > { %v9018_v14 = vrot.slane %v9010_v33, %v21760_v13  ;;  %v9025_v0 = vrot.slane %v9011_v48, %v21760_v13  ;;  %v8965_v25 = vpop.permute.xlu1 %8964 }
 0x462   : > { %v8973_v12 = vpop.permute.xlu0 %8972 }
 0x463   : > { %v9058_v27 = vcombine.low %v9002_v38, %v9018_v14  ;;  %v9059_v44 = vcombine.high %v9002_v38, %v9018_v14  ;;  %v9074_v34 = vcombine.low %v9009_v9, %v9025_v0  ;;  %v9075_v29 = vcombine.high %v9009_v9, %v9025_v0 }
 0x464   : > { %v9042_v20 = vcombine.low %v8965_v25, %v8973_v12  ;;  %v9043_v3 = vcombine.high %v8965_v25, %v8973_v12  ;;  %18663 = vmatmul.mubr.msk.bf16.vlgmr.msra.gmra.mrb[100].mxu1 %vm9834_vm1, %v8055_v60 }
 0x465   : > { %v9066_v42 = vrot.slane %v9058_v27, %v21767_v24  ;;  %v9073_v28 = vrot.slane %v9059_v44, %v21767_v24  ;;  %v9082_v18 = vrot.slane %v9074_v34, %v21767_v24  ;;  %v9089_v15 = vrot.slane %v9075_v29, %v21767_v24  ;;  %18667 = vmatpush3.bf16.xpose.msra.mxu1 %v10851_v57 }
 0x466   : > { %18668 = vmatprep.mubr.msk.bf16.mxu1 %vm21026_vm0, %v24580_v40  ;;  %v9050_v31 = vrot.slane %v9042_v20, %v21760_v13  ;;  %v9057_v47 = vrot.slane %v9043_v3, %v21760_v13  ;;  %18672 = vmatprep.subr.bf16.mxu1 %v24580_v40 }
 0x467   : > { %v17885_v62 = vcombine.low %v9066_v42, %v9073_v28  ;;  %v17887_v45 = vcombine.high %v9066_v42, %v9073_v28  ;;  %v17889_v19 = vcombine.low %v9082_v18, %v9089_v15  ;;  %v17891_v8 = vcombine.high %v9082_v18, %v9089_v15 }
 0x468   : > { %v9090_v37 = vcombine.low %v9034_v59, %v9050_v31  ;;  %v9091_v46 = vcombine.high %v9034_v59, %v9050_v31  ;;  %v9106_v21 = vcombine.low %v9041_v53, %v9057_v47  ;;  %v9107_v39 = vcombine.high %v9041_v53, %v9057_v47 }
 0x469   : > { %v9410_v22 = vrot.slane %v17885_v62, %v21760_v13  ;;  %v9426_v17 = vrot.slane %v17887_v45, %v21760_v13  ;;  %v9442_v10 = vrot.slane %v17889_v19, %v21760_v13  ;;  %v9458_v49 = vrot.slane %v17891_v8, %v21760_v13 }
 0x46a   : > { %v9098_v56 = vrot.slane %v9090_v37, %v21767_v24  ;;  %v9105_v61 = vrot.slane %v9091_v46, %v21767_v24  ;;  %v9114_v33 = vrot.slane %v9106_v21, %v21767_v24  ;;  %v9121_v48 = vrot.slane %v9107_v39, %v21767_v24 }
 0x46b   : > { %v9466_v41 = vcombine.low %v9410_v22, %v9426_v17  ;;  %v9498_v38 = vcombine.low %v9442_v10, %v9458_v49  ;;  %v9467_v35 = vcombine.high %v9410_v22, %v9426_v17  ;;  %v9499_v51 = vcombine.high %v9442_v10, %v9458_v49 }
 0x46c   : > { %v17886_v9 = vcombine.low %v9098_v56, %v9105_v61  ;;  %v17888_v2 = vcombine.high %v9098_v56, %v9105_v61  ;;  %v17890_v59 = vcombine.low %v9114_v33, %v9121_v48  ;;  %v17892_v14 = vcombine.high %v9114_v33, %v9121_v48  ;;  %18669 = vmatmul.mubr.msk.bf16.vlgmr.msra.gmra.mrb[104].mxu1 %vm9834_vm1, %v8056_v32  ;;  %v1583_v48 = vld [vmem:[%s21584_s23 + $0x10] sm:$0x3] }
 0x46d   : > { %v9474_v0 = vrot.slane %v9466_v41, %v21767_v24  ;;  %v9506_v36 = vrot.slane %v9498_v38, %v21767_v24  ;;  %v9481_v53 = vrot.slane %v9467_v35, %v21767_v24  ;;  %v9513_v60 = vrot.slane %v9499_v51, %v21767_v24  ;;  %18673 = vmatpush3.bf16.xpose.msra.mxu1 %v10897_v30 }
 0x46e   : > { %18674 = vmatprep.mubr.msk.bf16.mxu1 %vm21026_vm0, %v24580_v40  ;;  %v9417_v16 = vrot.slane %v17886_v9, %v21760_v13  ;;  %v9433_v54 = vrot.slane %v17888_v2, %v21760_v13  ;;  %v9449_v25 = vrot.slane %v17890_v59, %v21760_v13  ;;  %v9465_v12 = vrot.slane %v17892_v14, %v21760_v13 }
 0x46f   : > { %18684 = vmatprep.subr.bf16.mxu1 %v24580_v40  ;;  %v9530_v27 = vcombine.low %v9474_v0, %v9506_v36  ;;  %v9531_v44 = vcombine.high %v9474_v0, %v9506_v36  ;;  %v23061_v34 = vcombine.low %v9481_v53, %v9513_v60  ;;  %v23063_v29 = vcombine.high %v9481_v53, %v9513_v60 }
 0x470   : > { %v9482_v57 = vcombine.low %v9417_v16, %v9433_v54  ;;  %v9483_v20 = vcombine.high %v9417_v16, %v9433_v54  ;;  %v9514_v28 = vcombine.low %v9449_v25, %v9465_v12  ;;  %v9515_v32 = vcombine.high %v9449_v25, %v9465_v12 }
 0x471   : > { %v9810_v3 = vpack.c.bf16 %v9530_v27, %v9530_v27  ;;  %v9811_v42 = vpack.c.bf16 %v9531_v44, %v9531_v44  ;;  %v8057_v30 = vpack.c.bf16 %v23028_v63, %v23028_v63  ;;  %v23098_v35 = vrot.slane %v1583_v48, %v21594_v4 }
 0x472   : > { %v9490_v18 = vrot.slane %v9482_v57, %v21767_v24  ;;  %v9497_v15 = vrot.slane %v9483_v20, %v21767_v24  ;;  %v9522_v62 = vrot.slane %v9514_v28, %v21767_v24  ;;  %v9529_v45 = vrot.slane %v9515_v32, %v21767_v24 }
 0x473   : > { %v11233_v31 = vsel %vm11231_vm3, %v9810_v3, 0  ;;  %v11279_v47 = vsel %vm11231_vm3, %v9811_v42, 0  ;;  %v23103_v9 = vrot.slane %v1583_v48, %v21599_v7 }
 0x474   : > { %18679 = vmatpush3.bf16.msra.mxu0 %v11233_v31  ;;  %18675 = vmatmul.mubr.msk.bf16.vlgmr.msra.gmra.mrb[108].mxu1 %vm9834_vm1, %v8057_v30  ;;  %v23075_v19 = vcombine.low %v9490_v18, %v9522_v62  ;;  %v23077_v8 = vcombine.high %v9490_v18, %v9522_v62  ;;  %v23081_v63 = vcombine.low %v9497_v15, %v9529_v45 }
 0x475   : > { %18690 = vmatprep.subr.bf16.mxu0 %v24580_v40  ;;  %18685 = vmatpush3.bf16.msra.mxu1 %v11279_v47  ;;  %v23083_v37 = vcombine.high %v9497_v15, %v9529_v45 }
 0x476   : > { %18686 = vmatprep.mubr.msk.bf16.mxu1 %vm21026_vm0, %v24580_v40  ;;  %18696 = vmatprep.subr.bf16.mxu1 %v24580_v40 }
 0x49c   : > { %v10942_v46 = vpop.xlane.xlu0 %10941 }
 0x49d   : > { %v11012_v21 = vsub.f32 %v22760_v26, %v10942_v46 }
 0x49f   : > { %v11036_v39 = vmul.f32 1.442695, %v11012_v21 }
 0x4a0   : > { %v10945_v22 = vpop.xlane.xlu1 %10944 }
 0x4a1   : > { %20881 = vpow2.f32 %v11036_v39  ;;  %v11013_v17 = vsub.f32 %v22792_v23, %v10945_v22  ;;  %v10948_v23 = vpop.xlane.xlu0 %10947 }
 0x4a2   : > { %v23088_v49 = vpop.f32.mrb[32].mxu1  ;;  %v11014_v14 = vsub.f32 %v22841_v55, %v10948_v23 }
 0x4a3   : > { %v11038_v10 = vmul.f32 1.442695, %v11013_v17  ;;  %v18562_v56 = vpop.f32.mrb[33].mxu1  ;;  %v10952_v61 = vsel %vm10939_vm2, %v23088_v49, -inf }
 0x4a4   : > { %10953 = vmax.xlane.f32.xlu1 %v10952_v61  ;;  %v10062_v33 = vpop.f32.mrb[34].mxu1  ;;  %v11040_v27 = vmul.f32 1.442695, %v11014_v14 }
 0x4a5   : > { %20883 = vpow2.f32 %v11038_v10  ;;  %v18563_v41 = vpop.f32.mrb[35].mxu1  ;;  %v10951_v55 = vpop.xlane.xlu0 %10950 }
 0x4a6   : > { %20885 = vpow2.f32 %v11040_v27  ;;  %v11015_v20 = vsub.f32 %v22870_v58, %v10951_v55 }
 0x4a8   : > { %v11042_v3 = vmul.f32 1.442695, %v11015_v20 }
 0x4aa   : > { %20887 = vpow2.f32 %v11042_v3 }
 0x4ab   : > { %v23093_v38 = vpop.eup %20881  ;;  %v23100_v51 = vpop.f32.mrb[16].mxu0 }
 0x4ac   : > { %v11084_v26 = vsel %vm10939_vm2, %v23093_v38, 0.0  ;;  %v23105_v2 = vpop.f32.mrb[17].mxu0  ;;  %v23116_v16 = vpop.f32.mrb[36].mxu1 }
 0x4ad   : > { %11085 = vadd.xlane.f32.xlu1 %v11084_v26  ;;  %v7153_v59 = vpop.f32.mrb[18].mxu0  ;;  %v18568_v54 = vpop.f32.mrb[37].mxu1  ;;  %v10955_v25 = vsel %vm10939_vm2, %v23116_v16, -inf }
 0x4ae   : > { %v23109_v0 = vadd.f32 %v7153_v59, %v23098_v35  ;;  %v7155_v36 = vpop.f32.mrb[19].mxu0  ;;  %10956 = vmax.xlane.f32.xlu0 %v10955_v25  ;;  %v10108_v12 = vpop.f32.mrb[38].mxu1 }
 0x4af   : > { %v23112_v53 = vadd.f32 %v7155_v36, %v23103_v9  ;;  %v23114_v60 = vpop.eup %20883  ;;  %v18569_v44 = vpop.f32.mrb[39].mxu1 }
 0x4b0   : > { %v11087_v57 = vsel %vm10939_vm2, %v23114_v60, 0.0  ;;  %v23127_v15 = vpop.eup %20885 }
 0x4b1   : > { %v11090_v31 = vsel %vm10939_vm2, %v23127_v15, 0.0 }
 0x4b2   : > { %11088 = vadd.xlane.f32.xlu0 %v11087_v57 }
 0x4b4   : > { %v23135_v45 = vpop.eup %20887 }
 0x4b5   : > { %v11093_v39 = vsel %vm10939_vm2, %v23135_v45, 0.0 }
 0x4b9   : > { %v23123_v42 = vpop.f32.mrb[40].mxu1 }
 0x4ba   : > { %v18574_v28 = vpop.f32.mrb[41].mxu1  ;;  %v10958_v18 = vsel %vm10939_vm2, %v23123_v42, -inf }
 0x4bb   : > { %v10154_v32 = vpop.f32.mrb[42].mxu1  ;;  %10959 = vmax.xlane.f32.xlu1 %v10958_v18 }
 0x4bc   : > { %v18575_v30 = vpop.f32.mrb[43].mxu1 }
 0x4bf   : > { %11091 = vadd.xlane.f32.xlu1 %v11090_v31 }
 0x4c6   : > { %v23131_v47 = vpop.f32.mrb[44].mxu1 }
 0x4c7   : > { %v18580_v58 = vpop.f32.mrb[45].mxu1  ;;  %v10961_v62 = vsel %vm10939_vm2, %v23131_v47, -inf }
 0x4c8   : > { %v10200_v46 = vpop.f32.mrb[46].mxu1  ;;  %10962 = vmax.xlane.f32.xlu0 %v10961_v62 }
 0x4c9   : > { %v18581_v21 = vpop.f32.mrb[47].mxu1 }
 0x4cc   : > { %11094 = vadd.xlane.f32.xlu0 %v11093_v39 }
 0x4ce   : > { %v23139_v22 = vpop.f32.mrb[48].mxu1 }
 0x4cf   : > { %v18586_v17 = vpop.f32.mrb[49].mxu1  ;;  %v10964_v10 = vsel %vm10939_vm2, %v23139_v22, -inf }
 0x4d0   : > { %v10246_v56 = vpop.f32.mrb[50].mxu1  ;;  %10965 = vmax.xlane.f32.xlu1 %v10964_v10 }
 0x4d1   : > { %v18587_v61 = vpop.f32.mrb[51].mxu1 }
 0x4d6   : > { %v23143_v33 = vpop.f32.mrb[52].mxu1 }
 0x4d7   : > { %v18592_v48 = vpop.f32.mrb[53].mxu1  ;;  %v10967_v41 = vsel %vm10939_vm2, %v23143_v33, -inf }
 0x4d8   : > { %v10292_v26 = vpop.f32.mrb[54].mxu1  ;;  %10968 = vmax.xlane.f32.xlu0 %v10967_v41 }
 0x4d9   : > { %v18593_v23 = vpop.f32.mrb[55].mxu1 }
 0x4de   : > { %v23147_v59 = vpop.f32.mrb[56].mxu1 }
 0x4df   : > { %v18598_v14 = vpop.f32.mrb[57].mxu1  ;;  %v10970_v36 = vsel %vm10939_vm2, %v23147_v59, -inf }
 0x4e0   : > { %10971 = vmax.xlane.f32.xlu1 %v10970_v36  ;;  %v10338_v54 = vpop.f32.mrb[58].mxu1  ;;  %v23175_v36 = vadd.f32 %v23100_v51, %v23098_v35 }
 0x4e1   : > { %v18599_v25 = vpop.f32.mrb[59].mxu1 }
 0x4e7   : > { %v23151_v12 = vpop.f32.mrb[60].mxu1 }
 0x4e8   : > { %v18604_v27 = vpop.f32.mrb[61].mxu1  ;;  %v10973_v44 = vsel %vm10939_vm2, %v23151_v12, -inf }
 0x4e9   : > { %10974 = vmax.xlane.f32.xlu0 %v10973_v44  ;;  %v10384_v55 = vpop.f32.mrb[62].mxu1 }
 0x4ea   : > { %v18605_v57 = vpop.f32.mrb[63].mxu1 }
 0x4ef   : > { %v23155_v20 = vpop.f32.mrb[64].mxu1 }
 0x4f0   : > { %v18610_v3 = vpop.f32.mrb[65].mxu1  ;;  %v10976_v28 = vsel %vm10939_vm2, %v23155_v20, -inf }
 0x4f1   : > { %10977 = vmax.xlane.f32.xlu1 %v10976_v28  ;;  %v10430_v18 = vpop.f32.mrb[66].mxu1  ;;  %v23183_v28 = vadd.f32 %v23105_v2, %v23103_v9 }
 0x4f2   : > { %v18611_v32 = vpop.f32.mrb[67].mxu1 }
 0x4f7   : > { %v23159_v30 = vpop.f32.mrb[68].mxu1 }
 0x4f8   : > { %v18616_v31 = vpop.f32.mrb[69].mxu1  ;;  %v10979_v58 = vsel %vm10939_vm2, %v23159_v30, -inf }
 0x4f9   : > { %10980 = vmax.xlane.f32.xlu0 %v10979_v58  ;;  %v10476_v62 = vpop.f32.mrb[70].mxu1 }
 0x4fa   : > { %v18617_v46 = vpop.f32.mrb[71].mxu1 }
 0x4ff   : > { %v23163_v21 = vpop.f32.mrb[72].mxu1 }
 0x500   : > { %v18622_v39 = vpop.f32.mrb[73].mxu1  ;;  %v10982_v17 = vsel %vm10939_vm2, %v23163_v21, -inf }
 0x501   : > { %10983 = vmax.xlane.f32.xlu1 %v10982_v17  ;;  %v10522_v10 = vpop.f32.mrb[74].mxu1 }
 0x502   : > { %v18623_v56 = vpop.f32.mrb[75].mxu1 }
 0x507   : > { %v23167_v61 = vpop.f32.mrb[76].mxu1 }
 0x508   : > { %v18628_v48 = vpop.f32.mrb[77].mxu1  ;;  %v10985_v41 = vsel %vm10939_vm2, %v23167_v61, -inf }
 0x509   : > { %10986 = vmax.xlane.f32.xlu0 %v10985_v41  ;;  %v10568_v26 = vpop.f32.mrb[78].mxu1 }
 0x50a   : > { %v18629_v23 = vpop.f32.mrb[79].mxu1 }
 0x50f   : > { %v23171_v14 = vpop.f32.mrb[80].mxu1 }
 0x510   : > { %v18634_v54 = vpop.f32.mrb[81].mxu1  ;;  %v10988_v9 = vsel %vm10939_vm2, %v23171_v14, -inf }
 0x511   : > { %v10614_v25 = vpop.f32.mrb[82].mxu1 }
 0x512   : > { %8980 = vrot.lane.b32.xlu1 %v23175_v36, %s21022_s24  ;;  %v18635_v27 = vpop.f32.mrb[83].mxu1 }
 0x517   : > { %v23179_v44 = vpop.f32.mrb[84].mxu1 }
 0x518   : > { %v18640_v55 = vpop.f32.mrb[85].mxu1 }
 0x519   : > { %v10660_v57 = vpop.f32.mrb[86].mxu1 }
 0x51a   : > { %v18641_v3 = vpop.f32.mrb[87].mxu1  ;;  %v10991_v57 = vsel %vm10939_vm2, %v23179_v44, -inf }
 0x51f   : > { %8988 = vrot.lane.b32.xlu0 %v23183_v28, %s21022_s24  ;;  %v23187_v35 = vpop.f32.mrb[88].mxu1 }
 0x520   : > { %v18646_v51 = vpop.f32.mrb[89].mxu1  ;;  %v10994_v25 = vsel %vm10939_vm2, %v23187_v35, -inf }
 0x521   : > { %v10706_v18 = vpop.f32.mrb[90].mxu1 }
 0x522   : > { %v18647_v32 = vpop.f32.mrb[91].mxu1 }
 0x527   : > { %v23189_v31 = vpop.f32.mrb[92].mxu1 }
 0x528   : > { %v18652_v58 = vpop.f32.mrb[93].mxu1  ;;  %v10997_v32 = vsel %vm10939_vm2, %v23189_v31, -inf }
 0x529   : > { %v10752_v62 = vpop.f32.mrb[94].mxu1 }
 0x52a   : > { %v18653_v46 = vpop.f32.mrb[95].mxu1 }
 0x52f   : > { %v23191_v39 = vpop.f32.mrb[96].mxu1 }
 0x530   : > { %v18658_v17 = vpop.f32.mrb[97].mxu1 }
 0x531   : > { %v10798_v10 = vpop.f32.mrb[98].mxu1  ;;  %v10954_v2 = vpop.xlane.xlu1 %10953 }
 0x532   : > { %v18659_v56 = vpop.f32.mrb[99].mxu1  ;;  %v11016_v48 = vsub.f32 %v23088_v49, %v10954_v2 }
 0x534   : > { %v11044_v23 = vmul.f32 1.442695, %v11016_v48  ;;  %v9812_v48 = vpack.c.bf16 %v23061_v34, %v23061_v34 }
 0x536   : > { %10989 = vmax.xlane.f32.xlu1 %v10988_v9  ;;  %20889 = vpow2.f32 %v11044_v23 }
 0x537   : > { %v23196_v41 = vpop.f32.mrb[100].mxu1 }
 0x538   : > { %v18664_v26 = vpop.f32.mrb[101].mxu1 }
 0x539   : > { %v10844_v54 = vpop.f32.mrb[102].mxu1 }
 0x53a   : > { %v11086_v27 = vpop.xlane.xlu1 %11085  ;;  %10995 = vmax.xlane.f32.xlu1 %v10994_v25  ;;  %v18665_v55 = vpop.f32.mrb[103].mxu1 }
 0x53b   : > { %20891 = vrcp.f32 %v11086_v27  ;;  %v10957_v51 = vpop.xlane.xlu0 %10956  ;;  %v11325_v27 = vsel %vm11231_vm3, %v9812_v48, 0 }
 0x53c   : > { %v11017_v58 = vsub.f32 %v23116_v16, %v10957_v51 }
 0x53e   : > { %10992 = vmax.xlane.f32.xlu0 %v10991_v57  ;;  %v11046_v46 = vmul.f32 1.442695, %v11017_v58 }
 0x53f   : > { %v23202_v3 = vpop.f32.mrb[104].mxu1  ;;  %v11089_v10 = vpop.xlane.xlu0 %11088 }
 0x540   : > { %v18670_v49 = vpop.f32.mrb[105].mxu1  ;;  %v23207_v17 = vpop.eup %20889  ;;  %20893 = vpow2.f32 %v11046_v46 }
 0x541   : > { %v10890_v18 = vpop.f32.mrb[106].mxu1  ;;  %v11096_v9 = vsel %vm10939_vm2, %v23207_v17, 0.0  ;;  %20895 = vrcp.f32 %v11089_v10 }
 0x542   : > { %10998 = vmax.xlane.f32.xlu0 %v10997_v32  ;;  %v18671_v62 = vpop.f32.mrb[107].mxu1  ;;  %11097 = vadd.xlane.f32.xlu1 %v11096_v9  ;;  %v9813_v32 = vpack.c.bf16 %v23063_v29, %v23063_v29 }
 0x544   : > { %v11371_v46 = vsel %vm11231_vm3, %v9813_v32, 0 }
 0x545   : > { %v20892_v56 = vpop.eup %20891 }
 0x546   : > { %v11157_v2 = vmul.f32 %v20892_v56, %v23093_v38 }
 0x547   : > { %v23214_v26 = vpop.f32.mrb[108].mxu1 }
 0x548   : > { %v18676_v16 = vpop.f32.mrb[109].mxu1  ;;  %v11204_v23 = vpack.c.bf16 %v11157_v2, %v11157_v2  ;;  %v10960_v38 = vpop.xlane.xlu1 %10959 }
 0x549   : > { %v10936_v54 = vpop.f32.mrb[110].mxu1  ;;  %v11018_v34 = vsub.f32 %v23123_v42, %v10960_v38 }
 0x54a   : > { %v18677_v25 = vpop.f32.mrb[111].mxu1  ;;  %18681 = vmatmul.mubr.msk.bf16.vlgmr.msra.gmra.mrb[20].mxu0 %vm10939_vm2, %v11204_v23  ;;  %v23221_v55 = vpop.eup %20893 }
 0x54b   : > { %18691 = vmatpush3.bf16.msra.mxu0 %v11325_v27  ;;  %18692 = vmatprep.mubr.msk.bf16.mxu0 %vm21026_vm0, %v24580_v40  ;;  %v20896_v57 = vpop.eup %20895  ;;  %v11099_v49 = vsel %vm10939_vm2, %v23221_v55, 0.0  ;;  %v11048_v18 = vmul.f32 1.442695, %v11018_v34 }
 0x54c   : > { %18702 = vmatprep.subr.bf16.mxu0 %v24580_v40  ;;  %11100 = vadd.xlane.f32.xlu0 %v11099_v49  ;;  %v11159_v51 = vmul.f32 %v20896_v57, %v23114_v60  ;;  %v11092_v58 = vpop.xlane.xlu1 %11091  ;;  %v9815_v49 = vpack.c.bf16 %v23077_v8, %v23077_v8 }
 0x54d   : > { %20897 = vpow2.f32 %v11048_v18 }
 0x54e   : > { %v11205_v62 = vpack.c.bf16 %v11159_v51, %v11159_v51  ;;  %20899 = vrcp.f32 %v11092_v58  ;;  %v11463_v32 = vsel %vm11231_vm3, %v9815_v49, 0 }
 0x550   : > { %18687 = vmatmul.mubr.msk.bf16.vlgmr.msra.gmra.mrb[112].mxu1 %vm10939_vm2, %v11205_v62 }
 0x551   : > { %18697 = vmatpush3.bf16.msra.mxu1 %v11371_v46  ;;  %18698 = vmatprep.mubr.msk.bf16.mxu1 %vm21026_vm0, %v24580_v40 }
 0x552   : > { %18708 = vmatprep.subr.bf16.mxu1 %v24580_v40 }
 0x555   : > { %v10963_v42 = vpop.xlane.xlu0 %10962 }
 0x556   : > { %v11019_v10 = vsub.f32 %v23131_v47, %v10963_v42  ;;  %v9814_v47 = vpack.c.bf16 %v23075_v19, %v23075_v19 }
 0x557   : > { %v23235_v29 = vpop.eup %20897 }
 0x558   : > { %v11050_v60 = vmul.f32 1.442695, %v11019_v10  ;;  %v20900_v9 = vpop.eup %20899  ;;  %v11102_v48 = vsel %vm10939_vm2, %v23235_v29, 0.0  ;;  %v11417_v27 = vsel %vm11231_vm3, %v9814_v47, 0 }
 0x559   : > { %v11095_v56 = vpop.xlane.xlu0 %11094  ;;  %v11161_v16 = vmul.f32 %v20900_v9, %v23127_v15  ;;  %11103 = vadd.xlane.f32.xlu1 %v11102_v48 }
 0x55a   : > { %20901 = vpow2.f32 %v11050_v60 }
 0x55b   : > { %20903 = vrcp.f32 %v11095_v56  ;;  %v11206_v25 = vpack.c.bf16 %v11161_v16, %v11161_v16 }
 0x55d   : > { %v10966_v2 = vpop.xlane.xlu1 %10965  ;;  %18693 = vmatmul.mubr.msk.bf16.vlgmr.msra.gmra.mrb[24].mxu0 %vm10939_vm2, %v11206_v25 }
 0x55e   : > { %v11020_v23 = vsub.f32 %v23139_v22, %v10966_v2  ;;  %18703 = vmatpush3.bf16.msra.mxu0 %v11417_v27  ;;  %18704 = vmatprep.mubr.msk.bf16.mxu0 %vm21026_vm0, %v24580_v40 }
 0x55f   : > { %18714 = vmatprep.subr.bf16.mxu0 %v24580_v40 }
 0x560   : > { %v11052_v54 = vmul.f32 1.442695, %v11020_v23 }
 0x562   : > { %20905 = vpow2.f32 %v11052_v54 }
 0x564   : > { %v23247_v38 = vpop.eup %20901 }
 0x565   : > { %v20904_v15 = vpop.eup %20903  ;;  %v10969_v22 = vpop.xlane.xlu0 %10968  ;;  %v11105_v19 = vsel %vm10939_vm2, %v23247_v38, 0.0 }
 0x566   : > { %v11163_v34 = vmul.f32 %v20904_v15, %v23135_v45  ;;  %v11021_v57 = vsub.f32 %v23143_v33, %v10969_v22  ;;  %11106 = vadd.xlane.f32.xlu0 %v11105_v19 }
 0x568   : > { %v11054_v51 = vmul.f32 1.442695, %v11021_v57  ;;  %v11207_v18 = vpack.c.bf16 %v11163_v34, %v11163_v34 }
 0x56a   : > { %20907 = vpow2.f32 %v11054_v51  ;;  %18699 = vmatmul.mubr.msk.bf16.vlgmr.msra.gmra.mrb[116].mxu1 %vm10939_vm2, %v11207_v18 }
 0x56b   : > { %18709 = vmatpush3.bf16.msra.mxu1 %v11463_v32  ;;  %18710 = vmatprep.mubr.msk.bf16.mxu1 %vm21026_vm0, %v24580_v40 }
 0x56c   : > { %v23260_v58 = vpop.eup %20905  ;;  %18720 = vmatprep.subr.bf16.mxu1 %v24580_v40 }
 0x56d   : > { %v10972_v45 = vpop.xlane.xlu1 %10971  ;;  %v11108_v33 = vsel %vm10939_vm2, %v23260_v58, 0.0 }
 0x56e   : > { %v11022_v8 = vsub.f32 %v23147_v59, %v10972_v45  ;;  %11109 = vadd.xlane.f32.xlu1 %v11108_v33 }
 0x570   : > { %v11056_v62 = vmul.f32 1.442695, %v11022_v8 }
 0x572   : > { %20909 = vpow2.f32 %v11056_v62 }
 0x574   : > { %v23266_v46 = vpop.eup %20907 }
 0x575   : > { %v11111_v10 = vsel %vm10939_vm2, %v23266_v46, 0.0 }
 0x576   : > { %v10975_v42 = vpop.xlane.xlu0 %10974  ;;  %11112 = vadd.xlane.f32.xlu0 %v11111_v10 }
 0x577   : > { %v11023_v60 = vsub.f32 %v23151_v12, %v10975_v42 }
 0x579   : > { %v11058_v56 = vmul.f32 1.442695, %v11023_v60 }
 0x57b   : > { %20911 = vpow2.f32 %v11058_v56  ;;  %v11006_v56 = vsel %vm10939_vm2, %v23202_v3, -inf }
 0x57c   : > { %v23271_v9 = vpop.eup %20909 }
 0x57d   : > { %v11114_v59 = vsel %vm10939_vm2, %v23271_v9, 0.0 }
 0x57e   : > { %v10978_v2 = vpop.xlane.xlu1 %10977  ;;  %11115 = vadd.xlane.f32.xlu1 %v11114_v59 }
 0x57f   : > { %v11024_v48 = vsub.f32 %v23155_v20, %v10978_v2 }
 0x581   : > { %v11060_v16 = vmul.f32 1.442695, %v11024_v48  ;;  %v11003_v48 = vsel %vm10939_vm2, %v23196_v41, -inf }
 0x583   : > { %20913 = vpow2.f32 %v11060_v16 }
 0x585   : > { %v23276_v23 = vpop.eup %20911 }
 0x586   : > { %v10981_v47 = vpop.xlane.xlu0 %10980  ;;  %v11117_v12 = vsel %vm10939_vm2, %v23276_v23, 0.0 }
 0x587   : > { %v11025_v54 = vsub.f32 %v23159_v30, %v10981_v47  ;;  %11118 = vadd.xlane.f32.xlu0 %v11117_v12 }
 0x589   : > { %v11062_v25 = vmul.f32 1.442695, %v11025_v54  ;;  %v11009_v54 = vsel %vm10939_vm2, %v23214_v26, -inf }
 0x58b   : > { %20915 = vpow2.f32 %v11062_v25 }
 0x58d   : > { %v23281_v27 = vpop.eup %20913 }
 0x58e   : > { %v11120_v15 = vsel %vm10939_vm2, %v23281_v27, 0.0  ;;  %v10984_v19 = vpop.xlane.xlu1 %10983 }
 0x58f   : > { %11121 = vadd.xlane.f32.xlu1 %v11120_v15  ;;  %v11026_v30 = vsub.f32 %v23163_v21, %v10984_v19  ;;  %v11000_v21 = vsel %vm10939_vm2, %v23191_v39, -inf  ;;  %v9130_v15 = vcombine.low %v23175_v36, %v23183_v28 }
 0x591   : > { %v11064_v34 = vmul.f32 1.442695, %v11026_v30 }
 0x592   : > { %v8981_v18 = vpop.permute.xlu1 %8980 }
 0x593   : > { %20917 = vpow2.f32 %v11064_v34  ;;  %v9138_v34 = vrot.slane %v9130_v15, %v21760_v13 }
 0x595   : > { %v23285_v20 = vpop.eup %20915 }
 0x596   : > { %v11123_v22 = vsel %vm10939_vm2, %v23285_v20, 0.0  ;;  %v10987_v57 = vpop.xlane.xlu0 %10986 }
 0x597   : > { %11124 = vadd.xlane.f32.xlu0 %v11123_v22  ;;  %v11027_v49 = vsub.f32 %v23167_v61, %v10987_v57  ;;  %v9131_v22 = vcombine.high %v23175_v36, %v23183_v28 }
 0x599   : > { %v11066_v51 = vmul.f32 1.442695, %v11027_v49  ;;  %v9145_v49 = vrot.slane %v9131_v22, %v21760_v13 }
 0x59a   : > { %v8989_v42 = vpop.permute.xlu0 %8988 }
 0x59b   : > { %20919 = vpow2.f32 %v11066_v51  ;;  %v9146_v47 = vcombine.low %v8981_v18, %v8989_v42  ;;  %v9147_v25 = vcombine.high %v8981_v18, %v8989_v42 }
 0x59d   : > { %v23295_v32 = vpop.eup %20917  ;;  %v9154_v19 = vrot.slane %v9146_v47, %v21760_v13  ;;  %v9161_v30 = vrot.slane %v9147_v25, %v21760_v13 }
 0x59e   : > { %v11126_v33 = vsel %vm10939_vm2, %v23295_v32, 0.0 }
 0x59f   : > { %v9162_v18 = vcombine.low %v9138_v34, %v9154_v19 }
 0x5a0   : > { %8950 = vrot.lane.b32.xlu1 %v22690_v11, %s21022_s24 }
 0x5a1   : > { %v9170_v42 = vrot.slane %v9162_v18, %v21767_v24 }
 0x5a5   : > { %v23302_v10 = vpop.eup %20919 }
 0x5a6   : > { %v11129_v60 = vsel %vm10939_vm2, %v23302_v10, 0.0 }
 0x5ad   : > { %8958 = vrot.lane.b32.xlu0 %v22702_v43, %s21022_s24 }
 0x5c3   : > { %v10990_v45 = vpop.xlane.xlu1 %10989 }
 0x5c4   : > { %v11028_v8 = vsub.f32 %v23171_v14, %v10990_v45  ;;  %11127 = vadd.xlane.f32.xlu1 %v11126_v33  ;;  %v9163_v33 = vcombine.high %v9138_v34, %v9154_v19 }
 0x5c6   : > { %v11068_v62 = vmul.f32 1.442695, %v11028_v8  ;;  %v9178_v8 = vcombine.low %v9145_v49, %v9161_v30 }
 0x5c7   : > { %v23309_v59 = vpop.xlane.xlu1 %10995 }
 0x5c8   : > { %20921 = vpow2.f32 %v11068_v62  ;;  %11001 = vmax.xlane.f32.xlu1 %v11000_v21  ;;  %v9179_v62 = vcombine.high %v9145_v49, %v9161_v30  ;;  %v9816_v21 = vpack.c.bf16 %v23081_v63, %v23081_v63  ;;  %v9817_v30 = vpack.c.bf16 %v23083_v37, %v23083_v37 }
 0x5c9   : > { %v11030_v37 = vsub.f32 %v23187_v35, %v23309_v59 }
 0x5cb   : > { %v10993_v61 = vpop.xlane.xlu0 %10992 }
 0x5cc   : > { %v11029_v2 = vsub.f32 %v23179_v44, %v10993_v61  ;;  %11130 = vadd.xlane.f32.xlu0 %v11129_v60  ;;  %11007 = vmax.xlane.f32.xlu1 %v11006_v56  ;;  %v9177_v61 = vrot.slane %v9163_v33, %v21767_v24  ;;  %v9186_v60 = vrot.slane %v9178_v8, %v21767_v24  ;;  %v11555_v33 = vsel %vm11231_vm3, %v9817_v30, 0 }
 0x5cd   : > { %v9193_v56 = vrot.slane %v9179_v62, %v21767_v24 }
 0x5ce   : > { %v11070_v14 = vmul.f32 1.442695, %v11029_v2  ;;  %v9538_v47 = vcombine.low %v9170_v42, %v9177_v61 }
 0x5cf   : > { %v11098_v44 = vpop.xlane.xlu1 %11097  ;;  %v23329_v51 = vpop.xlane.xlu0 %10998 }
 0x5d0   : > { %20923 = vpow2.f32 %v11070_v14  ;;  %11004 = vmax.xlane.f32.xlu0 %v11003_v48  ;;  %v11509_v48 = vsel %vm11231_vm3, %v9816_v21, 0  ;;  %v9545_v63 = vrot.slane %v9538_v47, %v21760_v13 }
 0x5d1   : > { %20925 = vrcp.f32 %v11098_v44  ;;  %v17894_v44 = vcombine.high %v9186_v60, %v9193_v56 }
 0x5d2   : > { %v23313_v16 = vpop.eup %20921 }
 0x5d3   : > { %v11132_v12 = vsel %vm10939_vm2, %v23313_v16, 0.0  ;;  %v9569_v15 = vrot.slane %v17894_v44, %v21760_v13 }
 0x5d4   : > { %11133 = vadd.xlane.f32.xlu1 %v11132_v12  ;;  %11010 = vmax.xlane.f32.xlu0 %v11009_v54  ;;  %v17893_v12 = vcombine.high %v9170_v42, %v9177_v61  ;;  %v9554_v54 = vcombine.low %v9186_v60, %v9193_v56  ;;  %v11072_v42 = vmul.f32 1.442695, %v11030_v37  ;;  %v11031_v56 = vsub.f32 %v23189_v31, %v23329_v51 }
 0x5d6   : > { %v9561_v25 = vrot.slane %v9554_v54, %v21760_v13  ;;  %v11074_v47 = vmul.f32 1.442695, %v11031_v56 }
 0x5d8   : > { %v9587_v59 = vcombine.high %v9561_v25, %v9569_v15 }
 0x5d9   : > { %v11101_v36 = vpop.xlane.xlu0 %11100 }
 0x5da   : > { %v23326_v57 = vpop.eup %20923  ;;  %20927 = vrcp.f32 %v11101_v36  ;;  %v9601_v54 = vrot.slane %v9587_v59, %v21767_v24 }
 0x5db   : > { %v11135_v45 = vsel %vm10939_vm2, %v23326_v57, 0.0  ;;  %v20926_v28 = vpop.eup %20925 }
 0x5dc   : > { %11136 = vadd.xlane.f32.xlu0 %v11135_v45  ;;  %v11165_v2 = vmul.f32 %v20926_v28, %v23207_v17  ;;  %v9553_v17 = vrot.slane %v17893_v12, %v21760_v13  ;;  %v9586_v45 = vcombine.low %v9561_v25, %v9569_v15 }
 0x5de   : > { %v11208_v14 = vpack.c.bf16 %v11165_v2, %v11165_v2  ;;  %v9570_v18 = vcombine.low %v9545_v63, %v9553_v17  ;;  %v9571_v35 = vcombine.high %v9545_v63, %v9553_v17 }
 0x5e0   : > { %18705 = vmatmul.mubr.msk.bf16.vlgmr.msra.gmra.mrb[28].mxu0 %vm10939_vm2, %v11208_v14  ;;  %v9578_v8 = vrot.slane %v9570_v18, %v21767_v24  ;;  %v9585_v51 = vrot.slane %v9571_v35, %v21767_v24 }
 0x5e1   : > { %18715 = vmatpush3.bf16.msra.mxu0 %v11509_v48  ;;  %18716 = vmatprep.mubr.msk.bf16.mxu0 %vm21026_vm0, %v24580_v40 }
 0x5e2   : > { %18726 = vmatprep.subr.bf16.mxu0 %v24580_v40  ;;  %v9604_v25 = vcombine.low %v9585_v51, %v9601_v54 }
 0x5e4   : > { %v20928_v22 = vpop.eup %20927  ;;  %v9820_v30 = vpack.c.bf16 %v9604_v25, %v9604_v25 }
 0x5e5   : > { %8966 = vrot.lane.b32.xlu1 %v22699_v5, %s21022_s24  ;;  %v11167_v19 = vmul.f32 %v20928_v22, %v23221_v55  ;;  %v9594_v55 = vrot.slane %v9586_v45, %v21767_v24  ;;  %v9605_v45 = vcombine.high %v9585_v51, %v9601_v54 }
 0x5e6   : > { %v11104_v49 = vpop.xlane.xlu1 %11103  ;;  %v11693_v18 = vsel %vm11231_vm3, %v9820_v30, 0 }
 0x5e7   : > { %v11209_v34 = vpack.c.bf16 %v11167_v19, %v11167_v19  ;;  %20929 = vrcp.f32 %v11104_v49  ;;  %v9602_v36 = vcombine.low %v9578_v8, %v9594_v55  ;;  %v9603_v48 = vcombine.high %v9578_v8, %v9594_v55 }
 0x5e8   : > { %v9821_v37 = vpack.c.bf16 %v9605_v45, %v9605_v45 }
 0x5e9   : > { %18711 = vmatmul.mubr.msk.bf16.vlgmr.msra.gmra.mrb[120].mxu1 %vm10939_vm2, %v11209_v34  ;;  %v9818_v61 = vpack.c.bf16 %v9602_v36, %v9602_v36  ;;  %v9819_v31 = vpack.c.bf16 %v9603_v48, %v9603_v48 }
 0x5ea   : > { %18721 = vmatpush3.bf16.msra.mxu1 %v11555_v33  ;;  %18722 = vmatprep.mubr.msk.bf16.mxu1 %vm21026_vm0, %v24580_v40 }
 0x5eb   : > { %18732 = vmatprep.subr.bf16.mxu1 %v24580_v40  ;;  %v11601_v14 = vsel %vm11231_vm3, %v9818_v61, 0  ;;  %v11647_v17 = vsel %vm11231_vm3, %v9819_v31, 0 }
 0x5f1   : > { %v20930_v28 = vpop.eup %20929 }
 0x5f2   : > { %8974 = vrot.lane.b32.xlu0 %v22713_v1, %s21022_s24  ;;  %v11169_v21 = vmul.f32 %v20930_v28, %v23235_v29  ;;  %v11739_v28 = vsel %vm11231_vm3, %v9821_v37, 0 }
 0x5f3   : > { %v11107_v62 = vpop.xlane.xlu0 %11106 }
 0x5f4   : > { %20931 = vrcp.f32 %v11107_v62  ;;  %v11210_v60 = vpack.c.bf16 %v11169_v21, %v11169_v21 }
 0x5f5   : > { %20933 = vpow2.f32 %v11072_v42 }
 0x5f6   : > { %18717 = vmatmul.mubr.msk.bf16.vlgmr.msra.gmra.mrb[32].mxu0 %vm10939_vm2, %v11210_v60 }
 0x5f7   : > { %18727 = vmatpush3.bf16.msra.mxu0 %v11601_v14  ;;  %18728 = vmatprep.mubr.msk.bf16.mxu0 %vm21026_vm0, %v24580_v40 }
 0x5f8   : > { %18738 = vmatprep.subr.bf16.mxu0 %v24580_v40 }
 0x5fb   : > { %v11110_v2 = vpop.xlane.xlu1 %11109 }
 0x5fc   : > { %20935 = vrcp.f32 %v11110_v2 }
 0x5fd   : > { %20937 = vpow2.f32 %v11074_v47  ;;  %v9199_v47 = vcombine.high %v22690_v11, %v22702_v43 }
 0x5fe   : > { %v20932_v29 = vpop.eup %20931 }
 0x5ff   : > { %v11171_v12 = vmul.f32 %v20932_v29, %v23247_v38  ;;  %v23378_v15 = vpop.eup %20933  ;;  %v9213_v25 = vrot.slane %v9199_v47, %v21760_v13 }
 0x600   : > { %v11138_v19 = vsel %vm10939_vm2, %v23378_v15, 0.0 }
 0x601   : > { %v11211_v44 = vpack.c.bf16 %v11171_v12, %v11171_v12 }
 0x603   : > { %v11113_v63 = vpop.xlane.xlu0 %11112  ;;  %18723 = vmatmul.mubr.msk.bf16.vlgmr.msra.gmra.mrb[124].mxu1 %vm10939_vm2, %v11211_v44 }
 0x604   : > { %20939 = vrcp.f32 %v11113_v63  ;;  %18733 = vmatpush3.bf16.msra.mxu1 %v11647_v17  ;;  %18734 = vmatprep.mubr.msk.bf16.mxu1 %vm21026_vm0, %v24580_v40 }
 0x605   : > { %18744 = vmatprep.subr.bf16.mxu1 %v24580_v40 }
 0x606   : > { %v20936_v38 = vpop.eup %20935 }
 0x607   : > { %v11173_v22 = vmul.f32 %v20936_v38, %v23260_v58  ;;  %v23388_v33 = vpop.eup %20937 }
 0x608   : > { %v11141_v55 = vsel %vm10939_vm2, %v23388_v33, 0.0 }
 0x609   : > { %11139 = vadd.xlane.f32.xlu1 %v11138_v19  ;;  %v11212_v34 = vpack.c.bf16 %v11173_v22, %v11173_v22 }
 0x60b   : > { %v11116_v49 = vpop.xlane.xlu1 %11115  ;;  %18729 = vmatmul.mubr.msk.bf16.vlgmr.msra.gmra.mrb[36].mxu0 %vm10939_vm2, %v11212_v34 }
 0x60c   : > { %20941 = vrcp.f32 %v11116_v49  ;;  %18739 = vmatpush3.bf16.msra.mxu0 %v11693_v18  ;;  %18740 = vmatprep.mubr.msk.bf16.mxu0 %vm21026_vm0, %v24580_v40 }
 0x60d   : > { %18750 = vmatprep.subr.bf16.mxu0 %v24580_v40 }
 0x60e   : > { %v20940_v58 = vpop.eup %20939 }
 0x60f   : > { %v11175_v8 = vmul.f32 %v20940_v58, %v23266_v46 }
 0x611   : > { %11142 = vadd.xlane.f32.xlu0 %v11141_v55  ;;  %v11213_v62 = vpack.c.bf16 %v11175_v8, %v11175_v8 }
 0x613   : > { %18735 = vmatmul.mubr.msk.bf16.vlgmr.msra.gmra.mrb[128].mxu1 %vm10939_vm2, %v11213_v62 }
 0x614   : > { %v11119_v36 = vpop.xlane.xlu0 %11118  ;;  %18745 = vmatpush3.bf16.msra.mxu1 %v11739_v28  ;;  %18746 = vmatprep.mubr.msk.bf16.mxu1 %vm21026_vm0, %v24580_v40 }
 0x615   : > { %20943 = vrcp.f32 %v11119_v36  ;;  %18756 = vmatprep.subr.bf16.mxu1 %v24580_v40 }
 0x616   : > { %v20942_v42 = vpop.eup %20941 }
 0x617   : > { %v11177_v46 = vmul.f32 %v20942_v42, %v23271_v9  ;;  %v9198_v9 = vcombine.low %v22690_v11, %v22702_v43 }
 0x619   : > { %v11214_v21 = vpack.c.bf16 %v11177_v46, %v11177_v46  ;;  %v9206_v17 = vrot.slane %v9198_v9, %v21760_v13 }
 0x61b   : > { %18741 = vmatmul.mubr.msk.bf16.vlgmr.msra.gmra.mrb[40].mxu0 %vm10939_vm2, %v11214_v21 }
 0x61c   : > { %18752 = vmatprep.mubr.msk.bf16.mxu0 %vm21026_vm0, %v24580_v40  ;;  %v11122_v35 = vpop.xlane.xlu1 %11121 }
 0x61d   : > { %v23403_v61 = vpop.f32.mrb[20].mxu0  ;;  %20945 = vrcp.f32 %v11122_v35 }
 0x61e   : > { %v18682_v60 = vpop.f32.mrb[21].mxu0 }
 0x61f   : > { %v20944_v56 = vpop.eup %20943  ;;  %v11272_v2 = vpop.f32.mrb[22].mxu0 }
 0x620   : > { %v11179_v14 = vmul.f32 %v20944_v56, %v23276_v23  ;;  %v18683_v48 = vpop.f32.mrb[23].mxu0  ;;  %v8951_v12 = vpop.permute.xlu1 %8950 }
 0x622   : > { %v11215_v59 = vpack.c.bf16 %v11179_v14, %v11179_v14 }
 0x623   : > { %v23415_v51 = vpop.f32.mrb[112].mxu1 }
 0x624   : > { %18747 = vmatmul.mubr.msk.bf16.vlgmr.msra.gmra.mrb[132].mxu1 %vm10939_vm2, %v11215_v59  ;;  %v11125_v29 = vpop.xlane.xlu0 %11124  ;;  %v18688_v44 = vpop.f32.mrb[113].mxu1 }
 0x625   : > { %18758 = vmatprep.mubr.msk.bf16.mxu1 %vm21026_vm0, %v24580_v40  ;;  %v11318_v63 = vpop.f32.mrb[114].mxu1  ;;  %20947 = vrcp.f32 %v11125_v29 }
 0x626   : > { %v18689_v19 = vpop.f32.mrb[115].mxu1 }
 0x627   : > { %v20946_v14 = vpop.eup %20945 }
 0x628   : > { %v8959_v31 = vpop.permute.xlu0 %8958 }
 0x629   : > { %v9214_v23 = vcombine.low %v8951_v12, %v8959_v31  ;;  %v9215_v54 = vcombine.high %v8951_v12, %v8959_v31 }
 0x62b   : > { %v9222_v38 = vrot.slane %v9214_v23, %v21760_v13  ;;  %v9229_v22 = vrot.slane %v9215_v54, %v21760_v13 }
 0x62d   : > { %v9262_v30 = vcombine.low %v9206_v17, %v9222_v38  ;;  %v9263_v11 = vcombine.high %v9206_v17, %v9222_v38  ;;  %v9278_v43 = vcombine.low %v9213_v25, %v9229_v22  ;;  %v9279_v34 = vcombine.high %v9213_v25, %v9229_v22 }
 0x62e   : > { %v11181_v22 = vmul.f32 %v20946_v14, %v23281_v27 }
 0x62f   : > { %v9270_v49 = vrot.slane %v9262_v30, %v21767_v24  ;;  %v9277_v18 = vrot.slane %v9263_v11, %v21767_v24  ;;  %v9286_v45 = vrot.slane %v9278_v43, %v21767_v24  ;;  %v9293_v58 = vrot.slane %v9279_v34, %v21767_v24  ;;  %v20948_v12 = vpop.eup %20947 }
 0x630   : > { %v11361_v48 = vpop.f32.mrb[24].mxu0  ;;  %v11183_v19 = vmul.f32 %v20948_v12, %v23285_v20 }
 0x631   : > { %v17895_v8 = vcombine.low %v9270_v49, %v9277_v18  ;;  %v17897_v55 = vcombine.high %v9270_v49, %v9277_v18  ;;  %v17899_v37 = vcombine.low %v9286_v45, %v9293_v58  ;;  %v17901_v62 = vcombine.high %v9286_v45, %v9293_v58  ;;  %v18694_v47 = vpop.f32.mrb[25].mxu0 }
 0x632   : > { %v12333_v31 = vcombine.low %v23403_v61, %v11361_v48  ;;  %v12334_v23 = vcombine.high %v23403_v61, %v11361_v48  ;;  %v11364_v54 = vpop.f32.mrb[26].mxu0  ;;  %v11216_v61 = vpack.c.bf16 %v11181_v22, %v11181_v22  ;;  %v11217_v58 = vpack.c.bf16 %v11183_v19, %v11183_v19 }
 0x633   : > { %v9614_v36 = vrot.slane %v17895_v8, %v21760_v13  ;;  %v9630_v28 = vrot.slane %v17897_v55, %v21760_v13  ;;  %v9646_v42 = vrot.slane %v17899_v37, %v21760_v13  ;;  %v9662_v46 = vrot.slane %v17901_v62, %v21760_v13  ;;  %v18695_v38 = vpop.f32.mrb[27].mxu0 }
 0x634   : > { %v12341_v55 = vrot.slane %v12333_v31, %v21760_v13  ;;  %v12348_v37 = vrot.slane %v12334_v23, %v21760_v13 }
 0x635   : > { %v9670_v21 = vcombine.low %v9614_v36, %v9630_v28  ;;  %v9702_v60 = vcombine.low %v9646_v42, %v9662_v46  ;;  %v9671_v56 = vcombine.high %v9614_v36, %v9630_v28  ;;  %v9703_v2 = vcombine.high %v9646_v42, %v9662_v46 }
 0x637   : > { %v9678_v35 = vrot.slane %v9670_v21, %v21767_v24  ;;  %v9710_v59 = vrot.slane %v9702_v60, %v21767_v24  ;;  %v9685_v29 = vrot.slane %v9671_v56, %v21767_v24  ;;  %v9717_v9 = vrot.slane %v9703_v2, %v21767_v24 }
 0x639   : > { %v9734_v44 = vcombine.low %v9678_v35, %v9710_v59  ;;  %v9735_v63 = vcombine.high %v9678_v35, %v9710_v59  ;;  %v9736_v17 = vcombine.low %v9685_v29, %v9717_v9  ;;  %v9737_v25 = vcombine.high %v9685_v29, %v9717_v9 }
 0x63b   : > { %v9822_v30 = vpack.c.bf16 %v9734_v44, %v9734_v44  ;;  %v9823_v11 = vpack.c.bf16 %v9735_v63, %v9735_v63  ;;  %v9824_v49 = vpack.c.bf16 %v9736_v17, %v9736_v17  ;;  %v9825_v18 = vpack.c.bf16 %v9737_v25, %v9737_v25 }
 0x63d   : > { %v11785_v43 = vsel %vm11231_vm3, %v9822_v30, 0  ;;  %v11831_v34 = vsel %vm11231_vm3, %v9823_v11, 0  ;;  %v11407_v45 = vpop.f32.mrb[116].mxu1  ;;  %v11877_v36 = vsel %vm11231_vm3, %v9824_v49, 0  ;;  %v11923_v28 = vsel %vm11231_vm3, %v9825_v18, 0 }
 0x63e   : > { %18751 = vmatpush3.bf16.msra.mxu0 %v11785_v43  ;;  %18757 = vmatpush3.bf16.msra.mxu1 %v11831_v34  ;;  %v12349_v27 = vcombine.low %v23415_v51, %v11407_v45  ;;  %v12350_v20 = vcombine.high %v23415_v51, %v11407_v45  ;;  %v18700_v8 = vpop.f32.mrb[117].mxu1 }
 0x63f   : > { %18762 = vmatprep.subr.bf16.mxu0 %v24580_v40  ;;  %18768 = vmatprep.subr.bf16.mxu1 %v24580_v40  ;;  %v11410_v62 = vpop.f32.mrb[118].mxu1 }
 0x640   : > { %v12357_v42 = vrot.slane %v12349_v27, %v21760_v13  ;;  %v12364_v46 = vrot.slane %v12350_v20, %v21760_v13  ;;  %v18701_v21 = vpop.f32.mrb[119].mxu1 }
 0x641   : > { %18753 = vmatmul.mubr.msk.bf16.vlgmr.msra.gmra.mrb[44].mxu0 %vm10939_vm2, %v11216_v61  ;;  %18759 = vmatmul.mubr.msk.bf16.vlgmr.msra.gmra.mrb[136].mxu1 %vm10939_vm2, %v11217_v58 }
 0x642   : > { %18763 = vmatpush3.bf16.msra.mxu0 %v11877_v36  ;;  %18769 = vmatpush3.bf16.msra.mxu1 %v11923_v28  ;;  %v12397_v51 = vcombine.low %v12341_v55, %v12357_v42  ;;  %v12398_v60 = vcombine.high %v12341_v55, %v12357_v42  ;;  %v12413_v56 = vcombine.low %v12348_v37, %v12364_v46 }
 0x643   : > { %v12414_v2 = vcombine.high %v12348_v37, %v12364_v46  ;;  %18764 = vmatprep.mubr.msk.bf16.mxu0 %vm21026_vm0, %v24580_v40  ;;  %18770 = vmatprep.mubr.msk.bf16.mxu1 %vm21026_vm0, %v24580_v40 }
 0x644   : > { %18774 = vmatprep.subr.bf16.mxu0 %v24580_v40  ;;  %v12405_v14 = vrot.slane %v12397_v51, %v21767_v24  ;;  %v12412_v48 = vrot.slane %v12398_v60, %v21767_v24  ;;  %v12421_v35 = vrot.slane %v12413_v56, %v21767_v24  ;;  %18780 = vmatprep.subr.bf16.mxu1 %v24580_v40 }
 0x645   : > { %v12428_v59 = vrot.slane %v12414_v2, %v21767_v24 }
 0x646   : > { %v17953_v29 = vcombine.low %v12405_v14, %v12412_v48  ;;  %v17955_v9 = vcombine.high %v12405_v14, %v12412_v48  ;;  %v9230_v14 = vcombine.low %v22699_v5, %v22713_v1  ;;  %v9231_v48 = vcombine.high %v22699_v5, %v22713_v1 }
 0x647   : > { %v17957_v47 = vcombine.low %v12421_v35, %v12428_v59  ;;  %v17959_v12 = vcombine.high %v12421_v35, %v12428_v59 }
 0x648   : > { %v12749_v31 = vrot.slane %v17953_v29, %v21760_v13  ;;  %v12765_v23 = vrot.slane %v17955_v9, %v21760_v13 }
 0x649   : > { %v12781_v54 = vrot.slane %v17957_v47, %v21760_v13  ;;  %v12797_v44 = vrot.slane %v17959_v12, %v21760_v13  ;;  %v9238_v47 = vrot.slane %v9230_v14, %v21760_v13  ;;  %v9245_v12 = vrot.slane %v9231_v48, %v21760_v13 }
 0x64a   : > { %v12806_v63 = vcombine.high %v12749_v31, %v12765_v23  ;;  %v12805_v25 = vcombine.low %v12749_v31, %v12765_v23 }
 0x64b   : > { %v12838_v17 = vcombine.high %v12781_v54, %v12797_v44  ;;  %v12837_v38 = vcombine.low %v12781_v54, %v12797_v44 }
 0x64c   : > { %v23466_v22 = vrot.slane %v12806_v63, %v21767_v24  ;;  %v23472_v30 = vrot.slane %v12805_v25, %v21767_v24 }
 0x64d   : > { %v23469_v19 = vrot.slane %v12838_v17, %v21767_v24  ;;  %v23475_v11 = vrot.slane %v12837_v38, %v21767_v24 }
 0x64f   : > { %v12872_v43 = vcombine.high %v23466_v22, %v23469_v19  ;;  %v12869_v34 = vcombine.low %v23472_v30, %v23475_v11  ;;  %v12870_v49 = vcombine.high %v23472_v30, %v23475_v11  ;;  %v12871_v18 = vcombine.low %v23466_v22, %v23469_v19  ;;  %v20431_v22 = vld [vmem:[%s23651_s15 + $0x330] ss:$24 sps:$4 sm:$0xff]  }
 0x650   : > { %v20434_v19 = vld [vmem:[%s23651_s15 + $0x338] ss:$24 sps:$4 sm:$0xff]  }
 0x651   : > { %v11128_v61 = vpop.xlane.xlu1 %11127 }
 0x652   : > { %20949 = vrcp.f32 %v11128_v61 }
 0x655   : > { %v11002_v45 = vpop.xlane.xlu1 %11001 }
 0x656   : > { %v11032_v58 = vsub.f32 %v23191_v39, %v11002_v45 }
 0x658   : > { %v11076_v27 = vmul.f32 1.442695, %v11032_v58 }
 0x659   : > { %v11131_v20 = vpop.xlane.xlu0 %11130  ;;  %v23491_v42 = vpop.xlane.xlu1 %11007 }
 0x65a   : > { %20951 = vpow2.f32 %v11076_v27 }
 0x65b   : > { %20953 = vrcp.f32 %v11131_v20 }
 0x65c   : > { %v20950_v8 = vpop.eup %20949 }
 0x65d   : > { %v11185_v55 = vmul.f32 %v20950_v8, %v23295_v32  ;;  %v11005_v37 = vpop.xlane.xlu0 %11004 }
 0x65e   : > { %v11033_v62 = vsub.f32 %v23196_v41, %v11005_v37 }
 0x65f   : > { %v11218_v36 = vpack.c.bf16 %v11185_v55, %v11185_v55 }
 0x660   : > { %v11078_v28 = vmul.f32 1.442695, %v11033_v62 }
 0x661   : > { %18765 = vmatmul.mubr.msk.bf16.vlgmr.msra.gmra.mrb[48].mxu0 %vm10939_vm2, %v11218_v36  ;;  %v23495_v21 = vpop.xlane.xlu0 %11010  ;;  %v11134_v51 = vpop.xlane.xlu1 %11133 }
 0x662   : > { %20955 = vpow2.f32 %v11078_v28  ;;  %18776 = vmatprep.mubr.msk.bf16.mxu0 %vm21026_vm0, %v24580_v40 }
 0x663   : > { %20957 = vrcp.f32 %v11134_v51 }
 0x664   : > { %v23493_v39 = vpop.eup %20951 }
 0x665   : > { %v20954_v46 = vpop.eup %20953  ;;  %v11144_v32 = vsel %vm10939_vm2, %v23493_v39, 0.0  ;;  %v8967_v35 = vpop.permute.xlu1 %8966 }
 0x666   : > { %v11187_v41 = vmul.f32 %v20954_v46, %v23302_v10  ;;  %11145 = vadd.xlane.f32.xlu1 %v11144_v32 }
 0x668   : > { %v11219_v60 = vpack.c.bf16 %v11187_v41, %v11187_v41 }
 0x669   : > { %v11137_v56 = vpop.xlane.xlu0 %11136 }
 0x66a   : > { %18771 = vmatmul.mubr.msk.bf16.vlgmr.msra.gmra.mrb[140].mxu1 %vm10939_vm2, %v11219_v60  ;;  %20959 = vrcp.f32 %v11137_v56 }
 0x66b   : > { %18782 = vmatprep.mubr.msk.bf16.mxu1 %vm21026_vm0, %v24580_v40 }
 0x66c   : > { %v23503_v2 = vpop.eup %20955 }
 0x66d   : > { %v8975_v59 = vpop.permute.xlu0 %8974  ;;  %v11147_v10 = vsel %vm10939_vm2, %v23503_v2, 0.0  ;;  %v20958_v32 = vpop.eup %20957 }
 0x66e   : > { %v9246_v29 = vcombine.low %v8967_v35, %v8975_v59  ;;  %v9247_v9 = vcombine.high %v8967_v35, %v8975_v59  ;;  %11148 = vadd.xlane.f32.xlu0 %v11147_v10 }
 0x670   : > { %v9254_v31 = vrot.slane %v9246_v29, %v21760_v13  ;;  %v9261_v23 = vrot.slane %v9247_v9, %v21760_v13  ;;  %v11189_v29 = vmul.f32 %v20958_v32, %v23313_v16  ;;  %v11034_v16 = vsub.f32 %v23202_v3, %v23491_v42 }
 0x671   : > { %v11035_v3 = vsub.f32 %v23214_v26, %v23495_v21 }
 0x672   : > { %v9294_v54 = vcombine.low %v9238_v47, %v9254_v31  ;;  %v9295_v44 = vcombine.high %v9238_v47, %v9254_v31  ;;  %v9310_v5 = vcombine.low %v9245_v12, %v9261_v23  ;;  %v9311_v1 = vcombine.high %v9245_v12, %v9261_v23 }
 0x673   : > { %v11082_v42 = vmul.f32 1.442695, %v11035_v3 }
 0x674   : > { %v9302_v63 = vrot.slane %v9294_v54, %v21767_v24  ;;  %v9309_v17 = vrot.slane %v9295_v44, %v21767_v24  ;;  %v9318_v25 = vrot.slane %v9310_v5, %v21767_v24  ;;  %v9325_v38 = vrot.slane %v9311_v1, %v21767_v24  ;;  %v20960_v14 = vpop.eup %20959 }
 0x675   : > { %v11191_v9 = vmul.f32 %v20960_v14, %v23326_v57  ;;  %v11220_v5 = vpack.c.bf16 %v11189_v29, %v11189_v29 }
 0x676   : > { %v17896_v61 = vcombine.low %v9302_v63, %v9309_v17  ;;  %v17898_v45 = vcombine.high %v9302_v63, %v9309_v17  ;;  %v17900_v58 = vcombine.low %v9318_v25, %v9325_v38  ;;  %v17902_v27 = vcombine.high %v9318_v25, %v9325_v38 }
 0x677   : > { %8982 = vrot.lane.b32.xlu1 %v23109_v0, %s21022_s24  ;;  %v11221_v1 = vpack.c.bf16 %v11191_v9, %v11191_v9  ;;  %v11080_v17 = vmul.f32 1.442695, %v11034_v16 }
 0x678   : > { %v9621_v20 = vrot.slane %v17896_v61, %v21760_v13  ;;  %v9637_v8 = vrot.slane %v17898_v45, %v21760_v13  ;;  %v9653_v55 = vrot.slane %v17900_v58, %v21760_v13  ;;  %v9669_v37 = vrot.slane %v17902_v27, %v21760_v13 }
 0x679   : > { %20961 = vpow2.f32 %v11080_v17 }
 0x67a   : > { %v9686_v62 = vcombine.low %v9621_v20, %v9637_v8  ;;  %v9718_v36 = vcombine.low %v9653_v55, %v9669_v37  ;;  %v9687_v28 = vcombine.high %v9621_v20, %v9637_v8  ;;  %v9719_v46 = vcombine.high %v9653_v55, %v9669_v37 }
 0x67b   : > { %20963 = vpow2.f32 %v11082_v42 }
 0x67c   : > { %v9694_v41 = vrot.slane %v9686_v62, %v21767_v24  ;;  %v9726_v51 = vrot.slane %v9718_v36, %v21767_v24  ;;  %v9701_v60 = vrot.slane %v9687_v28, %v21767_v24  ;;  %v9733_v56 = vrot.slane %v9719_v46, %v21767_v24 }
 0x67e   : > { %v9738_v48 = vcombine.low %v9694_v41, %v9726_v51  ;;  %v9739_v35 = vcombine.high %v9694_v41, %v9726_v51  ;;  %v9740_v59 = vcombine.low %v9701_v60, %v9733_v56  ;;  %v9741_v10 = vcombine.high %v9701_v60, %v9733_v56 }
 0x680   : > { %v9826_v47 = vpack.c.bf16 %v9738_v48, %v9738_v48  ;;  %v9827_v12 = vpack.c.bf16 %v9739_v35, %v9739_v35  ;;  %v9828_v54 = vpack.c.bf16 %v9740_v59, %v9740_v59  ;;  %v9829_v44 = vpack.c.bf16 %v9741_v10, %v9741_v10 }
 0x682   : > { %v11969_v31 = vsel %vm11231_vm3, %v9826_v47, 0  ;;  %v12015_v23 = vsel %vm11231_vm3, %v9827_v12, 0  ;;  %v12061_v57 = vsel %vm11231_vm3, %v9828_v54, 0  ;;  %v12107_v63 = vsel %vm11231_vm3, %v9829_v44, 0 }
 0x683   : > { %18775 = vmatpush3.bf16.msra.mxu0 %v11969_v31  ;;  %18781 = vmatpush3.bf16.msra.mxu1 %v12015_v23  ;;  %v23551_v38 = vpop.eup %20961 }
 0x684   : > { %8990 = vrot.lane.b32.xlu0 %v23112_v53, %s21022_s24  ;;  %18786 = vmatprep.subr.bf16.mxu0 %v24580_v40  ;;  %v11150_v61 = vsel %vm10939_vm2, %v23551_v38, 0.0 }
 0x685   : > { %18792 = vmatprep.subr.bf16.mxu1 %v24580_v40  ;;  %v23555_v58 = vpop.eup %20963 }
 0x686   : > { %18777 = vmatmul.mubr.msk.bf16.vlgmr.msra.gmra.mrb[52].mxu0 %vm10939_vm2, %v11220_v5  ;;  %18783 = vmatmul.mubr.msk.bf16.vlgmr.msra.gmra.mrb[144].mxu1 %vm10939_vm2, %v11221_v1  ;;  %v11153_v26 = vsel %vm10939_vm2, %v23555_v58, 0.0 }
 0x687   : > { %18787 = vmatpush3.bf16.msra.mxu0 %v12061_v57  ;;  %18793 = vmatpush3.bf16.msra.mxu1 %v12107_v63 }
 0x688   : > { %18788 = vmatprep.mubr.msk.bf16.mxu0 %vm21026_vm0, %v24580_v40  ;;  %18794 = vmatprep.mubr.msk.bf16.mxu1 %vm21026_vm0, %v24580_v40 }
 0x689   : > { %18798 = vmatprep.subr.bf16.mxu0 %v24580_v40  ;;  %18804 = vmatprep.subr.bf16.mxu1 %v24580_v40 }
 0x696   : > { %v11140_v25 = vpop.xlane.xlu1 %11139 }
 0x697   : > { %20965 = vrcp.f32 %v11140_v25 }
 0x69b   : > { %11151 = vadd.xlane.f32.xlu1 %v11150_v61 }
 0x69e   : > { %v11143_v45 = vpop.xlane.xlu0 %11142 }
 0x69f   : > { %20967 = vrcp.f32 %v11143_v45 }
 0x6a1   : > { %v20966_v27 = vpop.eup %20965 }
 0x6a2   : > { %v11193_v20 = vmul.f32 %v20966_v27, %v23378_v15 }
 0x6a3   : > { %11154 = vadd.xlane.f32.xlu0 %v11153_v26 }
 0x6a4   : > { %v11222_v21 = vpack.c.bf16 %v11193_v20, %v11193_v20 }
 0x6a6   : > { %18789 = vmatmul.mubr.msk.bf16.vlgmr.msra.gmra.mrb[56].mxu0 %vm10939_vm2, %v11222_v21 }
 0x6a7   : > { %18800 = vmatprep.mubr.msk.bf16.mxu0 %vm21026_vm0, %v24580_v40 }
 0x6a9   : > { %v20968_v8 = vpop.eup %20967 }
 0x6aa   : > { %v11195_v55 = vmul.f32 %v20968_v8, %v23388_v33 }
 0x6ac   : > { %v11223_v37 = vpack.c.bf16 %v11195_v55, %v11195_v55 }
 0x6ae   : > { %18795 = vmatmul.mubr.msk.bf16.vlgmr.msra.gmra.mrb[148].mxu1 %vm10939_vm2, %v11223_v37 }
 0x6af   : > { %18806 = vmatprep.mubr.msk.bf16.mxu1 %vm21026_vm0, %v24580_v40 }
 0x6b3   : > { %v11453_v15 = vpop.f32.mrb[28].mxu0 }
 0x6b4   : > { %v18706_v62 = vpop.f32.mrb[29].mxu0 }
 0x6b5   : > { %v11456_v36 = vpop.f32.mrb[30].mxu0 }
 0x6b6   : > { %v18707_v28 = vpop.f32.mrb[31].mxu0 }
 0x6bc   : > { %v11499_v46 = vpop.f32.mrb[120].mxu1 }
 0x6bd   : > { %v18712_v32 = vpop.f32.mrb[121].mxu1 }
 0x6be   : > { %v11502_v41 = vpop.f32.mrb[122].mxu1 }
 0x6bf   : > { %v18713_v51 = vpop.f32.mrb[123].mxu1 }
 0x6c9   : > { %v11545_v60 = vpop.f32.mrb[32].mxu0 }
 0x6ca   : > { %v12365_v56 = vcombine.low %v11453_v15, %v11545_v60  ;;  %v12366_v14 = vcombine.high %v11453_v15, %v11545_v60  ;;  %v18718_v48 = vpop.f32.mrb[33].mxu0 }
 0x6cb   : > { %v11548_v35 = vpop.f32.mrb[34].mxu0 }
 0x6cc   : > { %v18719_v33 = vpop.f32.mrb[35].mxu0  ;;  %v12373_v12 = vrot.slane %v12365_v56, %v21760_v13  ;;  %v12380_v31 = vrot.slane %v12366_v14, %v21760_v13 }
 0x6d6   : > { %v11591_v59 = vpop.f32.mrb[124].mxu1 }
 0x6d7   : > { %v12381_v10 = vcombine.low %v11499_v46, %v11591_v59  ;;  %v12382_v29 = vcombine.high %v11499_v46, %v11591_v59  ;;  %v18724_v9 = vpop.f32.mrb[125].mxu1 }
 0x6d8   : > { %v11594_v47 = vpop.f32.mrb[126].mxu1 }
 0x6d9   : > { %v12389_v23 = vrot.slane %v12381_v10, %v21760_v13  ;;  %v12396_v54 = vrot.slane %v12382_v29, %v21760_v13  ;;  %v18725_v44 = vpop.f32.mrb[127].mxu1 }
 0x6db   : > { %v12429_v5 = vcombine.low %v12373_v12, %v12389_v23  ;;  %v12430_v1 = vcombine.high %v12373_v12, %v12389_v23  ;;  %v12445_v16 = vcombine.low %v12380_v31, %v12396_v54  ;;  %v12446_v57 = vcombine.high %v12380_v31, %v12396_v54 }
 0x6dd   : > { %v12437_v63 = vrot.slane %v12429_v5, %v21767_v24  ;;  %v12444_v17 = vrot.slane %v12430_v1, %v21767_v24  ;;  %v12453_v3 = vrot.slane %v12445_v16, %v21767_v24  ;;  %v12460_v42 = vrot.slane %v12446_v57, %v21767_v24 }
 0x6de   : > { %v11637_v25 = vpop.f32.mrb[36].mxu0 }
 0x6df   : > { %v17954_v61 = vcombine.low %v12437_v63, %v12444_v17  ;;  %v17956_v45 = vcombine.high %v12437_v63, %v12444_v17  ;;  %v17958_v27 = vcombine.low %v12453_v3, %v12460_v42  ;;  %v17960_v20 = vcombine.high %v12453_v3, %v12460_v42  ;;  %v18730_v26 = vpop.f32.mrb[37].mxu0 }
 0x6e0   : > { %v11640_v21 = vpop.f32.mrb[38].mxu0 }
 0x6e1   : > { %v12756_v8 = vrot.slane %v17954_v61, %v21760_v13  ;;  %v12772_v55 = vrot.slane %v17956_v45, %v21760_v13  ;;  %v12788_v37 = vrot.slane %v17958_v27, %v21760_v13  ;;  %v12804_v15 = vrot.slane %v17960_v20, %v21760_v13  ;;  %v18731_v62 = vpop.f32.mrb[39].mxu0 }
 0x6e3   : > { %v12822_v36 = vcombine.high %v12756_v8, %v12772_v55  ;;  %v12854_v28 = vcombine.high %v12788_v37, %v12804_v15  ;;  %v12821_v46 = vcombine.low %v12756_v8, %v12772_v55  ;;  %v12853_v32 = vcombine.low %v12788_v37, %v12804_v15 }
 0x6e4   : > { %v9334_v55 = vcombine.low %v23109_v0, %v23112_v53 }
 0x6e5   : > { %v23580_v41 = vrot.slane %v12822_v36, %v21767_v24  ;;  %v23583_v51 = vrot.slane %v12854_v28, %v21767_v24  ;;  %v23586_v60 = vrot.slane %v12821_v46, %v21767_v24  ;;  %v23589_v56 = vrot.slane %v12853_v32, %v21767_v24 }
 0x6e6   : > { %v11683_v14 = vpop.f32.mrb[128].mxu1  ;;  %v9335_v28 = vcombine.high %v23109_v0, %v23112_v53 }
 0x6e7   : > { %v18736_v48 = vpop.f32.mrb[129].mxu1  ;;  %v12876_v35 = vcombine.high %v23580_v41, %v23583_v51  ;;  %v12873_v33 = vcombine.low %v23586_v60, %v23589_v56  ;;  %v12874_v59 = vcombine.high %v23586_v60, %v23589_v56  ;;  %v12875_v10 = vcombine.low %v23580_v41, %v23583_v51  ;;  %v20527_v56 = vld [vmem:[%s23651_s15 + $0x630] ss:$24 sps:$4 sm:$0xff]  }
 0x6e8   : > { %v11686_v29 = vpop.f32.mrb[130].mxu1  ;;  %v9349_v0 = vrot.slane %v9335_v28, %v21760_v13 }
 0x6e9   : > { %v18737_v9 = vpop.f32.mrb[131].mxu1 }
 0x6ee   : > { %v11729_v47 = vpop.f32.mrb[40].mxu0 }
 0x6ef   : > { %v12469_v12 = vcombine.low %v11637_v25, %v11729_v47  ;;  %v12470_v31 = vcombine.high %v11637_v25, %v11729_v47  ;;  %v18742_v23 = vpop.f32.mrb[41].mxu0  ;;  %v9342_v47 = vrot.slane %v9334_v55, %v21760_v13 }
 0x6f0   : > { %v11732_v54 = vpop.f32.mrb[42].mxu0 }
 0x6f1   : > { %v18743_v44 = vpop.f32.mrb[43].mxu0  ;;  %v12477_v17 = vrot.slane %v12469_v12, %v21760_v13  ;;  %v12484_v3 = vrot.slane %v12470_v31, %v21760_v13 }
 0x6f3   : > { %v11146_v42 = vpop.xlane.xlu1 %11145 }
 0x6f4   : > { %20969 = vrcp.f32 %v11146_v42 }
 0x6f7   : > { %v11775_v5 = vpop.f32.mrb[132].mxu1  ;;  %v8983_v32 = vpop.permute.xlu1 %8982 }
 0x6f8   : > { %v12485_v1 = vcombine.low %v11683_v14, %v11775_v5  ;;  %v12486_v16 = vcombine.high %v11683_v14, %v11775_v5  ;;  %v18748_v57 = vpop.f32.mrb[133].mxu1 }
 0x6f9   : > { %v11778_v63 = vpop.f32.mrb[134].mxu1 }
 0x6fa   : > { %v12493_v61 = vrot.slane %v12485_v1, %v21760_v13  ;;  %v12500_v45 = vrot.slane %v12486_v16, %v21760_v13  ;;  %v18749_v27 = vpop.f32.mrb[135].mxu1 }
 0x6fb   : > { %v11149_v20 = vpop.xlane.xlu0 %11148 }
 0x6fc   : > { %v12501_v25 = vcombine.low %v12477_v17, %v12493_v61  ;;  %v12502_v26 = vcombine.high %v12477_v17, %v12493_v61  ;;  %v12517_v21 = vcombine.low %v12484_v3, %v12500_v45  ;;  %v12518_v8 = vcombine.high %v12484_v3, %v12500_v45 }
 0x6fd   : > { %20971 = vrcp.f32 %v11149_v20 }
 0x6fe   : > { %v12509_v37 = vrot.slane %v12501_v25, %v21767_v24  ;;  %v12516_v15 = vrot.slane %v12502_v26, %v21767_v24  ;;  %v12525_v62 = vrot.slane %v12517_v21, %v21767_v24  ;;  %v12532_v36 = vrot.slane %v12518_v8, %v21767_v24 }
 0x6ff   : > { %v8991_v46 = vpop.permute.xlu0 %8990 }
 0x700   : > { %v13013_v14 = vcombine.low %v12509_v37, %v12516_v15  ;;  %v17969_v48 = vcombine.high %v12509_v37, %v12516_v15  ;;  %v13029_v29 = vcombine.low %v12525_v62, %v12532_v36  ;;  %v17970_v9 = vcombine.high %v12525_v62, %v12532_v36 }
 0x701   : > { %v9350_v12 = vcombine.low %v8983_v32, %v8991_v46  ;;  %v9351_v31 = vcombine.high %v8983_v32, %v8991_v46 }
 0x702   : > { %v13020_v23 = vrot.slane %v13013_v14, %v21760_v13  ;;  %v13028_v54 = vrot.slane %v17969_v48, %v21760_v13  ;;  %v13036_v44 = vrot.slane %v13029_v29, %v21760_v13  ;;  %v13044_v5 = vrot.slane %v17970_v9, %v21760_v13  ;;  %v20970_v29 = vpop.eup %20969 }
 0x703   : > { %v9358_v53 = vrot.slane %v9350_v12, %v21760_v13  ;;  %v9365_v1 = vrot.slane %v9351_v31, %v21760_v13 }
 0x704   : > { %v13046_v16 = vcombine.high %v13020_v23, %v13028_v54  ;;  %v13062_v57 = vcombine.high %v13036_v44, %v13044_v5  ;;  %v13045_v63 = vcombine.low %v13020_v23, %v13028_v54  ;;  %v13061_v17 = vcombine.low %v13036_v44, %v13044_v5 }
 0x705   : > { %v9366_v3 = vcombine.low %v9342_v47, %v9358_v53  ;;  %v9367_v42 = vcombine.high %v9342_v47, %v9358_v53  ;;  %v9382_v61 = vcombine.low %v9349_v0, %v9365_v1  ;;  %v9383_v45 = vcombine.high %v9349_v0, %v9365_v1 }
 0x706   : > { %v23620_v27 = vrot.slane %v13046_v16, %v21767_v24  ;;  %v23623_v25 = vrot.slane %v13062_v57, %v21767_v24  ;;  %v23626_v20 = vrot.slane %v13045_v63, %v21767_v24  ;;  %v23629_v26 = vrot.slane %v13061_v17, %v21767_v24 }
 0x707   : > { %v9374_v21 = vrot.slane %v9366_v3, %v21767_v24  ;;  %v9381_v8 = vrot.slane %v9367_v42, %v21767_v24  ;;  %v9390_v55 = vrot.slane %v9382_v61, %v21767_v24  ;;  %v9397_v37 = vrot.slane %v9383_v45, %v21767_v24  ;;  %v20972_v23 = vpop.eup %20971 }
 0x708   : > { %v13080_v15 = vcombine.high %v23620_v27, %v23623_v25  ;;  %v13077_v62 = vcombine.low %v23626_v20, %v23629_v26  ;;  %v13078_v36 = vcombine.high %v23626_v20, %v23629_v26  ;;  %v13079_v48 = vcombine.low %v23620_v27, %v23623_v25  ;;  %v20620_v27 = vld [vmem:[%s23651_s15 + $0x40] ss:$24 sps:$4 sm:$0xff]   ;;  %v20625_v25 = vld [vmem:[%s23651_s15 + $0x74] ss:$24 sps:$4 sm:$0xff]  }
 0x709   : > { %v9742_v28 = vcombine.low %v9374_v21, %v9381_v8  ;;  %v17903_v46 = vcombine.high %v9374_v21, %v9381_v8  ;;  %v9758_v32 = vcombine.low %v9390_v55, %v9397_v37  ;;  %v17904_v14 = vcombine.high %v9390_v55, %v9397_v37 }
 0x70a   : > { %v11197_v61 = vmul.f32 %v20970_v29, %v23493_v39  ;;  %v11199_v45 = vmul.f32 %v20972_v23, %v23503_v2 }
 0x70b   : > { %v9749_v9 = vrot.slane %v9742_v28, %v21760_v13  ;;  %v9757_v47 = vrot.slane %v17903_v46, %v21760_v13  ;;  %v9765_v12 = vrot.slane %v9758_v32, %v21760_v13  ;;  %v9773_v31 = vrot.slane %v17904_v14, %v21760_v13 }
 0x70c   : > { %v11225_v23 = vpack.c.bf16 %v11199_v45, %v11199_v45 }
 0x70d   : > { %v9774_v54 = vcombine.low %v9749_v9, %v9757_v47  ;;  %v9790_v44 = vcombine.low %v9765_v12, %v9773_v31  ;;  %v9775_v5 = vcombine.high %v9749_v9, %v9757_v47  ;;  %v9791_v0 = vcombine.high %v9765_v12, %v9773_v31 }
 0x70e   : > { %v11224_v31 = vpack.c.bf16 %v11197_v61, %v11197_v61 }
 0x70f   : > { %v9782_v53 = vrot.slane %v9774_v54, %v21767_v24  ;;  %v9798_v1 = vrot.slane %v9790_v44, %v21767_v24  ;;  %v9789_v16 = vrot.slane %v9775_v5, %v21767_v24  ;;  %v9805_v57 = vrot.slane %v9791_v0, %v21767_v24  ;;  %v20331_v54 = vld [vmem:[%s23651_s15 + $0x4] ss:$24 sps:$4 sm:$0xff]  }
 0x710   : > { %v20334_v44 = vld [vmem:[%s23651_s15 + $0xc] ss:$24 sps:$4 sm:$0xff]  }
 0x711   : > { %v9806_v63 = vcombine.low %v9782_v53, %v9798_v1  ;;  %v9807_v17 = vcombine.high %v9782_v53, %v9798_v1  ;;  %v9808_v3 = vcombine.low %v9789_v16, %v9805_v57  ;;  %v9809_v42 = vcombine.high %v9789_v16, %v9805_v57 }
 0x713   : > { %v9830_v21 = vpack.c.bf16 %v9806_v63, %v9806_v63  ;;  %v9831_v8 = vpack.c.bf16 %v9807_v17, %v9807_v17  ;;  %v9832_v9 = vpack.c.bf16 %v9808_v3, %v9808_v3  ;;  %v9833_v47 = vpack.c.bf16 %v9809_v42, %v9809_v42  ;;  %v20329_v42 = vld [vmem:[%s23651_s15] ss:$24 sps:$4 sm:$0xff]  }
 0x714   : > { %v23659_v55 = vpop.f32.mrb[44].mxu0  ;;  %v23661_v37 = vpop.f32.mrb[136].mxu1 }
 0x715   : > { %v18754_v28 = vpop.f32.mrb[45].mxu0  ;;  %v18760_v46 = vpop.f32.mrb[137].mxu1  ;;  %v12153_v32 = vsel %vm11231_vm3, %v9830_v21, 0  ;;  %v12199_v14 = vsel %vm11231_vm3, %v9831_v8, 0  ;;  %v12245_v5 = vsel %vm11231_vm3, %v9832_v9, 0  ;;  %v12291_v0 = vsel %vm11231_vm3, %v9833_v47, 0 }
 0x716   : > { %18799 = vmatpush3.bf16.msra.mxu0 %v12153_v32  ;;  %18805 = vmatpush3.bf16.msra.mxu1 %v12199_v14  ;;  %v11824_v39 = vpop.f32.mrb[46].mxu0  ;;  %v11870_v2 = vpop.f32.mrb[138].mxu1  ;;  %v20337_v21 = vld [vmem:[%s23651_s15 + $0x34] ss:$24 sps:$4 sm:$0xff]   ;;  %v20335_v28 = vld [vmem:[%s23651_s15 + $0x30] ss:$24 sps:$4 sm:$0xff]  }
 0x717   : > { %v18755_v29 = vpop.f32.mrb[47].mxu0  ;;  %v18761_v12 = vpop.f32.mrb[139].mxu1  ;;  %18810 = vmatprep.subr.bf16.mxu0 %v24580_v40  ;;  %18816 = vmatprep.subr.bf16.mxu1 %v24580_v40  ;;  %v20343_v46 = vld [vmem:[%s23651_s15 + $0x64] ss:$24 sps:$4 sm:$0xff]   ;;  %v20332_v32 = vld [vmem:[%s23651_s15 + $0x8] ss:$24 sps:$4 sm:$0xff]  }
 0x718   : > { %v20341_v14 = vld [vmem:[%s23651_s15 + $0x60] ss:$24 sps:$4 sm:$0xff]   ;;  %v20340_v9 = vld [vmem:[%s23651_s15 + $0x3c] ss:$24 sps:$4 sm:$0xff]  }
 0x719   : > { %18801 = vmatmul.mubr.msk.bf16.vlgmr.msra.gmra.mrb[60].mxu0 %vm10939_vm2, %v11224_v31  ;;  %18807 = vmatmul.mubr.msk.bf16.vlgmr.msra.gmra.mrb[152].mxu1 %vm10939_vm2, %v11225_v23  ;;  %v20349_v39 = vld [vmem:[%s23651_s15 + $0x94] ss:$24 sps:$4 sm:$0xff]  }
 0x71a   : > { %18811 = vmatpush3.bf16.msra.mxu0 %v12245_v5  ;;  %18817 = vmatpush3.bf16.msra.mxu1 %v12291_v0 }
 0x71b   : > { %18812 = vmatprep.mubr.msk.bf16.mxu0 %vm21026_vm0, %v24580_v40  ;;  %18818 = vmatprep.mubr.msk.bf16.mxu1 %vm21026_vm0, %v24580_v40 }
 0x71c   : > { %14975 = vmatprep.subr.bf16.mxu0 %v20331_v54  ;;  %15104 = vmatprep.subr.bf16.mxu1 %v20334_v44  ;;  %v20338_v54 = vld [vmem:[%s23651_s15 + $0x38] ss:$24 sps:$4 sm:$0xff]  }
 0x71d   : > { %v20347_v44 = vld [vmem:[%s23651_s15 + $0x90] ss:$24 sps:$4 sm:$0xff]  }
 0x728   : > { %v11152_v53 = vpop.xlane.xlu1 %11151 }
 0x729   : > { %20973 = vrcp.f32 %v11152_v53 }
 0x730   : > { %v11155_v1 = vpop.xlane.xlu0 %11154 }
 0x731   : > { %20975 = vrcp.f32 %v11155_v1 }
 0x733   : > { %v20974_v16 = vpop.eup %20973 }
 0x734   : > { %v11201_v57 = vmul.f32 %v20974_v16, %v23551_v38  ;;  %v11913_v63 = vpop.f32.mrb[48].mxu0  ;;  %v20355_v16 = vld [vmem:[%s23651_s15 + $0xc4] ss:$24 sps:$4 sm:$0xff]  }
 0x735   : > { %v12537_v17 = vcombine.low %v23659_v55, %v11913_v63  ;;  %v12538_v3 = vcombine.high %v23659_v55, %v11913_v63  ;;  %v18766_v40 = vpop.f32.mrb[49].mxu0 }
 0x736   : > { %v11916_v61 = vpop.f32.mrb[50].mxu0  ;;  %v11226_v45 = vpack.c.bf16 %v11201_v57, %v11201_v57 }
 0x737   : > { %v18767_v8 = vpop.f32.mrb[51].mxu0  ;;  %v12545_v5 = vrot.slane %v12537_v17, %v21760_v13 }
 0x738   : > { %18813 = vmatmul.mubr.msk.bf16.vlgmr.msra.gmra.mrb[64].mxu0 %vm10939_vm2, %v11226_v45 }
 0x739   : > { %14976 = vmatpush1.bf16.msra.mxu0 %v20329_v42  ;;  %v20353_v42 = vld [vmem:[%s23651_s15 + $0xc0] ss:$24 sps:$4 sm:$0xff]  }
 0x73a   : > { %14977 = vmatprep.subr.bf16.mxu0 %v20337_v21 }
 0x73b   : > { %v20976_v38 = vpop.eup %20975 }
 0x73c   : > { %v11203_v55 = vmul.f32 %v20976_v38, %v23555_v58  ;;  %v12552_v58 = vrot.slane %v12538_v3, %v21760_v13  ;;  %v20344_v3 = vld [vmem:[%s23651_s15 + $0x68] ss:$24 sps:$4 sm:$0xff]  }
 0x73d   : > { %v11959_v47 = vpop.f32.mrb[140].mxu1  ;;  %14978 = vmatpush1.bf16.msra.mxu0 %v20335_v28  ;;  %v20352_v28 = vld [vmem:[%s23651_s15 + $0x9c] ss:$24 sps:$4 sm:$0xff]  }
 0x73e   : > { %v12553_v2 = vcombine.low %v23661_v37, %v11959_v47  ;;  %v12554_v29 = vcombine.high %v23661_v37, %v11959_v47  ;;  %v18772_v12 = vpop.f32.mrb[141].mxu1  ;;  %v11227_v31 = vpack.c.bf16 %v11203_v55, %v11203_v55  ;;  %14979 = vmatprep.subr.bf16.mxu0 %v20343_v46  ;;  %v20346_v37 = vld [vmem:[%s23651_s15 + $0x6c] ss:$24 sps:$4 sm:$0xff]  }
 0x73f   : > { %v11962_v23 = vpop.f32.mrb[142].mxu1  ;;  %v20361_v46 = vld [vmem:[%s23651_s15 + $0xf4] ss:$24 sps:$4 sm:$0xff]  }
 0x740   : > { %v12561_v0 = vrot.slane %v12553_v2, %v21760_v13  ;;  %v12568_v53 = vrot.slane %v12554_v29, %v21760_v13  ;;  %v18773_v1 = vpop.f32.mrb[143].mxu1  ;;  %18819 = vmatmul.mubr.msk.bf16.vlgmr.msra.gmra.mrb[156].mxu1 %vm10939_vm2, %v11227_v31  ;;  %v20350_v29 = vld [vmem:[%s23651_s15 + $0x98] ss:$24 sps:$4 sm:$0xff]   ;;  %v20358_v12 = vld [vmem:[%s23651_s15 + $0xcc] ss:$24 sps:$4 sm:$0xff]  }
 0x741   : > { %15105 = vmatpush1.bf16.msra.mxu1 %v20332_v32  ;;  %14980 = vmatpush1.bf16.msra.mxu0 %v20341_v14  ;;  %v20359_v31 = vld [vmem:[%s23651_s15 + $0xf0] ss:$24 sps:$4 sm:$0xff]   ;;  %v20367_v23 = vld [vmem:[%s23651_s15 + $0x124] ss:$24 sps:$4 sm:$0xff]  }
 0x742   : > { %v12601_v57 = vcombine.low %v12545_v5, %v12561_v0  ;;  %v12602_v63 = vcombine.high %v12545_v5, %v12561_v0  ;;  %v12617_v40 = vcombine.low %v12552_v58, %v12568_v53  ;;  %v12618_v17 = vcombine.high %v12552_v58, %v12568_v53  ;;  %15106 = vmatprep.subr.bf16.mxu1 %v20340_v9 }
 0x743   : > { %14981 = vmatprep.subr.bf16.mxu0 %v20349_v39 }
 0x744   : > { %v12609_v61 = vrot.slane %v12601_v57, %v21767_v24  ;;  %v12616_v45 = vrot.slane %v12602_v63, %v21767_v24  ;;  %v12625_v21 = vrot.slane %v12617_v40, %v21767_v24  ;;  %v12632_v8 = vrot.slane %v12618_v17, %v21767_v24  ;;  %v20364_v57 = vld [vmem:[%s23651_s15 + $0xfc] ss:$24 sps:$4 sm:$0xff]   ;;  %v20365_v63 = vld [vmem:[%s23651_s15 + $0x120] ss:$24 sps:$4 sm:$0xff]  }
 0x745   : > { %15107 = vmatpush1.bf16.msra.mxu1 %v20338_v54  ;;  %14982 = vmatpush1.bf16.msra.mxu0 %v20347_v44  ;;  %v20373_v40 = vld [vmem:[%s23651_s15 + $0x154] ss:$24 sps:$4 sm:$0xff]  }
 0x746   : > { %v17961_v38 = vcombine.low %v12609_v61, %v12616_v45  ;;  %v17963_v32 = vcombine.high %v12609_v61, %v12616_v45  ;;  %v17965_v14 = vcombine.low %v12625_v21, %v12632_v8  ;;  %v17967_v55 = vcombine.high %v12625_v21, %v12632_v8  ;;  %15108 = vmatprep.subr.bf16.mxu1 %v20346_v37  ;;  %v20362_v8 = vld [vmem:[%s23651_s15 + $0xf8] ss:$24 sps:$4 sm:$0xff]  }
 0x747   : > { %14983 = vmatprep.subr.bf16.mxu0 %v20355_v16  ;;  %v20356_v16 = vld [vmem:[%s23651_s15 + $0xc8] ss:$24 sps:$4 sm:$0xff]  }
 0x748   : > { %v12885_v9 = vrot.slane %v17961_v38, %v21760_v13  ;;  %v12901_v47 = vrot.slane %v17963_v32, %v21760_v13  ;;  %v12917_v39 = vrot.slane %v17965_v14, %v21760_v13  ;;  %v12933_v2 = vrot.slane %v17967_v55, %v21760_v13  ;;  %v20379_v38 = vld [vmem:[%s23651_s15 + $0x184] ss:$24 sps:$4 sm:$0xff]   ;;  %v20385_v14 = vld [vmem:[%s23651_s15 + $0x1b4] ss:$24 sps:$4 sm:$0xff]   ;;  %v20374_v55 = vld [vmem:[%s23651_s15 + $0x158] ss:$24 sps:$4 sm:$0xff]  }
 0x749   : > { %15109 = vmatpush1.bf16.msra.mxu1 %v20344_v3  ;;  %14984 = vmatpush1.bf16.msra.mxu0 %v20353_v42  ;;  %v20376_v32 = vld [vmem:[%s23651_s15 + $0x15c] ss:$24 sps:$4 sm:$0xff]  }
 0x74a   : > { %v12942_v54 = vcombine.high %v12885_v9, %v12901_v47  ;;  %v12974_v44 = vcombine.high %v12917_v39, %v12933_v2  ;;  %v12941_v5 = vcombine.low %v12885_v9, %v12901_v47  ;;  %v12973_v58 = vcombine.low %v12917_v39, %v12933_v2  ;;  %15110 = vmatprep.subr.bf16.mxu1 %v20352_v28  ;;  %v20370_v28 = vld [vmem:[%s23651_s15 + $0x12c] ss:$24 sps:$4 sm:$0xff]   ;;  %v20383_v2 = vld [vmem:[%s23651_s15 + $0x1b0] ss:$24 sps:$4 sm:$0xff]  }
 0x74b   : > { %14985 = vmatprep.subr.bf16.mxu0 %v20361_v46  ;;  %v20371_v46 = vld [vmem:[%s23651_s15 + $0x150] ss:$24 sps:$4 sm:$0xff]   ;;  %v20382_v9 = vld [vmem:[%s23651_s15 + $0x18c] ss:$24 sps:$4 sm:$0xff]  }
 0x74c   : > { %v23718_v0 = vrot.slane %v12942_v54, %v21767_v24  ;;  %v23721_v53 = vrot.slane %v12974_v44, %v21767_v24  ;;  %v23724_v1 = vrot.slane %v12941_v5, %v21767_v24  ;;  %v23727_v37 = vrot.slane %v12973_v58, %v21767_v24  ;;  %v20380_v58 = vld [vmem:[%s23651_s15 + $0x188] ss:$24 sps:$4 sm:$0xff]  }
 0x74d   : > { %15111 = vmatpush1.bf16.msra.mxu1 %v20350_v29  ;;  %14986 = vmatpush1.bf16.msra.mxu0 %v20359_v31  ;;  %v20391_v29 = vld [vmem:[%s23651_s15 + $0x1e4] ss:$24 sps:$4 sm:$0xff]  }
 0x74e   : > { %v13008_v17 = vcombine.high %v23718_v0, %v23721_v53  ;;  %v13006_v3 = vcombine.high %v23724_v1, %v23727_v37  ;;  %v13005_v42 = vcombine.low %v23724_v1, %v23727_v37  ;;  %15112 = vmatprep.subr.bf16.mxu1 %v20358_v12  ;;  %14987 = vmatprep.subr.bf16.mxu0 %v20367_v23  ;;  %v20428_v1 = vld [vmem:[%s23651_s15 + $0x308] ss:$24 sps:$4 sm:$0xff]   ;;  %v20433_v37 = vld [vmem:[%s23651_s15 + $0x334] ss:$24 sps:$4 sm:$0xff]  }
 0x74f   : > { %v13007_v61 = vcombine.low %v23718_v0, %v23721_v53  ;;  %v20442_v0 = vld [vmem:[%s23651_s15 + $0x36c] ss:$24 sps:$4 sm:$0xff]   ;;  %v20437_v53 = vld [vmem:[%s23651_s15 + $0x360] ss:$24 sps:$4 sm:$0xff]  }
 0x750   : > { %v19003_v45 = vpack.i.bf16 %v13008_v17, %v12872_v43  ;;  %v19008_v21 = vpack.i.bf16 %v13006_v3, %v12870_v49  ;;  %v20368_v43 = vld [vmem:[%s23651_s15 + $0x128] ss:$24 sps:$4 sm:$0xff]   ;;  %v20394_v17 = vld [vmem:[%s23651_s15 + $0x1ec] ss:$24 sps:$4 sm:$0xff]  }
 0x751   : > { %15113 = vmatpush1.bf16.msra.mxu1 %v20356_v16  ;;  %14988 = vmatpush1.bf16.msra.mxu0 %v20365_v63  ;;  %v20377_v49 = vld [vmem:[%s23651_s15 + $0x180] ss:$24 sps:$4 sm:$0xff]   ;;  %v20388_v16 = vld [vmem:[%s23651_s15 + $0x1bc] ss:$24 sps:$4 sm:$0xff]   ;;  %v20395_v3 = vld [vmem:[%s23651_s15 + $0x210] ss:$24 sps:$4 sm:$0xff]  }
 0x752   : > { %19004 = vrot.lane.b32.xlu1 %v19003_v45, %s21022_s24  ;;  %19009 = vrot.lane.b32.xlu0 %v19008_v21, %s21022_s24  ;;  %v20397_v63 = vld [vmem:[%s23651_s15 + $0x214] ss:$24 sps:$4 sm:$0xff]   ;;  %v20403_v45 = vld [vmem:[%s23651_s15 + $0x244] ss:$24 sps:$4 sm:$0xff]  }
 0x753   : > { %15114 = vmatprep.subr.bf16.mxu1 %v20364_v57  ;;  %14989 = vmatprep.subr.bf16.mxu0 %v20373_v40  ;;  %v20389_v57 = vld [vmem:[%s23651_s15 + $0x1e0] ss:$24 sps:$4 sm:$0xff]  }
 0x754   : > { %v20386_v40 = vld [vmem:[%s23651_s15 + $0x1b8] ss:$24 sps:$4 sm:$0xff]   ;;  %v20392_v21 = vld [vmem:[%s23651_s15 + $0x1e8] ss:$24 sps:$4 sm:$0xff]  }
 0x755   : > { %15115 = vmatpush1.bf16.msra.mxu1 %v20362_v8  ;;  %14990 = vmatpush1.bf16.msra.mxu0 %v20371_v46  ;;  %v20401_v8 = vld [vmem:[%s23651_s15 + $0x240] ss:$24 sps:$4 sm:$0xff]   ;;  %v20409_v46 = vld [vmem:[%s23651_s15 + $0x274] ss:$24 sps:$4 sm:$0xff]  }
 0x756   : > { %15116 = vmatprep.subr.bf16.mxu1 %v20370_v28  ;;  %14991 = vmatprep.subr.bf16.mxu0 %v20379_v38  ;;  %v20400_v28 = vld [vmem:[%s23651_s15 + $0x21c] ss:$24 sps:$4 sm:$0xff]   ;;  %v20398_v38 = vld [vmem:[%s23651_s15 + $0x218] ss:$24 sps:$4 sm:$0xff]  }
 0x759   : > { %v23759_v47 = vpop.f32.mrb[52].mxu0  ;;  %v23761_v39 = vpop.f32.mrb[144].mxu1  ;;  %15117 = vmatpush1.bf16.msra.mxu1 %v20368_v43  ;;  %14992 = vmatpush1.bf16.msra.mxu0 %v20377_v49  ;;  %v20407_v43 = vld [vmem:[%s23651_s15 + $0x270] ss:$24 sps:$4 sm:$0xff]   ;;  %v20415_v49 = vld [vmem:[%s23651_s15 + $0x2a4] ss:$24 sps:$4 sm:$0xff]  }
 0x75a   : > { %v18778_v12 = vpop.f32.mrb[53].mxu0  ;;  %v18784_v31 = vpop.f32.mrb[145].mxu1  ;;  %15118 = vmatprep.subr.bf16.mxu1 %v20376_v32  ;;  %14993 = vmatprep.subr.bf16.mxu0 %v20385_v14  ;;  %v20406_v32 = vld [vmem:[%s23651_s15 + $0x24c] ss:$24 sps:$4 sm:$0xff]   ;;  %v20404_v14 = vld [vmem:[%s23651_s15 + $0x248] ss:$24 sps:$4 sm:$0xff]  }
 0x75b   : > { %v12008_v23 = vpop.f32.mrb[54].mxu0  ;;  %v12054_v54 = vpop.f32.mrb[146].mxu1  ;;  %v20419_v12 = vld [vmem:[%s23651_s15 + $0x2d0] ss:$24 sps:$4 sm:$0xff]   ;;  %v20418_v31 = vld [vmem:[%s23651_s15 + $0x2ac] ss:$24 sps:$4 sm:$0xff]  }
 0x75c   : > { %v18779_v44 = vpop.f32.mrb[55].mxu0  ;;  %v18785_v5 = vpop.f32.mrb[147].mxu1  ;;  %v20427_v23 = vld [vmem:[%s23651_s15 + $0x304] ss:$24 sps:$4 sm:$0xff]   ;;  %v20416_v54 = vld [vmem:[%s23651_s15 + $0x2a8] ss:$24 sps:$4 sm:$0xff]  }
 0x75d   : > { %15119 = vmatpush1.bf16.msra.mxu1 %v20374_v55  ;;  %14994 = vmatpush1.bf16.msra.mxu0 %v20383_v2  ;;  %v20413_v55 = vld [vmem:[%s23651_s15 + $0x2a0] ss:$24 sps:$4 sm:$0xff]   ;;  %v20421_v2 = vld [vmem:[%s23651_s15 + $0x2d4] ss:$24 sps:$4 sm:$0xff]  }
 0x75e   : > { %15120 = vmatprep.subr.bf16.mxu1 %v20382_v9  ;;  %14995 = vmatprep.subr.bf16.mxu0 %v20391_v29  ;;  %v20412_v9 = vld [vmem:[%s23651_s15 + $0x27c] ss:$24 sps:$4 sm:$0xff]   ;;  %v20410_v29 = vld [vmem:[%s23651_s15 + $0x278] ss:$24 sps:$4 sm:$0xff]  }
 0x75f   : > { %v20424_v44 = vld [vmem:[%s23651_s15 + $0x2dc] ss:$24 sps:$4 sm:$0xff]  }
 0x761   : > { %15121 = vmatpush1.bf16.msra.mxu1 %v20380_v58  ;;  %14996 = vmatpush1.bf16.msra.mxu0 %v20389_v57  ;;  %v20422_v58 = vld [vmem:[%s23651_s15 + $0x2d8] ss:$24 sps:$4 sm:$0xff]  }
 0x762   : > { %15122 = vmatprep.subr.bf16.mxu1 %v20388_v16  ;;  %14997 = vmatprep.subr.bf16.mxu0 %v20397_v63  ;;  %v20430_v16 = vld [vmem:[%s23651_s15 + $0x30c] ss:$24 sps:$4 sm:$0xff]  }
 0x765   : > { %15123 = vmatpush1.bf16.msra.mxu1 %v20386_v40  ;;  %14998 = vmatpush1.bf16.msra.mxu0 %v20395_v3 }
 0x766   : > { %15124 = vmatprep.subr.bf16.mxu1 %v20394_v17  ;;  %14999 = vmatprep.subr.bf16.mxu0 %v20403_v45 }
 0x769   : > { %15125 = vmatpush1.bf16.msra.mxu1 %v20392_v21  ;;  %15000 = vmatpush1.bf16.msra.mxu0 %v20401_v8 }
 0x76a   : > { %15126 = vmatprep.subr.bf16.mxu1 %v20400_v28  ;;  %15001 = vmatprep.subr.bf16.mxu0 %v20409_v46 }
 0x76d   : > { %15127 = vmatpush1.bf16.msra.mxu1 %v20398_v38  ;;  %15002 = vmatpush1.bf16.msra.mxu0 %v20407_v43 }
 0x76e   : > { %15128 = vmatprep.subr.bf16.mxu1 %v20406_v32  ;;  %15003 = vmatprep.subr.bf16.mxu0 %v20415_v49 }
 0x771   : > { %15129 = vmatpush1.bf16.msra.mxu1 %v20404_v14  ;;  %15004 = vmatpush1.bf16.msra.mxu0 %v20413_v55 }
 0x772   : > { %15130 = vmatprep.subr.bf16.mxu1 %v20412_v9  ;;  %15005 = vmatprep.subr.bf16.mxu0 %v20421_v2 }
 0x775   : > { %15131 = vmatpush1.bf16.msra.mxu1 %v20410_v29  ;;  %15006 = vmatpush1.bf16.msra.mxu0 %v20419_v12 }
 0x776   : > { %15132 = vmatprep.subr.bf16.mxu1 %v20418_v31  ;;  %15018 = vmatprep.subr.bf16.mxu0 %v20427_v23 }
 0x779   : > { %v12097_v5 = vpop.f32.mrb[56].mxu0  ;;  %15133 = vmatpush1.bf16.msra.mxu1 %v20416_v54 }
 0x77a   : > { %v12569_v57 = vcombine.low %v23759_v47, %v12097_v5  ;;  %v12570_v63 = vcombine.high %v23759_v47, %v12097_v5  ;;  %v18790_v40 = vpop.f32.mrb[57].mxu0  ;;  %15134 = vmatprep.subr.bf16.mxu1 %v20424_v44 }
 0x77b   : > { %v12100_v17 = vpop.f32.mrb[58].mxu0 }
 0x77c   : > { %v18791_v3 = vpop.f32.mrb[59].mxu0  ;;  %v12577_v38 = vrot.slane %v12569_v57, %v21760_v13  ;;  %v12584_v43 = vrot.slane %v12570_v63, %v21760_v13 }
 0x77d   : > { %15135 = vmatpush1.bf16.msra.mxu1 %v20422_v58 }
 0x77e   : > { %15147 = vmatprep.subr.bf16.mxu1 %v20430_v16 }
 0x781   : > { %v12143_v45 = vpop.f32.mrb[148].mxu1 }
 0x782   : > { %v12585_v21 = vcombine.low %v23761_v39, %v12143_v45  ;;  %v12586_v8 = vcombine.high %v23761_v39, %v12143_v45  ;;  %v18796_v28 = vpop.f32.mrb[149].mxu1 }
 0x783   : > { %v12146_v46 = vpop.f32.mrb[150].mxu1 }
 0x784   : > { %v12593_v32 = vrot.slane %v12585_v21, %v21760_v13  ;;  %v12600_v47 = vrot.slane %v12586_v8, %v21760_v13  ;;  %v18797_v49 = vpop.f32.mrb[151].mxu1 }
 0x786   : > { %v12633_v14 = vcombine.low %v12577_v38, %v12593_v32  ;;  %v12634_v55 = vcombine.high %v12577_v38, %v12593_v32  ;;  %v12649_v9 = vcombine.low %v12584_v43, %v12600_v47  ;;  %v12650_v2 = vcombine.high %v12584_v43, %v12600_v47 }
 0x788   : > { %v12641_v29 = vrot.slane %v12633_v14, %v21767_v24  ;;  %v12648_v12 = vrot.slane %v12634_v55, %v21767_v24  ;;  %v12657_v39 = vrot.slane %v12649_v9, %v21767_v24  ;;  %v12664_v31 = vrot.slane %v12650_v2, %v21767_v24 }
 0x78a   : > { %v17962_v23 = vcombine.low %v12641_v29, %v12648_v12  ;;  %v17964_v54 = vcombine.high %v12641_v29, %v12648_v12  ;;  %v17966_v44 = vcombine.low %v12657_v39, %v12664_v31  ;;  %v17968_v5 = vcombine.high %v12657_v39, %v12664_v31 }
 0x78c   : > { %v12892_v58 = vrot.slane %v17962_v23, %v21760_v13  ;;  %v12908_v16 = vrot.slane %v17964_v54, %v21760_v13  ;;  %v12924_v57 = vrot.slane %v17966_v44, %v21760_v13  ;;  %v12940_v63 = vrot.slane %v17968_v5, %v21760_v13  ;;  %v20445_v54 = vld [vmem:[%s23651_s15 + $0x394] ss:$24 sps:$4 sm:$0xff]   ;;  %v20443_v5 = vld [vmem:[%s23651_s15 + $0x390] ss:$24 sps:$4 sm:$0xff]  }
 0x78d   : > { %v20448_v44 = vld [vmem:[%s23651_s15 + $0x39c] ss:$24 sps:$4 sm:$0xff]  }
 0x78e   : > { %v12958_v40 = vcombine.high %v12892_v58, %v12908_v16  ;;  %v12990_v17 = vcombine.high %v12924_v57, %v12940_v63  ;;  %v12957_v3 = vcombine.low %v12892_v58, %v12908_v16  ;;  %v12989_v45 = vcombine.low %v12924_v57, %v12940_v63  ;;  %v20446_v58 = vld [vmem:[%s23651_s15 + $0x398] ss:$24 sps:$4 sm:$0xff]   ;;  %v20451_v16 = vld [vmem:[%s23651_s15 + $0x3c4] ss:$24 sps:$4 sm:$0xff]  }
 0x78f   : > { %v20454_v57 = vld [vmem:[%s23651_s15 + $0x3cc] ss:$24 sps:$4 sm:$0xff]   ;;  %v20449_v63 = vld [vmem:[%s23651_s15 + $0x3c0] ss:$24 sps:$4 sm:$0xff]  }
 0x790   : > { %v23810_v21 = vrot.slane %v12958_v40, %v21767_v24  ;;  %v23813_v8 = vrot.slane %v12990_v17, %v21767_v24  ;;  %v23816_v28 = vrot.slane %v12957_v3, %v21767_v24  ;;  %v23819_v46 = vrot.slane %v12989_v45, %v21767_v24  ;;  %v20452_v40 = vld [vmem:[%s23651_s15 + $0x3c8] ss:$24 sps:$4 sm:$0xff]   ;;  %v20457_v17 = vld [vmem:[%s23651_s15 + $0x3f4] ss:$24 sps:$4 sm:$0xff]  }
 0x791   : > { %v20460_v3 = vld [vmem:[%s23651_s15 + $0x3fc] ss:$24 sps:$4 sm:$0xff]   ;;  %v20455_v45 = vld [vmem:[%s23651_s15 + $0x3f0] ss:$24 sps:$4 sm:$0xff]  }
 0x792   : > { %v13012_v38 = vcombine.high %v23810_v21, %v23813_v8  ;;  %v13010_v43 = vcombine.high %v23816_v28, %v23819_v46  ;;  %v13009_v32 = vcombine.low %v23816_v28, %v23819_v46  ;;  %v13011_v47 = vcombine.low %v23810_v21, %v23813_v8 }
 0x794   : > { %v19013_v49 = vpack.i.bf16 %v13012_v38, %v12876_v35  ;;  %v19018_v14 = vpack.i.bf16 %v13010_v43, %v12874_v59  ;;  %v20458_v38 = vld [vmem:[%s23651_s15 + $0x3f8] ss:$24 sps:$4 sm:$0xff]   ;;  %v20463_v43 = vld [vmem:[%s23651_s15 + $0x424] ss:$24 sps:$4 sm:$0xff]  }
 0x796   : > { %19014 = vrot.lane.b32.xlu1 %v19013_v49, %s21022_s24  ;;  %v20466_v49 = vld [vmem:[%s23651_s15 + $0x42c] ss:$24 sps:$4 sm:$0xff]  }
 0x79a   : > { %19019 = vrot.lane.b32.xlu1 %v19018_v14, %s21022_s24  ;;  %v20461_v14 = vld [vmem:[%s23651_s15 + $0x420] ss:$24 sps:$4 sm:$0xff]  }
 0x7c4   : > { %v19005_v55 = vpop.permute.xlu1 %19004  ;;  %v19010_v9 = vpop.permute.xlu0 %19009 }
 0x7c5   : > { %v19007_v2 = vunpack.i.h.bf16 %v19005_v55  ;;  %v19006_v29 = vunpack.i.l.bf16 %v19005_v55  ;;  %v19012_v12 = vunpack.i.h.bf16 %v19010_v9  ;;  %v19011_v39 = vunpack.i.l.bf16 %v19010_v9  ;;  %v20464_v55 = vld [vmem:[%s23651_s15 + $0x428] ss:$24 sps:$4 sm:$0xff]   ;;  %v20469_v9 = vld [vmem:[%s23651_s15 + $0x454] ss:$24 sps:$4 sm:$0xff]  }
 0x7c7   : > { %v13197_v35 = vsel %vm9834_vm1, %v12869_v34, %v19011_v39  ;;  %v13198_v59 = vsel %vm9834_vm1, %v13005_v42, %v19012_v12  ;;  %v13199_v31 = vsel %vm9834_vm1, %v12871_v18, %v19006_v29  ;;  %v13200_v23 = vsel %vm9834_vm1, %v13007_v61, %v19007_v2  ;;  %v20425_v34 = vld [vmem:[%s23651_s15 + $0x300] ss:$24 sps:$4 sm:$0xff]   ;;  %v20436_v42 = vld [vmem:[%s23651_s15 + $0x33c] ss:$24 sps:$4 sm:$0xff]   ;;  %v20467_v29 = vld [vmem:[%s23651_s15 + $0x450] ss:$24 sps:$4 sm:$0xff]  }
 0x7c8   : > { %v23853_v30 = vpack.c.bf16 %v13198_v59, %v13197_v35  ;;  %v23855_v11 = vpack.c.bf16 %v13200_v23, %v13199_v31  ;;  %v20439_v18 = vld [vmem:[%s23651_s15 + $0x364] ss:$24 sps:$4 sm:$0xff]   ;;  %v20440_v61 = vld [vmem:[%s23651_s15 + $0x368] ss:$24 sps:$4 sm:$0xff]   ;;  %v20470_v12 = vld [vmem:[%s23651_s15 + $0x458] ss:$24 sps:$4 sm:$0xff]  }
 0x7c9   : > { %v20472_v2 = vld [vmem:[%s23651_s15 + $0x45c] ss:$24 sps:$4 sm:$0xff]   ;;  %v20478_v35 = vld [vmem:[%s23651_s15 + $0x48c] ss:$24 sps:$4 sm:$0xff]   ;;  %v20473_v59 = vld [vmem:[%s23651_s15 + $0x480] ss:$24 sps:$4 sm:$0xff]  }
 0x7ca   : > { %15007 = vmatprep.mubr.bf16.mxu0 %v23855_v11  ;;  %15136 = vmatprep.mubr.bf16.mxu1 %v23855_v11  ;;  %v20475_v39 = vld [vmem:[%s23651_s15 + $0x484] ss:$24 sps:$4 sm:$0xff]   ;;  %v20476_v31 = vld [vmem:[%s23651_s15 + $0x488] ss:$24 sps:$4 sm:$0xff]   ;;  %v20481_v23 = vld [vmem:[%s23651_s15 + $0x4b4] ss:$24 sps:$4 sm:$0xff]  }
 0x7cb   : > { %15008 = vmatmul.mubr.bf16.vlgmr.msra.gmra.mrb[68].mxu0 %v23853_v30  ;;  %15137 = vmatmul.mubr.bf16.vlgmr.msra.gmra.mrb[160].mxu1 %v23853_v30 }
 0x7cc   : > { %15019 = vmatpush1.bf16.msra.mxu0 %v20425_v34  ;;  %15148 = vmatpush1.bf16.msra.mxu1 %v20428_v1  ;;  %v20484_v34 = vld [vmem:[%s23651_s15 + $0x4bc] ss:$24 sps:$4 sm:$0xff]  }
 0x7cd   : > { %15020 = vmatprep.subr.bf16.mxu0 %v20433_v37  ;;  %15149 = vmatprep.subr.bf16.mxu1 %v20436_v42  ;;  %v20479_v42 = vld [vmem:[%s23651_s15 + $0x4b0] ss:$24 sps:$4 sm:$0xff]  }
 0x7d0   : > { %15021 = vmatpush1.bf16.msra.mxu0 %v20431_v22  ;;  %15150 = vmatpush1.bf16.msra.mxu1 %v20434_v19  ;;  %v20482_v22 = vld [vmem:[%s23651_s15 + $0x4b8] ss:$24 sps:$4 sm:$0xff]  }
 0x7d1   : > { %15022 = vmatprep.subr.bf16.mxu0 %v20439_v18  ;;  %15151 = vmatprep.subr.bf16.mxu1 %v20442_v0  ;;  %v20487_v0 = vld [vmem:[%s23651_s15 + $0x4e4] ss:$24 sps:$4 sm:$0xff]  }
 0x7d4   : > { %15023 = vmatpush1.bf16.msra.mxu0 %v20437_v53  ;;  %15152 = vmatpush1.bf16.msra.mxu1 %v20440_v61  ;;  %v20490_v53 = vld [vmem:[%s23651_s15 + $0x4ec] ss:$24 sps:$4 sm:$0xff]  }
 0x7d5   : > { %15024 = vmatprep.subr.bf16.mxu0 %v20445_v54  ;;  %15153 = vmatprep.subr.bf16.mxu1 %v20448_v44 }
 0x7d8   : > { %15025 = vmatpush1.bf16.msra.mxu0 %v20443_v5  ;;  %15154 = vmatpush1.bf16.msra.mxu1 %v20446_v58  ;;  %v20485_v58 = vld [vmem:[%s23651_s15 + $0x4e0] ss:$24 sps:$4 sm:$0xff]  }
 0x7d9   : > { %15026 = vmatprep.subr.bf16.mxu0 %v20451_v16  ;;  %15155 = vmatprep.subr.bf16.mxu1 %v20454_v57  ;;  %v20488_v16 = vld [vmem:[%s23651_s15 + $0x4e8] ss:$24 sps:$4 sm:$0xff]   ;;  %v20493_v57 = vld [vmem:[%s23651_s15 + $0x514] ss:$24 sps:$4 sm:$0xff]  }
 0x7dc   : > { %15027 = vmatpush1.bf16.msra.mxu0 %v20449_v63  ;;  %15156 = vmatpush1.bf16.msra.mxu1 %v20452_v40  ;;  %v20496_v63 = vld [vmem:[%s23651_s15 + $0x51c] ss:$24 sps:$4 sm:$0xff]   ;;  %v20491_v40 = vld [vmem:[%s23651_s15 + $0x510] ss:$24 sps:$4 sm:$0xff]  }
 0x7dd   : > { %15028 = vmatprep.subr.bf16.mxu0 %v20457_v17  ;;  %15157 = vmatprep.subr.bf16.mxu1 %v20460_v3  ;;  %v20494_v17 = vld [vmem:[%s23651_s15 + $0x518] ss:$24 sps:$4 sm:$0xff]   ;;  %v20499_v3 = vld [vmem:[%s23651_s15 + $0x544] ss:$24 sps:$4 sm:$0xff]  }
 0x7e0   : > { %15029 = vmatpush1.bf16.msra.mxu0 %v20455_v45  ;;  %15158 = vmatpush1.bf16.msra.mxu1 %v20458_v38  ;;  %v20502_v45 = vld [vmem:[%s23651_s15 + $0x54c] ss:$24 sps:$4 sm:$0xff]   ;;  %v20497_v38 = vld [vmem:[%s23651_s15 + $0x540] ss:$24 sps:$4 sm:$0xff]  }
 0x7e1   : > { %15030 = vmatprep.subr.bf16.mxu0 %v20463_v43  ;;  %15159 = vmatprep.subr.bf16.mxu1 %v20466_v49  ;;  %v20500_v43 = vld [vmem:[%s23651_s15 + $0x548] ss:$24 sps:$4 sm:$0xff]   ;;  %v20505_v49 = vld [vmem:[%s23651_s15 + $0x574] ss:$24 sps:$4 sm:$0xff]  }
 0x7e4   : > { %15031 = vmatpush1.bf16.msra.mxu0 %v20461_v14  ;;  %15160 = vmatpush1.bf16.msra.mxu1 %v20464_v55  ;;  %v20508_v14 = vld [vmem:[%s23651_s15 + $0x57c] ss:$24 sps:$4 sm:$0xff]   ;;  %v20503_v55 = vld [vmem:[%s23651_s15 + $0x570] ss:$24 sps:$4 sm:$0xff]  }
 0x7e5   : > { %15032 = vmatprep.subr.bf16.mxu0 %v20469_v9  ;;  %15161 = vmatprep.subr.bf16.mxu1 %v20472_v2  ;;  %v20506_v9 = vld [vmem:[%s23651_s15 + $0x578] ss:$24 sps:$4 sm:$0xff]   ;;  %v20511_v2 = vld [vmem:[%s23651_s15 + $0x5a4] ss:$24 sps:$4 sm:$0xff]  }
 0x7e8   : > { %15033 = vmatpush1.bf16.msra.mxu0 %v20467_v29  ;;  %15162 = vmatpush1.bf16.msra.mxu1 %v20470_v12  ;;  %v20514_v29 = vld [vmem:[%s23651_s15 + $0x5ac] ss:$24 sps:$4 sm:$0xff]   ;;  %v20509_v12 = vld [vmem:[%s23651_s15 + $0x5a0] ss:$24 sps:$4 sm:$0xff]  }
 0x7e9   : > { %15034 = vmatprep.subr.bf16.mxu0 %v20475_v39  ;;  %15163 = vmatprep.subr.bf16.mxu1 %v20478_v35  ;;  %v20512_v39 = vld [vmem:[%s23651_s15 + $0x5a8] ss:$24 sps:$4 sm:$0xff]   ;;  %v20517_v35 = vld [vmem:[%s23651_s15 + $0x5d4] ss:$24 sps:$4 sm:$0xff]  }
 0x7ec   : > { %v23897_v1 = vpop.f32.mrb[60].mxu0  ;;  %v23899_v37 = vpop.f32.mrb[152].mxu1  ;;  %15035 = vmatpush1.bf16.msra.mxu0 %v20473_v59  ;;  %15164 = vmatpush1.bf16.msra.mxu1 %v20476_v31  ;;  %v20520_v59 = vld [vmem:[%s23651_s15 + $0x5dc] ss:$24 sps:$4 sm:$0xff]   ;;  %v20515_v31 = vld [vmem:[%s23651_s15 + $0x5d0] ss:$24 sps:$4 sm:$0xff]  }
 0x7ed   : > { %v18802_v19 = vpop.f32.mrb[61].mxu0  ;;  %v18808_v18 = vpop.f32.mrb[153].mxu1  ;;  %15036 = vmatprep.subr.bf16.mxu0 %v20481_v23  ;;  %15165 = vmatprep.subr.bf16.mxu1 %v20484_v34  ;;  %v20518_v23 = vld [vmem:[%s23651_s15 + $0x5d8] ss:$24 sps:$4 sm:$0xff]   ;;  %v20523_v34 = vld [vmem:[%s23651_s15 + $0x604] ss:$24 sps:$4 sm:$0xff]  }
 0x7ee   : > { %v12192_v61 = vpop.f32.mrb[62].mxu0  ;;  %v12238_v54 = vpop.f32.mrb[154].mxu1 }
 0x7ef   : > { %v18803_v44 = vpop.f32.mrb[63].mxu0  ;;  %v18809_v5 = vpop.f32.mrb[155].mxu1 }
 0x7f0   : > { %15037 = vmatpush1.bf16.msra.mxu0 %v20479_v42  ;;  %15166 = vmatpush1.bf16.msra.mxu1 %v20482_v22  ;;  %v20526_v42 = vld [vmem:[%s23651_s15 + $0x60c] ss:$24 sps:$4 sm:$0xff]  }
 0x7f1   : > { %15038 = vmatprep.subr.bf16.mxu0 %v20487_v0  ;;  %15167 = vmatprep.subr.bf16.mxu1 %v20490_v53 }
 0x7f4   : > { %15039 = vmatpush1.bf16.msra.mxu0 %v20485_v58  ;;  %15168 = vmatpush1.bf16.msra.mxu1 %v20488_v16 }
 0x7f5   : > { %15040 = vmatprep.subr.bf16.mxu0 %v20493_v57  ;;  %15169 = vmatprep.subr.bf16.mxu1 %v20496_v63 }
 0x7f8   : > { %15041 = vmatpush1.bf16.msra.mxu0 %v20491_v40  ;;  %15170 = vmatpush1.bf16.msra.mxu1 %v20494_v17  ;;  %v20529_v40 = vld [vmem:[%s23651_s15 + $0x634] ss:$24 sps:$4 sm:$0xff]  }
 0x7f9   : > { %15042 = vmatprep.subr.bf16.mxu0 %v20499_v3  ;;  %15171 = vmatprep.subr.bf16.mxu1 %v20502_v45  ;;  %v20532_v17 = vld [vmem:[%s23651_s15 + $0x63c] ss:$24 sps:$4 sm:$0xff]  }
 0x7fa   : > { %v20535_v3 = vld [vmem:[%s23651_s15 + $0x664] ss:$24 sps:$4 sm:$0xff]  }
 0x7fc   : > { %15043 = vmatpush1.bf16.msra.mxu0 %v20497_v38  ;;  %15172 = vmatpush1.bf16.msra.mxu1 %v20500_v43  ;;  %v20538_v38 = vld [vmem:[%s23651_s15 + $0x66c] ss:$24 sps:$4 sm:$0xff]  }
 0x7fd   : > { %15044 = vmatprep.subr.bf16.mxu0 %v20505_v49  ;;  %15173 = vmatprep.subr.bf16.mxu1 %v20508_v14 }
 0x800   : > { %15045 = vmatpush1.bf16.msra.mxu0 %v20503_v55  ;;  %15174 = vmatpush1.bf16.msra.mxu1 %v20506_v9 }
 0x801   : > { %15046 = vmatprep.subr.bf16.mxu0 %v20511_v2  ;;  %15175 = vmatprep.subr.bf16.mxu1 %v20514_v29  ;;  %v20536_v2 = vld [vmem:[%s23651_s15 + $0x668] ss:$24 sps:$4 sm:$0xff]  }
 0x804   : > { %15047 = vmatpush1.bf16.msra.mxu0 %v20509_v12  ;;  %15176 = vmatpush1.bf16.msra.mxu1 %v20512_v39 }
 0x805   : > { %15048 = vmatprep.subr.bf16.mxu0 %v20517_v35  ;;  %15177 = vmatprep.subr.bf16.mxu1 %v20520_v59  ;;  %v20541_v59 = vld [vmem:[%s23651_s15 + $0x694] ss:$24 sps:$4 sm:$0xff]  }
 0x808   : > { %v19015_v22 = vpop.permute.xlu1 %19014  ;;  %15049 = vmatpush1.bf16.msra.mxu0 %v20515_v31  ;;  %15178 = vmatpush1.bf16.msra.mxu1 %v20518_v23  ;;  %v20544_v31 = vld [vmem:[%s23651_s15 + $0x69c] ss:$24 sps:$4 sm:$0xff]  }
 0x809   : > { %v19017_v19 = vunpack.i.h.bf16 %v19015_v22  ;;  %v19016_v18 = vunpack.i.l.bf16 %v19015_v22  ;;  %15061 = vmatprep.subr.bf16.mxu0 %v20523_v34  ;;  %15190 = vmatprep.subr.bf16.mxu1 %v20526_v42 }
 0x80b   : > { %v12281_v0 = vpop.f32.mrb[64].mxu0  ;;  %v13203_v53 = vsel %vm9834_vm1, %v12875_v10, %v19016_v18  ;;  %v13204_v61 = vsel %vm9834_vm1, %v13011_v47, %v19017_v19  ;;  %v20521_v47 = vld [vmem:[%s23651_s15 + $0x600] ss:$24 sps:$4 sm:$0xff]   ;;  %v20539_v19 = vld [vmem:[%s23651_s15 + $0x690] ss:$24 sps:$4 sm:$0xff]  }
 0x80c   : > { %v12673_v54 = vcombine.low %v23897_v1, %v12281_v0  ;;  %v12674_v44 = vcombine.high %v23897_v1, %v12281_v0  ;;  %v18814_v5 = vpop.f32.mrb[65].mxu0  ;;  %v19020_v58 = vpop.permute.xlu1 %19019  ;;  %v23939_v16 = vpack.c.bf16 %v13204_v61, %v13203_v53  ;;  %v20524_v1 = vld [vmem:[%s23651_s15 + $0x608] ss:$24 sps:$4 sm:$0xff]   ;;  %v20542_v18 = vld [vmem:[%s23651_s15 + $0x698] ss:$24 sps:$4 sm:$0xff]  }
 0x80d   : > { %v19022_v41 = vunpack.i.h.bf16 %v19020_v58  ;;  %v19021_v51 = vunpack.i.l.bf16 %v19020_v58  ;;  %v12284_v57 = vpop.f32.mrb[66].mxu0  ;;  %v20550_v5 = vld [vmem:[%s23651_s15 + $0x6cc] ss:$24 sps:$4 sm:$0xff]  }
 0x80e   : > { %v18815_v10 = vpop.f32.mrb[67].mxu0  ;;  %15050 = vmatprep.mubr.bf16.mxu0 %v23939_v16  ;;  %15179 = vmatprep.mubr.bf16.mxu1 %v23939_v16  ;;  %v12681_v43 = vrot.slane %v12673_v54, %v21760_v13  ;;  %v12688_v49 = vrot.slane %v12674_v44, %v21760_v13  ;;  %v20547_v44 = vld [vmem:[%s23651_s15 + $0x6c4] ss:$24 sps:$4 sm:$0xff]  }
 0x80f   : > { %v13201_v21 = vsel %vm9834_vm1, %v12873_v33, %v19021_v51  ;;  %v13202_v8 = vsel %vm9834_vm1, %v13009_v32, %v19022_v41  ;;  %v20530_v33 = vld [vmem:[%s23651_s15 + $0x638] ss:$24 sps:$4 sm:$0xff]  }
 0x810   : > { %v23953_v63 = vpack.c.bf16 %v13202_v8, %v13201_v21  ;;  %v20545_v10 = vld [vmem:[%s23651_s15 + $0x6c0] ss:$24 sps:$4 sm:$0xff]  }
 0x811   : > { %v20548_v21 = vld [vmem:[%s23651_s15 + $0x6c8] ss:$24 sps:$4 sm:$0xff]  }
 0x812   : > { %15051 = vmatmul.mubr.bf16.vlgmr.msra.gmra.mrb[68].mxu0 %v23953_v63  ;;  %15180 = vmatmul.mubr.bf16.vlgmr.msra.gmra.mrb[160].mxu1 %v23953_v63 }
 0x813   : > { %v12327_v60 = vpop.f32.mrb[156].mxu1  ;;  %15062 = vmatpush1.bf16.msra.mxu0 %v20521_v47  ;;  %15191 = vmatpush1.bf16.msra.mxu1 %v20524_v1 }
 0x814   : > { %v12689_v28 = vcombine.low %v23899_v37, %v12327_v60  ;;  %v12690_v46 = vcombine.high %v23899_v37, %v12327_v60  ;;  %v18820_v32 = vpop.f32.mrb[157].mxu1  ;;  %15063 = vmatprep.subr.bf16.mxu0 %v20529_v40  ;;  %15192 = vmatprep.subr.bf16.mxu1 %v20532_v17  ;;  %v20533_v37 = vld [vmem:[%s23651_s15 + $0x660] ss:$24 sps:$4 sm:$0xff]   ;;  %v20553_v17 = vld [vmem:[%s23651_s15 + $0x6f4] ss:$24 sps:$4 sm:$0xff]  }
 0x815   : > { %v12330_v45 = vpop.f32.mrb[158].mxu1  ;;  %v20556_v60 = vld [vmem:[%s23651_s15 + $0x6fc] ss:$24 sps:$4 sm:$0xff]   ;;  %v20554_v32 = vld [vmem:[%s23651_s15 + $0x6f8] ss:$24 sps:$4 sm:$0xff]  }
 0x816   : > { %v12697_v14 = vrot.slane %v12689_v28, %v21760_v13  ;;  %v12704_v55 = vrot.slane %v12690_v46, %v21760_v13  ;;  %v18821_v9 = vpop.f32.mrb[159].mxu1  ;;  %v20551_v46 = vld [vmem:[%s23651_s15 + $0x6f0] ss:$24 sps:$4 sm:$0xff]  }
 0x817   : > { %15064 = vmatpush1.bf16.msra.mxu0 %v20527_v56  ;;  %15193 = vmatpush1.bf16.msra.mxu1 %v20530_v33  ;;  %v20557_v9 = vld [vmem:[%s23651_s15 + $0x720] ss:$24 sps:$4 sm:$0xff]  }
 0x818   : > { %v12705_v29 = vcombine.low %v12681_v43, %v12697_v14  ;;  %v12706_v12 = vcombine.high %v12681_v43, %v12697_v14  ;;  %v12721_v39 = vcombine.low %v12688_v49, %v12704_v55  ;;  %v12722_v35 = vcombine.high %v12688_v49, %v12704_v55  ;;  %15065 = vmatprep.subr.bf16.mxu0 %v20535_v3  ;;  %v20562_v43 = vld [vmem:[%s23651_s15 + $0x72c] ss:$24 sps:$4 sm:$0xff]  }
 0x819   : > { %15194 = vmatprep.subr.bf16.mxu1 %v20538_v38 }
 0x81a   : > { %v12713_v23 = vrot.slane %v12705_v29, %v21767_v24  ;;  %v12720_v34 = vrot.slane %v12706_v12, %v21767_v24  ;;  %v12729_v42 = vrot.slane %v12721_v39, %v21767_v24  ;;  %v12736_v22 = vrot.slane %v12722_v35, %v21767_v24  ;;  %v20568_v29 = vld [vmem:[%s23651_s15 + $0x75c] ss:$24 sps:$4 sm:$0xff]   ;;  %v20574_v39 = vld [vmem:[%s23651_s15 + $0x78c] ss:$24 sps:$4 sm:$0xff]   ;;  %v20569_v35 = vld [vmem:[%s23651_s15 + $0x780] ss:$24 sps:$4 sm:$0xff]  }
 0x81b   : > { %15066 = vmatpush1.bf16.msra.mxu0 %v20533_v37  ;;  %15195 = vmatpush1.bf16.msra.mxu1 %v20536_v2  ;;  %v20560_v37 = vld [vmem:[%s23651_s15 + $0x728] ss:$24 sps:$4 sm:$0xff]   ;;  %v20565_v2 = vld [vmem:[%s23651_s15 + $0x754] ss:$24 sps:$4 sm:$0xff]   ;;  %v20571_v12 = vld [vmem:[%s23651_s15 + $0x784] ss:$24 sps:$4 sm:$0xff]  }
 0x81c   : > { %v13081_v0 = vcombine.low %v12713_v23, %v12720_v34  ;;  %v17971_v53 = vcombine.high %v12713_v23, %v12720_v34  ;;  %v13097_v61 = vcombine.low %v12729_v42, %v12736_v22  ;;  %v17972_v54 = vcombine.high %v12729_v42, %v12736_v22  ;;  %15067 = vmatprep.subr.bf16.mxu0 %v20541_v59  ;;  %v20572_v59 = vld [vmem:[%s23651_s15 + $0x788] ss:$24 sps:$4 sm:$0xff]   ;;  %v20580_v23 = vld [vmem:[%s23651_s15 + $0x7bc] ss:$24 sps:$4 sm:$0xff]   ;;  %v20578_v42 = vld [vmem:[%s23651_s15 + $0x7b8] ss:$24 sps:$4 sm:$0xff]  }
 0x81d   : > { %15196 = vmatprep.subr.bf16.mxu1 %v20544_v31  ;;  %v20577_v31 = vld [vmem:[%s23651_s15 + $0x7b4] ss:$24 sps:$4 sm:$0xff]   ;;  %v20575_v34 = vld [vmem:[%s23651_s15 + $0x7b0] ss:$24 sps:$4 sm:$0xff]   ;;  %v20583_v22 = vld [vmem:[%s23651_s15 + $0x7e4] ss:$24 sps:$4 sm:$0xff]  }
 0x81e   : > { %v13088_v58 = vrot.slane %v13081_v0, %v21760_v13  ;;  %v13096_v41 = vrot.slane %v17971_v53, %v21760_v13  ;;  %v13104_v51 = vrot.slane %v13097_v61, %v21760_v13  ;;  %v13112_v57 = vrot.slane %v17972_v54, %v21760_v13  ;;  %v20584_v0 = vld [vmem:[%s23651_s15 + $0x7e8] ss:$24 sps:$4 sm:$0xff]   ;;  %v20589_v53 = vld [vmem:[%s23651_s15 + $0x814] ss:$24 sps:$4 sm:$0xff]  }
 0x81f   : > { %15068 = vmatpush1.bf16.msra.mxu0 %v20539_v19  ;;  %15197 = vmatpush1.bf16.msra.mxu1 %v20542_v18  ;;  %v20586_v19 = vld [vmem:[%s23651_s15 + $0x7ec] ss:$24 sps:$4 sm:$0xff]   ;;  %v20581_v18 = vld [vmem:[%s23651_s15 + $0x7e0] ss:$24 sps:$4 sm:$0xff]   ;;  %v20592_v61 = vld [vmem:[%s23651_s15 + $0x81c] ss:$24 sps:$4 sm:$0xff]  }
 0x820   : > { %v13114_v8 = vcombine.high %v13088_v58, %v13096_v41  ;;  %v13130_v47 = vcombine.high %v13104_v51, %v13112_v57  ;;  %v13113_v1 = vcombine.low %v13088_v58, %v13096_v41  ;;  %v13129_v40 = vcombine.low %v13104_v51, %v13112_v57  ;;  %15069 = vmatprep.subr.bf16.mxu0 %v20547_v44  ;;  %v20587_v54 = vld [vmem:[%s23651_s15 + $0x810] ss:$24 sps:$4 sm:$0xff]   ;;  %v20598_v58 = vld [vmem:[%s23651_s15 + $0x84c] ss:$24 sps:$4 sm:$0xff]   ;;  %v20593_v41 = vld [vmem:[%s23651_s15 + $0x840] ss:$24 sps:$4 sm:$0xff]  }
 0x821   : > { %15198 = vmatprep.subr.bf16.mxu1 %v20550_v5  ;;  %v20590_v44 = vld [vmem:[%s23651_s15 + $0x818] ss:$24 sps:$4 sm:$0xff]   ;;  %v20595_v5 = vld [vmem:[%s23651_s15 + $0x844] ss:$24 sps:$4 sm:$0xff]   ;;  %v20596_v51 = vld [vmem:[%s23651_s15 + $0x848] ss:$24 sps:$4 sm:$0xff]  }
 0x822   : > { %v23990_v56 = vrot.slane %v13114_v8, %v21767_v24  ;;  %v23993_v13 = vrot.slane %v13130_v47, %v21767_v24  ;;  %v23996_v33 = vrot.slane %v13113_v1, %v21767_v24  ;;  %v23999_v28 = vrot.slane %v13129_v40, %v21767_v24  ;;  %v20559_v24 = vld [vmem:[%s23651_s15 + $0x724] ss:$24 sps:$4 sm:$0xff]   ;;  %v20601_v57 = vld [vmem:[%s23651_s15 + $0x874] ss:$24 sps:$4 sm:$0xff]   ;;  %v20602_v8 = vld [vmem:[%s23651_s15 + $0x878] ss:$24 sps:$4 sm:$0xff]  }
 0x823   : > { %15070 = vmatpush1.bf16.msra.mxu0 %v20545_v10  ;;  %15199 = vmatpush1.bf16.msra.mxu1 %v20548_v21  ;;  %v20604_v10 = vld [vmem:[%s23651_s15 + $0x87c] ss:$24 sps:$4 sm:$0xff]   ;;  %v20599_v21 = vld [vmem:[%s23651_s15 + $0x870] ss:$24 sps:$4 sm:$0xff]   ;;  %v20610_v1 = vld [vmem:[%s23651_s15 + $0x8ac] ss:$24 sps:$4 sm:$0xff]  }
 0x824   : > { %v13148_v3 = vcombine.high %v23990_v56, %v23993_v13  ;;  %v13146_v45 = vcombine.high %v23996_v33, %v23999_v28  ;;  %v13145_v38 = vcombine.low %v23996_v33, %v23999_v28  ;;  %15071 = vmatprep.subr.bf16.mxu0 %v20553_v17  ;;  %15200 = vmatprep.subr.bf16.mxu1 %v20556_v60  ;;  %v20607_v47 = vld [vmem:[%s23651_s15 + $0x8a4] ss:$24 sps:$4 sm:$0xff]   ;;  %v20605_v40 = vld [vmem:[%s23651_s15 + $0x8a0] ss:$24 sps:$4 sm:$0xff]   ;;  %v20613_v60 = vld [vmem:[%s23651_s15 + $0x8d4] ss:$24 sps:$4 sm:$0xff]  }
 0x825   : > { %v13147_v49 = vcombine.low %v23990_v56, %v23993_v13  ;;  %v20608_v17 = vld [vmem:[%s23651_s15 + $0x8a8] ss:$24 sps:$4 sm:$0xff]   ;;  %v20622_v33 = vld [vmem:[%s23651_s15 + $0x44] ss:$24 sps:$4 sm:$0xff]   ;;  %v20631_v28 = vld [vmem:[%s23651_s15 + $0xd4] ss:$24 sps:$4 sm:$0xff]  }
 0x826   : > { %v19023_v14 = vpack.i.bf16 %v13148_v3, %v13080_v15  ;;  %v19028_v55 = vpack.i.bf16 %v13146_v45, %v13078_v36  ;;  %v20563_v15 = vld [vmem:[%s23651_s15 + $0x750] ss:$24 sps:$4 sm:$0xff]   ;;  %v20619_v45 = vld [vmem:[%s23651_s15 + $0x14] ss:$24 sps:$4 sm:$0xff]   ;;  %v20628_v56 = vld [vmem:[%s23651_s15 + $0xa4] ss:$24 sps:$4 sm:$0xff]  }
 0x827   : > { %15072 = vmatpush1.bf16.msra.mxu0 %v20551_v46  ;;  %15201 = vmatpush1.bf16.msra.mxu1 %v20554_v32  ;;  %v20566_v36 = vld [vmem:[%s23651_s15 + $0x758] ss:$24 sps:$4 sm:$0xff]   ;;  %v20616_v46 = vld [vmem:[%s23651_s15 + $0x8dc] ss:$24 sps:$4 sm:$0xff]  }
 0x828   : > { %19024 = vrot.lane.b32.xlu0 %v19023_v14, %s21022_s24  ;;  %19029 = vrot.lane.b32.xlu1 %v19028_v55, %s21022_s24  ;;  %v20611_v32 = vld [vmem:[%s23651_s15 + $0x8d0] ss:$24 sps:$4 sm:$0xff]   ;;  %v20626_v13 = vld [vmem:[%s23651_s15 + $0xa0] ss:$24 sps:$4 sm:$0xff]   ;;  %s24216_s24 = scalar_lea.vmem %s24565_s7, %s18971_s21 }
 0x829   : > { %15073 = vmatprep.subr.bf16.mxu0 %v20559_v24  ;;  %15202 = vmatprep.subr.bf16.mxu1 %v20562_v43  ;;  %v20614_v3 = vld [vmem:[%s23651_s15 + $0x8d8] ss:$24 sps:$4 sm:$0xff]  }
 0x82b   : > { %15074 = vmatpush1.bf16.msra.mxu0 %v20557_v9  ;;  %15203 = vmatpush1.bf16.msra.mxu1 %v20560_v37 }
 0x82c   : > { %15075 = vmatprep.subr.bf16.mxu0 %v20565_v2  ;;  %15204 = vmatprep.subr.bf16.mxu1 %v20568_v29 }
 0x82f   : > { %15076 = vmatpush1.bf16.msra.mxu0 %v20563_v15  ;;  %15205 = vmatpush1.bf16.msra.mxu1 %v20566_v36 }
 0x830   : > { %15077 = vmatprep.subr.bf16.mxu0 %v20571_v12  ;;  %15206 = vmatprep.subr.bf16.mxu1 %v20574_v39  ;;  %v20637_v12 = vld [vmem:[%s23651_s15 + $0x134] ss:$24 sps:$4 sm:$0xff]   ;;  %v20635_v39 = vld [vmem:[%s23651_s15 + $0x130] ss:$24 sps:$4 sm:$0xff]  }
 0x833   : > { %15078 = vmatpush1.bf16.msra.mxu0 %v20569_v35  ;;  %15207 = vmatpush1.bf16.msra.mxu1 %v20572_v59  ;;  %v20640_v35 = vld [vmem:[%s23651_s15 + $0x164] ss:$24 sps:$4 sm:$0xff]   ;;  %v20638_v59 = vld [vmem:[%s23651_s15 + $0x160] ss:$24 sps:$4 sm:$0xff]  }
 0x834   : > { %15079 = vmatprep.subr.bf16.mxu0 %v20577_v31  ;;  %15208 = vmatprep.subr.bf16.mxu1 %v20580_v23  ;;  %v20643_v31 = vld [vmem:[%s23651_s15 + $0x194] ss:$24 sps:$4 sm:$0xff]   ;;  %v20641_v23 = vld [vmem:[%s23651_s15 + $0x190] ss:$24 sps:$4 sm:$0xff]  }
 0x837   : > { %15080 = vmatpush1.bf16.msra.mxu0 %v20575_v34  ;;  %15209 = vmatpush1.bf16.msra.mxu1 %v20578_v42  ;;  %v20646_v34 = vld [vmem:[%s23651_s15 + $0x1c4] ss:$24 sps:$4 sm:$0xff]   ;;  %v20644_v42 = vld [vmem:[%s23651_s15 + $0x1c0] ss:$24 sps:$4 sm:$0xff]  }
 0x838   : > { %15081 = vmatprep.subr.bf16.mxu0 %v20583_v22  ;;  %15210 = vmatprep.subr.bf16.mxu1 %v20586_v19  ;;  %v20649_v22 = vld [vmem:[%s23651_s15 + $0x1f4] ss:$24 sps:$4 sm:$0xff]   ;;  %v20647_v19 = vld [vmem:[%s23651_s15 + $0x1f0] ss:$24 sps:$4 sm:$0xff]  }
 0x83b   : > { %15082 = vmatpush1.bf16.msra.mxu0 %v20581_v18  ;;  %15211 = vmatpush1.bf16.msra.mxu1 %v20584_v0  ;;  %v20652_v18 = vld [vmem:[%s23651_s15 + $0x224] ss:$24 sps:$4 sm:$0xff]   ;;  %v20650_v0 = vld [vmem:[%s23651_s15 + $0x220] ss:$24 sps:$4 sm:$0xff]  }
 0x83c   : > { %15083 = vmatprep.subr.bf16.mxu0 %v20589_v53  ;;  %15212 = vmatprep.subr.bf16.mxu1 %v20592_v61  ;;  %v20655_v53 = vld [vmem:[%s23651_s15 + $0x254] ss:$24 sps:$4 sm:$0xff]   ;;  %v20653_v61 = vld [vmem:[%s23651_s15 + $0x250] ss:$24 sps:$4 sm:$0xff]  }
 0x83f   : > { %15084 = vmatpush1.bf16.msra.mxu0 %v20587_v54  ;;  %15213 = vmatpush1.bf16.msra.mxu1 %v20590_v44  ;;  %v20658_v54 = vld [vmem:[%s23651_s15 + $0x284] ss:$24 sps:$4 sm:$0xff]   ;;  %v20656_v44 = vld [vmem:[%s23651_s15 + $0x280] ss:$24 sps:$4 sm:$0xff]  }
 0x840   : > { %15085 = vmatprep.subr.bf16.mxu0 %v20595_v5  ;;  %15214 = vmatprep.subr.bf16.mxu1 %v20598_v58  ;;  %v20661_v5 = vld [vmem:[%s23651_s15 + $0x2b4] ss:$24 sps:$4 sm:$0xff]   ;;  %v20659_v58 = vld [vmem:[%s23651_s15 + $0x2b0] ss:$24 sps:$4 sm:$0xff]  }
 0x843   : > { %15086 = vmatpush1.bf16.msra.mxu0 %v20593_v41  ;;  %15215 = vmatpush1.bf16.msra.mxu1 %v20596_v51  ;;  %v20664_v41 = vld [vmem:[%s23651_s15 + $0x2e4] ss:$24 sps:$4 sm:$0xff]   ;;  %v20662_v51 = vld [vmem:[%s23651_s15 + $0x2e0] ss:$24 sps:$4 sm:$0xff]  }
 0x844   : > { %15087 = vmatprep.subr.bf16.mxu0 %v20601_v57  ;;  %15216 = vmatprep.subr.bf16.mxu1 %v20604_v10  ;;  %v20667_v57 = vld [vmem:[%s23651_s15 + $0x314] ss:$24 sps:$4 sm:$0xff]   ;;  %v20665_v10 = vld [vmem:[%s23651_s15 + $0x310] ss:$24 sps:$4 sm:$0xff]  }
 0x847   : > { %15088 = vmatpush1.bf16.msra.mxu0 %v20599_v21  ;;  %15217 = vmatpush1.bf16.msra.mxu1 %v20602_v8  ;;  %v20670_v21 = vld [vmem:[%s23651_s15 + $0x344] ss:$24 sps:$4 sm:$0xff]   ;;  %v20668_v8 = vld [vmem:[%s23651_s15 + $0x340] ss:$24 sps:$4 sm:$0xff]  }
 0x848   : > { %15089 = vmatprep.subr.bf16.mxu0 %v20607_v47  ;;  %15218 = vmatprep.subr.bf16.mxu1 %v20610_v1  ;;  %v20673_v47 = vld [vmem:[%s23651_s15 + $0x374] ss:$24 sps:$4 sm:$0xff]   ;;  %v20671_v1 = vld [vmem:[%s23651_s15 + $0x370] ss:$24 sps:$4 sm:$0xff]  }
 0x84b   : > { %15090 = vmatpush1.bf16.msra.mxu0 %v20605_v40  ;;  %15219 = vmatpush1.bf16.msra.mxu1 %v20608_v17  ;;  %v20676_v40 = vld [vmem:[%s23651_s15 + $0x3a4] ss:$24 sps:$4 sm:$0xff]   ;;  %v20674_v17 = vld [vmem:[%s23651_s15 + $0x3a0] ss:$24 sps:$4 sm:$0xff]  }
 0x84c   : > { %15091 = vmatprep.subr.bf16.mxu0 %v20613_v60  ;;  %15220 = vmatprep.subr.bf16.mxu1 %v20616_v46  ;;  %v20677_v60 = vld [vmem:[%s23651_s15 + $0x3d0] ss:$24 sps:$4 sm:$0xff]   ;;  %v20680_v46 = vld [vmem:[%s23651_s15 + $0x400] ss:$24 sps:$4 sm:$0xff]  }
 0x84f   : > { %15092 = vmatpush1.bf16.msra.mxu0 %v20611_v32  ;;  %15221 = vmatpush1.bf16.msra.mxu1 %v20614_v3  ;;  %v20685_v32 = vld [vmem:[%s23651_s15 + $0x434] ss:$24 sps:$4 sm:$0xff]   ;;  %v20683_v3 = vld [vmem:[%s23651_s15 + $0x430] ss:$24 sps:$4 sm:$0xff]  }
 0x850   : > { %15233 = vmatprep.subr.bf16.mxu0 %v20619_v45  ;;  %v20688_v45 = vld [vmem:[%s23651_s15 + $0x464] ss:$24 sps:$4 sm:$0xff]  }
 0x89a   : > { %v19025_v24 = vpop.permute.xlu0 %19024  ;;  %v19030_v43 = vpop.permute.xlu1 %19029 }
 0x89b   : > { %v19027_v14 = vunpack.i.h.bf16 %v19025_v24  ;;  %v19026_v55 = vunpack.i.l.bf16 %v19025_v24  ;;  %v19032_v9 = vunpack.i.h.bf16 %v19030_v43  ;;  %v19031_v37 = vunpack.i.l.bf16 %v19030_v43  ;;  %v20686_v24 = vld [vmem:[%s23651_s15 + $0x460] ss:$24 sps:$4 sm:$0xff]   ;;  %v20691_v43 = vld [vmem:[%s23651_s15 + $0x494] ss:$24 sps:$4 sm:$0xff]  }
 0x89d   : > { %v13205_v2 = vsel %vm9834_vm1, %v13077_v62, %v19031_v37  ;;  %v13206_v29 = vsel %vm9834_vm1, %v13145_v38, %v19032_v9  ;;  %v13207_v15 = vsel %vm9834_vm1, %v13079_v48, %v19026_v55  ;;  %v13208_v36 = vsel %vm9834_vm1, %v13147_v49, %v19027_v14  ;;  %v20617_v62 = vld [vmem:[%s23651_s15 + $0x10] ss:$24 sps:$4 sm:$0xff]   ;;  %v20632_v49 = vld [vmem:[%s23651_s15 + $0x100] ss:$24 sps:$4 sm:$0xff]   ;;  %v20694_v55 = vld [vmem:[%s23651_s15 + $0x4c4] ss:$24 sps:$4 sm:$0xff]  }
 0x89e   : > { %v24076_v20 = vpack.c.bf16 %v13206_v29, %v13205_v2  ;;  %v24078_v26 = vpack.c.bf16 %v13208_v36, %v13207_v15  ;;  %v20623_v48 = vld [vmem:[%s23651_s15 + $0x70] ss:$24 sps:$4 sm:$0xff]   ;;  %v20692_v9 = vld [vmem:[%s23651_s15 + $0x4c0] ss:$24 sps:$4 sm:$0xff]   ;;  %v20697_v37 = vld [vmem:[%s23651_s15 + $0x4f4] ss:$24 sps:$4 sm:$0xff]  }
 0x89f   : > { %v20629_v38 = vld [vmem:[%s23651_s15 + $0xd0] ss:$24 sps:$4 sm:$0xff]   ;;  %v20700_v29 = vld [vmem:[%s23651_s15 + $0x524] ss:$24 sps:$4 sm:$0xff]   ;;  %v20698_v15 = vld [vmem:[%s23651_s15 + $0x520] ss:$24 sps:$4 sm:$0xff]  }
 0x8a0   : > { %15093 = vmatprep.mubr.bf16.mxu0 %v24078_v26  ;;  %15222 = vmatprep.mubr.bf16.mxu1 %v24078_v26  ;;  %v20689_v14 = vld [vmem:[%s23651_s15 + $0x490] ss:$24 sps:$4 sm:$0xff]   ;;  %v20703_v36 = vld [vmem:[%s23651_s15 + $0x554] ss:$24 sps:$4 sm:$0xff]  }
 0x8a1   : > { %15094 = vmatmul.mubr.bf16.vlgmr.msra.gmra.mrb[68].mxu0 %v24076_v20  ;;  %15223 = vmatmul.mubr.bf16.vlgmr.msra.gmra.mrb[160].mxu1 %v24076_v20  ;;  %v20695_v2 = vld [vmem:[%s23651_s15 + $0x4f0] ss:$24 sps:$4 sm:$0xff]  }
 0x8a2   : > { %15234 = vmatpush1.bf16.msra.mxu0 %v20617_v62  ;;  %15265 = vmatprep.mubr.bf16.mxu0 %v23855_v11  ;;  %v20634_v11 = vld [vmem:[%s23651_s15 + $0x104] ss:$24 sps:$4 sm:$0xff]   ;;  %v20701_v62 = vld [vmem:[%s23651_s15 + $0x550] ss:$24 sps:$4 sm:$0xff]  }
 0x8a3   : > { %15235 = vmatprep.subr.bf16.mxu0 %v20622_v33  ;;  %v20706_v33 = vld [vmem:[%s23651_s15 + $0x584] ss:$24 sps:$4 sm:$0xff]  }
 0x8a6   : > { %15236 = vmatpush1.bf16.msra.mxu0 %v20620_v27  ;;  %v20704_v27 = vld [vmem:[%s23651_s15 + $0x580] ss:$24 sps:$4 sm:$0xff]  }
 0x8a7   : > { %15237 = vmatprep.subr.bf16.mxu0 %v20625_v25  ;;  %v20709_v25 = vld [vmem:[%s23651_s15 + $0x5b4] ss:$24 sps:$4 sm:$0xff]  }
 0x8aa   : > { %15238 = vmatpush1.bf16.msra.mxu0 %v20623_v48  ;;  %v20707_v48 = vld [vmem:[%s23651_s15 + $0x5b0] ss:$24 sps:$4 sm:$0xff]  }
 0x8ab   : > { %15239 = vmatprep.subr.bf16.mxu0 %v20628_v56  ;;  %v20712_v56 = vld [vmem:[%s23651_s15 + $0x5e4] ss:$24 sps:$4 sm:$0xff]  }
 0x8ae   : > { %15240 = vmatpush1.bf16.msra.mxu0 %v20626_v13  ;;  %v20710_v13 = vld [vmem:[%s23651_s15 + $0x5e0] ss:$24 sps:$4 sm:$0xff]  }
 0x8af   : > { %15241 = vmatprep.subr.bf16.mxu0 %v20631_v28  ;;  %v20715_v28 = vld [vmem:[%s23651_s15 + $0x614] ss:$24 sps:$4 sm:$0xff]  }
 0x8b2   : > { %15242 = vmatpush1.bf16.msra.mxu0 %v20629_v38  ;;  %v20713_v38 = vld [vmem:[%s23651_s15 + $0x610] ss:$24 sps:$4 sm:$0xff]  }
 0x8b3   : > { %15243 = vmatprep.subr.bf16.mxu0 %v20634_v11  ;;  %v20718_v11 = vld [vmem:[%s23651_s15 + $0x644] ss:$24 sps:$4 sm:$0xff]  }
 0x8b6   : > { %15244 = vmatpush1.bf16.msra.mxu0 %v20632_v49  ;;  %v20716_v49 = vld [vmem:[%s23651_s15 + $0x640] ss:$24 sps:$4 sm:$0xff]  }
 0x8b7   : > { %15245 = vmatprep.subr.bf16.mxu0 %v20637_v12  ;;  %v20721_v12 = vld [vmem:[%s23651_s15 + $0x674] ss:$24 sps:$4 sm:$0xff]  }
 0x8ba   : > { %15246 = vmatpush1.bf16.msra.mxu0 %v20635_v39  ;;  %v20719_v39 = vld [vmem:[%s23651_s15 + $0x670] ss:$24 sps:$4 sm:$0xff]  }
 0x8bb   : > { %15247 = vmatprep.subr.bf16.mxu0 %v20640_v35  ;;  %v20724_v35 = vld [vmem:[%s23651_s15 + $0x6a4] ss:$24 sps:$4 sm:$0xff]  }
 0x8be   : > { %15248 = vmatpush1.bf16.msra.mxu0 %v20638_v59  ;;  %v20722_v59 = vld [vmem:[%s23651_s15 + $0x6a0] ss:$24 sps:$4 sm:$0xff]  }
 0x8bf   : > { %15249 = vmatprep.subr.bf16.mxu0 %v20643_v31  ;;  %v20725_v31 = vld [vmem:[%s23651_s15 + $0x6d0] ss:$24 sps:$4 sm:$0xff]  }
 0x8c2   : > { %15250 = vmatpush1.bf16.msra.mxu0 %v20641_v23  ;;  %v20728_v23 = vld [vmem:[%s23651_s15 + $0x700] ss:$24 sps:$4 sm:$0xff]  }
 0x8c3   : > { %15251 = vmatprep.subr.bf16.mxu0 %v20646_v34  ;;  %v20733_v34 = vld [vmem:[%s23651_s15 + $0x734] ss:$24 sps:$4 sm:$0xff]  }
 0x8c6   : > { %15252 = vmatpush1.bf16.msra.mxu0 %v20644_v42  ;;  %v20731_v42 = vld [vmem:[%s23651_s15 + $0x730] ss:$24 sps:$4 sm:$0xff]  }
 0x8c7   : > { %15253 = vmatprep.subr.bf16.mxu0 %v20649_v22  ;;  %v20736_v22 = vld [vmem:[%s23651_s15 + $0x764] ss:$24 sps:$4 sm:$0xff]  }
 0x8ca   : > { %15254 = vmatpush1.bf16.msra.mxu0 %v20647_v19  ;;  %v20734_v19 = vld [vmem:[%s23651_s15 + $0x760] ss:$24 sps:$4 sm:$0xff]  }
 0x8cb   : > { %15255 = vmatprep.subr.bf16.mxu0 %v20652_v18  ;;  %v20739_v18 = vld [vmem:[%s23651_s15 + $0x794] ss:$24 sps:$4 sm:$0xff]  }
 0x8ce   : > { %15256 = vmatpush1.bf16.msra.mxu0 %v20650_v0  ;;  %v20737_v0 = vld [vmem:[%s23651_s15 + $0x790] ss:$24 sps:$4 sm:$0xff]  }
 0x8cf   : > { %15257 = vmatprep.subr.bf16.mxu0 %v20655_v53  ;;  %v20742_v53 = vld [vmem:[%s23651_s15 + $0x7c4] ss:$24 sps:$4 sm:$0xff]  }
 0x8d2   : > { %15258 = vmatpush1.bf16.msra.mxu0 %v20653_v61  ;;  %v20740_v61 = vld [vmem:[%s23651_s15 + $0x7c0] ss:$24 sps:$4 sm:$0xff]  }
 0x8d3   : > { %15259 = vmatprep.subr.bf16.mxu0 %v20658_v54  ;;  %v20745_v54 = vld [vmem:[%s23651_s15 + $0x7f4] ss:$24 sps:$4 sm:$0xff]  }
 0x8d6   : > { %15260 = vmatpush1.bf16.msra.mxu0 %v20656_v44  ;;  %v20743_v44 = vld [vmem:[%s23651_s15 + $0x7f0] ss:$24 sps:$4 sm:$0xff]  }
 0x8d7   : > { %15261 = vmatprep.subr.bf16.mxu0 %v20661_v5  ;;  %v20748_v5 = vld [vmem:[%s23651_s15 + $0x824] ss:$24 sps:$4 sm:$0xff]  }
 0x8da   : > { %15262 = vmatpush1.bf16.msra.mxu0 %v20659_v58  ;;  %v20746_v58 = vld [vmem:[%s23651_s15 + $0x820] ss:$24 sps:$4 sm:$0xff]  }
 0x8db   : > { %15263 = vmatprep.subr.bf16.mxu0 %v20664_v41  ;;  %v20751_v41 = vld [vmem:[%s23651_s15 + $0x854] ss:$24 sps:$4 sm:$0xff]  }
 0x8de   : > { %15264 = vmatpush1.bf16.msra.mxu0 %v20662_v51  ;;  %v20749_v51 = vld [vmem:[%s23651_s15 + $0x850] ss:$24 sps:$4 sm:$0xff]  }
 0x8df   : > { %15276 = vmatprep.subr.bf16.mxu0 %v20667_v57  ;;  %v20754_v57 = vld [vmem:[%s23651_s15 + $0x884] ss:$24 sps:$4 sm:$0xff]  }
 0x8e1   : > { %15266 = vmatmul.mubr.bf16.vlgmr.msra.gmra.mrb[72].mxu0 %v23853_v30  ;;  %v20679_v30 = vld [vmem:[%s23651_s15 + $0x3d4] ss:$24 sps:$4 sm:$0xff]  }
 0x8e2   : > { %15277 = vmatpush1.bf16.msra.mxu0 %v20665_v10  ;;  %15308 = vmatprep.mubr.bf16.mxu0 %v23939_v16  ;;  %v20682_v16 = vld [vmem:[%s23651_s15 + $0x404] ss:$24 sps:$4 sm:$0xff]   ;;  %v20752_v10 = vld [vmem:[%s23651_s15 + $0x880] ss:$24 sps:$4 sm:$0xff]  }
 0x8e3   : > { %15278 = vmatprep.subr.bf16.mxu0 %v20670_v21  ;;  %v20757_v21 = vld [vmem:[%s23651_s15 + $0x8b4] ss:$24 sps:$4 sm:$0xff]  }
 0x8e6   : > { %15279 = vmatpush1.bf16.msra.mxu0 %v20668_v8  ;;  %v20755_v8 = vld [vmem:[%s23651_s15 + $0x8b0] ss:$24 sps:$4 sm:$0xff]  }
 0x8e7   : > { %15280 = vmatprep.subr.bf16.mxu0 %v20673_v47  ;;  %v20760_v47 = vld [vmem:[%s23651_s15 + $0x8e4] ss:$24 sps:$4 sm:$0xff]  }
 0x8ea   : > { %15281 = vmatpush1.bf16.msra.mxu0 %v20671_v1  ;;  %v20758_v1 = vld [vmem:[%s23651_s15 + $0x8e0] ss:$24 sps:$4 sm:$0xff]  }
 0x8eb   : > { %15282 = vmatprep.subr.bf16.mxu0 %v20676_v40 }
 0x8ee   : > { %15283 = vmatpush1.bf16.msra.mxu0 %v20674_v17 }
 0x8ef   : > { %15284 = vmatprep.subr.bf16.mxu0 %v20679_v30 }
 0x8f2   : > { %15285 = vmatpush1.bf16.msra.mxu0 %v20677_v60 }
 0x8f3   : > { %15286 = vmatprep.subr.bf16.mxu0 %v20682_v16 }
 0x8f6   : > { %15287 = vmatpush1.bf16.msra.mxu0 %v20680_v46 }
 0x8f7   : > { %15288 = vmatprep.subr.bf16.mxu0 %v20685_v32 }
 0x8fa   : > { %15289 = vmatpush1.bf16.msra.mxu0 %v20683_v3 }
 0x8fb   : > { %15290 = vmatprep.subr.bf16.mxu0 %v20688_v45  ;;  %v13503_v45 = vld [vmem:[%s653_s20] sm:$0x3f] }
 0x8fe   : > { %15291 = vmatpush1.bf16.msra.mxu0 %v20686_v24  ;;  %v13512_v24 = vrot.slane %v13503_v45, %v21599_v7 }
 0x8ff   : > { %15292 = vmatprep.subr.bf16.mxu0 %v20691_v43 }
 0x902   : > { %15293 = vmatpush1.bf16.msra.mxu0 %v20689_v14 }
 0x903   : > { %15294 = vmatprep.subr.bf16.mxu0 %v20694_v55  ;;  %v13516_v55 = vrot.slane %v13503_v45, %v22132_v50 }
 0x906   : > { %15295 = vmatpush1.bf16.msra.mxu0 %v20692_v9 }
 0x907   : > { %15296 = vmatprep.subr.bf16.mxu0 %v20697_v37 }
 0x90a   : > { %15297 = vmatpush1.bf16.msra.mxu0 %v20695_v2  ;;  %v20986_v2 = vld [vmem:[%s21172_s19] sm:$0xff] }
 0x90b   : > { %15298 = vmatprep.subr.bf16.mxu0 %v20700_v29 }
 0x90e   : > { %15299 = vmatpush1.bf16.msra.mxu0 %v20698_v15  ;;  %v20987_v15 = vld [vmem:[%s21172_s19 + $0x8] sm:$0xff] }
 0x90f   : > { %15300 = vmatprep.subr.bf16.mxu0 %v20703_v36 }
 0x912   : > { %15301 = vmatpush1.bf16.msra.mxu0 %v20701_v62 }
 0x913   : > { %15302 = vmatprep.subr.bf16.mxu0 %v20706_v33  ;;  %v13520_v33 = vrot.slane %v13503_v45, %v22137_v52 }
 0x916   : > { %15303 = vmatpush1.bf16.msra.mxu0 %v20704_v27  ;;  %v20988_v27 = vld [vmem:[%s21172_s19 + $0x30] sm:$0xff] }
 0x917   : > { %15304 = vmatprep.subr.bf16.mxu0 %v20709_v25 }
 0x91a   : > { %15305 = vmatpush1.bf16.msra.mxu0 %v20707_v48  ;;  %v20989_v48 = vld [vmem:[%s21172_s19 + $0x38] sm:$0xff] }
 0x91b   : > { %15306 = vmatprep.subr.bf16.mxu0 %v20712_v56 }
 0x91e   : > { %15307 = vmatpush1.bf16.msra.mxu0 %v20710_v13 }
 0x91f   : > { %15319 = vmatprep.subr.bf16.mxu0 %v20715_v28 }
 0x921   : > { %15309 = vmatmul.mubr.bf16.vlgmr.msra.gmra.mrb[72].mxu0 %v23953_v63  ;;  %v20727_v63 = vld [vmem:[%s23651_s15 + $0x6d4] ss:$24 sps:$4 sm:$0xff]  }
 0x922   : > { %15320 = vmatpush1.bf16.msra.mxu0 %v20713_v38  ;;  %15351 = vmatprep.mubr.bf16.mxu0 %v24078_v26  ;;  %v20730_v26 = vld [vmem:[%s23651_s15 + $0x704] ss:$24 sps:$4 sm:$0xff]   ;;  %v20990_v38 = vld [vmem:[%s21172_s19 + $0x10] sm:$0xff] }
 0x923   : > { %15321 = vmatprep.subr.bf16.mxu0 %v20718_v11 }
 0x926   : > { %15322 = vmatpush1.bf16.msra.mxu0 %v20716_v49 }
 0x927   : > { %15323 = vmatprep.subr.bf16.mxu0 %v20721_v12 }
 0x92a   : > { %15324 = vmatpush1.bf16.msra.mxu0 %v20719_v39  ;;  %v13524_v39 = vrot.slane %v13503_v45, %v22165_v6 }
 0x92b   : > { %15325 = vmatprep.subr.bf16.mxu0 %v20724_v35  ;;  %v24589_v35 = vld [vmem:[#allocation2_spill] sm:$0xff] }
 0x92e   : > { %15326 = vmatpush1.bf16.msra.mxu0 %v20722_v59  ;;  %v13528_v59 = vrot.slane %v13503_v45, %v24589_v35 }
 0x92f   : > { %15327 = vmatprep.subr.bf16.mxu0 %v20727_v63 }
 0x932   : > { %15328 = vmatpush1.bf16.msra.mxu0 %v20725_v31  ;;  %v20991_v31 = vld [vmem:[%s21172_s19 + $0x40] sm:$0xff] }
 0x933   : > { %15329 = vmatprep.subr.bf16.mxu0 %v20730_v26 }
 0x936   : > { %15330 = vmatpush1.bf16.msra.mxu0 %v20728_v23 }
 0x937   : > { %15331 = vmatprep.subr.bf16.mxu0 %v20733_v34 }
 0x93a   : > { %15332 = vmatpush1.bf16.msra.mxu0 %v20731_v42  ;;  %v20992_v42 = vld [vmem:[%s21172_s19 + $0x18] sm:$0xff] }
 0x93b   : > { %15333 = vmatprep.subr.bf16.mxu0 %v20736_v22 }
 0x93e   : > { %15334 = vmatpush1.bf16.msra.mxu0 %v20734_v19 }
 0x93f   : > { %15335 = vmatprep.subr.bf16.mxu0 %v20739_v18 }
 0x942   : > { %15336 = vmatpush1.bf16.msra.mxu0 %v20737_v0 }
 0x943   : > { %15337 = vmatprep.subr.bf16.mxu0 %v20742_v53 }
 0x946   : > { %15338 = vmatpush1.bf16.msra.mxu0 %v20740_v61 }
 0x947   : > { %15339 = vmatprep.subr.bf16.mxu0 %v20745_v54 }
 0x94a   : > { %15340 = vmatpush1.bf16.msra.mxu0 %v20743_v44  ;;  %v20993_v44 = vld [vmem:[%s21172_s19 + $0x48] sm:$0xff] }
 0x94b   : > { %15341 = vmatprep.subr.bf16.mxu0 %v20748_v5 }
 0x94e   : > { %15342 = vmatpush1.bf16.msra.mxu0 %v20746_v58  ;;  %v20994_v58 = vld [vmem:[%s21172_s19 + $0x20] sm:$0xff] }
 0x94f   : > { %15343 = vmatprep.subr.bf16.mxu0 %v20751_v41 }
 0x952   : > { %15344 = vmatpush1.bf16.msra.mxu0 %v20749_v51 }
 0x953   : > { %15345 = vmatprep.subr.bf16.mxu0 %v20754_v57 }
 0x956   : > { %15346 = vmatpush1.bf16.msra.mxu0 %v20752_v10  ;;  %v20995_v10 = vld [vmem:[%s21172_s19 + $0x28] sm:$0xff] }
 0x957   : > { %15347 = vmatprep.subr.bf16.mxu0 %v20757_v21 }
 0x95a   : > { %15348 = vmatpush1.bf16.msra.mxu0 %v20755_v8 }
 0x95b   : > { %15349 = vmatprep.subr.bf16.mxu0 %v20760_v47 }
 0x95e   : > { %15350 = vmatpush1.bf16.msra.mxu0 %v20758_v1  ;;  %v20996_v1 = vld [vmem:[%s21172_s19 + $0x50] sm:$0xff] }
 0x961   : > { %15352 = vmatmul.mubr.bf16.vlgmr.msra.gmra.mrb[72].mxu0 %v24076_v20  ;;  %v13508_v20 = vrot.slane %v13503_v45, %v21594_v4  ;;  %v20762_v45 = vld [vmem:[%s24216_s24] sm:$0xff]  }
 0x974   : > { %v15095_v40 = vpop.f32.mrb[68].mxu0  ;;  %v15224_v17 = vpop.f32.mrb[160].mxu1 }
 0x975   : > { %v15097_v30 = vpop.f32.mrb[69].mxu0  ;;  %v15226_v60 = vpop.f32.mrb[161].mxu1  ;;  %v18858_v43 = vadd.f32 %v15095_v40, %v13508_v20  ;;  %v18862_v62 = vadd.f32 %v15224_v17, %v13516_v55 }
 0x976   : > { %v15099_v16 = vpop.f32.mrb[70].mxu0  ;;  %v15228_v46 = vpop.f32.mrb[162].mxu1  ;;  %v18859_v14 = vadd.f32 %v15097_v30, %v13512_v24  ;;  %v18863_v49 = vadd.f32 %v15226_v60, %v13520_v33  ;;  %v20997_v30 = vld [vmem:[%s21172_s19 + $0x58] sm:$0xff] }
 0x977   : > { %v15101_v32 = vpop.f32.mrb[71].mxu0  ;;  %v15230_v3 = vpop.f32.mrb[163].mxu1  ;;  %v18860_v9 = vadd.f32 %v15099_v16, %v13508_v20  ;;  %v15362_v29 = vadd.f32 %v20986_v2, %v18858_v43  ;;  %v18864_v28 = vadd.f32 %v15228_v46, %v13516_v55  ;;  %v15364_v11 = vadd.f32 %v20990_v38, %v18862_v62  ;;  %v20763_v20 = vld [vmem:[%s24216_s24 + $0x48] sm:$0xff]  }
 0x978   : > { %v18861_v37 = vadd.f32 %v15101_v32, %v13512_v24  ;;  %v15363_v36 = vadd.f32 %v20987_v15, %v18859_v14  ;;  %v18865_v23 = vadd.f32 %v15230_v3, %v13520_v33  ;;  %v15365_v22 = vadd.f32 %v20992_v42, %v18863_v49  ;;  %v20761_v3 = vld [vmem:[%s24216_s24 + $0x40] sm:$0xff]  }
 0x979   : > { %v15368_v25 = vadd.f32 %v20988_v27, %v18860_v9  ;;  %v15370_v26 = vadd.f32 %v20991_v31, %v18864_v28  ;;  %18468 = vmatprep.subr.bf16.mxu1 %v20761_v3 }
 0x97a   : > { %v15369_v56 = vadd.f32 %v20989_v48, %v18861_v37  ;;  %v15376_v13 = vadd.f32 %v15363_v36, %v15362_v29  ;;  %v15371_v5 = vadd.f32 %v20993_v44, %v18865_v23  ;;  %18469 = vmatpush3.bf16.msra.mxu1 %v20762_v45 }
 0x97b   : > { %18470 = vmatprep.subr.bf16.mxu1 %v20763_v20 }
 0x97c   : > { %v15383_v12 = vadd.f32 %v15369_v56, %v15368_v25  ;;  %v15377_v63 = vadd.f32 %v15376_v13, %v15364_v11 }
 0x97e   : > { %v15384_v19 = vadd.f32 %v15383_v12, %v15370_v26  ;;  %v15378_v54 = vadd.f32 %v15377_v63, %v15365_v22 }
 0x980   : > { %v15385_v47 = vadd.f32 %v15384_v19, %v15371_v5 }
 0xa34   : > { %v15353_v34 = vpop.f32.mrb[72].mxu0 }
 0xa35   : > { %v18866_v18 = vadd.f32 %v15353_v34, %v13524_v39  ;;  %v15355_v0 = vpop.f32.mrb[73].mxu0 }
 0xa36   : > { %v18867_v53 = vadd.f32 %v15355_v0, %v13528_v59  ;;  %v15357_v61 = vpop.f32.mrb[74].mxu0 }
 0xa37   : > { %v15366_v41 = vadd.f32 %v20994_v58, %v18866_v18  ;;  %v18868_v51 = vadd.f32 %v15357_v61, %v13524_v39  ;;  %v15359_v57 = vpop.f32.mrb[75].mxu0  ;;  %v20765_v58 = vld [vmem:[%s24216_s24 + $0x50] sm:$0xff]  }
 0xa38   : > { %v15367_v21 = vadd.f32 %v20995_v10, %v18867_v53  ;;  %v18869_v8 = vadd.f32 %v15359_v57, %v13528_v59  ;;  %v20768_v57 = vld [vmem:[%s24216_s24 + $0x18] sm:$0xff]   ;;  %v20769_v10 = vld [vmem:[%s24216_s24 + $0x60] sm:$0xff]  }
 0xa39   : > { %v15372_v40 = vadd.f32 %v20996_v1, %v18868_v51  ;;  %v15379_v17 = vadd.f32 %v15378_v54, %v15366_v41  ;;  %v20767_v51 = vld [vmem:[%s24216_s24 + $0x58] sm:$0xff]   ;;  %v20773_v1 = vld [vmem:[%s24216_s24 + $0x70] sm:$0xff]  }
 0xa3a   : > { %v15373_v60 = vadd.f32 %v20997_v30, %v18869_v8  ;;  %v20771_v8 = vld [vmem:[%s24216_s24 + $0x68] sm:$0xff]   ;;  %v20776_v30 = vld [vmem:[%s24216_s24 + $0x38] sm:$0xff]  }
 0xa3b   : > { %v15380_v16 = vadd.f32 %v15379_v17, %v15367_v21  ;;  %v15386_v46 = vadd.f32 %v15385_v47, %v15372_v40  ;;  %v20772_v47 = vld [vmem:[%s24216_s24 + $0x28] sm:$0xff]   ;;  %v20775_v17 = vld [vmem:[%s24216_s24 + $0x78] sm:$0xff]  }
 0xa3d   : > { %15381 = vadd.xlane.f32.xlu0 %v15380_v16  ;;  %v15387_v32 = vadd.f32 %v15386_v46, %v15373_v60 }
 0xa3f   : > { %15388 = vadd.xlane.f32.xlu1 %v15387_v32 }
 0xaca   : > { %v15382_v24 = vpop.xlane.xlu0 %15381 }
 0xacb   : > { %v15391_v43 = vmul.f32 0.0013020834, %v15382_v24  ;;  %v24287_v24 = vld [vmem:[%s657_s30] sm:$0x3f]  ;;  %s678_s30 = scalar_lea.vmem %s24568_s10, %s24186_s16 }
 0xacc   : > { %v15389_v14 = vpop.xlane.xlu1 %15388 }
 0xacd   : > { %v15392_v55 = vmul.f32 0.0013020834, %v15389_v14  ;;  %v24221_v9 = vsub.f32 %v15362_v29, %v15391_v43  ;;  %v24223_v37 = vsub.f32 %v15363_v36, %v15391_v43  ;;  %v24225_v2 = vsub.f32 %v15364_v11, %v15391_v43 }
 0xace   : > { %v24227_v15 = vsub.f32 %v15365_v22, %v15391_v43  ;;  %v24237_v13 = vsub.f32 %v15366_v41, %v15391_v43  ;;  %v20766_v41 = vld [vmem:[%s24216_s24 + $0x10] sm:$0xff]   ;;  %v15469_v14 = vrot.slane %v24287_v24, %v22165_v6 }
 0xacf   : > { %v15405_v62 = vmul.f32 %v24221_v9, %v24221_v9  ;;  %v15406_v33 = vmul.f32 %v24223_v37, %v24223_v37  ;;  %v24233_v27 = vsub.f32 %v15368_v25, %v15392_v55  ;;  %v24235_v48 = vsub.f32 %v15369_v56, %v15392_v55 }
 0xad0   : > { %v15407_v29 = vmul.f32 %v24225_v2, %v24225_v2  ;;  %v24241_v28 = vsub.f32 %v15370_v26, %v15392_v55  ;;  %v24243_v38 = vsub.f32 %v15371_v5, %v15392_v55  ;;  %v24249_v25 = vsub.f32 %v15367_v21, %v15391_v43  ;;  %v20764_v5 = vld [vmem:[%s24216_s24 + $0x8] sm:$0xff]   ;;  %v20770_v21 = vld [vmem:[%s24216_s24 + $0x20] sm:$0xff]  }
 0xad1   : > { %v15417_v36 = vadd.f32 %v15406_v33, %v15405_v62  ;;  %v15411_v11 = vmul.f32 %v24233_v27, %v24233_v27  ;;  %v15412_v49 = vmul.f32 %v24235_v48, %v24235_v48  ;;  %v15408_v56 = vmul.f32 %v24227_v15, %v24227_v15  ;;  %18471 = vmatpush3.bf16.msra.mxu1 %v20764_v5 }
 0xad2   : > { %v24253_v39 = vsub.f32 %v15372_v40, %v15392_v55  ;;  %v15413_v59 = vmul.f32 %v24241_v28, %v24241_v28  ;;  %v15409_v31 = vmul.f32 %v24237_v13, %v24237_v13  ;;  %v15414_v23 = vmul.f32 %v24243_v38, %v24243_v38  ;;  %18472 = vmatprep.subr.bf16.mxu1 %v20765_v58  ;;  %v20774_v40 = vld [vmem:[%s24216_s24 + $0x30] sm:$0xff]  }
 0xad3   : > { %v15418_v12 = vadd.f32 %v15417_v36, %v15407_v29  ;;  %v15424_v63 = vadd.f32 %v15412_v49, %v15411_v11  ;;  %v15410_v42 = vmul.f32 %v24249_v25, %v24249_v25  ;;  %v24263_v19 = vsub.f32 %v15373_v60, %v15392_v55  ;;  %v20777_v60 = vld [vmem:[%s24216_s24 + $0xc0] sm:$0xff]  }
 0xad4   : > { %v15415_v18 = vmul.f32 %v24253_v39, %v24253_v39  ;;  %v24297_v55 = vld [vmem:[%s661_s17] sm:$0x3f]  ;;  %v15457_v33 = vrot.slane %v24287_v24, %v21599_v7  ;;  %v15453_v36 = vrot.slane %v24287_v24, %v21594_v4  ;;  %s682_s17 = scalar_lea.vmem %s24569_s11, %s24186_s16 }
 0xad5   : > { %v15419_v26 = vadd.f32 %v15418_v12, %v15408_v56  ;;  %v15425_v34 = vadd.f32 %v15424_v63, %v15413_v59  ;;  %v15416_v54 = vmul.f32 %v24263_v19, %v24263_v19  ;;  %18473 = vmatpush3.bf16.msra.mxu1 %v20766_v41  ;;  %v15465_v56 = vrot.slane %v24287_v24, %v22137_v52  ;;  %v20778_v41 = vld [vmem:[%s24216_s24 + $0x80] sm:$0xff]  }
 0xad6   : > { %18474 = vmatprep.subr.bf16.mxu1 %v20767_v51  ;;  %v15496_v59 = vrot.slane %v24297_v55, %v21594_v4  ;;  %v15512_v63 = vrot.slane %v24297_v55, %v22165_v6 }
 0xad7   : > { %v15420_v22 = vadd.f32 %v15419_v26, %v15409_v31  ;;  %v15426_v0 = vadd.f32 %v15425_v34, %v15414_v23 }
 0xad9   : > { %v15421_v53 = vadd.f32 %v15420_v22, %v15410_v42  ;;  %v15427_v61 = vadd.f32 %v15426_v0, %v15415_v18  ;;  %18475 = vmatpush3.bf16.msra.mxu1 %v20768_v57  ;;  %v15508_v18 = vrot.slane %v24297_v55, %v22137_v52  ;;  %v20779_v57 = vld [vmem:[%s24216_s24 + $0xc8] sm:$0xff]  }
 0xada   : > { %18476 = vmatprep.subr.bf16.mxu1 %v20769_v10 }
 0xadb   : > { %15422 = vadd.xlane.f32.xlu0 %v15421_v53  ;;  %v15428_v44 = vadd.f32 %v15427_v61, %v15416_v54 }
 0xadd   : > { %18477 = vmatpush3.bf16.msra.mxu1 %v20770_v21 }
 0xade   : > { %18478 = vmatprep.subr.bf16.mxu1 %v20771_v8  ;;  %v20780_v8 = vld [vmem:[%s24216_s24 + $0x88] sm:$0xff]  }
 0xadf   : > { %15429 = vadd.xlane.f32.xlu0 %v15428_v44 }
 0xae1   : > { %18479 = vmatpush3.bf16.msra.mxu1 %v20772_v47  ;;  %v20781_v47 = vld [vmem:[%s24216_s24 + $0xd0] sm:$0xff]  }
 0xae2   : > { %18480 = vmatprep.subr.bf16.mxu1 %v20773_v1  ;;  %v20782_v1 = vld [vmem:[%s24216_s24 + $0x90] sm:$0xff]  }
 0xae5   : > { %18481 = vmatpush3.bf16.msra.mxu1 %v20774_v40  ;;  %v20783_v40 = vld [vmem:[%s24216_s24 + $0xd8] sm:$0xff]  }
 0xae6   : > { %18482 = vmatprep.subr.bf16.mxu1 %v20775_v17  ;;  %v20784_v17 = vld [vmem:[%s24216_s24 + $0x98] sm:$0xff]  }
 0xae9   : > { %18483 = vmatpush3.bf16.msra.mxu1 %v20776_v30  ;;  %v20785_v30 = vld [vmem:[%s24216_s24 + $0xe0] sm:$0xff]  }
 0xaea   : > { %18490 = vmatprep.subr.bf16.mxu1 %v20777_v60  ;;  %v20786_v60 = vld [vmem:[%s24216_s24 + $0xa0] sm:$0xff]  }
 0xb68   : > { %v15423_v16 = vpop.xlane.xlu0 %15422 }
 0xb69   : > { %v15431_v46 = vmul.f32 0.0013020834, %v15423_v16  ;;  %v20787_v16 = vld [vmem:[%s24216_s24 + $0xe8] sm:$0xff]  }
 0xb6b   : > { %v15433_v32 = vadd.f32 1e-05, %v15431_v46  ;;  %v20788_v46 = vld [vmem:[%s24216_s24 + $0xa8] sm:$0xff]  }
 0xb6c   : > { %v15430_v3 = vpop.xlane.xlu0 %15429 }
 0xb6d   : > { %20977 = vrsqrt.f32 %v15433_v32  ;;  %v15432_v45 = vmul.f32 0.0013020834, %v15430_v3  ;;  %v20789_v32 = vld [vmem:[%s24216_s24 + $0xf0] sm:$0xff]  }
 0xb6f   : > { %v15434_v20 = vadd.f32 1e-05, %v15432_v45 }
 0xb71   : > { %20979 = vrsqrt.f32 %v15434_v20 }
 0xb77   : > { %v24293_v43 = vpop.eup %20977 }
 0xb78   : > { %v15438_v62 = vmul.f32 %v24293_v43, %v24223_v37  ;;  %v15437_v29 = vmul.f32 %v24293_v43, %v24221_v9  ;;  %v15441_v11 = vmul.f32 %v24293_v43, %v24237_v13  ;;  %v15440_v49 = vmul.f32 %v24293_v43, %v24227_v15 }
 0xb79   : > { %v15500_v37 = vrot.slane %v24297_v55, %v21599_v7  ;;  %v15439_v20 = vmul.f32 %v24293_v43, %v24225_v2  ;;  %v15504_v2 = vrot.slane %v24297_v55, %v22132_v50 }
 0xb7a   : > { %v15484_v9 = vmul.f32 %v15469_v14, %v15441_v11  ;;  %v15481_v13 = vmul.f32 %v15457_v33, %v15438_v62  ;;  %v15480_v15 = vmul.f32 %v15453_v36, %v15437_v29  ;;  %v15483_v22 = vmul.f32 %v15465_v56, %v15440_v49  ;;  %v20790_v62 = vld [vmem:[%s24216_s24 + $0xb0] sm:$0xff]   ;;  %v20792_v49 = vld [vmem:[%s24216_s24 + $0xb8] sm:$0xff]  }
 0xb7b   : > { %v20980_v12 = vpop.eup %20979  ;;  %v15473_v29 = vrot.slane %v24287_v24, %v24589_v35 }
 0xb7c   : > { %v15444_v31 = vmul.f32 %v20980_v12, %v24235_v48  ;;  %v15443_v26 = vmul.f32 %v20980_v12, %v24233_v27  ;;  %v15446_v23 = vmul.f32 %v20980_v12, %v24243_v38  ;;  %v15447_v53 = vmul.f32 %v20980_v12, %v24253_v39 }
 0xb7d   : > { %v24325_v61 = vadd.f32 %v15512_v63, %v15484_v9  ;;  %v24327_v48 = vadd.f32 %v15500_v37, %v15481_v13  ;;  %v24331_v27 = vadd.f32 %v15496_v59, %v15480_v15  ;;  %v24342_v51 = vadd.f32 %v15508_v18, %v15483_v22  ;;  %v20796_v13 = vld [vmem:[%s24216_s24 + $0x108] sm:$0xff]   ;;  %v20798_v15 = vld [vmem:[%s24216_s24 + $0x110] sm:$0xff]   ;;  %v20802_v22 = vld [vmem:[%s24216_s24 + $0x120] sm:$0xff]  }
 0xb7e   : > { %v15487_v34 = vmul.f32 %v15457_v33, %v15444_v31  ;;  %v15486_v42 = vmul.f32 %v15453_v36, %v15443_v26  ;;  %v15489_v0 = vmul.f32 %v15465_v56, %v15446_v23  ;;  %v15490_v5 = vmul.f32 %v15469_v14, %v15447_v53  ;;  %v20797_v26 = vld [vmem:[%s24216_s24 + $0x150] sm:$0xff]   ;;  %v20799_v23 = vld [vmem:[%s24216_s24 + $0x158] sm:$0xff]  }
 0xb7f   : > { %v15445_v3 = vmul.f32 %v20980_v12, %v24241_v28  ;;  %v15448_v45 = vmul.f32 %v20980_v12, %v24263_v19  ;;  %v15461_v14 = vrot.slane %v24287_v24, %v22132_v50  ;;  %v15442_v33 = vmul.f32 %v24293_v43, %v24249_v25  ;;  %v20791_v28 = vld [vmem:[%s24216_s24 + $0xf8] sm:$0xff]   ;;  %v20793_v24 = vld [vmem:[%s24216_s24 + $0x140] sm:$0xff]   ;;  %v20805_v53 = vld [vmem:[%s24216_s24 + $0x170] sm:$0xff]  }
 0xb80   : > { %v24329_v54 = vadd.f32 %v15500_v37, %v15487_v34  ;;  %v24333_v38 = vadd.f32 %v15496_v59, %v15486_v42  ;;  %v24335_v44 = vadd.f32 %v15508_v18, %v15489_v0  ;;  %v24345_v10 = vadd.f32 %v15512_v63, %v15490_v5  ;;  %v20794_v59 = vld [vmem:[%s24216_s24 + $0x100] sm:$0xff]   ;;  %v20795_v63 = vld [vmem:[%s24216_s24 + $0x148] sm:$0xff]   ;;  %v20800_v34 = vld [vmem:[%s24216_s24 + $0x118] sm:$0xff]  }
 0xb81   : > { %v15488_v36 = vmul.f32 %v15461_v14, %v15445_v3  ;;  %v15491_v19 = vmul.f32 %v15473_v29, %v15448_v45  ;;  %v15482_v11 = vmul.f32 %v15461_v14, %v15439_v20  ;;  %v15485_v56 = vmul.f32 %v15473_v29, %v15442_v33  ;;  %v20801_v42 = vld [vmem:[%s24216_s24 + $0x160] sm:$0xff]   ;;  %v20803_v18 = vld [vmem:[%s24216_s24 + $0x168] sm:$0xff]   ;;  %v20806_v5 = vld [vmem:[%s24216_s24 + $0x130] sm:$0xff]  }
 0xb82   : > { %v15536_v58 = vpack.c.bf16 %v24329_v54, %v24327_v48  ;;  %v15535_v39 = vpack.c.bf16 %v24333_v38, %v24331_v27  ;;  %v15538_v21 = vpack.c.bf16 %v24335_v44, %v24342_v51  ;;  %v15516_v12 = vrot.slane %v24297_v55, %v24589_v35  ;;  %v20804_v0 = vld [vmem:[%s24216_s24 + $0x128] sm:$0xff]   ;;  %v20827_v3 = vld [vmem:[%s24411_s22 + $0x120] ss:$24 sps:$4 sm:$0xff]   ;;  %v20829_v45 = vld [vmem:[%s24411_s22 + $0x124] ss:$24 sps:$4 sm:$0xff]  }
 0xb83   : > { %v24376_v25 = vadd.f32 %v15504_v2, %v15488_v36  ;;  %v24381_v37 = vadd.f32 %v15504_v2, %v15482_v11  ;;  %v20832_v20 = vld [vmem:[%s24411_s22 + $0x154] ss:$24 sps:$4 sm:$0xff]   ;;  %v21027_v14 = vmov 0  }
 0xb84   : > { %15964 = vmatprep.mubr.bf16.mxu1 %v15536_v58  ;;  %v24379_v43 = vadd.f32 %v15516_v12, %v15491_v19  ;;  %v24384_v9 = vadd.f32 %v15516_v12, %v15485_v56  ;;  %v20807_v58 = vld [vmem:[%s24216_s24 + $0x178] sm:$0xff]   ;;  %v20835_v33 = vld [vmem:[%s24411_s22 + $0xc] ss:$24 sps:$4 sm:$0xff]  }
 0xb85   : > { %15965 = vmatmul.mubr.bf16.vlgmr.msra.gmra.mrb[164].mxu1 %v15535_v39  ;;  %v15537_v55 = vpack.c.bf16 %v24376_v25, %v24381_v37  ;;  %v20808_v39 = vld [vmem:[%s24216_s24 + $0x138] sm:$0xff]   ;;  %s669_s24 = scalar_lea.vmem %s24566_s8, %s24595_s25 }
 0xb86   : > { %18491 = vmatpush3.bf16.msra.mxu1 %v20778_v41  ;;  %16005 = vmatprep.mubr.bf16.mxu1 %v15538_v21  ;;  %v15540_v31 = vpack.c.bf16 %v24379_v43, %v24384_v9  ;;  %v15539_v41 = vpack.c.bf16 %v24345_v10, %v24325_v61  ;;  %v20811_v21 = vld [vmem:[%s24411_s22 + $0x4] ss:$24 sps:$4 sm:$0xff]  }
 0xb87   : > { %18492 = vmatprep.subr.bf16.mxu1 %v20779_v57  ;;  %v20809_v57 = vld [vmem:[%s24411_s22] ss:$24 sps:$4 sm:$0xff]  }
 0xb8a   : > { %18493 = vmatpush3.bf16.msra.mxu1 %v20780_v8  ;;  %v20814_v8 = vld [vmem:[%s24411_s22 + $0x34] ss:$24 sps:$4 sm:$0xff]  }
 0xb8b   : > { %18494 = vmatprep.subr.bf16.mxu1 %v20781_v47  ;;  %v20812_v47 = vld [vmem:[%s24411_s22 + $0x30] ss:$24 sps:$4 sm:$0xff]  }
 0xb8e   : > { %18495 = vmatpush3.bf16.msra.mxu1 %v20782_v1  ;;  %v20817_v1 = vld [vmem:[%s24411_s22 + $0x64] ss:$24 sps:$4 sm:$0xff]  }
 0xb8f   : > { %18496 = vmatprep.subr.bf16.mxu1 %v20783_v40  ;;  %v20815_v40 = vld [vmem:[%s24411_s22 + $0x60] ss:$24 sps:$4 sm:$0xff]  }
 0xb92   : > { %18497 = vmatpush3.bf16.msra.mxu1 %v20784_v17  ;;  %v20820_v17 = vld [vmem:[%s24411_s22 + $0x94] ss:$24 sps:$4 sm:$0xff]  }
 0xb93   : > { %18498 = vmatprep.subr.bf16.mxu1 %v20785_v30  ;;  %v20818_v30 = vld [vmem:[%s24411_s22 + $0x90] ss:$24 sps:$4 sm:$0xff]  }
 0xb96   : > { %18499 = vmatpush3.bf16.msra.mxu1 %v20786_v60  ;;  %v20823_v60 = vld [vmem:[%s24411_s22 + $0xc4] ss:$24 sps:$4 sm:$0xff]  }
 0xb97   : > { %18500 = vmatprep.subr.bf16.mxu1 %v20787_v16  ;;  %v20821_v16 = vld [vmem:[%s24411_s22 + $0xc0] ss:$24 sps:$4 sm:$0xff]  }
 0xb9a   : > { %18501 = vmatpush3.bf16.msra.mxu1 %v20788_v46  ;;  %v20826_v46 = vld [vmem:[%s24411_s22 + $0xf4] ss:$24 sps:$4 sm:$0xff]  }
 0xb9b   : > { %18502 = vmatprep.subr.bf16.mxu1 %v20789_v32  ;;  %v20824_v32 = vld [vmem:[%s24411_s22 + $0xf0] ss:$24 sps:$4 sm:$0xff]  }
 0xb9e   : > { %18503 = vmatpush3.bf16.msra.mxu1 %v20790_v62  ;;  %v20830_v62 = vld [vmem:[%s24411_s22 + $0x150] ss:$24 sps:$4 sm:$0xff]  }
 0xb9f   : > { %18504 = vmatprep.subr.bf16.mxu1 %v20791_v28 }
 0xba2   : > { %18505 = vmatpush3.bf16.msra.mxu1 %v20792_v49  ;;  %v18261_v49 = vld [vmem:[%s669_s24] ss:$0 sm:$0xff] }
 0xba3   : > { %18512 = vmatprep.subr.bf16.mxu1 %v20793_v24 }
 0xba5   : > { %16006 = vmatmul.mubr.bf16.vlgmr.msra.gmra.mrb[168].mxu1 %v15537_v55 }
 0xba6   : > { %18513 = vmatpush3.bf16.msra.mxu1 %v20794_v59  ;;  %16046 = vmatprep.mubr.bf16.mxu1 %v15540_v31 }
 0xba7   : > { %18514 = vmatprep.subr.bf16.mxu1 %v20795_v63 }
 0xbaa   : > { %18515 = vmatpush3.bf16.msra.mxu1 %v20796_v13 }
 0xbab   : > { %18516 = vmatprep.subr.bf16.mxu1 %v20797_v26 }
 0xbae   : > { %18517 = vmatpush3.bf16.msra.mxu1 %v20798_v15 }
 0xbaf   : > { %18518 = vmatprep.subr.bf16.mxu1 %v20799_v23 }
 0xbb2   : > { %18519 = vmatpush3.bf16.msra.mxu1 %v20800_v34 }
 0xbb3   : > { %18520 = vmatprep.subr.bf16.mxu1 %v20801_v42 }
 0xbb6   : > { %18521 = vmatpush3.bf16.msra.mxu1 %v20802_v22 }
 0xbb7   : > { %18522 = vmatprep.subr.bf16.mxu1 %v20803_v18 }
 0xbba   : > { %18523 = vmatpush3.bf16.msra.mxu1 %v20804_v0 }
 0xbbb   : > { %18524 = vmatprep.subr.bf16.mxu1 %v20805_v53 }
 0xbbe   : > { %18525 = vmatpush3.bf16.msra.mxu1 %v20806_v5 }
 0xbbf   : > { %18526 = vmatprep.subr.bf16.mxu1 %v20807_v58 }
 0xbc2   : > { %18527 = vmatpush3.bf16.msra.mxu1 %v20808_v39 }
 0xbc3   : > { %16378 = vmatprep.subr.bf16.mxu1 %v20811_v21  ;;  %v20838_v21 = vld [vmem:[%s24411_s22 + $0x3c] ss:$24 sps:$4 sm:$0xff]  }
 0xbc5   : > { %16047 = vmatmul.mubr.bf16.vlgmr.msra.gmra.mrb[172].mxu1 %v15539_v41  ;;  %v20833_v41 = vld [vmem:[%s24411_s22 + $0x8] ss:$24 sps:$4 sm:$0xff]  }
 0xbc6   : > { %16379 = vmatpush1.bf16.msra.mxu1 %v20809_v57  ;;  %16410 = vmatprep.mubr.bf16.mxu1 %v21027_v14 }
 0xbc7   : > { %16380 = vmatprep.subr.bf16.mxu1 %v20814_v8  ;;  %v20836_v8 = vld [vmem:[%s24411_s22 + $0x38] ss:$24 sps:$4 sm:$0xff]  }
 0xbca   : > { %16381 = vmatpush1.bf16.msra.mxu1 %v20812_v47  ;;  %v20841_v47 = vld [vmem:[%s24411_s22 + $0x6c] ss:$24 sps:$4 sm:$0xff]  }
 0xbcb   : > { %16382 = vmatprep.subr.bf16.mxu1 %v20817_v1  ;;  %v20839_v1 = vld [vmem:[%s24411_s22 + $0x68] ss:$24 sps:$4 sm:$0xff]  }
 0xbce   : > { %16383 = vmatpush1.bf16.msra.mxu1 %v20815_v40  ;;  %v20844_v40 = vld [vmem:[%s24411_s22 + $0x9c] ss:$24 sps:$4 sm:$0xff]  }
 0xbcf   : > { %16384 = vmatprep.subr.bf16.mxu1 %v20820_v17  ;;  %v20842_v17 = vld [vmem:[%s24411_s22 + $0x98] ss:$24 sps:$4 sm:$0xff]  }
 0xbd2   : > { %16385 = vmatpush1.bf16.msra.mxu1 %v20818_v30  ;;  %v20847_v30 = vld [vmem:[%s24411_s22 + $0xcc] ss:$24 sps:$4 sm:$0xff]  }
 0xbd3   : > { %16386 = vmatprep.subr.bf16.mxu1 %v20823_v60  ;;  %v20845_v60 = vld [vmem:[%s24411_s22 + $0xc8] ss:$24 sps:$4 sm:$0xff]  }
 0xbd6   : > { %16387 = vmatpush1.bf16.msra.mxu1 %v20821_v16  ;;  %v20850_v16 = vld [vmem:[%s24411_s22 + $0xfc] ss:$24 sps:$4 sm:$0xff]  }
 0xbd7   : > { %16388 = vmatprep.subr.bf16.mxu1 %v20826_v46  ;;  %v20848_v46 = vld [vmem:[%s24411_s22 + $0xf8] ss:$24 sps:$4 sm:$0xff]  }
 0xbda   : > { %16389 = vmatpush1.bf16.msra.mxu1 %v20824_v32  ;;  %v20853_v32 = vld [vmem:[%s24411_s22 + $0x12c] ss:$24 sps:$4 sm:$0xff]  }
 0xbdb   : > { %16390 = vmatprep.subr.bf16.mxu1 %v20829_v45  ;;  %v20856_v45 = vld [vmem:[%s24411_s22 + $0x15c] ss:$24 sps:$4 sm:$0xff]  }
 0xbde   : > { %16391 = vmatpush1.bf16.msra.mxu1 %v20827_v3  ;;  %v20851_v3 = vld [vmem:[%s24411_s22 + $0x128] ss:$24 sps:$4 sm:$0xff]  }
 0xbdf   : > { %16392 = vmatprep.subr.bf16.mxu1 %v20832_v20  ;;  %v20854_v20 = vld [vmem:[%s24411_s22 + $0x158] ss:$24 sps:$4 sm:$0xff]  }
 0xbe2   : > { %16393 = vmatpush1.bf16.msra.mxu1 %v20830_v62  ;;  %v20859_v62 = vld [vmem:[%s24411_s22 + $0x14] ss:$24 sps:$4 sm:$0xff]  }
 0xbe3   : > { %16421 = vmatprep.subr.bf16.mxu1 %v20835_v33  ;;  %v20857_v33 = vld [vmem:[%s24411_s22 + $0x10] ss:$24 sps:$4 sm:$0xff]  }
 0xc58   : > { %v18484_v29 = vpop.f32.mrb[164].mxu1 }
 0xc59   : > { %v18485_v28 = vpop.f32.mrb[165].mxu1 }
 0xc5a   : > { %v18486_v36 = vadd.f32 %v18485_v28, %v18484_v29  ;;  %v18487_v19 = vpop.f32.mrb[166].mxu1  ;;  %v20862_v29 = vld [vmem:[%s24411_s22 + $0x44] ss:$24 sps:$4 sm:$0xff]   ;;  %v20860_v28 = vld [vmem:[%s24411_s22 + $0x40] ss:$24 sps:$4 sm:$0xff]  }
 0xc5b   : > { %v18488_v11 = vpop.f32.mrb[167].mxu1 }
 0xc5c   : > { %v18489_v2 = vadd.f32 %v18488_v11, %v18487_v19  ;;  %v15967_v24 = vadd.f32 %v18486_v36, %v18261_v49  ;;  %v20865_v36 = vld [vmem:[%s24411_s22 + $0x74] ss:$24 sps:$4 sm:$0xff]   ;;  %v20863_v19 = vld [vmem:[%s24411_s22 + $0x70] ss:$24 sps:$4 sm:$0xff]   ;;  %v20868_v11 = vld [vmem:[%s24411_s22 + $0xa4] ss:$24 sps:$4 sm:$0xff]  }
 0xc5e   : > { %v15970_v31 = vadd.f32 %v18489_v2, %v18261_v49  ;;  %v20866_v2 = vld [vmem:[%s24411_s22 + $0xa0] ss:$24 sps:$4 sm:$0xff]   ;;  %v20871_v49 = vld [vmem:[%s24411_s22 + $0xd4] ss:$24 sps:$4 sm:$0xff]  }
 0xc78   : > { %v18506_v56 = vpop.f32.mrb[168].mxu1 }
 0xc79   : > { %v18507_v12 = vpop.f32.mrb[169].mxu1 }
 0xc7a   : > { %v18508_v59 = vadd.f32 %v18507_v12, %v18506_v56  ;;  %v18509_v55 = vpop.f32.mrb[170].mxu1  ;;  %v20869_v56 = vld [vmem:[%s24411_s22 + $0xd0] ss:$24 sps:$4 sm:$0xff]   ;;  %v20874_v12 = vld [vmem:[%s24411_s22 + $0x104] ss:$24 sps:$4 sm:$0xff]  }
 0xc7b   : > { %v18510_v63 = vpop.f32.mrb[171].mxu1 }
 0xc7c   : > { %v16008_v13 = vadd.f32 %v18508_v59, %v15967_v24  ;;  %v18511_v26 = vadd.f32 %v18510_v63, %v18509_v55  ;;  %v20877_v24 = vld [vmem:[%s24411_s22 + $0x134] ss:$24 sps:$4 sm:$0xff]   ;;  %v20875_v59 = vld [vmem:[%s24411_s22 + $0x130] ss:$24 sps:$4 sm:$0xff]   ;;  %v20880_v55 = vld [vmem:[%s24411_s22 + $0x164] ss:$24 sps:$4 sm:$0xff]  }
 0xc7d   : > { %v20878_v63 = vld [vmem:[%s24411_s22 + $0x160] ss:$24 sps:$4 sm:$0xff]  }
 0xc7e   : > { %v16011_v15 = vadd.f32 %v18511_v26, %v15970_v31 }
 0xc98   : > { %v18528_v23 = vpop.f32.mrb[172].mxu1 }
 0xc99   : > { %v18529_v34 = vpop.f32.mrb[173].mxu1 }
 0xc9a   : > { %v18530_v42 = vadd.f32 %v18529_v34, %v18528_v23  ;;  %v18531_v22 = vpop.f32.mrb[174].mxu1 }
 0xc9b   : > { %v18532_v18 = vpop.f32.mrb[175].mxu1 }
 0xc9c   : > { %v16049_v0 = vadd.f32 %v18530_v42, %v16008_v13  ;;  %v18533_v53 = vadd.f32 %v18532_v18, %v18531_v22  ;;  %v16106_v18 = vld [vmem:[%s678_s30] sm:$0x3f] }
 0xc9e   : > { %v16052_v5 = vadd.f32 %v18533_v53, %v16011_v15  ;;  %v16055_v58 = vmax.f32 %v16049_v0, 0.0  ;;  %v16111_v0 = vrot.slane %v16106_v18, %v21594_v4  ;;  %v16115_v53 = vrot.slane %v16106_v18, %v21599_v7 }
 0xca0   : > { %v16056_v39 = vmax.f32 %v16052_v5, 0.0  ;;  %v16119_v5 = vrot.slane %v16106_v18, %v22132_v50 }
 0xca2   : > { %v24436_v57 = vpack.c.bf16 %v16056_v39, %v16055_v58 }
 0xca4   : > { %16411 = vmatmul.mubr.bf16.vlgmr.msra.gmra.mrb[176].mxu1 %v24436_v57 }
 0xca5   : > { %16422 = vmatpush1.bf16.msra.mxu1 %v20833_v41  ;;  %16453 = vmatprep.mubr.bf16.mxu1 %v21027_v14 }
 0xca6   : > { %16423 = vmatprep.subr.bf16.mxu1 %v20838_v21 }
 0xca9   : > { %16424 = vmatpush1.bf16.msra.mxu1 %v20836_v8  ;;  %v16123_v8 = vrot.slane %v16106_v18, %v22137_v52 }
 0xcaa   : > { %16425 = vmatprep.subr.bf16.mxu1 %v20841_v47 }
 0xcad   : > { %16426 = vmatpush1.bf16.msra.mxu1 %v20839_v1 }
 0xcae   : > { %16427 = vmatprep.subr.bf16.mxu1 %v20844_v40 }
 0xcb1   : > { %16428 = vmatpush1.bf16.msra.mxu1 %v20842_v17 }
 0xcb2   : > { %16429 = vmatprep.subr.bf16.mxu1 %v20847_v30 }
 0xcb5   : > { %16430 = vmatpush1.bf16.msra.mxu1 %v20845_v60 }
 0xcb6   : > { %16431 = vmatprep.subr.bf16.mxu1 %v20850_v16 }
 0xcb9   : > { %16432 = vmatpush1.bf16.msra.mxu1 %v20848_v46 }
 0xcba   : > { %16433 = vmatprep.subr.bf16.mxu1 %v20853_v32 }
 0xcbd   : > { %16434 = vmatpush1.bf16.msra.mxu1 %v20851_v3 }
 0xcbe   : > { %16435 = vmatprep.subr.bf16.mxu1 %v20856_v45  ;;  %v16127_v45 = vrot.slane %v16106_v18, %v22165_v6 }
 0xcc1   : > { %16436 = vmatpush1.bf16.msra.mxu1 %v20854_v20  ;;  %v16131_v20 = vrot.slane %v16106_v18, %v24589_v35 }
 0xcc2   : > { %16464 = vmatprep.subr.bf16.mxu1 %v20859_v62 }
 0xcc4   : > { %16454 = vmatmul.mubr.bf16.vlgmr.msra.gmra.mrb[180].mxu1 %v24436_v57 }
 0xcc5   : > { %16465 = vmatpush1.bf16.msra.mxu1 %v20857_v33  ;;  %16496 = vmatprep.mubr.bf16.mxu1 %v21027_v14  ;;  %v20872_v14 = vld [vmem:[%s24411_s22 + $0x100] ss:$24 sps:$4 sm:$0xff]   ;;  %s686_s22 = scalar_lea.vmem %s24570_s12, %s24186_s16  ;;  %s18972_s16 = smul.u32 48, %s24595_s25 }
 0xcc6   : > { %16466 = vmatprep.subr.bf16.mxu1 %v20862_v29 }
 0xcc7   : > { %s696_s25 = scalar_lea.vmem %s24571_s13, %s18972_s16 }
 0xcc9   : > { %16467 = vmatpush1.bf16.msra.mxu1 %v20860_v28 }
 0xcca   : > { %16468 = vmatprep.subr.bf16.mxu1 %v20865_v36 }
 0xccd   : > { %16469 = vmatpush1.bf16.msra.mxu1 %v20863_v19 }
 0xcce   : > { %16470 = vmatprep.subr.bf16.mxu1 %v20868_v11 }
 0xcd1   : > { %16471 = vmatpush1.bf16.msra.mxu1 %v20866_v2 }
 0xcd2   : > { %16472 = vmatprep.subr.bf16.mxu1 %v20871_v49 }
 0xcd5   : > { %16473 = vmatpush1.bf16.msra.mxu1 %v20869_v56 }
 0xcd6   : > { %16474 = vmatprep.subr.bf16.mxu1 %v20874_v12 }
 0xcd9   : > { %16475 = vmatpush1.bf16.msra.mxu1 %v20872_v14 }
 0xcda   : > { %16476 = vmatprep.subr.bf16.mxu1 %v20877_v24 }
 0xcdd   : > { %16477 = vmatpush1.bf16.msra.mxu1 %v20875_v59 }
 0xcde   : > { %16478 = vmatprep.subr.bf16.mxu1 %v20880_v55 }
 0xce1   : > { %16479 = vmatpush1.bf16.msra.mxu1 %v20878_v63 }
 0xce4   : > { %16497 = vmatmul.mubr.bf16.vlgmr.msra.gmra.mrb[184].mxu1 %v24436_v57 }
 0xd77   : > { %v16412_v31 = vpop.f32.mrb[176].mxu1 }
 0xd78   : > { %v16414_v13 = vpop.f32.mrb[177].mxu1  ;;  %v16413_v58 = vadd.f32 %v16412_v31, %v16111_v0 }
 0xd79   : > { %v16416_v26 = vpop.f32.mrb[178].mxu1  ;;  %v16415_v39 = vadd.f32 %v16414_v13, %v16115_v53 }
 0xd7a   : > { %v16418_v15 = vpop.f32.mrb[179].mxu1  ;;  %v16417_v41 = vadd.f32 %v16416_v26, %v16111_v0  ;;  %v16507_v47 = vadd.f32 %v16413_v58, %v24331_v27 }
 0xd7b   : > { %v16419_v57 = vadd.f32 %v16418_v15, %v16115_v53  ;;  %v16508_v1 = vadd.f32 %v16415_v39, %v24327_v48 }
 0xd7c   : > { %v16513_v17 = vadd.f32 %v16417_v41, %v24333_v38 }
 0xd7d   : > { %v16514_v30 = vadd.f32 %v16419_v57, %v24329_v54  ;;  %v16521_v46 = vadd.f32 %v16508_v1, %v16507_v47 }
 0xd7f   : > { %v16528_v62 = vadd.f32 %v16514_v30, %v16513_v17 }
 0xd97   : > { %v16455_v23 = vpop.f32.mrb[180].mxu1 }
 0xd98   : > { %v16457_v34 = vpop.f32.mrb[181].mxu1  ;;  %v16456_v21 = vadd.f32 %v16455_v23, %v16119_v5 }
 0xd99   : > { %v16459_v42 = vpop.f32.mrb[182].mxu1  ;;  %v16458_v16 = vadd.f32 %v16457_v34, %v16123_v8 }
 0xd9a   : > { %v16461_v22 = vpop.f32.mrb[183].mxu1  ;;  %v16460_v40 = vadd.f32 %v16459_v42, %v16119_v5  ;;  %v16509_v60 = vadd.f32 %v16456_v21, %v24381_v37 }
 0xd9b   : > { %v16462_v3 = vadd.f32 %v16461_v22, %v16123_v8  ;;  %v16510_v48 = vadd.f32 %v16458_v16, %v24342_v51 }
 0xd9c   : > { %v16515_v32 = vadd.f32 %v16460_v40, %v24376_v25  ;;  %v16522_v27 = vadd.f32 %v16521_v46, %v16509_v60 }
 0xd9d   : > { %v16516_v38 = vadd.f32 %v16462_v3, %v24335_v44 }
 0xd9e   : > { %v16529_v29 = vadd.f32 %v16528_v62, %v16515_v32  ;;  %v16523_v19 = vadd.f32 %v16522_v27, %v16510_v48 }
 0xda0   : > { %v16530_v12 = vadd.f32 %v16529_v29, %v16516_v38 }
 0xdb7   : > { %v16498_v33 = vpop.f32.mrb[184].mxu1 }
 0xdb8   : > { %v16499_v54 = vadd.f32 %v16498_v33, %v16127_v45  ;;  %v16500_v28 = vpop.f32.mrb[185].mxu1 }
 0xdb9   : > { %v16501_v37 = vadd.f32 %v16500_v28, %v16131_v20  ;;  %v16502_v36 = vpop.f32.mrb[186].mxu1 }
 0xdba   : > { %v16511_v25 = vadd.f32 %v16499_v54, %v24325_v61  ;;  %v16503_v11 = vadd.f32 %v16502_v36, %v16127_v45  ;;  %v16504_v2 = vpop.f32.mrb[187].mxu1  ;;  %v16519_v36 = vld [vmem:[%s682_s17] sm:$0x3f] }
 0xdbb   : > { %v16512_v49 = vadd.f32 %v16501_v37, %v24384_v9  ;;  %v16505_v56 = vadd.f32 %v16504_v2, %v16131_v20  ;;  %v16605_v2 = vrot.slane %v16519_v36, %v22132_v50 }
 0xdbc   : > { %v16517_v14 = vadd.f32 %v16503_v11, %v24345_v10  ;;  %v16524_v51 = vadd.f32 %v16523_v19, %v16511_v25  ;;  %v16520_v19 = vld [vmem:[%s686_s22] sm:$0x3f]  ;;  %v16601_v11 = vrot.slane %v16519_v36, %v21599_v7 }
 0xdbd   : > { %v16518_v24 = vadd.f32 %v16505_v56, %v24379_v43  ;;  %v16613_v56 = vrot.slane %v16519_v36, %v22165_v6 }
 0xdbe   : > { %v16525_v59 = vadd.f32 %v16524_v51, %v16512_v49  ;;  %v16531_v44 = vadd.f32 %v16530_v12, %v16517_v14  ;;  %v16617_v12 = vrot.slane %v16519_v36, %v24589_v35  ;;  %v16640_v51 = vrot.slane %v16520_v19, %v21594_v4 }
 0xdc0   : > { %16526 = vadd.xlane.f32.xlu1 %v16525_v59  ;;  %v16532_v55 = vadd.f32 %v16531_v44, %v16518_v24  ;;  %v16648_v59 = vrot.slane %v16520_v19, %v22132_v50  ;;  %v16652_v44 = vrot.slane %v16520_v19, %v22137_v52 }
 0xdc2   : > { %16533 = vadd.xlane.f32.xlu0 %v16532_v55 }
 0xe4d   : > { %v16527_v63 = vpop.xlane.xlu1 %16526 }
 0xe4e   : > { %v16535_v31 = vmul.f32 0.0013020834, %v16527_v63 }
 0xe4f   : > { %v16534_v13 = vpop.xlane.xlu0 %16533 }
 0xe50   : > { %v16536_v61 = vmul.f32 0.0013020834, %v16534_v13  ;;  %v16537_v26 = vsub.f32 %v16507_v47, %v16535_v31  ;;  %v16538_v15 = vsub.f32 %v16508_v1, %v16535_v31  ;;  %v16539_v23 = vsub.f32 %v16509_v60, %v16535_v31 }
 0xe51   : > { %v16540_v9 = vsub.f32 %v16510_v48, %v16535_v31  ;;  %v16541_v43 = vsub.f32 %v16511_v25, %v16535_v31  ;;  %v16542_v41 = vsub.f32 %v16512_v49, %v16535_v31  ;;  %v16597_v25 = vrot.slane %v16519_v36, %v21594_v4 }
 0xe52   : > { %v16549_v34 = vmul.f32 %v16537_v26, %v16537_v26  ;;  %v16550_v42 = vmul.f32 %v16538_v15, %v16538_v15  ;;  %v24495_v22 = vsub.f32 %v16513_v17, %v16536_v61  ;;  %v24497_v10 = vsub.f32 %v16514_v30, %v16536_v61 }
 0xe53   : > { %v16551_v18 = vmul.f32 %v16539_v23, %v16539_v23  ;;  %v24499_v53 = vsub.f32 %v16515_v32, %v16536_v61  ;;  %v24501_v5 = vsub.f32 %v16516_v38, %v16536_v61  ;;  %v16552_v57 = vmul.f32 %v16540_v9, %v16540_v9 }
 0xe54   : > { %v16561_v0 = vadd.f32 %v16550_v42, %v16549_v34  ;;  %v16555_v58 = vmul.f32 %v24495_v22, %v24495_v22  ;;  %v16556_v39 = vmul.f32 %v24497_v10, %v24497_v10  ;;  %v24507_v8 = vsub.f32 %v16517_v14, %v16536_v61 }
 0xe55   : > { %v16557_v47 = vmul.f32 %v24499_v53, %v24499_v53  ;;  %v16553_v40 = vmul.f32 %v16541_v43, %v16541_v43  ;;  %v24511_v30 = vsub.f32 %v16518_v24, %v16536_v61  ;;  %v16558_v60 = vmul.f32 %v24501_v5, %v24501_v5 }
 0xe56   : > { %v16562_v21 = vadd.f32 %v16561_v0, %v16551_v18  ;;  %v16568_v1 = vadd.f32 %v16556_v39, %v16555_v58  ;;  %v16554_v46 = vmul.f32 %v16542_v41, %v16542_v41  ;;  %v16559_v3 = vmul.f32 %v24507_v8, %v24507_v8 }
 0xe57   : > { %v16560_v62 = vmul.f32 %v24511_v30, %v24511_v30  ;;  %v16609_v49 = vrot.slane %v16519_v36, %v22137_v52  ;;  %v16644_v24 = vrot.slane %v16520_v19, %v21599_v7  ;;  %v16656_v61 = vrot.slane %v16520_v19, %v22165_v6 }
 0xe58   : > { %v16563_v17 = vadd.f32 %v16562_v21, %v16552_v57  ;;  %v16569_v16 = vadd.f32 %v16568_v1, %v16557_v47  ;;  %v16660_v34 = vrot.slane %v16520_v19, %v24589_v35 }
 0xe5a   : > { %v16564_v32 = vadd.f32 %v16563_v17, %v16553_v40  ;;  %v16570_v45 = vadd.f32 %v16569_v16, %v16558_v60 }
 0xe5c   : > { %v16565_v20 = vadd.f32 %v16564_v32, %v16554_v46  ;;  %v16571_v27 = vadd.f32 %v16570_v45, %v16559_v3 }
 0xe5e   : > { %16566 = vadd.xlane.f32.xlu1 %v16565_v20  ;;  %v16572_v48 = vadd.f32 %v16571_v27, %v16560_v62 }
 0xe60   : > { %16573 = vadd.xlane.f32.xlu0 %v16572_v48 }
 0xeeb   : > { %v16567_v33 = vpop.xlane.xlu1 %16566 }
 0xeec   : > { %v16575_v29 = vmul.f32 0.0013020834, %v16567_v33 }
 0xeed   : > { %v16574_v54 = vpop.xlane.xlu0 %16573 }
 0xeee   : > { %v16577_v38 = vadd.f32 1e-05, %v16575_v29  ;;  %v16576_v28 = vmul.f32 0.0013020834, %v16574_v54 }
 0xef0   : > { %20981 = vrsqrt.f32 %v16577_v38  ;;  %v16578_v37 = vadd.f32 1e-05, %v16576_v28 }
 0xef2   : > { %20983 = vrsqrt.f32 %v16578_v37 }
 0xefa   : > { %v20982_v14 = vpop.eup %20981 }
 0xefb   : > { %v16581_v55 = vmul.f32 %v20982_v14, %v16537_v26  ;;  %v16582_v63 = vmul.f32 %v20982_v14, %v16538_v15  ;;  %v16583_v31 = vmul.f32 %v20982_v14, %v16539_v23  ;;  %v16584_v13 = vmul.f32 %v20982_v14, %v16540_v9 }
 0xefc   : > { %v16585_v42 = vmul.f32 %v20982_v14, %v16541_v43  ;;  %v16586_v18 = vmul.f32 %v20982_v14, %v16542_v41  ;;  %v20984_v0 = vpop.eup %20983 }
 0xefd   : > { %v16624_v58 = vmul.f32 %v16597_v25, %v16581_v55  ;;  %v16625_v4 = vmul.f32 %v16601_v11, %v16582_v63  ;;  %v16626_v39 = vmul.f32 %v16605_v2, %v16583_v31  ;;  %v16627_v7 = vmul.f32 %v16609_v49, %v16584_v13 }
 0xefe   : > { %v16628_v57 = vmul.f32 %v16613_v56, %v16585_v42  ;;  %v16629_v50 = vmul.f32 %v16617_v12, %v16586_v18  ;;  %v16587_v52 = vmul.f32 %v20984_v0, %v24495_v22  ;;  %v16588_v26 = vmul.f32 %v20984_v0, %v24497_v10 }
 0xeff   : > { %v16667_v15 = vadd.f32 %v16640_v51, %v16624_v58  ;;  %v16668_v23 = vadd.f32 %v16644_v24, %v16625_v4  ;;  %v16669_v9 = vadd.f32 %v16648_v59, %v16626_v39  ;;  %v16670_v6 = vadd.f32 %v16652_v44, %v16627_v7 }
 0xf00   : > { %v16671_v35 = vadd.f32 %v16656_v61, %v16628_v57  ;;  %v16672_v43 = vadd.f32 %v16660_v34, %v16629_v50  ;;  %v16589_v41 = vmul.f32 %v20984_v0, %v24499_v53  ;;  %v16590_v21 = vmul.f32 %v20984_v0, %v24501_v5 }
 0xf01   : > { %v18366_v47 = vpack.c.bf16 %v16668_v23, %v16667_v15  ;;  %v18367_v1 = vpack.c.bf16 %v16670_v6, %v16669_v9  ;;  %v16591_v22 = vmul.f32 %v20984_v0, %v24507_v8  ;;  %v16592_v10 = vmul.f32 %v20984_v0, %v24511_v30 }
 0xf02   : > { %v18368_v40 = vpack.c.bf16 %v16672_v43, %v16671_v35  ;;  %v16630_v17 = vmul.f32 %v16597_v25, %v16587_v52  ;;  %v16631_v60 = vmul.f32 %v16601_v11, %v16588_v26  ;;  %v16632_v16 = vmul.f32 %v16605_v2, %v16589_v41 }
 0xf03   : > { %16727 = vst [vmem:[%s696_s25] sm:$0xff] %v18366_v47  ;;  %16728 = vst [vmem:[%s696_s25 + $0x8] sm:$0xff] %v18367_v1  ;;  %v16633_v46 = vmul.f32 %v16609_v49, %v16590_v21  ;;  %v16634_v32 = vmul.f32 %v16613_v56, %v16591_v22  ;;  %v16635_v3 = vmul.f32 %v16617_v12, %v16592_v10 }
 0xf04   : > { %16729 = vst [vmem:[%s696_s25 + $0x10] sm:$0xff] %v18368_v40  ;;  %v16673_v45 = vadd.f32 %v16640_v51, %v16630_v17  ;;  %v16674_v53 = vadd.f32 %v16644_v24, %v16631_v60  ;;  %v16675_v20 = vadd.f32 %v16648_v59, %v16632_v16 }
 0xf05   : > { %v16676_v5 = vadd.f32 %v16652_v44, %v16633_v46  ;;  %v16677_v62 = vadd.f32 %v16656_v61, %v16634_v32  ;;  %v16678_v27 = vadd.f32 %v16660_v34, %v16635_v3 }
 0xf06   : > { %v18369_v48 = vpack.c.bf16 %v16674_v53, %v16673_v45 }
 0xf07   : > { %v18370_v8 = vpack.c.bf16 %v16676_v5, %v16675_v20  ;;  %v18371_v33 = vpack.c.bf16 %v16678_v27, %v16677_v62 }
 0xf08   : > { %16730 = vst [vmem:[%s696_s25 + $0x18] sm:$0xff] %v18369_v48 }
 0xf09   : > { %16731 = vst [vmem:[%s696_s25 + $0x20] sm:$0xff] %v18370_v8  ;;  %16732 = vst [vmem:[%s696_s25 + $0x28] sm:$0xff] %v18371_v33 }
 0xf0a PF: > { %s23_s27 = sadd.s32 1, %s21020_s27   ;;  %s24590_s25 = smov %s21016_s26 }
 0xf0b   : > { %p20_p5 = scmp.ge.s32.totalorder %s23_s27, 4   ;;  %s24591_s26 = smov %s24593_s28 }
 0xf0d   :  { %22 = sbr.rel (!%p20_p5) target bundleno = 2 (0x2), region = 138 }

</bundles_post_ra>
